<compile_context>
chip_gen: v7x
topology: tpu7x:2x2x1
jax: 0.10.0
libtpu: 0.0.40
codegen_flags: <defaults>
</compile_context>

<pallas_src>
import functools

import jax
import jax.numpy as jnp
from jax.experimental import pallas as pl
from jax.experimental.pallas import tpu as pltpu

VMEM_SPEC = pl.BlockSpec(memory_space=pltpu.MemorySpace.VMEM)


def _softmax_last(s):
    m = jnp.max(s, axis=-1, keepdims=True)
    e = jnp.exp(s - m)
    return e * pl.reciprocal(jnp.sum(e, axis=-1, keepdims=True), approx=True)


# ----------------------------------------------------------------------------------------
# Encoder: spatial attention + LSTM cell (zero initial state) over T_enc steps.
# Sequential (local/global attention weights carry across steps).
# ----------------------------------------------------------------------------------------
def _encoder_kernel(loc_in_ref, glob_in_ref, lhf_ref, ghf_ref, distmat_ref,
                    init_la_ref, init_ga_ref,
                    w_enc_l_ref, w_enc_g_ref, b_enc_ref,
                    w_att_ref, v_att_ref,
                    h_out_ref, *, lamda, n_steps, hidden):
    H = hidden
    lhf = lhf_ref[...]            # [B, F, T*T]  conv_local_u features, repeated over j, +bll
    ghf = ghf_ref[...]            # [B, S, T*T]  conv_global_k features, repeated over j, +blg
    TT = lhf.shape[-1]
    distmat = distmat_ref[...]    # [B, S]
    w_enc_l = w_enc_l_ref[...]    # [F, 3H] fused (i|g|o) gate weights (no padding)
    w_enc_g = w_enc_g_ref[...]    # [S, 3H]
    b_enc = b_enc_ref[...]        # [1, 3H]
    w_att = w_att_ref[...]        # [H, 2*T*T]  (tiled linear_local | tiled linear_global)
    v_att = v_att_ref[...]        # [2, T*T]    row0: tiled local_v, row1: tiled global_v
    v_l = v_att[0:1, :]
    v_g = v_att[1:2, :]

    local_attn = init_la_ref[...]      # [B, F]
    global_attn = init_ga_ref[...]     # [B, S]

    for t in range(n_steps):
        local_x = local_attn * loc_in_ref[t]       # [B, F]
        global_x = global_attn * glob_in_ref[t]    # [B, S]

        # LSTMCell(cat([local_x, global_x]), hx=None): c = sig(i)*tanh(g); h = sig(o)*tanh(c)
        gates = (jnp.dot(local_x, w_enc_l, preferred_element_type=jnp.float32)
                 + jnp.dot(global_x, w_enc_g, preferred_element_type=jnp.float32)
                 + b_enc)                          # [B, 3H]
        gi = gates[:, 0:H]
        gg = gates[:, H:2 * H]
        go = gates[:, 2 * H:3 * H]
        c = jax.nn.sigmoid(gi) * jnp.tanh(gg)      # cell state  (attention query)
        h = jax.nn.sigmoid(go) * jnp.tanh(c)       # cell output
        h_out_ref[t] = h

        # local + global attention projections in one fused dot (biases folded into lhf/ghf)
        y_both = jnp.dot(c, w_att, preferred_element_type=jnp.float32)   # [B, 2*T*T]
        y_l = y_both[:, 0:TT]
        y_g = y_both[:, TT:2 * TT]

        # lane index = o*T + j ; local_v depends on j only (already tiled in v_l/v_g)
        s_l = jnp.sum(jnp.tanh(lhf + y_l[:, None, :]) * v_l[None], axis=-1)   # [B, F]
        local_attn = _softmax_last(s_l)

        g = jnp.sum(jnp.tanh(ghf + y_g[:, None, :]) * v_g[None], axis=-1)     # [B, S]
        g = (1.0 - lamda) * g + lamda * distmat
        global_attn = _softmax_last(g)


# ----------------------------------------------------------------------------------------
# Decoder: one grid step == one decoder time step (all T_dec steps independent because the
# LSTMCell is called with hx=None and `attn` is an externally supplied parameter each step).
# The (o, j) attention contraction is blocked into lane-dense 512-wide chunks.
# ----------------------------------------------------------------------------------------
def _decoder_kernel(dec_in_ref, w_cat_ref, gwb_ref, wla_ref, v_ref,
                    hf_ref, hproj_ref, w_ho_ref, b_fold_ref,
                    out_ref, *, hidden, n_chunks, chunk):
    H = hidden
    B = hf_ref.shape[0]
    T_enc = hf_ref.shape[1]

    dec_in = dec_in_ref[0]                     # [B, 1+E+H]  (ones | ext | attn0)

    # x = linear_concat(cat([ones, ext, attn0]))  (bias folded into the ones-column weight)
    x = jnp.sum(dec_in * w_cat_ref[...], axis=-1, keepdims=True)        # [B, 1]

    # decoder LSTMCell(x, hx=None): packed [w_i|w_g|w_o] / [b_i|b_g|b_o]
    gwb = gwb_ref[...]                                                  # [2, 3H]
    gates = x * gwb[0:1, :] + gwb[1:2, :]                               # [B, 3H]
    gi = gates[:, 0:H]
    gg = gates[:, H:2 * H]
    go = gates[:, 2 * H:3 * H]
    c = jax.nn.sigmoid(gi) * jnp.tanh(gg)      # cell state (attention query)
    h = jax.nn.sigmoid(go) * jnp.tanh(c)       # cell output

    # temporal attention scores: s[b,t] = sum_{o,j} v[j] * tanh(hf[b,t,o] + y[b,j])
    # lane layout per 512-wide chunk: lane l = o_local*H + j  (y/v tiled over o in wrapper,
    # hf repeated over j in wrapper, linear_attention bias folded into hf).
    y_rep = jnp.dot(c, wla_ref[...], preferred_element_type=jnp.float32)   # [B, chunk]
    v_pack = v_ref[...]                                                    # [1, chunk]
    s = jnp.zeros((B, T_enc), jnp.float32)
    for ci in range(n_chunks):
        hf_c = hf_ref[:, :, ci * chunk:(ci + 1) * chunk]                   # [B, T_enc, chunk]
        z = jnp.tanh(hf_c + y_rep[:, None, :])
        s = s + jnp.sum(z * v_pack[None], axis=-1)                         # [B, T_enc]

    a = _softmax_last(s)                                                   # [B, T_enc]

    # folded output head: linear_out(linear_output(cat([h, attn])))
    #   attn @ (Wout_a@Wlo) == sum_t a[b,t] * hproj[b,t,:]   (hproj precomputed in wrapper)
    attn_o = jnp.sum(a[:, :, None] * hproj_ref[...], axis=1)               # [B, n_out]
    out_ref[0] = (jnp.dot(h, w_ho_ref[...], preferred_element_type=jnp.float32)
                  + attn_o + b_fold_ref[...])


# ----------------------------------------------------------------------------------------
# Parameters (deterministic synthetic init, mirroring the PyTorch module's parameters).
# ----------------------------------------------------------------------------------------
def init_params(key, cfg):
    B = cfg['batch_size']
    F = len(cfg['input_features'])
    S = cfg['num_station']
    T = cfg['input_len']
    H = cfg['n_hidden_encoder']
    E = len(cfg['external_features'])
    T_dec = cfg['n_steps_decoder']
    n_out = cfg['n_output_decoder']
    out_size = cfg['output_size']

    keys = iter(jax.random.split(key, 64))

    def nrm(shape, scale=0.1):
        return scale * jax.random.normal(next(keys), shape, dtype=jnp.float32)

    p = {}
    # encoder LSTMCell (only i, g, o gates matter with zero initial state);
    # input weights split into local (F cols) and global (S cols) parts, bias = b_ih + b_hh.
    for g in ('i', 'g', 'o'):
        p[f'enc_wl_{g}'] = nrm((F, H))
        p[f'enc_wg_{g}'] = nrm((S, H))
        p[f'enc_b_{g}'] = nrm((1, H), 0.01)
    # spatial attention
    p['wcl'] = nrm((T, T));      p['bcl'] = nrm((1, T), 0.01)
    p['wll'] = nrm((H, T));      p['bll'] = nrm((1, T), 0.01)
    p['lv'] = nrm((1, T), 1.0)
    p['wcg'] = nrm((T, T * F));  p['bcg'] = nrm((1, T), 0.01)
    p['wlg'] = nrm((H, T));      p['blg'] = nrm((1, T), 0.01)
    p['gv'] = nrm((1, T), 1.0)
    # nn.Parameters created inside SpatialAttention.forward (xavier) -> deterministic here
    p['init_la'] = nrm((B, F), 0.5)
    p['init_ga'] = nrm((B, S), 0.5)
    # nn.Parameter `attn` re-created each decoder step (xavier) -> deterministic here
    p['attn0'] = nrm((T_dec, B, H), 0.5)
    # temporal attention: linear_concat split (ones-input col, ext cols, attn cols)
    p['w_cat_inp'] = nrm((1, 1));   p['w_cat_ext'] = nrm((1, E))
    p['w_cat_attn'] = nrm((1, H));  p['b_cat'] = nrm((1, 1), 0.01)
    # decoder LSTMCell (input size = n_input_decoder = 1)
    for g in ('i', 'g', 'o'):
        p[f'dec_w_{g}'] = nrm((1, H))
        p[f'dec_b_{g}'] = nrm((1, H), 0.01)
    p['wc'] = nrm((H, H));   p['bc'] = nrm((1, H), 0.01)
    p['wla'] = nrm((H, H));  p['bla'] = nrm((1, H), 0.01)
    p['v'] = nrm((1, H), 1.0)
    p['wout_h'] = nrm((H, out_size));  p['wout_a'] = nrm((H, out_size))
    p['b_out'] = nrm((1, out_size), 0.01)
    p['wlo'] = nrm((out_size, n_out)); p['blo'] = nrm((1, n_out), 0.01)
    return p


# ----------------------------------------------------------------------------------------
# Forward (glue + two pallas_calls).
# ----------------------------------------------------------------------------------------
def geoman2_forward(params, x, ext, distmat, cfg):
    B, T_enc, S, F = x.shape
    T_dec, E = ext.shape[1], ext.shape[2]
    H = cfg['n_hidden_encoder']
    n_out = cfg['n_output_decoder']
    lamda = float(cfg['lamda'])

    # ----- input_transform (glue) -----
    loc_in = jnp.transpose(x[:, :, 0, :], (1, 0, 2))               # [T_enc, B, F]
    glob_in = jnp.transpose(x[:, :, :, 0], (1, 0, 2))              # [T_enc, B, S]
    local_attn_states = jnp.transpose(x[:, :, 0, :], (0, 2, 1))    # [B, F, T_enc]
    global_attn_states = jnp.transpose(x, (0, 2, 3, 1))            # [B, S, F, T_enc]
    ext_in = jnp.transpose(ext, (1, 0, 2))                         # [T_dec, B, E]

    # TODO(synk): the scrambling .view() reshapes of the attention states stay as XLA glue;
    # in-kernel minor-dim re-interpretations are not cleanly supported by Mosaic.
    lh = local_attn_states.reshape(B, T_enc, F)                    # [B, c, i]
    lh_r = jnp.transpose(lh, (0, 2, 1))                            # [B, i, c]
    gh = global_attn_states.reshape(B, T_enc, S, F)                # [B, c, s, j]
    gh_r = jnp.transpose(gh, (0, 2, 1, 3)).reshape(B, S, T_enc * F)

    # Loop-invariant conv_local_u / conv_global_k features as real matmuls.
    lhf = jnp.einsum('bic,oc->bio', lh_r, params['wcl']) + params['bcl']   # [B, F, T]
    ghf = jnp.einsum('bsk,ok->bso', gh_r, params['wcg']) + params['bcg']   # [B, S, T]

    # Lane-dense broadcast layouts (lane = o*T + j); linear_* biases folded into features.
    lhf_bc = jnp.repeat(lhf, T_enc, axis=-1) + jnp.tile(params['bll'], (1, T_enc))[None]
    ghf_bc = jnp.repeat(ghf, T_enc, axis=-1) + jnp.tile(params['blg'], (1, T_enc))[None]
    w_att = jnp.concatenate([jnp.tile(params['wll'], (1, T_enc)),
                             jnp.tile(params['wlg'], (1, T_enc))], axis=1)  # [H, 2*T*T]
    v_att = jnp.concatenate([jnp.tile(params['lv'], (1, T_enc)),
                             jnp.tile(params['gv'], (1, T_enc))], axis=0)   # [2, T*T]

    # Fused encoder LSTM gate weights (i|g|o), unpadded 3H columns.
    w_enc_l = jnp.concatenate([params['enc_wl_i'], params['enc_wl_g'],
                               params['enc_wl_o']], axis=1)                 # [F, 3H]
    w_enc_g = jnp.concatenate([params['enc_wg_i'], params['enc_wg_g'],
                               params['enc_wg_o']], axis=1)                 # [S, 3H]
    b_enc = jnp.concatenate([params['enc_b_i'], params['enc_b_g'],
                             params['enc_b_o']], axis=1)                    # [1, 3H]

    enc_args = (loc_in, glob_in, lhf_bc, ghf_bc, distmat,
                params['init_la'], params['init_ga'],
                w_enc_l, w_enc_g, b_enc, w_att, v_att)

    enc_h = pl.pallas_call(
        functools.partial(_encoder_kernel, lamda=lamda, n_steps=T_enc, hidden=H),
        out_shape=jax.ShapeDtypeStruct((T_enc, B, H), jnp.float32),
        in_specs=[VMEM_SPEC] * len(enc_args),
        out_specs=VMEM_SPEC,
    )(*enc_args)

    # ----- TemporalAttention state prep (glue; scrambling .view kept out of the kernel) -----
    attention_states = jnp.transpose(enc_h, (1, 0, 2))                           # [B, T, H]
    hidden_r = jnp.transpose(attention_states.reshape(B, H, T_enc), (0, 2, 1))   # [B, T, H]

    # w_conv features (loop invariant), then repeated over j so the decoder chunk lanes are
    # 128-dense; linear_attention bias folded in.
    hf = jnp.einsum('btc,oc->bto', hidden_r, params['wc']) + params['bc']        # [B, T, H]
    hf_rep = (jnp.repeat(hf, H, axis=-1)
              + jnp.tile(params['bla'], (1, H))[None])                           # [B, T, H*H]

    O_C = 8                                   # o-channels per chunk -> 512-lane chunks
    chunk = O_C * H
    n_chunks = H // O_C
    wla_pack = jnp.tile(params['wla'], (1, O_C))                                 # [H, 512]
    v_pack = jnp.tile(params['v'], (1, O_C))                                     # [1, 512]

    # Fold linear_output followed by linear_out into a single affine head; pre-project the
    # attention read-out (hidden) through the attn half of that head.
    w_ho = params['wout_h'] @ params['wlo']                                      # [H, n_out]
    w_ao = params['wout_a'] @ params['wlo']                                      # [H, n_out]
    b_fold = params['b_out'] @ params['wlo'] + params['blo']                     # [1, n_out]
    hproj = jnp.einsum('bth,ho->bto', hidden_r, w_ao)                            # [B, T, n_out]

    # Decoder step inputs: cat([ones(B,1), ext, attn0]); linear_concat bias folded into the
    # weight of the constant ones column.
    dec_in = jnp.concatenate([jnp.ones((T_dec, B, 1), jnp.float32),
                              ext_in, params['attn0']], axis=-1)                 # [T_dec,B,1+E+H]
    w_cat = jnp.concatenate([params['w_cat_inp'] + params['b_cat'],
                             params['w_cat_ext'], params['w_cat_attn']], axis=1)  # [1, 1+E+H]

    dec_gates_wb = jnp.concatenate(
        [jnp.concatenate([params['dec_w_i'], params['dec_w_g'], params['dec_w_o']], axis=1),
         jnp.concatenate([params['dec_b_i'], params['dec_b_g'], params['dec_b_o']], axis=1)],
        axis=0)                                                                  # [2, 3H]

    W_in = 1 + E + H
    dec_specs = [
        pl.BlockSpec((1, B, W_in), lambda s: (s, 0, 0)),        # dec_in  (per-step block)
        pl.BlockSpec((1, W_in), lambda s: (0, 0)),              # w_cat
        pl.BlockSpec((2, 3 * H), lambda s: (0, 0)),             # dec_gates_wb
        pl.BlockSpec((H, chunk), lambda s: (0, 0)),             # wla_pack
        pl.BlockSpec((1, chunk), lambda s: (0, 0)),             # v_pack
        pl.BlockSpec((B, T_enc, H * H), lambda s: (0, 0, 0)),   # hf_rep (DMA'd once)
        pl.BlockSpec((B, T_enc, n_out), lambda s: (0, 0, 0)),   # hproj
        pl.BlockSpec((H, n_out), lambda s: (0, 0)),             # w_ho
        pl.BlockSpec((1, n_out), lambda s: (0, 0)),             # b_fold
    ]

    pred = pl.pallas_call(
        functools.partial(_decoder_kernel, hidden=H, n_chunks=n_chunks, chunk=chunk),
        grid=(T_dec,),
        out_shape=jax.ShapeDtypeStruct((T_dec, B, n_out), jnp.float32),
        in_specs=dec_specs,
        out_specs=pl.BlockSpec((1, B, n_out), lambda s: (s, 0, 0)),
        compiler_params=pltpu.CompilerParams(dimension_semantics=("parallel",)),
    )(dec_in, w_cat, dec_gates_wb, wla_pack, v_pack, hf_rep, hproj, w_ho, b_fold)

    # outs = torch.cat(preds, dim=1)
    outs = jnp.transpose(pred, (1, 0, 2)).reshape(B, T_dec * n_out)
    return outs


if __name__ == "__main__":
    cfg = dict(
        batch_size=4,
        input_features=[0, 1, 2, 3],   # n_input_encoder = 4
        input_len=8,                   # n_steps_encoder
        num_station=6,
        n_hidden_encoder=64,           # must be 64 (view(-1, 1, 64) in GeoMan2)
        n_hidden_decoder=64,           # must be 64 (attention_states view)
        n_input_decoder=1,             # required for linear_concat dims to match
        external_features=[0, 1, 2],   # n_input_ext = 3
        ext_flag=True,
        output_size=64,
        n_output_decoder=2,
        lamda=0.3,
        n_steps_decoder=5,
    )

    key = jax.random.PRNGKey(0)
    kx, ke, kd, kp = jax.random.split(key, 4)
    B = cfg['batch_size']
    x = jax.random.normal(
        kx, (B, cfg['input_len'], cfg['num_station'], len(cfg['input_features'])),
        dtype=jnp.float32)
    ext = jax.random.normal(
        ke, (B, cfg['n_steps_decoder'], len(cfg['external_features'])), dtype=jnp.float32)
    distmat = jax.random.normal(kd, (B, cfg['num_station']), dtype=jnp.float32)

    params = init_params(kp, cfg)

    fwd = jax.jit(functools.partial(geoman2_forward, cfg=cfg))
    out = fwd(params, x, ext, distmat)
    out = jax.block_until_ready(out)

    assert out.shape == (B, cfg['n_steps_decoder'] * cfg['n_output_decoder'])
    assert bool(jnp.all(jnp.isfinite(out)))
    print("KERNEL_OK")
</pallas_src>

<mosaic_0001>
module attributes {stable_mosaic.version = 11 : i64} {
  func.func @_encoder_kernel(%arg0: memref<8x4x4xf32, #tpu.memory_space<vmem>>, %arg1: memref<8x4x6xf32, #tpu.memory_space<vmem>>, %arg2: memref<4x4x64xf32, #tpu.memory_space<vmem>>, %arg3: memref<4x6x64xf32, #tpu.memory_space<vmem>>, %arg4: memref<4x6xf32, #tpu.memory_space<vmem>>, %arg5: memref<4x4xf32, #tpu.memory_space<vmem>>, %arg6: memref<4x6xf32, #tpu.memory_space<vmem>>, %arg7: memref<4x192xf32, #tpu.memory_space<vmem>>, %arg8: memref<6x192xf32, #tpu.memory_space<vmem>>, %arg9: memref<1x192xf32, #tpu.memory_space<vmem>>, %arg10: memref<64x128xf32, #tpu.memory_space<vmem>>, %arg11: memref<2x64xf32, #tpu.memory_space<vmem>>, %arg12: memref<8x4x64xf32, #tpu.memory_space<vmem>>) attributes {dimension_semantics = [], scalar_prefetch = 0 : i64, scratch_operands = 0 : i64, tpu.core_type = #tpu.core_type<tc>} {
    %c0 = arith.constant 0 : index
    %c0_0 = arith.constant 0 : index
    %c0_1 = arith.constant 0 : index
    %0 = vector.load %arg2[%c0, %c0_0, %c0_1] : memref<4x4x64xf32, #tpu.memory_space<vmem>>, vector<4x4x64xf32>
    %c0_2 = arith.constant 0 : index
    %c0_3 = arith.constant 0 : index
    %c0_4 = arith.constant 0 : index
    %1 = vector.load %arg3[%c0_2, %c0_3, %c0_4] : memref<4x6x64xf32, #tpu.memory_space<vmem>>, vector<4x6x64xf32>
    %c0_5 = arith.constant 0 : index
    %c0_6 = arith.constant 0 : index
    %2 = vector.load %arg4[%c0_5, %c0_6] : memref<4x6xf32, #tpu.memory_space<vmem>>, vector<4x6xf32>
    %c0_7 = arith.constant 0 : index
    %c0_8 = arith.constant 0 : index
    %3 = vector.load %arg7[%c0_7, %c0_8] : memref<4x192xf32, #tpu.memory_space<vmem>>, vector<4x192xf32>
    %c0_9 = arith.constant 0 : index
    %c0_10 = arith.constant 0 : index
    %4 = vector.load %arg8[%c0_9, %c0_10] : memref<6x192xf32, #tpu.memory_space<vmem>>, vector<6x192xf32>
    %c0_11 = arith.constant 0 : index
    %c0_12 = arith.constant 0 : index
    %5 = vector.load %arg9[%c0_11, %c0_12] : memref<1x192xf32, #tpu.memory_space<vmem>>, vector<1x192xf32>
    %c0_13 = arith.constant 0 : index
    %c0_14 = arith.constant 0 : index
    %6 = vector.load %arg10[%c0_13, %c0_14] : memref<64x128xf32, #tpu.memory_space<vmem>>, vector<64x128xf32>
    %c0_15 = arith.constant 0 : index
    %c0_16 = arith.constant 0 : index
    %7 = vector.load %arg11[%c0_15, %c0_16] : memref<2x64xf32, #tpu.memory_space<vmem>>, vector<2x64xf32>
    %8 = vector.extract_strided_slice %7 {offsets = [0, 0], sizes = [1, 64], strides = [1, 1]} : vector<2x64xf32> to vector<1x64xf32>
    %9 = vector.extract_strided_slice %7 {offsets = [1, 0], sizes = [1, 64], strides = [1, 1]} : vector<2x64xf32> to vector<1x64xf32>
    %c0_17 = arith.constant 0 : index
    %c0_18 = arith.constant 0 : index
    %10 = vector.load %arg5[%c0_17, %c0_18] : memref<4x4xf32, #tpu.memory_space<vmem>>, vector<4x4xf32>
    %c0_19 = arith.constant 0 : index
    %c0_20 = arith.constant 0 : index
    %11 = vector.load %arg6[%c0_19, %c0_20] : memref<4x6xf32, #tpu.memory_space<vmem>>, vector<4x6xf32>
    %c0_21 = arith.constant 0 : index
    %c0_22 = arith.constant 0 : index
    %c0_23 = arith.constant 0 : index
    %12 = vector.load %arg0[%c0_21, %c0_22, %c0_23] : memref<8x4x4xf32, #tpu.memory_space<vmem>>, vector<1x4x4xf32>
    %13 = vector.shape_cast %12 : vector<1x4x4xf32> to vector<4x4xf32>
    %14 = arith.mulf %10, %13 : vector<4x4xf32>
    %c0_24 = arith.constant 0 : index
    %c0_25 = arith.constant 0 : index
    %c0_26 = arith.constant 0 : index
    %15 = vector.load %arg1[%c0_24, %c0_25, %c0_26] : memref<8x4x6xf32, #tpu.memory_space<vmem>>, vector<1x4x6xf32>
    %16 = vector.shape_cast %15 : vector<1x4x6xf32> to vector<4x6xf32>
    %17 = arith.mulf %11, %16 : vector<4x6xf32>
    %cst = arith.constant dense<0.000000e+00> : vector<4x192xf32>
    %18 = tpu.matmul %14, %3, %cst {dimension_numbers = #tpu.dot_dimension_numbers<[1], [0], [0], [1], [0, 0, 1, 1], [], []>} : vector<4x4xf32>, vector<4x192xf32>, vector<4x192xf32> -> vector<4x192xf32>
    %cst_27 = arith.constant dense<0.000000e+00> : vector<4x192xf32>
    %19 = tpu.matmul %17, %4, %cst_27 {dimension_numbers = #tpu.dot_dimension_numbers<[1], [0], [0], [1], [0, 0, 1, 1], [], []>} : vector<4x6xf32>, vector<6x192xf32>, vector<4x192xf32> -> vector<4x192xf32>
    %20 = arith.addf %18, %19 : vector<4x192xf32>
    %21 = vector.broadcast %5 : vector<1x192xf32> to vector<4x192xf32>
    %22 = arith.addf %20, %21 : vector<4x192xf32>
    %23 = vector.extract_strided_slice %22 {offsets = [0, 0], sizes = [4, 64], strides = [1, 1]} : vector<4x192xf32> to vector<4x64xf32>
    %24 = vector.extract_strided_slice %22 {offsets = [0, 64], sizes = [4, 64], strides = [1, 1]} : vector<4x192xf32> to vector<4x64xf32>
    %25 = vector.extract_strided_slice %22 {offsets = [0, 128], sizes = [4, 64], strides = [1, 1]} : vector<4x192xf32> to vector<4x64xf32>
    %26 = arith.negf %23 : vector<4x64xf32>
    %27 = math.exp %26 : vector<4x64xf32>
    %cst_28 = arith.constant 1.000000e+00 : f32
    %28 = vector.broadcast %cst_28 : f32 to vector<4x64xf32>
    %29 = arith.addf %28, %27 : vector<4x64xf32>
    %30 = arith.divf %28, %29 : vector<4x64xf32>
    %31 = math.tanh %24 : vector<4x64xf32>
    %32 = arith.mulf %30, %31 : vector<4x64xf32>
    %33 = arith.negf %25 : vector<4x64xf32>
    %34 = math.exp %33 : vector<4x64xf32>
    %cst_29 = arith.constant 1.000000e+00 : f32
    %35 = vector.broadcast %cst_29 : f32 to vector<4x64xf32>
    %36 = arith.addf %35, %34 : vector<4x64xf32>
    %37 = arith.divf %35, %36 : vector<4x64xf32>
    %38 = math.tanh %32 : vector<4x64xf32>
    %39 = arith.mulf %37, %38 : vector<4x64xf32>
    %c0_30 = arith.constant 0 : index
    %c0_31 = arith.constant 0 : index
    %c0_32 = arith.constant 0 : index
    %40 = vector.load %arg12[%c0_30, %c0_31, %c0_32] : memref<8x4x64xf32, #tpu.memory_space<vmem>>, vector<1x4x64xf32>
    %41 = vector.shape_cast %40 : vector<1x4x64xf32> to vector<4x64xf32>
    %42 = vector.shape_cast %39 : vector<4x64xf32> to vector<1x4x64xf32>
    tpu.vector_store %arg12[%c0_30, %c0_31, %c0_32], %42 {strides = array<i32>} : memref<8x4x64xf32, #tpu.memory_space<vmem>>, vector<1x4x64xf32>,
    %cst_33 = arith.constant dense<0.000000e+00> : vector<4x128xf32>
    %43 = tpu.matmul %32, %6, %cst_33 {dimension_numbers = #tpu.dot_dimension_numbers<[1], [0], [0], [1], [0, 0, 1, 1], [], []>} : vector<4x64xf32>, vector<64x128xf32>, vector<4x128xf32> -> vector<4x128xf32>
    %44 = vector.extract_strided_slice %43 {offsets = [0, 0], sizes = [4, 64], strides = [1, 1]} : vector<4x128xf32> to vector<4x64xf32>
    %45 = vector.extract_strided_slice %43 {offsets = [0, 64], sizes = [4, 64], strides = [1, 1]} : vector<4x128xf32> to vector<4x64xf32>
    %46 = vector.shape_cast %44 : vector<4x64xf32> to vector<4x1x64xf32>
    %47 = vector.broadcast %46 : vector<4x1x64xf32> to vector<4x4x64xf32>
    %48 = arith.addf %0, %47 : vector<4x4x64xf32>
    %49 = math.tanh %48 : vector<4x4x64xf32>
    %50 = vector.shape_cast %8 : vector<1x64xf32> to vector<1x1x64xf32>
    %51 = vector.broadcast %50 : vector<1x1x64xf32> to vector<4x4x64xf32>
    %52 = arith.mulf %49, %51 : vector<4x4x64xf32>
    %cst_34 = arith.constant dense<0.000000e+00> : vector<4x4xf32>
    %53 = vector.multi_reduction <add>, %52, %cst_34 [2] : vector<4x4x64xf32> to vector<4x4xf32>
    %cst_35 = arith.constant dense<0xFF800000> : vector<4xf32>
    %54 = vector.multi_reduction <maximumf>, %53, %cst_35 [1] : vector<4x4xf32> to vector<4xf32>
    %55 = vector.shape_cast %54 : vector<4xf32> to vector<4x1xf32>
    %56 = vector.broadcast %55 : vector<4x1xf32> to vector<4x4xf32>
    %57 = arith.subf %53, %56 : vector<4x4xf32>
    %58 = math.exp %57 : vector<4x4xf32>
    %cst_36 = arith.constant dense<0.000000e+00> : vector<4xf32>
    %59 = vector.multi_reduction <add>, %58, %cst_36 [1] : vector<4x4xf32> to vector<4xf32>
    %60 = vector.shape_cast %59 : vector<4xf32> to vector<4x1xf32>
    %61 = tpu.reciprocal %60 {approx = true} : vector<4x1xf32> -> vector<4x1xf32>
    %62 = vector.broadcast %61 : vector<4x1xf32> to vector<4x4xf32>
    %63 = arith.mulf %58, %62 : vector<4x4xf32>
    %64 = vector.shape_cast %45 : vector<4x64xf32> to vector<4x1x64xf32>
    %65 = vector.broadcast %64 : vector<4x1x64xf32> to vector<4x6x64xf32>
    %66 = arith.addf %1, %65 : vector<4x6x64xf32>
    %67 = math.tanh %66 : vector<4x6x64xf32>
    %68 = vector.shape_cast %9 : vector<1x64xf32> to vector<1x1x64xf32>
    %69 = vector.broadcast %68 : vector<1x1x64xf32> to vector<4x6x64xf32>
    %70 = arith.mulf %67, %69 : vector<4x6x64xf32>
    %cst_37 = arith.constant dense<0.000000e+00> : vector<4x6xf32>
    %71 = vector.multi_reduction <add>, %70, %cst_37 [2] : vector<4x6x64xf32> to vector<4x6xf32>
    %cst_38 = arith.constant 0.699999988 : f32
    %72 = vector.broadcast %cst_38 : f32 to vector<4x6xf32>
    %73 = arith.mulf %72, %71 : vector<4x6xf32>
    %cst_39 = arith.constant 3.000000e-01 : f32
    %74 = vector.broadcast %cst_39 : f32 to vector<4x6xf32>
    %75 = arith.mulf %74, %2 : vector<4x6xf32>
    %76 = arith.addf %73, %75 : vector<4x6xf32>
    %cst_40 = arith.constant dense<0xFF800000> : vector<4xf32>
    %77 = vector.multi_reduction <maximumf>, %76, %cst_40 [1] : vector<4x6xf32> to vector<4xf32>
    %78 = vector.shape_cast %77 : vector<4xf32> to vector<4x1xf32>
    %79 = vector.broadcast %78 : vector<4x1xf32> to vector<4x6xf32>
    %80 = arith.subf %76, %79 : vector<4x6xf32>
    %81 = math.exp %80 : vector<4x6xf32>
    %cst_41 = arith.constant dense<0.000000e+00> : vector<4xf32>
    %82 = vector.multi_reduction <add>, %81, %cst_41 [1] : vector<4x6xf32> to vector<4xf32>
    %83 = vector.shape_cast %82 : vector<4xf32> to vector<4x1xf32>
    %84 = tpu.reciprocal %83 {approx = true} : vector<4x1xf32> -> vector<4x1xf32>
    %85 = vector.broadcast %84 : vector<4x1xf32> to vector<4x6xf32>
    %86 = arith.mulf %81, %85 : vector<4x6xf32>
    %c1 = arith.constant 1 : index
    %c0_42 = arith.constant 0 : index
    %c0_43 = arith.constant 0 : index
    %87 = vector.load %arg0[%c1, %c0_42, %c0_43] : memref<8x4x4xf32, #tpu.memory_space<vmem>>, vector<1x4x4xf32>
    %88 = vector.shape_cast %87 : vector<1x4x4xf32> to vector<4x4xf32>
    %89 = arith.mulf %63, %88 : vector<4x4xf32>
    %c1_44 = arith.constant 1 : index
    %c0_45 = arith.constant 0 : index
    %c0_46 = arith.constant 0 : index
    %90 = vector.load %arg1[%c1_44, %c0_45, %c0_46] : memref<8x4x6xf32, #tpu.memory_space<vmem>>, vector<1x4x6xf32>
    %91 = vector.shape_cast %90 : vector<1x4x6xf32> to vector<4x6xf32>
    %92 = arith.mulf %86, %91 : vector<4x6xf32>
    %cst_47 = arith.constant dense<0.000000e+00> : vector<4x192xf32>
    %93 = tpu.matmul %89, %3, %cst_47 {dimension_numbers = #tpu.dot_dimension_numbers<[1], [0], [0], [1], [0, 0, 1, 1], [], []>} : vector<4x4xf32>, vector<4x192xf32>, vector<4x192xf32> -> vector<4x192xf32>
    %cst_48 = arith.constant dense<0.000000e+00> : vector<4x192xf32>
    %94 = tpu.matmul %92, %4, %cst_48 {dimension_numbers = #tpu.dot_dimension_numbers<[1], [0], [0], [1], [0, 0, 1, 1], [], []>} : vector<4x6xf32>, vector<6x192xf32>, vector<4x192xf32> -> vector<4x192xf32>
    %95 = arith.addf %93, %94 : vector<4x192xf32>
    %96 = vector.broadcast %5 : vector<1x192xf32> to vector<4x192xf32>
    %97 = arith.addf %95, %96 : vector<4x192xf32>
    %98 = vector.extract_strided_slice %97 {offsets = [0, 0], sizes = [4, 64], strides = [1, 1]} : vector<4x192xf32> to vector<4x64xf32>
    %99 = vector.extract_strided_slice %97 {offsets = [0, 64], sizes = [4, 64], strides = [1, 1]} : vector<4x192xf32> to vector<4x64xf32>
    %100 = vector.extract_strided_slice %97 {offsets = [0, 128], sizes = [4, 64], strides = [1, 1]} : vector<4x192xf32> to vector<4x64xf32>
    %101 = arith.negf %98 : vector<4x64xf32>
    %102 = math.exp %101 : vector<4x64xf32>
    %cst_49 = arith.constant 1.000000e+00 : f32
    %103 = vector.broadcast %cst_49 : f32 to vector<4x64xf32>
    %104 = arith.addf %103, %102 : vector<4x64xf32>
    %105 = arith.divf %103, %104 : vector<4x64xf32>
    %106 = math.tanh %99 : vector<4x64xf32>
    %107 = arith.mulf %105, %106 : vector<4x64xf32>
    %108 = arith.negf %100 : vector<4x64xf32>
    %109 = math.exp %108 : vector<4x64xf32>
    %cst_50 = arith.constant 1.000000e+00 : f32
    %110 = vector.broadcast %cst_50 : f32 to vector<4x64xf32>
    %111 = arith.addf %110, %109 : vector<4x64xf32>
    %112 = arith.divf %110, %111 : vector<4x64xf32>
    %113 = math.tanh %107 : vector<4x64xf32>
    %114 = arith.mulf %112, %113 : vector<4x64xf32>
    %c1_51 = arith.constant 1 : index
    %c0_52 = arith.constant 0 : index
    %c0_53 = arith.constant 0 : index
    %115 = vector.load %arg12[%c1_51, %c0_52, %c0_53] : memref<8x4x64xf32, #tpu.memory_space<vmem>>, vector<1x4x64xf32>
    %116 = vector.shape_cast %115 : vector<1x4x64xf32> to vector<4x64xf32>
    %117 = vector.shape_cast %114 : vector<4x64xf32> to vector<1x4x64xf32>
    tpu.vector_store %arg12[%c1_51, %c0_52, %c0_53], %117 {strides = array<i32>} : memref<8x4x64xf32, #tpu.memory_space<vmem>>, vector<1x4x64xf32>,
    %cst_54 = arith.constant dense<0.000000e+00> : vector<4x128xf32>
    %118 = tpu.matmul %107, %6, %cst_54 {dimension_numbers = #tpu.dot_dimension_numbers<[1], [0], [0], [1], [0, 0, 1, 1], [], []>} : vector<4x64xf32>, vector<64x128xf32>, vector<4x128xf32> -> vector<4x128xf32>
    %119 = vector.extract_strided_slice %118 {offsets = [0, 0], sizes = [4, 64], strides = [1, 1]} : vector<4x128xf32> to vector<4x64xf32>
    %120 = vector.extract_strided_slice %118 {offsets = [0, 64], sizes = [4, 64], strides = [1, 1]} : vector<4x128xf32> to vector<4x64xf32>
    %121 = vector.shape_cast %119 : vector<4x64xf32> to vector<4x1x64xf32>
    %122 = vector.broadcast %121 : vector<4x1x64xf32> to vector<4x4x64xf32>
    %123 = arith.addf %0, %122 : vector<4x4x64xf32>
    %124 = math.tanh %123 : vector<4x4x64xf32>
    %125 = vector.shape_cast %8 : vector<1x64xf32> to vector<1x1x64xf32>
    %126 = vector.broadcast %125 : vector<1x1x64xf32> to vector<4x4x64xf32>
    %127 = arith.mulf %124, %126 : vector<4x4x64xf32>
    %cst_55 = arith.constant dense<0.000000e+00> : vector<4x4xf32>
    %128 = vector.multi_reduction <add>, %127, %cst_55 [2] : vector<4x4x64xf32> to vector<4x4xf32>
    %cst_56 = arith.constant dense<0xFF800000> : vector<4xf32>
    %129 = vector.multi_reduction <maximumf>, %128, %cst_56 [1] : vector<4x4xf32> to vector<4xf32>
    %130 = vector.shape_cast %129 : vector<4xf32> to vector<4x1xf32>
    %131 = vector.broadcast %130 : vector<4x1xf32> to vector<4x4xf32>
    %132 = arith.subf %128, %131 : vector<4x4xf32>
    %133 = math.exp %132 : vector<4x4xf32>
    %cst_57 = arith.constant dense<0.000000e+00> : vector<4xf32>
    %134 = vector.multi_reduction <add>, %133, %cst_57 [1] : vector<4x4xf32> to vector<4xf32>
    %135 = vector.shape_cast %134 : vector<4xf32> to vector<4x1xf32>
    %136 = tpu.reciprocal %135 {approx = true} : vector<4x1xf32> -> vector<4x1xf32>
    %137 = vector.broadcast %136 : vector<4x1xf32> to vector<4x4xf32>
    %138 = arith.mulf %133, %137 : vector<4x4xf32>
    %139 = vector.shape_cast %120 : vector<4x64xf32> to vector<4x1x64xf32>
    %140 = vector.broadcast %139 : vector<4x1x64xf32> to vector<4x6x64xf32>
    %141 = arith.addf %1, %140 : vector<4x6x64xf32>
    %142 = math.tanh %141 : vector<4x6x64xf32>
    %143 = vector.shape_cast %9 : vector<1x64xf32> to vector<1x1x64xf32>
    %144 = vector.broadcast %143 : vector<1x1x64xf32> to vector<4x6x64xf32>
    %145 = arith.mulf %142, %144 : vector<4x6x64xf32>
    %cst_58 = arith.constant dense<0.000000e+00> : vector<4x6xf32>
    %146 = vector.multi_reduction <add>, %145, %cst_58 [2] : vector<4x6x64xf32> to vector<4x6xf32>
    %cst_59 = arith.constant 0.699999988 : f32
    %147 = vector.broadcast %cst_59 : f32 to vector<4x6xf32>
    %148 = arith.mulf %147, %146 : vector<4x6xf32>
    %cst_60 = arith.constant 3.000000e-01 : f32
    %149 = vector.broadcast %cst_60 : f32 to vector<4x6xf32>
    %150 = arith.mulf %149, %2 : vector<4x6xf32>
    %151 = arith.addf %148, %150 : vector<4x6xf32>
    %cst_61 = arith.constant dense<0xFF800000> : vector<4xf32>
    %152 = vector.multi_reduction <maximumf>, %151, %cst_61 [1] : vector<4x6xf32> to vector<4xf32>
    %153 = vector.shape_cast %152 : vector<4xf32> to vector<4x1xf32>
    %154 = vector.broadcast %153 : vector<4x1xf32> to vector<4x6xf32>
    %155 = arith.subf %151, %154 : vector<4x6xf32>
    %156 = math.exp %155 : vector<4x6xf32>
    %cst_62 = arith.constant dense<0.000000e+00> : vector<4xf32>
    %157 = vector.multi_reduction <add>, %156, %cst_62 [1] : vector<4x6xf32> to vector<4xf32>
    %158 = vector.shape_cast %157 : vector<4xf32> to vector<4x1xf32>
    %159 = tpu.reciprocal %158 {approx = true} : vector<4x1xf32> -> vector<4x1xf32>
    %160 = vector.broadcast %159 : vector<4x1xf32> to vector<4x6xf32>
    %161 = arith.mulf %156, %160 : vector<4x6xf32>
    %c2 = arith.constant 2 : index
    %c0_63 = arith.constant 0 : index
    %c0_64 = arith.constant 0 : index
    %162 = vector.load %arg0[%c2, %c0_63, %c0_64] : memref<8x4x4xf32, #tpu.memory_space<vmem>>, vector<1x4x4xf32>
    %163 = vector.shape_cast %162 : vector<1x4x4xf32> to vector<4x4xf32>
    %164 = arith.mulf %138, %163 : vector<4x4xf32>
    %c2_65 = arith.constant 2 : index
    %c0_66 = arith.constant 0 : index
    %c0_67 = arith.constant 0 : index
    %165 = vector.load %arg1[%c2_65, %c0_66, %c0_67] : memref<8x4x6xf32, #tpu.memory_space<vmem>>, vector<1x4x6xf32>
    %166 = vector.shape_cast %165 : vector<1x4x6xf32> to vector<4x6xf32>
    %167 = arith.mulf %161, %166 : vector<4x6xf32>
    %cst_68 = arith.constant dense<0.000000e+00> : vector<4x192xf32>
    %168 = tpu.matmul %164, %3, %cst_68 {dimension_numbers = #tpu.dot_dimension_numbers<[1], [0], [0], [1], [0, 0, 1, 1], [], []>} : vector<4x4xf32>, vector<4x192xf32>, vector<4x192xf32> -> vector<4x192xf32>
    %cst_69 = arith.constant dense<0.000000e+00> : vector<4x192xf32>
    %169 = tpu.matmul %167, %4, %cst_69 {dimension_numbers = #tpu.dot_dimension_numbers<[1], [0], [0], [1], [0, 0, 1, 1], [], []>} : vector<4x6xf32>, vector<6x192xf32>, vector<4x192xf32> -> vector<4x192xf32>
    %170 = arith.addf %168, %169 : vector<4x192xf32>
    %171 = vector.broadcast %5 : vector<1x192xf32> to vector<4x192xf32>
    %172 = arith.addf %170, %171 : vector<4x192xf32>
    %173 = vector.extract_strided_slice %172 {offsets = [0, 0], sizes = [4, 64], strides = [1, 1]} : vector<4x192xf32> to vector<4x64xf32>
    %174 = vector.extract_strided_slice %172 {offsets = [0, 64], sizes = [4, 64], strides = [1, 1]} : vector<4x192xf32> to vector<4x64xf32>
    %175 = vector.extract_strided_slice %172 {offsets = [0, 128], sizes = [4, 64], strides = [1, 1]} : vector<4x192xf32> to vector<4x64xf32>
    %176 = arith.negf %173 : vector<4x64xf32>
    %177 = math.exp %176 : vector<4x64xf32>
    %cst_70 = arith.constant 1.000000e+00 : f32
    %178 = vector.broadcast %cst_70 : f32 to vector<4x64xf32>
    %179 = arith.addf %178, %177 : vector<4x64xf32>
    %180 = arith.divf %178, %179 : vector<4x64xf32>
    %181 = math.tanh %174 : vector<4x64xf32>
    %182 = arith.mulf %180, %181 : vector<4x64xf32>
    %183 = arith.negf %175 : vector<4x64xf32>
    %184 = math.exp %183 : vector<4x64xf32>
    %cst_71 = arith.constant 1.000000e+00 : f32
    %185 = vector.broadcast %cst_71 : f32 to vector<4x64xf32>
    %186 = arith.addf %185, %184 : vector<4x64xf32>
    %187 = arith.divf %185, %186 : vector<4x64xf32>
    %188 = math.tanh %182 : vector<4x64xf32>
    %189 = arith.mulf %187, %188 : vector<4x64xf32>
    %c2_72 = arith.constant 2 : index
    %c0_73 = arith.constant 0 : index
    %c0_74 = arith.constant 0 : index
    %190 = vector.load %arg12[%c2_72, %c0_73, %c0_74] : memref<8x4x64xf32, #tpu.memory_space<vmem>>, vector<1x4x64xf32>
    %191 = vector.shape_cast %190 : vector<1x4x64xf32> to vector<4x64xf32>
    %192 = vector.shape_cast %189 : vector<4x64xf32> to vector<1x4x64xf32>
    tpu.vector_store %arg12[%c2_72, %c0_73, %c0_74], %192 {strides = array<i32>} : memref<8x4x64xf32, #tpu.memory_space<vmem>>, vector<1x4x64xf32>,
    %cst_75 = arith.constant dense<0.000000e+00> : vector<4x128xf32>
    %193 = tpu.matmul %182, %6, %cst_75 {dimension_numbers = #tpu.dot_dimension_numbers<[1], [0], [0], [1], [0, 0, 1, 1], [], []>} : vector<4x64xf32>, vector<64x128xf32>, vector<4x128xf32> -> vector<4x128xf32>
    %194 = vector.extract_strided_slice %193 {offsets = [0, 0], sizes = [4, 64], strides = [1, 1]} : vector<4x128xf32> to vector<4x64xf32>
    %195 = vector.extract_strided_slice %193 {offsets = [0, 64], sizes = [4, 64], strides = [1, 1]} : vector<4x128xf32> to vector<4x64xf32>
    %196 = vector.shape_cast %194 : vector<4x64xf32> to vector<4x1x64xf32>
    %197 = vector.broadcast %196 : vector<4x1x64xf32> to vector<4x4x64xf32>
    %198 = arith.addf %0, %197 : vector<4x4x64xf32>
    %199 = math.tanh %198 : vector<4x4x64xf32>
    %200 = vector.shape_cast %8 : vector<1x64xf32> to vector<1x1x64xf32>
    %201 = vector.broadcast %200 : vector<1x1x64xf32> to vector<4x4x64xf32>
    %202 = arith.mulf %199, %201 : vector<4x4x64xf32>
    %cst_76 = arith.constant dense<0.000000e+00> : vector<4x4xf32>
    %203 = vector.multi_reduction <add>, %202, %cst_76 [2] : vector<4x4x64xf32> to vector<4x4xf32>
    %cst_77 = arith.constant dense<0xFF800000> : vector<4xf32>
    %204 = vector.multi_reduction <maximumf>, %203, %cst_77 [1] : vector<4x4xf32> to vector<4xf32>
    %205 = vector.shape_cast %204 : vector<4xf32> to vector<4x1xf32>
    %206 = vector.broadcast %205 : vector<4x1xf32> to vector<4x4xf32>
    %207 = arith.subf %203, %206 : vector<4x4xf32>
    %208 = math.exp %207 : vector<4x4xf32>
    %cst_78 = arith.constant dense<0.000000e+00> : vector<4xf32>
    %209 = vector.multi_reduction <add>, %208, %cst_78 [1] : vector<4x4xf32> to vector<4xf32>
    %210 = vector.shape_cast %209 : vector<4xf32> to vector<4x1xf32>
    %211 = tpu.reciprocal %210 {approx = true} : vector<4x1xf32> -> vector<4x1xf32>
    %212 = vector.broadcast %211 : vector<4x1xf32> to vector<4x4xf32>
    %213 = arith.mulf %208, %212 : vector<4x4xf32>
    %214 = vector.shape_cast %195 : vector<4x64xf32> to vector<4x1x64xf32>
    %215 = vector.broadcast %214 : vector<4x1x64xf32> to vector<4x6x64xf32>
    %216 = arith.addf %1, %215 : vector<4x6x64xf32>
    %217 = math.tanh %216 : vector<4x6x64xf32>
    %218 = vector.shape_cast %9 : vector<1x64xf32> to vector<1x1x64xf32>
    %219 = vector.broadcast %218 : vector<1x1x64xf32> to vector<4x6x64xf32>
    %220 = arith.mulf %217, %219 : vector<4x6x64xf32>
    %cst_79 = arith.constant dense<0.000000e+00> : vector<4x6xf32>
    %221 = vector.multi_reduction <add>, %220, %cst_79 [2] : vector<4x6x64xf32> to vector<4x6xf32>
    %cst_80 = arith.constant 0.699999988 : f32
    %222 = vector.broadcast %cst_80 : f32 to vector<4x6xf32>
    %223 = arith.mulf %222, %221 : vector<4x6xf32>
    %cst_81 = arith.constant 3.000000e-01 : f32
    %224 = vector.broadcast %cst_81 : f32 to vector<4x6xf32>
    %225 = arith.mulf %224, %2 : vector<4x6xf32>
    %226 = arith.addf %223, %225 : vector<4x6xf32>
    %cst_82 = arith.constant dense<0xFF800000> : vector<4xf32>
    %227 = vector.multi_reduction <maximumf>, %226, %cst_82 [1] : vector<4x6xf32> to vector<4xf32>
    %228 = vector.shape_cast %227 : vector<4xf32> to vector<4x1xf32>
    %229 = vector.broadcast %228 : vector<4x1xf32> to vector<4x6xf32>
    %230 = arith.subf %226, %229 : vector<4x6xf32>
    %231 = math.exp %230 : vector<4x6xf32>
    %cst_83 = arith.constant dense<0.000000e+00> : vector<4xf32>
    %232 = vector.multi_reduction <add>, %231, %cst_83 [1] : vector<4x6xf32> to vector<4xf32>
    %233 = vector.shape_cast %232 : vector<4xf32> to vector<4x1xf32>
    %234 = tpu.reciprocal %233 {approx = true} : vector<4x1xf32> -> vector<4x1xf32>
    %235 = vector.broadcast %234 : vector<4x1xf32> to vector<4x6xf32>
    %236 = arith.mulf %231, %235 : vector<4x6xf32>
    %c3 = arith.constant 3 : index
    %c0_84 = arith.constant 0 : index
    %c0_85 = arith.constant 0 : index
    %237 = vector.load %arg0[%c3, %c0_84, %c0_85] : memref<8x4x4xf32, #tpu.memory_space<vmem>>, vector<1x4x4xf32>
    %238 = vector.shape_cast %237 : vector<1x4x4xf32> to vector<4x4xf32>
    %239 = arith.mulf %213, %238 : vector<4x4xf32>
    %c3_86 = arith.constant 3 : index
    %c0_87 = arith.constant 0 : index
    %c0_88 = arith.constant 0 : index
    %240 = vector.load %arg1[%c3_86, %c0_87, %c0_88] : memref<8x4x6xf32, #tpu.memory_space<vmem>>, vector<1x4x6xf32>
    %241 = vector.shape_cast %240 : vector<1x4x6xf32> to vector<4x6xf32>
    %242 = arith.mulf %236, %241 : vector<4x6xf32>
    %cst_89 = arith.constant dense<0.000000e+00> : vector<4x192xf32>
    %243 = tpu.matmul %239, %3, %cst_89 {dimension_numbers = #tpu.dot_dimension_numbers<[1], [0], [0], [1], [0, 0, 1, 1], [], []>} : vector<4x4xf32>, vector<4x192xf32>, vector<4x192xf32> -> vector<4x192xf32>
    %cst_90 = arith.constant dense<0.000000e+00> : vector<4x192xf32>
    %244 = tpu.matmul %242, %4, %cst_90 {dimension_numbers = #tpu.dot_dimension_numbers<[1], [0], [0], [1], [0, 0, 1, 1], [], []>} : vector<4x6xf32>, vector<6x192xf32>, vector<4x192xf32> -> vector<4x192xf32>
    %245 = arith.addf %243, %244 : vector<4x192xf32>
    %246 = vector.broadcast %5 : vector<1x192xf32> to vector<4x192xf32>
    %247 = arith.addf %245, %246 : vector<4x192xf32>
    %248 = vector.extract_strided_slice %247 {offsets = [0, 0], sizes = [4, 64], strides = [1, 1]} : vector<4x192xf32> to vector<4x64xf32>
    %249 = vector.extract_strided_slice %247 {offsets = [0, 64], sizes = [4, 64], strides = [1, 1]} : vector<4x192xf32> to vector<4x64xf32>
    %250 = vector.extract_strided_slice %247 {offsets = [0, 128], sizes = [4, 64], strides = [1, 1]} : vector<4x192xf32> to vector<4x64xf32>
    %251 = arith.negf %248 : vector<4x64xf32>
    %252 = math.exp %251 : vector<4x64xf32>
    %cst_91 = arith.constant 1.000000e+00 : f32
    %253 = vector.broadcast %cst_91 : f32 to vector<4x64xf32>
    %254 = arith.addf %253, %252 : vector<4x64xf32>
    %255 = arith.divf %253, %254 : vector<4x64xf32>
    %256 = math.tanh %249 : vector<4x64xf32>
    %257 = arith.mulf %255, %256 : vector<4x64xf32>
    %258 = arith.negf %250 : vector<4x64xf32>
    %259 = math.exp %258 : vector<4x64xf32>
    %cst_92 = arith.constant 1.000000e+00 : f32
    %260 = vector.broadcast %cst_92 : f32 to vector<4x64xf32>
    %261 = arith.addf %260, %259 : vector<4x64xf32>
    %262 = arith.divf %260, %261 : vector<4x64xf32>
    %263 = math.tanh %257 : vector<4x64xf32>
    %264 = arith.mulf %262, %263 : vector<4x64xf32>
    %c3_93 = arith.constant 3 : index
    %c0_94 = arith.constant 0 : index
    %c0_95 = arith.constant 0 : index
    %265 = vector.load %arg12[%c3_93, %c0_94, %c0_95] : memref<8x4x64xf32, #tpu.memory_space<vmem>>, vector<1x4x64xf32>
    %266 = vector.shape_cast %265 : vector<1x4x64xf32> to vector<4x64xf32>
    %267 = vector.shape_cast %264 : vector<4x64xf32> to vector<1x4x64xf32>
    tpu.vector_store %arg12[%c3_93, %c0_94, %c0_95], %267 {strides = array<i32>} : memref<8x4x64xf32, #tpu.memory_space<vmem>>, vector<1x4x64xf32>,
    %cst_96 = arith.constant dense<0.000000e+00> : vector<4x128xf32>
    %268 = tpu.matmul %257, %6, %cst_96 {dimension_numbers = #tpu.dot_dimension_numbers<[1], [0], [0], [1], [0, 0, 1, 1], [], []>} : vector<4x64xf32>, vector<64x128xf32>, vector<4x128xf32> -> vector<4x128xf32>
    %269 = vector.extract_strided_slice %268 {offsets = [0, 0], sizes = [4, 64], strides = [1, 1]} : vector<4x128xf32> to vector<4x64xf32>
    %270 = vector.extract_strided_slice %268 {offsets = [0, 64], sizes = [4, 64], strides = [1, 1]} : vector<4x128xf32> to vector<4x64xf32>
    %271 = vector.shape_cast %269 : vector<4x64xf32> to vector<4x1x64xf32>
    %272 = vector.broadcast %271 : vector<4x1x64xf32> to vector<4x4x64xf32>
    %273 = arith.addf %0, %272 : vector<4x4x64xf32>
    %274 = math.tanh %273 : vector<4x4x64xf32>
    %275 = vector.shape_cast %8 : vector<1x64xf32> to vector<1x1x64xf32>
    %276 = vector.broadcast %275 : vector<1x1x64xf32> to vector<4x4x64xf32>
    %277 = arith.mulf %274, %276 : vector<4x4x64xf32>
    %cst_97 = arith.constant dense<0.000000e+00> : vector<4x4xf32>
    %278 = vector.multi_reduction <add>, %277, %cst_97 [2] : vector<4x4x64xf32> to vector<4x4xf32>
    %cst_98 = arith.constant dense<0xFF800000> : vector<4xf32>
    %279 = vector.multi_reduction <maximumf>, %278, %cst_98 [1] : vector<4x4xf32> to vector<4xf32>
    %280 = vector.shape_cast %279 : vector<4xf32> to vector<4x1xf32>
    %281 = vector.broadcast %280 : vector<4x1xf32> to vector<4x4xf32>
    %282 = arith.subf %278, %281 : vector<4x4xf32>
    %283 = math.exp %282 : vector<4x4xf32>
    %cst_99 = arith.constant dense<0.000000e+00> : vector<4xf32>
    %284 = vector.multi_reduction <add>, %283, %cst_99 [1] : vector<4x4xf32> to vector<4xf32>
    %285 = vector.shape_cast %284 : vector<4xf32> to vector<4x1xf32>
    %286 = tpu.reciprocal %285 {approx = true} : vector<4x1xf32> -> vector<4x1xf32>
    %287 = vector.broadcast %286 : vector<4x1xf32> to vector<4x4xf32>
    %288 = arith.mulf %283, %287 : vector<4x4xf32>
    %289 = vector.shape_cast %270 : vector<4x64xf32> to vector<4x1x64xf32>
    %290 = vector.broadcast %289 : vector<4x1x64xf32> to vector<4x6x64xf32>
    %291 = arith.addf %1, %290 : vector<4x6x64xf32>
    %292 = math.tanh %291 : vector<4x6x64xf32>
    %293 = vector.shape_cast %9 : vector<1x64xf32> to vector<1x1x64xf32>
    %294 = vector.broadcast %293 : vector<1x1x64xf32> to vector<4x6x64xf32>
    %295 = arith.mulf %292, %294 : vector<4x6x64xf32>
    %cst_100 = arith.constant dense<0.000000e+00> : vector<4x6xf32>
    %296 = vector.multi_reduction <add>, %295, %cst_100 [2] : vector<4x6x64xf32> to vector<4x6xf32>
    %cst_101 = arith.constant 0.699999988 : f32
    %297 = vector.broadcast %cst_101 : f32 to vector<4x6xf32>
    %298 = arith.mulf %297, %296 : vector<4x6xf32>
    %cst_102 = arith.constant 3.000000e-01 : f32
    %299 = vector.broadcast %cst_102 : f32 to vector<4x6xf32>
    %300 = arith.mulf %299, %2 : vector<4x6xf32>
    %301 = arith.addf %298, %300 : vector<4x6xf32>
    %cst_103 = arith.constant dense<0xFF800000> : vector<4xf32>
    %302 = vector.multi_reduction <maximumf>, %301, %cst_103 [1] : vector<4x6xf32> to vector<4xf32>
    %303 = vector.shape_cast %302 : vector<4xf32> to vector<4x1xf32>
    %304 = vector.broadcast %303 : vector<4x1xf32> to vector<4x6xf32>
    %305 = arith.subf %301, %304 : vector<4x6xf32>
    %306 = math.exp %305 : vector<4x6xf32>
    %cst_104 = arith.constant dense<0.000000e+00> : vector<4xf32>
    %307 = vector.multi_reduction <add>, %306, %cst_104 [1] : vector<4x6xf32> to vector<4xf32>
    %308 = vector.shape_cast %307 : vector<4xf32> to vector<4x1xf32>
    %309 = tpu.reciprocal %308 {approx = true} : vector<4x1xf32> -> vector<4x1xf32>
    %310 = vector.broadcast %309 : vector<4x1xf32> to vector<4x6xf32>
    %311 = arith.mulf %306, %310 : vector<4x6xf32>
    %c4 = arith.constant 4 : index
    %c0_105 = arith.constant 0 : index
    %c0_106 = arith.constant 0 : index
    %312 = vector.load %arg0[%c4, %c0_105, %c0_106] : memref<8x4x4xf32, #tpu.memory_space<vmem>>, vector<1x4x4xf32>
    %313 = vector.shape_cast %312 : vector<1x4x4xf32> to vector<4x4xf32>
    %314 = arith.mulf %288, %313 : vector<4x4xf32>
    %c4_107 = arith.constant 4 : index
    %c0_108 = arith.constant 0 : index
    %c0_109 = arith.constant 0 : index
    %315 = vector.load %arg1[%c4_107, %c0_108, %c0_109] : memref<8x4x6xf32, #tpu.memory_space<vmem>>, vector<1x4x6xf32>
    %316 = vector.shape_cast %315 : vector<1x4x6xf32> to vector<4x6xf32>
    %317 = arith.mulf %311, %316 : vector<4x6xf32>
    %cst_110 = arith.constant dense<0.000000e+00> : vector<4x192xf32>
    %318 = tpu.matmul %314, %3, %cst_110 {dimension_numbers = #tpu.dot_dimension_numbers<[1], [0], [0], [1], [0, 0, 1, 1], [], []>} : vector<4x4xf32>, vector<4x192xf32>, vector<4x192xf32> -> vector<4x192xf32>
    %cst_111 = arith.constant dense<0.000000e+00> : vector<4x192xf32>
    %319 = tpu.matmul %317, %4, %cst_111 {dimension_numbers = #tpu.dot_dimension_numbers<[1], [0], [0], [1], [0, 0, 1, 1], [], []>} : vector<4x6xf32>, vector<6x192xf32>, vector<4x192xf32> -> vector<4x192xf32>
    %320 = arith.addf %318, %319 : vector<4x192xf32>
    %321 = vector.broadcast %5 : vector<1x192xf32> to vector<4x192xf32>
    %322 = arith.addf %320, %321 : vector<4x192xf32>
    %323 = vector.extract_strided_slice %322 {offsets = [0, 0], sizes = [4, 64], strides = [1, 1]} : vector<4x192xf32> to vector<4x64xf32>
    %324 = vector.extract_strided_slice %322 {offsets = [0, 64], sizes = [4, 64], strides = [1, 1]} : vector<4x192xf32> to vector<4x64xf32>
    %325 = vector.extract_strided_slice %322 {offsets = [0, 128], sizes = [4, 64], strides = [1, 1]} : vector<4x192xf32> to vector<4x64xf32>
    %326 = arith.negf %323 : vector<4x64xf32>
    %327 = math.exp %326 : vector<4x64xf32>
    %cst_112 = arith.constant 1.000000e+00 : f32
    %328 = vector.broadcast %cst_112 : f32 to vector<4x64xf32>
    %329 = arith.addf %328, %327 : vector<4x64xf32>
    %330 = arith.divf %328, %329 : vector<4x64xf32>
    %331 = math.tanh %324 : vector<4x64xf32>
    %332 = arith.mulf %330, %331 : vector<4x64xf32>
    %333 = arith.negf %325 : vector<4x64xf32>
    %334 = math.exp %333 : vector<4x64xf32>
    %cst_113 = arith.constant 1.000000e+00 : f32
    %335 = vector.broadcast %cst_113 : f32 to vector<4x64xf32>
    %336 = arith.addf %335, %334 : vector<4x64xf32>
    %337 = arith.divf %335, %336 : vector<4x64xf32>
    %338 = math.tanh %332 : vector<4x64xf32>
    %339 = arith.mulf %337, %338 : vector<4x64xf32>
    %c4_114 = arith.constant 4 : index
    %c0_115 = arith.constant 0 : index
    %c0_116 = arith.constant 0 : index
    %340 = vector.load %arg12[%c4_114, %c0_115, %c0_116] : memref<8x4x64xf32, #tpu.memory_space<vmem>>, vector<1x4x64xf32>
    %341 = vector.shape_cast %340 : vector<1x4x64xf32> to vector<4x64xf32>
    %342 = vector.shape_cast %339 : vector<4x64xf32> to vector<1x4x64xf32>
    tpu.vector_store %arg12[%c4_114, %c0_115, %c0_116], %342 {strides = array<i32>} : memref<8x4x64xf32, #tpu.memory_space<vmem>>, vector<1x4x64xf32>,
    %cst_117 = arith.constant dense<0.000000e+00> : vector<4x128xf32>
    %343 = tpu.matmul %332, %6, %cst_117 {dimension_numbers = #tpu.dot_dimension_numbers<[1], [0], [0], [1], [0, 0, 1, 1], [], []>} : vector<4x64xf32>, vector<64x128xf32>, vector<4x128xf32> -> vector<4x128xf32>
    %344 = vector.extract_strided_slice %343 {offsets = [0, 0], sizes = [4, 64], strides = [1, 1]} : vector<4x128xf32> to vector<4x64xf32>
    %345 = vector.extract_strided_slice %343 {offsets = [0, 64], sizes = [4, 64], strides = [1, 1]} : vector<4x128xf32> to vector<4x64xf32>
    %346 = vector.shape_cast %344 : vector<4x64xf32> to vector<4x1x64xf32>
    %347 = vector.broadcast %346 : vector<4x1x64xf32> to vector<4x4x64xf32>
    %348 = arith.addf %0, %347 : vector<4x4x64xf32>
    %349 = math.tanh %348 : vector<4x4x64xf32>
    %350 = vector.shape_cast %8 : vector<1x64xf32> to vector<1x1x64xf32>
    %351 = vector.broadcast %350 : vector<1x1x64xf32> to vector<4x4x64xf32>
    %352 = arith.mulf %349, %351 : vector<4x4x64xf32>
    %cst_118 = arith.constant dense<0.000000e+00> : vector<4x4xf32>
    %353 = vector.multi_reduction <add>, %352, %cst_118 [2] : vector<4x4x64xf32> to vector<4x4xf32>
    %cst_119 = arith.constant dense<0xFF800000> : vector<4xf32>
    %354 = vector.multi_reduction <maximumf>, %353, %cst_119 [1] : vector<4x4xf32> to vector<4xf32>
    %355 = vector.shape_cast %354 : vector<4xf32> to vector<4x1xf32>
    %356 = vector.broadcast %355 : vector<4x1xf32> to vector<4x4xf32>
    %357 = arith.subf %353, %356 : vector<4x4xf32>
    %358 = math.exp %357 : vector<4x4xf32>
    %cst_120 = arith.constant dense<0.000000e+00> : vector<4xf32>
    %359 = vector.multi_reduction <add>, %358, %cst_120 [1] : vector<4x4xf32> to vector<4xf32>
    %360 = vector.shape_cast %359 : vector<4xf32> to vector<4x1xf32>
    %361 = tpu.reciprocal %360 {approx = true} : vector<4x1xf32> -> vector<4x1xf32>
    %362 = vector.broadcast %361 : vector<4x1xf32> to vector<4x4xf32>
    %363 = arith.mulf %358, %362 : vector<4x4xf32>
    %364 = vector.shape_cast %345 : vector<4x64xf32> to vector<4x1x64xf32>
    %365 = vector.broadcast %364 : vector<4x1x64xf32> to vector<4x6x64xf32>
    %366 = arith.addf %1, %365 : vector<4x6x64xf32>
    %367 = math.tanh %366 : vector<4x6x64xf32>
    %368 = vector.shape_cast %9 : vector<1x64xf32> to vector<1x1x64xf32>
    %369 = vector.broadcast %368 : vector<1x1x64xf32> to vector<4x6x64xf32>
    %370 = arith.mulf %367, %369 : vector<4x6x64xf32>
    %cst_121 = arith.constant dense<0.000000e+00> : vector<4x6xf32>
    %371 = vector.multi_reduction <add>, %370, %cst_121 [2] : vector<4x6x64xf32> to vector<4x6xf32>
    %cst_122 = arith.constant 0.699999988 : f32
    %372 = vector.broadcast %cst_122 : f32 to vector<4x6xf32>
    %373 = arith.mulf %372, %371 : vector<4x6xf32>
    %cst_123 = arith.constant 3.000000e-01 : f32
    %374 = vector.broadcast %cst_123 : f32 to vector<4x6xf32>
    %375 = arith.mulf %374, %2 : vector<4x6xf32>
    %376 = arith.addf %373, %375 : vector<4x6xf32>
    %cst_124 = arith.constant dense<0xFF800000> : vector<4xf32>
    %377 = vector.multi_reduction <maximumf>, %376, %cst_124 [1] : vector<4x6xf32> to vector<4xf32>
    %378 = vector.shape_cast %377 : vector<4xf32> to vector<4x1xf32>
    %379 = vector.broadcast %378 : vector<4x1xf32> to vector<4x6xf32>
    %380 = arith.subf %376, %379 : vector<4x6xf32>
    %381 = math.exp %380 : vector<4x6xf32>
    %cst_125 = arith.constant dense<0.000000e+00> : vector<4xf32>
    %382 = vector.multi_reduction <add>, %381, %cst_125 [1] : vector<4x6xf32> to vector<4xf32>
    %383 = vector.shape_cast %382 : vector<4xf32> to vector<4x1xf32>
    %384 = tpu.reciprocal %383 {approx = true} : vector<4x1xf32> -> vector<4x1xf32>
    %385 = vector.broadcast %384 : vector<4x1xf32> to vector<4x6xf32>
    %386 = arith.mulf %381, %385 : vector<4x6xf32>
    %c5 = arith.constant 5 : index
    %c0_126 = arith.constant 0 : index
    %c0_127 = arith.constant 0 : index
    %387 = vector.load %arg0[%c5, %c0_126, %c0_127] : memref<8x4x4xf32, #tpu.memory_space<vmem>>, vector<1x4x4xf32>
    %388 = vector.shape_cast %387 : vector<1x4x4xf32> to vector<4x4xf32>
    %389 = arith.mulf %363, %388 : vector<4x4xf32>
    %c5_128 = arith.constant 5 : index
    %c0_129 = arith.constant 0 : index
    %c0_130 = arith.constant 0 : index
    %390 = vector.load %arg1[%c5_128, %c0_129, %c0_130] : memref<8x4x6xf32, #tpu.memory_space<vmem>>, vector<1x4x6xf32>
    %391 = vector.shape_cast %390 : vector<1x4x6xf32> to vector<4x6xf32>
    %392 = arith.mulf %386, %391 : vector<4x6xf32>
    %cst_131 = arith.constant dense<0.000000e+00> : vector<4x192xf32>
    %393 = tpu.matmul %389, %3, %cst_131 {dimension_numbers = #tpu.dot_dimension_numbers<[1], [0], [0], [1], [0, 0, 1, 1], [], []>} : vector<4x4xf32>, vector<4x192xf32>, vector<4x192xf32> -> vector<4x192xf32>
    %cst_132 = arith.constant dense<0.000000e+00> : vector<4x192xf32>
    %394 = tpu.matmul %392, %4, %cst_132 {dimension_numbers = #tpu.dot_dimension_numbers<[1], [0], [0], [1], [0, 0, 1, 1], [], []>} : vector<4x6xf32>, vector<6x192xf32>, vector<4x192xf32> -> vector<4x192xf32>
    %395 = arith.addf %393, %394 : vector<4x192xf32>
    %396 = vector.broadcast %5 : vector<1x192xf32> to vector<4x192xf32>
    %397 = arith.addf %395, %396 : vector<4x192xf32>
    %398 = vector.extract_strided_slice %397 {offsets = [0, 0], sizes = [4, 64], strides = [1, 1]} : vector<4x192xf32> to vector<4x64xf32>
    %399 = vector.extract_strided_slice %397 {offsets = [0, 64], sizes = [4, 64], strides = [1, 1]} : vector<4x192xf32> to vector<4x64xf32>
    %400 = vector.extract_strided_slice %397 {offsets = [0, 128], sizes = [4, 64], strides = [1, 1]} : vector<4x192xf32> to vector<4x64xf32>
    %401 = arith.negf %398 : vector<4x64xf32>
    %402 = math.exp %401 : vector<4x64xf32>
    %cst_133 = arith.constant 1.000000e+00 : f32
    %403 = vector.broadcast %cst_133 : f32 to vector<4x64xf32>
    %404 = arith.addf %403, %402 : vector<4x64xf32>
    %405 = arith.divf %403, %404 : vector<4x64xf32>
    %406 = math.tanh %399 : vector<4x64xf32>
    %407 = arith.mulf %405, %406 : vector<4x64xf32>
    %408 = arith.negf %400 : vector<4x64xf32>
    %409 = math.exp %408 : vector<4x64xf32>
    %cst_134 = arith.constant 1.000000e+00 : f32
    %410 = vector.broadcast %cst_134 : f32 to vector<4x64xf32>
    %411 = arith.addf %410, %409 : vector<4x64xf32>
    %412 = arith.divf %410, %411 : vector<4x64xf32>
    %413 = math.tanh %407 : vector<4x64xf32>
    %414 = arith.mulf %412, %413 : vector<4x64xf32>
    %c5_135 = arith.constant 5 : index
    %c0_136 = arith.constant 0 : index
    %c0_137 = arith.constant 0 : index
    %415 = vector.load %arg12[%c5_135, %c0_136, %c0_137] : memref<8x4x64xf32, #tpu.memory_space<vmem>>, vector<1x4x64xf32>
    %416 = vector.shape_cast %415 : vector<1x4x64xf32> to vector<4x64xf32>
    %417 = vector.shape_cast %414 : vector<4x64xf32> to vector<1x4x64xf32>
    tpu.vector_store %arg12[%c5_135, %c0_136, %c0_137], %417 {strides = array<i32>} : memref<8x4x64xf32, #tpu.memory_space<vmem>>, vector<1x4x64xf32>,
    %cst_138 = arith.constant dense<0.000000e+00> : vector<4x128xf32>
    %418 = tpu.matmul %407, %6, %cst_138 {dimension_numbers = #tpu.dot_dimension_numbers<[1], [0], [0], [1], [0, 0, 1, 1], [], []>} : vector<4x64xf32>, vector<64x128xf32>, vector<4x128xf32> -> vector<4x128xf32>
    %419 = vector.extract_strided_slice %418 {offsets = [0, 0], sizes = [4, 64], strides = [1, 1]} : vector<4x128xf32> to vector<4x64xf32>
    %420 = vector.extract_strided_slice %418 {offsets = [0, 64], sizes = [4, 64], strides = [1, 1]} : vector<4x128xf32> to vector<4x64xf32>
    %421 = vector.shape_cast %419 : vector<4x64xf32> to vector<4x1x64xf32>
    %422 = vector.broadcast %421 : vector<4x1x64xf32> to vector<4x4x64xf32>
    %423 = arith.addf %0, %422 : vector<4x4x64xf32>
    %424 = math.tanh %423 : vector<4x4x64xf32>
    %425 = vector.shape_cast %8 : vector<1x64xf32> to vector<1x1x64xf32>
    %426 = vector.broadcast %425 : vector<1x1x64xf32> to vector<4x4x64xf32>
    %427 = arith.mulf %424, %426 : vector<4x4x64xf32>
    %cst_139 = arith.constant dense<0.000000e+00> : vector<4x4xf32>
    %428 = vector.multi_reduction <add>, %427, %cst_139 [2] : vector<4x4x64xf32> to vector<4x4xf32>
    %cst_140 = arith.constant dense<0xFF800000> : vector<4xf32>
    %429 = vector.multi_reduction <maximumf>, %428, %cst_140 [1] : vector<4x4xf32> to vector<4xf32>
    %430 = vector.shape_cast %429 : vector<4xf32> to vector<4x1xf32>
    %431 = vector.broadcast %430 : vector<4x1xf32> to vector<4x4xf32>
    %432 = arith.subf %428, %431 : vector<4x4xf32>
    %433 = math.exp %432 : vector<4x4xf32>
    %cst_141 = arith.constant dense<0.000000e+00> : vector<4xf32>
    %434 = vector.multi_reduction <add>, %433, %cst_141 [1] : vector<4x4xf32> to vector<4xf32>
    %435 = vector.shape_cast %434 : vector<4xf32> to vector<4x1xf32>
    %436 = tpu.reciprocal %435 {approx = true} : vector<4x1xf32> -> vector<4x1xf32>
    %437 = vector.broadcast %436 : vector<4x1xf32> to vector<4x4xf32>
    %438 = arith.mulf %433, %437 : vector<4x4xf32>
    %439 = vector.shape_cast %420 : vector<4x64xf32> to vector<4x1x64xf32>
    %440 = vector.broadcast %439 : vector<4x1x64xf32> to vector<4x6x64xf32>
    %441 = arith.addf %1, %440 : vector<4x6x64xf32>
    %442 = math.tanh %441 : vector<4x6x64xf32>
    %443 = vector.shape_cast %9 : vector<1x64xf32> to vector<1x1x64xf32>
    %444 = vector.broadcast %443 : vector<1x1x64xf32> to vector<4x6x64xf32>
    %445 = arith.mulf %442, %444 : vector<4x6x64xf32>
    %cst_142 = arith.constant dense<0.000000e+00> : vector<4x6xf32>
    %446 = vector.multi_reduction <add>, %445, %cst_142 [2] : vector<4x6x64xf32> to vector<4x6xf32>
    %cst_143 = arith.constant 0.699999988 : f32
    %447 = vector.broadcast %cst_143 : f32 to vector<4x6xf32>
    %448 = arith.mulf %447, %446 : vector<4x6xf32>
    %cst_144 = arith.constant 3.000000e-01 : f32
    %449 = vector.broadcast %cst_144 : f32 to vector<4x6xf32>
    %450 = arith.mulf %449, %2 : vector<4x6xf32>
    %451 = arith.addf %448, %450 : vector<4x6xf32>
    %cst_145 = arith.constant dense<0xFF800000> : vector<4xf32>
    %452 = vector.multi_reduction <maximumf>, %451, %cst_145 [1] : vector<4x6xf32> to vector<4xf32>
    %453 = vector.shape_cast %452 : vector<4xf32> to vector<4x1xf32>
    %454 = vector.broadcast %453 : vector<4x1xf32> to vector<4x6xf32>
    %455 = arith.subf %451, %454 : vector<4x6xf32>
    %456 = math.exp %455 : vector<4x6xf32>
    %cst_146 = arith.constant dense<0.000000e+00> : vector<4xf32>
    %457 = vector.multi_reduction <add>, %456, %cst_146 [1] : vector<4x6xf32> to vector<4xf32>
    %458 = vector.shape_cast %457 : vector<4xf32> to vector<4x1xf32>
    %459 = tpu.reciprocal %458 {approx = true} : vector<4x1xf32> -> vector<4x1xf32>
    %460 = vector.broadcast %459 : vector<4x1xf32> to vector<4x6xf32>
    %461 = arith.mulf %456, %460 : vector<4x6xf32>
    %c6 = arith.constant 6 : index
    %c0_147 = arith.constant 0 : index
    %c0_148 = arith.constant 0 : index
    %462 = vector.load %arg0[%c6, %c0_147, %c0_148] : memref<8x4x4xf32, #tpu.memory_space<vmem>>, vector<1x4x4xf32>
    %463 = vector.shape_cast %462 : vector<1x4x4xf32> to vector<4x4xf32>
    %464 = arith.mulf %438, %463 : vector<4x4xf32>
    %c6_149 = arith.constant 6 : index
    %c0_150 = arith.constant 0 : index
    %c0_151 = arith.constant 0 : index
    %465 = vector.load %arg1[%c6_149, %c0_150, %c0_151] : memref<8x4x6xf32, #tpu.memory_space<vmem>>, vector<1x4x6xf32>
    %466 = vector.shape_cast %465 : vector<1x4x6xf32> to vector<4x6xf32>
    %467 = arith.mulf %461, %466 : vector<4x6xf32>
    %cst_152 = arith.constant dense<0.000000e+00> : vector<4x192xf32>
    %468 = tpu.matmul %464, %3, %cst_152 {dimension_numbers = #tpu.dot_dimension_numbers<[1], [0], [0], [1], [0, 0, 1, 1], [], []>} : vector<4x4xf32>, vector<4x192xf32>, vector<4x192xf32> -> vector<4x192xf32>
    %cst_153 = arith.constant dense<0.000000e+00> : vector<4x192xf32>
    %469 = tpu.matmul %467, %4, %cst_153 {dimension_numbers = #tpu.dot_dimension_numbers<[1], [0], [0], [1], [0, 0, 1, 1], [], []>} : vector<4x6xf32>, vector<6x192xf32>, vector<4x192xf32> -> vector<4x192xf32>
    %470 = arith.addf %468, %469 : vector<4x192xf32>
    %471 = vector.broadcast %5 : vector<1x192xf32> to vector<4x192xf32>
    %472 = arith.addf %470, %471 : vector<4x192xf32>
    %473 = vector.extract_strided_slice %472 {offsets = [0, 0], sizes = [4, 64], strides = [1, 1]} : vector<4x192xf32> to vector<4x64xf32>
    %474 = vector.extract_strided_slice %472 {offsets = [0, 64], sizes = [4, 64], strides = [1, 1]} : vector<4x192xf32> to vector<4x64xf32>
    %475 = vector.extract_strided_slice %472 {offsets = [0, 128], sizes = [4, 64], strides = [1, 1]} : vector<4x192xf32> to vector<4x64xf32>
    %476 = arith.negf %473 : vector<4x64xf32>
    %477 = math.exp %476 : vector<4x64xf32>
    %cst_154 = arith.constant 1.000000e+00 : f32
    %478 = vector.broadcast %cst_154 : f32 to vector<4x64xf32>
    %479 = arith.addf %478, %477 : vector<4x64xf32>
    %480 = arith.divf %478, %479 : vector<4x64xf32>
    %481 = math.tanh %474 : vector<4x64xf32>
    %482 = arith.mulf %480, %481 : vector<4x64xf32>
    %483 = arith.negf %475 : vector<4x64xf32>
    %484 = math.exp %483 : vector<4x64xf32>
    %cst_155 = arith.constant 1.000000e+00 : f32
    %485 = vector.broadcast %cst_155 : f32 to vector<4x64xf32>
    %486 = arith.addf %485, %484 : vector<4x64xf32>
    %487 = arith.divf %485, %486 : vector<4x64xf32>
    %488 = math.tanh %482 : vector<4x64xf32>
    %489 = arith.mulf %487, %488 : vector<4x64xf32>
    %c6_156 = arith.constant 6 : index
    %c0_157 = arith.constant 0 : index
    %c0_158 = arith.constant 0 : index
    %490 = vector.load %arg12[%c6_156, %c0_157, %c0_158] : memref<8x4x64xf32, #tpu.memory_space<vmem>>, vector<1x4x64xf32>
    %491 = vector.shape_cast %490 : vector<1x4x64xf32> to vector<4x64xf32>
    %492 = vector.shape_cast %489 : vector<4x64xf32> to vector<1x4x64xf32>
    tpu.vector_store %arg12[%c6_156, %c0_157, %c0_158], %492 {strides = array<i32>} : memref<8x4x64xf32, #tpu.memory_space<vmem>>, vector<1x4x64xf32>,
    %cst_159 = arith.constant dense<0.000000e+00> : vector<4x128xf32>
    %493 = tpu.matmul %482, %6, %cst_159 {dimension_numbers = #tpu.dot_dimension_numbers<[1], [0], [0], [1], [0, 0, 1, 1], [], []>} : vector<4x64xf32>, vector<64x128xf32>, vector<4x128xf32> -> vector<4x128xf32>
    %494 = vector.extract_strided_slice %493 {offsets = [0, 0], sizes = [4, 64], strides = [1, 1]} : vector<4x128xf32> to vector<4x64xf32>
    %495 = vector.extract_strided_slice %493 {offsets = [0, 64], sizes = [4, 64], strides = [1, 1]} : vector<4x128xf32> to vector<4x64xf32>
    %496 = vector.shape_cast %494 : vector<4x64xf32> to vector<4x1x64xf32>
    %497 = vector.broadcast %496 : vector<4x1x64xf32> to vector<4x4x64xf32>
    %498 = arith.addf %0, %497 : vector<4x4x64xf32>
    %499 = math.tanh %498 : vector<4x4x64xf32>
    %500 = vector.shape_cast %8 : vector<1x64xf32> to vector<1x1x64xf32>
    %501 = vector.broadcast %500 : vector<1x1x64xf32> to vector<4x4x64xf32>
    %502 = arith.mulf %499, %501 : vector<4x4x64xf32>
    %cst_160 = arith.constant dense<0.000000e+00> : vector<4x4xf32>
    %503 = vector.multi_reduction <add>, %502, %cst_160 [2] : vector<4x4x64xf32> to vector<4x4xf32>
    %cst_161 = arith.constant dense<0xFF800000> : vector<4xf32>
    %504 = vector.multi_reduction <maximumf>, %503, %cst_161 [1] : vector<4x4xf32> to vector<4xf32>
    %505 = vector.shape_cast %504 : vector<4xf32> to vector<4x1xf32>
    %506 = vector.broadcast %505 : vector<4x1xf32> to vector<4x4xf32>
    %507 = arith.subf %503, %506 : vector<4x4xf32>
    %508 = math.exp %507 : vector<4x4xf32>
    %cst_162 = arith.constant dense<0.000000e+00> : vector<4xf32>
    %509 = vector.multi_reduction <add>, %508, %cst_162 [1] : vector<4x4xf32> to vector<4xf32>
    %510 = vector.shape_cast %509 : vector<4xf32> to vector<4x1xf32>
    %511 = tpu.reciprocal %510 {approx = true} : vector<4x1xf32> -> vector<4x1xf32>
    %512 = vector.broadcast %511 : vector<4x1xf32> to vector<4x4xf32>
    %513 = arith.mulf %508, %512 : vector<4x4xf32>
    %514 = vector.shape_cast %495 : vector<4x64xf32> to vector<4x1x64xf32>
    %515 = vector.broadcast %514 : vector<4x1x64xf32> to vector<4x6x64xf32>
    %516 = arith.addf %1, %515 : vector<4x6x64xf32>
    %517 = math.tanh %516 : vector<4x6x64xf32>
    %518 = vector.shape_cast %9 : vector<1x64xf32> to vector<1x1x64xf32>
    %519 = vector.broadcast %518 : vector<1x1x64xf32> to vector<4x6x64xf32>
    %520 = arith.mulf %517, %519 : vector<4x6x64xf32>
    %cst_163 = arith.constant dense<0.000000e+00> : vector<4x6xf32>
    %521 = vector.multi_reduction <add>, %520, %cst_163 [2] : vector<4x6x64xf32> to vector<4x6xf32>
    %cst_164 = arith.constant 0.699999988 : f32
    %522 = vector.broadcast %cst_164 : f32 to vector<4x6xf32>
    %523 = arith.mulf %522, %521 : vector<4x6xf32>
    %cst_165 = arith.constant 3.000000e-01 : f32
    %524 = vector.broadcast %cst_165 : f32 to vector<4x6xf32>
    %525 = arith.mulf %524, %2 : vector<4x6xf32>
    %526 = arith.addf %523, %525 : vector<4x6xf32>
    %cst_166 = arith.constant dense<0xFF800000> : vector<4xf32>
    %527 = vector.multi_reduction <maximumf>, %526, %cst_166 [1] : vector<4x6xf32> to vector<4xf32>
    %528 = vector.shape_cast %527 : vector<4xf32> to vector<4x1xf32>
    %529 = vector.broadcast %528 : vector<4x1xf32> to vector<4x6xf32>
    %530 = arith.subf %526, %529 : vector<4x6xf32>
    %531 = math.exp %530 : vector<4x6xf32>
    %cst_167 = arith.constant dense<0.000000e+00> : vector<4xf32>
    %532 = vector.multi_reduction <add>, %531, %cst_167 [1] : vector<4x6xf32> to vector<4xf32>
    %533 = vector.shape_cast %532 : vector<4xf32> to vector<4x1xf32>
    %534 = tpu.reciprocal %533 {approx = true} : vector<4x1xf32> -> vector<4x1xf32>
    %535 = vector.broadcast %534 : vector<4x1xf32> to vector<4x6xf32>
    %536 = arith.mulf %531, %535 : vector<4x6xf32>
    %c7 = arith.constant 7 : index
    %c0_168 = arith.constant 0 : index
    %c0_169 = arith.constant 0 : index
    %537 = vector.load %arg0[%c7, %c0_168, %c0_169] : memref<8x4x4xf32, #tpu.memory_space<vmem>>, vector<1x4x4xf32>
    %538 = vector.shape_cast %537 : vector<1x4x4xf32> to vector<4x4xf32>
    %539 = arith.mulf %513, %538 : vector<4x4xf32>
    %c7_170 = arith.constant 7 : index
    %c0_171 = arith.constant 0 : index
    %c0_172 = arith.constant 0 : index
    %540 = vector.load %arg1[%c7_170, %c0_171, %c0_172] : memref<8x4x6xf32, #tpu.memory_space<vmem>>, vector<1x4x6xf32>
    %541 = vector.shape_cast %540 : vector<1x4x6xf32> to vector<4x6xf32>
    %542 = arith.mulf %536, %541 : vector<4x6xf32>
    %cst_173 = arith.constant dense<0.000000e+00> : vector<4x192xf32>
    %543 = tpu.matmul %539, %3, %cst_173 {dimension_numbers = #tpu.dot_dimension_numbers<[1], [0], [0], [1], [0, 0, 1, 1], [], []>} : vector<4x4xf32>, vector<4x192xf32>, vector<4x192xf32> -> vector<4x192xf32>
    %cst_174 = arith.constant dense<0.000000e+00> : vector<4x192xf32>
    %544 = tpu.matmul %542, %4, %cst_174 {dimension_numbers = #tpu.dot_dimension_numbers<[1], [0], [0], [1], [0, 0, 1, 1], [], []>} : vector<4x6xf32>, vector<6x192xf32>, vector<4x192xf32> -> vector<4x192xf32>
    %545 = arith.addf %543, %544 : vector<4x192xf32>
    %546 = vector.broadcast %5 : vector<1x192xf32> to vector<4x192xf32>
    %547 = arith.addf %545, %546 : vector<4x192xf32>
    %548 = vector.extract_strided_slice %547 {offsets = [0, 0], sizes = [4, 64], strides = [1, 1]} : vector<4x192xf32> to vector<4x64xf32>
    %549 = vector.extract_strided_slice %547 {offsets = [0, 64], sizes = [4, 64], strides = [1, 1]} : vector<4x192xf32> to vector<4x64xf32>
    %550 = vector.extract_strided_slice %547 {offsets = [0, 128], sizes = [4, 64], strides = [1, 1]} : vector<4x192xf32> to vector<4x64xf32>
    %551 = arith.negf %548 : vector<4x64xf32>
    %552 = math.exp %551 : vector<4x64xf32>
    %cst_175 = arith.constant 1.000000e+00 : f32
    %553 = vector.broadcast %cst_175 : f32 to vector<4x64xf32>
    %554 = arith.addf %553, %552 : vector<4x64xf32>
    %555 = arith.divf %553, %554 : vector<4x64xf32>
    %556 = math.tanh %549 : vector<4x64xf32>
    %557 = arith.mulf %555, %556 : vector<4x64xf32>
    %558 = arith.negf %550 : vector<4x64xf32>
    %559 = math.exp %558 : vector<4x64xf32>
    %cst_176 = arith.constant 1.000000e+00 : f32
    %560 = vector.broadcast %cst_176 : f32 to vector<4x64xf32>
    %561 = arith.addf %560, %559 : vector<4x64xf32>
    %562 = arith.divf %560, %561 : vector<4x64xf32>
    %563 = math.tanh %557 : vector<4x64xf32>
    %564 = arith.mulf %562, %563 : vector<4x64xf32>
    %c7_177 = arith.constant 7 : index
    %c0_178 = arith.constant 0 : index
    %c0_179 = arith.constant 0 : index
    %565 = vector.load %arg12[%c7_177, %c0_178, %c0_179] : memref<8x4x64xf32, #tpu.memory_space<vmem>>, vector<1x4x64xf32>
    %566 = vector.shape_cast %565 : vector<1x4x64xf32> to vector<4x64xf32>
    %567 = vector.shape_cast %564 : vector<4x64xf32> to vector<1x4x64xf32>
    tpu.vector_store %arg12[%c7_177, %c0_178, %c0_179], %567 {strides = array<i32>} : memref<8x4x64xf32, #tpu.memory_space<vmem>>, vector<1x4x64xf32>,
    return
  }
}

module attributes {stable_mosaic.version = 11 : i64} {
  func.func @_decoder_kernel(%arg0: i32, %arg1: memref<1x4x68xf32, #tpu.memory_space<vmem>>, %arg2: memref<1x68xf32, #tpu.memory_space<vmem>>, %arg3: memref<2x192xf32, #tpu.memory_space<vmem>>, %arg4: memref<64x512xf32, #tpu.memory_space<vmem>>, %arg5: memref<1x512xf32, #tpu.memory_space<vmem>>, %arg6: memref<4x8x4096xf32, #tpu.memory_space<vmem>>, %arg7: memref<4x8x2xf32, #tpu.memory_space<vmem>>, %arg8: memref<64x2xf32, #tpu.memory_space<vmem>>, %arg9: memref<1x2xf32, #tpu.memory_space<vmem>>, %arg10: memref<1x4x2xf32, #tpu.memory_space<vmem>>) attributes {dimension_semantics = [#tpu.dimension_semantics<parallel>], iteration_bounds = array<i64: 5>, scalar_prefetch = 0 : i64, scratch_operands = 0 : i64, tpu.core_type = #tpu.core_type<tc>, window_params = [{transform_indices = @transform_0, window_bounds = array<i64: 1, 4, 68>}, {pipeline_mode = #tpu.pipeline_mode<synchronous>, transform_indices = @transform_1, window_bounds = array<i64: 1, 68>}, {pipeline_mode = #tpu.pipeline_mode<synchronous>, transform_indices = @transform_2, window_bounds = array<i64: 2, 192>}, {pipeline_mode = #tpu.pipeline_mode<synchronous>, transform_indices = @transform_3, window_bounds = array<i64: 64, 512>}, {pipeline_mode = #tpu.pipeline_mode<synchronous>, transform_indices = @transform_4, window_bounds = array<i64: 1, 512>}, {pipeline_mode = #tpu.pipeline_mode<synchronous>, transform_indices = @transform_5, window_bounds = array<i64: 4, 8, 4096>}, {pipeline_mode = #tpu.pipeline_mode<synchronous>, transform_indices = @transform_6, window_bounds = array<i64: 4, 8, 2>}, {pipeline_mode = #tpu.pipeline_mode<synchronous>, transform_indices = @transform_7, window_bounds = array<i64: 64, 2>}, {pipeline_mode = #tpu.pipeline_mode<synchronous>, transform_indices = @transform_8, window_bounds = array<i64: 1, 2>}, {transform_indices = @transform_9, window_bounds = array<i64: 1, 4, 2>}]} {
    %c0 = arith.constant 0 : index
    %c0_0 = arith.constant 0 : index
    %c0_1 = arith.constant 0 : index
    %0 = vector.load %arg1[%c0, %c0_0, %c0_1] : memref<1x4x68xf32, #tpu.memory_space<vmem>>, vector<1x4x68xf32>
    %1 = vector.shape_cast %0 : vector<1x4x68xf32> to vector<4x68xf32>
    %c0_2 = arith.constant 0 : index
    %c0_3 = arith.constant 0 : index
    %2 = vector.load %arg2[%c0_2, %c0_3] : memref<1x68xf32, #tpu.memory_space<vmem>>, vector<1x68xf32>
    %3 = vector.broadcast %2 : vector<1x68xf32> to vector<4x68xf32>
    %4 = arith.mulf %1, %3 : vector<4x68xf32>
    %cst = arith.constant dense<0.000000e+00> : vector<4xf32>
    %5 = vector.multi_reduction <add>, %4, %cst [1] : vector<4x68xf32> to vector<4xf32>
    %6 = vector.shape_cast %5 : vector<4xf32> to vector<4x1xf32>
    %c0_4 = arith.constant 0 : index
    %c0_5 = arith.constant 0 : index
    %7 = vector.load %arg3[%c0_4, %c0_5] : memref<2x192xf32, #tpu.memory_space<vmem>>, vector<2x192xf32>
    %8 = vector.extract_strided_slice %7 {offsets = [0, 0], sizes = [1, 192], strides = [1, 1]} : vector<2x192xf32> to vector<1x192xf32>
    %9 = vector.broadcast %6 : vector<4x1xf32> to vector<4x192xf32>
    %10 = vector.broadcast %8 : vector<1x192xf32> to vector<4x192xf32>
    %11 = arith.mulf %9, %10 : vector<4x192xf32>
    %12 = vector.extract_strided_slice %7 {offsets = [1, 0], sizes = [1, 192], strides = [1, 1]} : vector<2x192xf32> to vector<1x192xf32>
    %13 = vector.broadcast %12 : vector<1x192xf32> to vector<4x192xf32>
    %14 = arith.addf %11, %13 : vector<4x192xf32>
    %15 = vector.extract_strided_slice %14 {offsets = [0, 0], sizes = [4, 64], strides = [1, 1]} : vector<4x192xf32> to vector<4x64xf32>
    %16 = vector.extract_strided_slice %14 {offsets = [0, 64], sizes = [4, 64], strides = [1, 1]} : vector<4x192xf32> to vector<4x64xf32>
    %17 = vector.extract_strided_slice %14 {offsets = [0, 128], sizes = [4, 64], strides = [1, 1]} : vector<4x192xf32> to vector<4x64xf32>
    %18 = arith.negf %15 : vector<4x64xf32>
    %19 = math.exp %18 : vector<4x64xf32>
    %cst_6 = arith.constant 1.000000e+00 : f32
    %20 = vector.broadcast %cst_6 : f32 to vector<4x64xf32>
    %21 = arith.addf %20, %19 : vector<4x64xf32>
    %22 = arith.divf %20, %21 : vector<4x64xf32>
    %23 = math.tanh %16 : vector<4x64xf32>
    %24 = arith.mulf %22, %23 : vector<4x64xf32>
    %25 = arith.negf %17 : vector<4x64xf32>
    %26 = math.exp %25 : vector<4x64xf32>
    %cst_7 = arith.constant 1.000000e+00 : f32
    %27 = vector.broadcast %cst_7 : f32 to vector<4x64xf32>
    %28 = arith.addf %27, %26 : vector<4x64xf32>
    %29 = arith.divf %27, %28 : vector<4x64xf32>
    %30 = math.tanh %24 : vector<4x64xf32>
    %31 = arith.mulf %29, %30 : vector<4x64xf32>
    %c0_8 = arith.constant 0 : index
    %c0_9 = arith.constant 0 : index
    %32 = vector.load %arg4[%c0_8, %c0_9] : memref<64x512xf32, #tpu.memory_space<vmem>>, vector<64x512xf32>
    %cst_10 = arith.constant dense<0.000000e+00> : vector<4x512xf32>
    %33 = tpu.matmul %24, %32, %cst_10 {dimension_numbers = #tpu.dot_dimension_numbers<[1], [0], [0], [1], [0, 0, 1, 1], [], []>} : vector<4x64xf32>, vector<64x512xf32>, vector<4x512xf32> -> vector<4x512xf32>
    %c0_11 = arith.constant 0 : index
    %c0_12 = arith.constant 0 : index
    %34 = vector.load %arg5[%c0_11, %c0_12] : memref<1x512xf32, #tpu.memory_space<vmem>>, vector<1x512xf32>
    %cst_13 = arith.constant 0.000000e+00 : f32
    %35 = vector.broadcast %cst_13 : f32 to vector<4x8xf32>
    %c0_14 = arith.constant 0 : index
    %c0_15 = arith.constant 0 : index
    %c0_16 = arith.constant 0 : index
    %36 = vector.load %arg6[%c0_14, %c0_15, %c0_16] : memref<4x8x4096xf32, #tpu.memory_space<vmem>>, vector<4x8x512xf32>
    %37 = vector.shape_cast %33 : vector<4x512xf32> to vector<4x1x512xf32>
    %38 = vector.broadcast %37 : vector<4x1x512xf32> to vector<4x8x512xf32>
    %39 = arith.addf %36, %38 : vector<4x8x512xf32>
    %40 = math.tanh %39 : vector<4x8x512xf32>
    %41 = vector.shape_cast %34 : vector<1x512xf32> to vector<1x1x512xf32>
    %42 = vector.broadcast %41 : vector<1x1x512xf32> to vector<4x8x512xf32>
    %43 = arith.mulf %40, %42 : vector<4x8x512xf32>
    %cst_17 = arith.constant dense<0.000000e+00> : vector<4x8xf32>
    %44 = vector.multi_reduction <add>, %43, %cst_17 [2] : vector<4x8x512xf32> to vector<4x8xf32>
    %45 = arith.addf %35, %44 : vector<4x8xf32>
    %c0_18 = arith.constant 0 : index
    %c0_19 = arith.constant 0 : index
    %c512 = arith.constant 512 : index
    %46 = vector.load %arg6[%c0_18, %c0_19, %c512] : memref<4x8x4096xf32, #tpu.memory_space<vmem>>, vector<4x8x512xf32>
    %47 = vector.shape_cast %33 : vector<4x512xf32> to vector<4x1x512xf32>
    %48 = vector.broadcast %47 : vector<4x1x512xf32> to vector<4x8x512xf32>
    %49 = arith.addf %46, %48 : vector<4x8x512xf32>
    %50 = math.tanh %49 : vector<4x8x512xf32>
    %51 = vector.shape_cast %34 : vector<1x512xf32> to vector<1x1x512xf32>
    %52 = vector.broadcast %51 : vector<1x1x512xf32> to vector<4x8x512xf32>
    %53 = arith.mulf %50, %52 : vector<4x8x512xf32>
    %cst_20 = arith.constant dense<0.000000e+00> : vector<4x8xf32>
    %54 = vector.multi_reduction <add>, %53, %cst_20 [2] : vector<4x8x512xf32> to vector<4x8xf32>
    %55 = arith.addf %45, %54 : vector<4x8xf32>
    %c0_21 = arith.constant 0 : index
    %c0_22 = arith.constant 0 : index
    %c1024 = arith.constant 1024 : index
    %56 = vector.load %arg6[%c0_21, %c0_22, %c1024] : memref<4x8x4096xf32, #tpu.memory_space<vmem>>, vector<4x8x512xf32>
    %57 = vector.shape_cast %33 : vector<4x512xf32> to vector<4x1x512xf32>
    %58 = vector.broadcast %57 : vector<4x1x512xf32> to vector<4x8x512xf32>
    %59 = arith.addf %56, %58 : vector<4x8x512xf32>
    %60 = math.tanh %59 : vector<4x8x512xf32>
    %61 = vector.shape_cast %34 : vector<1x512xf32> to vector<1x1x512xf32>
    %62 = vector.broadcast %61 : vector<1x1x512xf32> to vector<4x8x512xf32>
    %63 = arith.mulf %60, %62 : vector<4x8x512xf32>
    %cst_23 = arith.constant dense<0.000000e+00> : vector<4x8xf32>
    %64 = vector.multi_reduction <add>, %63, %cst_23 [2] : vector<4x8x512xf32> to vector<4x8xf32>
    %65 = arith.addf %55, %64 : vector<4x8xf32>
    %c0_24 = arith.constant 0 : index
    %c0_25 = arith.constant 0 : index
    %c1536 = arith.constant 1536 : index
    %66 = vector.load %arg6[%c0_24, %c0_25, %c1536] : memref<4x8x4096xf32, #tpu.memory_space<vmem>>, vector<4x8x512xf32>
    %67 = vector.shape_cast %33 : vector<4x512xf32> to vector<4x1x512xf32>
    %68 = vector.broadcast %67 : vector<4x1x512xf32> to vector<4x8x512xf32>
    %69 = arith.addf %66, %68 : vector<4x8x512xf32>
    %70 = math.tanh %69 : vector<4x8x512xf32>
    %71 = vector.shape_cast %34 : vector<1x512xf32> to vector<1x1x512xf32>
    %72 = vector.broadcast %71 : vector<1x1x512xf32> to vector<4x8x512xf32>
    %73 = arith.mulf %70, %72 : vector<4x8x512xf32>
    %cst_26 = arith.constant dense<0.000000e+00> : vector<4x8xf32>
    %74 = vector.multi_reduction <add>, %73, %cst_26 [2] : vector<4x8x512xf32> to vector<4x8xf32>
    %75 = arith.addf %65, %74 : vector<4x8xf32>
    %c0_27 = arith.constant 0 : index
    %c0_28 = arith.constant 0 : index
    %c2048 = arith.constant 2048 : index
    %76 = vector.load %arg6[%c0_27, %c0_28, %c2048] : memref<4x8x4096xf32, #tpu.memory_space<vmem>>, vector<4x8x512xf32>
    %77 = vector.shape_cast %33 : vector<4x512xf32> to vector<4x1x512xf32>
    %78 = vector.broadcast %77 : vector<4x1x512xf32> to vector<4x8x512xf32>
    %79 = arith.addf %76, %78 : vector<4x8x512xf32>
    %80 = math.tanh %79 : vector<4x8x512xf32>
    %81 = vector.shape_cast %34 : vector<1x512xf32> to vector<1x1x512xf32>
    %82 = vector.broadcast %81 : vector<1x1x512xf32> to vector<4x8x512xf32>
    %83 = arith.mulf %80, %82 : vector<4x8x512xf32>
    %cst_29 = arith.constant dense<0.000000e+00> : vector<4x8xf32>
    %84 = vector.multi_reduction <add>, %83, %cst_29 [2] : vector<4x8x512xf32> to vector<4x8xf32>
    %85 = arith.addf %75, %84 : vector<4x8xf32>
    %c0_30 = arith.constant 0 : index
    %c0_31 = arith.constant 0 : index
    %c2560 = arith.constant 2560 : index
    %86 = vector.load %arg6[%c0_30, %c0_31, %c2560] : memref<4x8x4096xf32, #tpu.memory_space<vmem>>, vector<4x8x512xf32>
    %87 = vector.shape_cast %33 : vector<4x512xf32> to vector<4x1x512xf32>
    %88 = vector.broadcast %87 : vector<4x1x512xf32> to vector<4x8x512xf32>
    %89 = arith.addf %86, %88 : vector<4x8x512xf32>
    %90 = math.tanh %89 : vector<4x8x512xf32>
    %91 = vector.shape_cast %34 : vector<1x512xf32> to vector<1x1x512xf32>
    %92 = vector.broadcast %91 : vector<1x1x512xf32> to vector<4x8x512xf32>
    %93 = arith.mulf %90, %92 : vector<4x8x512xf32>
    %cst_32 = arith.constant dense<0.000000e+00> : vector<4x8xf32>
    %94 = vector.multi_reduction <add>, %93, %cst_32 [2] : vector<4x8x512xf32> to vector<4x8xf32>
    %95 = arith.addf %85, %94 : vector<4x8xf32>
    %c0_33 = arith.constant 0 : index
    %c0_34 = arith.constant 0 : index
    %c3072 = arith.constant 3072 : index
    %96 = vector.load %arg6[%c0_33, %c0_34, %c3072] : memref<4x8x4096xf32, #tpu.memory_space<vmem>>, vector<4x8x512xf32>
    %97 = vector.shape_cast %33 : vector<4x512xf32> to vector<4x1x512xf32>
    %98 = vector.broadcast %97 : vector<4x1x512xf32> to vector<4x8x512xf32>
    %99 = arith.addf %96, %98 : vector<4x8x512xf32>
    %100 = math.tanh %99 : vector<4x8x512xf32>
    %101 = vector.shape_cast %34 : vector<1x512xf32> to vector<1x1x512xf32>
    %102 = vector.broadcast %101 : vector<1x1x512xf32> to vector<4x8x512xf32>
    %103 = arith.mulf %100, %102 : vector<4x8x512xf32>
    %cst_35 = arith.constant dense<0.000000e+00> : vector<4x8xf32>
    %104 = vector.multi_reduction <add>, %103, %cst_35 [2] : vector<4x8x512xf32> to vector<4x8xf32>
    %105 = arith.addf %95, %104 : vector<4x8xf32>
    %c0_36 = arith.constant 0 : index
    %c0_37 = arith.constant 0 : index
    %c3584 = arith.constant 3584 : index
    %106 = vector.load %arg6[%c0_36, %c0_37, %c3584] : memref<4x8x4096xf32, #tpu.memory_space<vmem>>, vector<4x8x512xf32>
    %107 = vector.shape_cast %33 : vector<4x512xf32> to vector<4x1x512xf32>
    %108 = vector.broadcast %107 : vector<4x1x512xf32> to vector<4x8x512xf32>
    %109 = arith.addf %106, %108 : vector<4x8x512xf32>
    %110 = math.tanh %109 : vector<4x8x512xf32>
    %111 = vector.shape_cast %34 : vector<1x512xf32> to vector<1x1x512xf32>
    %112 = vector.broadcast %111 : vector<1x1x512xf32> to vector<4x8x512xf32>
    %113 = arith.mulf %110, %112 : vector<4x8x512xf32>
    %cst_38 = arith.constant dense<0.000000e+00> : vector<4x8xf32>
    %114 = vector.multi_reduction <add>, %113, %cst_38 [2] : vector<4x8x512xf32> to vector<4x8xf32>
    %115 = arith.addf %105, %114 : vector<4x8xf32>
    %cst_39 = arith.constant dense<0xFF800000> : vector<4xf32>
    %116 = vector.multi_reduction <maximumf>, %115, %cst_39 [1] : vector<4x8xf32> to vector<4xf32>
    %117 = vector.shape_cast %116 : vector<4xf32> to vector<4x1xf32>
    %118 = vector.broadcast %117 : vector<4x1xf32> to vector<4x8xf32>
    %119 = arith.subf %115, %118 : vector<4x8xf32>
    %120 = math.exp %119 : vector<4x8xf32>
    %cst_40 = arith.constant dense<0.000000e+00> : vector<4xf32>
    %121 = vector.multi_reduction <add>, %120, %cst_40 [1] : vector<4x8xf32> to vector<4xf32>
    %122 = vector.shape_cast %121 : vector<4xf32> to vector<4x1xf32>
    %123 = tpu.reciprocal %122 {approx = true} : vector<4x1xf32> -> vector<4x1xf32>
    %124 = vector.broadcast %123 : vector<4x1xf32> to vector<4x8xf32>
    %125 = arith.mulf %120, %124 : vector<4x8xf32>
    %126 = vector.shape_cast %125 : vector<4x8xf32> to vector<4x8x1xf32>
    %c0_41 = arith.constant 0 : index
    %c0_42 = arith.constant 0 : index
    %c0_43 = arith.constant 0 : index
    %127 = vector.load %arg7[%c0_41, %c0_42, %c0_43] : memref<4x8x2xf32, #tpu.memory_space<vmem>>, vector<4x8x2xf32>
    %128 = vector.broadcast %126 : vector<4x8x1xf32> to vector<4x8x2xf32>
    %129 = arith.mulf %128, %127 : vector<4x8x2xf32>
    %cst_44 = arith.constant dense<0.000000e+00> : vector<4x2xf32>
    %130 = vector.multi_reduction <add>, %129, %cst_44 [1] : vector<4x8x2xf32> to vector<4x2xf32>
    %c0_45 = arith.constant 0 : index
    %c0_46 = arith.constant 0 : index
    %131 = vector.load %arg8[%c0_45, %c0_46] : memref<64x2xf32, #tpu.memory_space<vmem>>, vector<64x2xf32>
    %cst_47 = arith.constant dense<0.000000e+00> : vector<4x2xf32>
    %132 = tpu.matmul %31, %131, %cst_47 {dimension_numbers = #tpu.dot_dimension_numbers<[1], [0], [0], [1], [0, 0, 1, 1], [], []>} : vector<4x64xf32>, vector<64x2xf32>, vector<4x2xf32> -> vector<4x2xf32>
    %133 = arith.addf %132, %130 : vector<4x2xf32>
    %c0_48 = arith.constant 0 : index
    %c0_49 = arith.constant 0 : index
    %134 = vector.load %arg9[%c0_48, %c0_49] : memref<1x2xf32, #tpu.memory_space<vmem>>, vector<1x2xf32>
    %135 = vector.broadcast %134 : vector<1x2xf32> to vector<4x2xf32>
    %136 = arith.addf %133, %135 : vector<4x2xf32>
    %c0_50 = arith.constant 0 : index
    %c0_51 = arith.constant 0 : index
    %c0_52 = arith.constant 0 : index
    %137 = vector.load %arg10[%c0_50, %c0_51, %c0_52] : memref<1x4x2xf32, #tpu.memory_space<vmem>>, vector<1x4x2xf32>
    %138 = vector.shape_cast %137 : vector<1x4x2xf32> to vector<4x2xf32>
    %139 = vector.shape_cast %136 : vector<4x2xf32> to vector<1x4x2xf32>
    tpu.vector_store %arg10[%c0_50, %c0_51, %c0_52], %139 {strides = array<i32>} : memref<1x4x2xf32, #tpu.memory_space<vmem>>, vector<1x4x2xf32>,
    return
  }
  func.func @transform_0(%arg0: i32) -> (i32, i32, i32) {
    %c0_i32 = arith.constant 0 : i32
    %c0_i32_0 = arith.constant 0 : i32
    %c0_i32_1 = arith.constant 0 : i32
    return %arg0, %c0_i32, %c0_i32_0 : i32, i32, i32
  }
  func.func @transform_1(%arg0: i32) -> (i32, i32) {
    %c0_i32 = arith.constant 0 : i32
    %c0_i32_0 = arith.constant 0 : i32
    %c0_i32_1 = arith.constant 0 : i32
    return %c0_i32, %c0_i32_0 : i32, i32
  }
  func.func @transform_2(%arg0: i32) -> (i32, i32) {
    %c0_i32 = arith.constant 0 : i32
    %c0_i32_0 = arith.constant 0 : i32
    %c0_i32_1 = arith.constant 0 : i32
    return %c0_i32, %c0_i32_0 : i32, i32
  }
  func.func @transform_3(%arg0: i32) -> (i32, i32) {
    %c0_i32 = arith.constant 0 : i32
    %c0_i32_0 = arith.constant 0 : i32
    %c0_i32_1 = arith.constant 0 : i32
    return %c0_i32, %c0_i32_0 : i32, i32
  }
  func.func @transform_4(%arg0: i32) -> (i32, i32) {
    %c0_i32 = arith.constant 0 : i32
    %c0_i32_0 = arith.constant 0 : i32
    %c0_i32_1 = arith.constant 0 : i32
    return %c0_i32, %c0_i32_0 : i32, i32
  }
  func.func @transform_5(%arg0: i32) -> (i32, i32, i32) {
    %c0_i32 = arith.constant 0 : i32
    %c0_i32_0 = arith.constant 0 : i32
    %c0_i32_1 = arith.constant 0 : i32
    %c0_i32_2 = arith.constant 0 : i32
    return %c0_i32, %c0_i32_0, %c0_i32_1 : i32, i32, i32
  }
  func.func @transform_6(%arg0: i32) -> (i32, i32, i32) {
    %c0_i32 = arith.constant 0 : i32
    %c0_i32_0 = arith.constant 0 : i32
    %c0_i32_1 = arith.constant 0 : i32
    %c0_i32_2 = arith.constant 0 : i32
    return %c0_i32, %c0_i32_0, %c0_i32_1 : i32, i32, i32
  }
  func.func @transform_7(%arg0: i32) -> (i32, i32) {
    %c0_i32 = arith.constant 0 : i32
    %c0_i32_0 = arith.constant 0 : i32
    %c0_i32_1 = arith.constant 0 : i32
    return %c0_i32, %c0_i32_0 : i32, i32
  }
  func.func @transform_8(%arg0: i32) -> (i32, i32) {
    %c0_i32 = arith.constant 0 : i32
    %c0_i32_0 = arith.constant 0 : i32
    %c0_i32_1 = arith.constant 0 : i32
    return %c0_i32, %c0_i32_0 : i32, i32
  }
  func.func @transform_9(%arg0: i32) -> (i32, i32, i32) {
    %c0_i32 = arith.constant 0 : i32
    %c0_i32_0 = arith.constant 0 : i32
    %c0_i32_1 = arith.constant 0 : i32
    return %arg0, %c0_i32, %c0_i32_0 : i32, i32, i32
  }
}

</mosaic_0001>

<bundles_post_ra>
// kernel: tile.84
= control target key start
LH: loop header
LB: loop body
LE: loop exit
PB: predicated region body
PF: predicated region fallthrough
CT: control target
= control target key end

     0   :  { %vm228_vm0 = vcmask 1047556   ;;  %s765_s14 = smov 64   ;;  %vm3_vm1 = vcmask 523264   ;;  %vm232_vm2 = vcmask 1048064   ;;  %s1512_s0 = inlined_call_operand.vmem [shape: f32[64,8,64], index: 0, kind: input, shape index: {}]   ;;  %s1513_s1 = inlined_call_operand.vmem [shape: f32[64,512], index: 1, kind: output, shape index: {}]  }
   0x1   :  { %v674_v0 = vld [vmem:[%s1512_s0 + $0x81] ss:$8 sm:$0xf]   ;;  %v695_v24 = vld [vmem:[%s1512_s0 + $0x43] ss:$8 sm:$0xf]  }
   0x2   :  { %v675_v1 = vld [vmem:[%s1512_s0 + $0x81] ss:$8 sm:$0xf0]   ;;  %v696_v25 = vld [vmem:[%s1512_s0 + $0x43] ss:$8 sm:$0xf0]  }
   0x3   :  { %v250_v2 = vsel %vm228_vm0, %v675_v1, %v674_v0  ;;  %v669_v3 = vld [vmem:[%s1512_s0 + $0x1] ss:$8 sm:$0xf]   ;;  %v692_v26 = vld [vmem:[%s1512_s0 + $0x3] ss:$8 sm:$0xf]   ;;  %v327_v28 = vsel %vm228_vm0, %v696_v25, %v695_v24 }
   0x4   :  { %v670_v4 = vld [vmem:[%s1512_s0 + $0x1] ss:$8 sm:$0xf0]   ;;  %251 = vrot.lane.b32.xlu1 %v250_v2, %s765_s14  ;;  %v693_v27 = vld [vmem:[%s1512_s0 + $0x3] ss:$8 sm:$0xf0]  }
   0x5   :  { %v229_v5 = vsel %vm228_vm0, %v670_v4, %v669_v3  ;;  %v677_v6 = vld [vmem:[%s1512_s0 + $0xc1] ss:$8 sm:$0xf]   ;;  %v316_v29 = vsel %vm228_vm0, %v693_v27, %v692_v26  ;;  %v701_v30 = vld [vmem:[%s1512_s0 + $0xc3] ss:$8 sm:$0xf]  }
   0x6   :  { %v678_v7 = vld [vmem:[%s1512_s0 + $0xc1] ss:$8 sm:$0xf0]   ;;  %230 = vrot.lane.b32.xlu0 %v229_v5, %s765_s14  ;;  %v702_v31 = vld [vmem:[%s1512_s0 + $0xc3] ss:$8 sm:$0xf0]  }
   0x7   :  { %v261_v8 = vsel %vm228_vm0, %v678_v7, %v677_v6  ;;  %v671_v9 = vld [vmem:[%s1512_s0 + $0x41] ss:$8 sm:$0xf]   ;;  %v698_v32 = vld [vmem:[%s1512_s0 + $0x83] ss:$8 sm:$0xf]   ;;  %v349_v34 = vsel %vm228_vm0, %v702_v31, %v701_v30 }
   0x8   :  { %v672_v10 = vld [vmem:[%s1512_s0 + $0x41] ss:$8 sm:$0xf0]   ;;  %262 = vrot.lane.b32.xlu1 %v261_v8, %s765_s14  ;;  %v699_v33 = vld [vmem:[%s1512_s0 + $0x83] ss:$8 sm:$0xf0]  }
   0x9   :  { %v239_v11 = vsel %vm228_vm0, %v672_v10, %v671_v9  ;;  %v683_v12 = vld [vmem:[%s1512_s0 + $0x141] ss:$8 sm:$0xf]   ;;  %v338_v35 = vsel %vm228_vm0, %v699_v33, %v698_v32  ;;  %v707_v36 = vld [vmem:[%s1512_s0 + $0x143] ss:$8 sm:$0xf]  }
   0xa   :  { %v684_v13 = vld [vmem:[%s1512_s0 + $0x141] ss:$8 sm:$0xf0]   ;;  %240 = vrot.lane.b32.xlu0 %v239_v11, %s765_s14  ;;  %v708_v37 = vld [vmem:[%s1512_s0 + $0x143] ss:$8 sm:$0xf0]  }
   0xb   :  { %v680_v14 = vld [vmem:[%s1512_s0 + $0x101] ss:$8 sm:$0xf]   ;;  %v283_v16 = vsel %vm228_vm0, %v684_v13, %v683_v12  ;;  %v704_v38 = vld [vmem:[%s1512_s0 + $0x103] ss:$8 sm:$0xf]   ;;  %v371_v40 = vsel %vm228_vm0, %v708_v37, %v707_v36 }
   0xc   :  { %v681_v15 = vld [vmem:[%s1512_s0 + $0x101] ss:$8 sm:$0xf0]   ;;  %284 = vrot.lane.b32.xlu1 %v283_v16, %s765_s14  ;;  %v705_v39 = vld [vmem:[%s1512_s0 + $0x103] ss:$8 sm:$0xf0]  }
   0xd   :  { %v272_v17 = vsel %vm228_vm0, %v681_v15, %v680_v14  ;;  %v689_v18 = vld [vmem:[%s1512_s0 + $0x1c1] ss:$8 sm:$0xf]   ;;  %v360_v41 = vsel %vm228_vm0, %v705_v39, %v704_v38  ;;  %v713_v42 = vld [vmem:[%s1512_s0 + $0x1c3] ss:$8 sm:$0xf]  }
   0xe   :  { %v690_v19 = vld [vmem:[%s1512_s0 + $0x1c1] ss:$8 sm:$0xf0]   ;;  %273 = vrot.lane.b32.xlu0 %v272_v17, %s765_s14  ;;  %v714_v43 = vld [vmem:[%s1512_s0 + $0x1c3] ss:$8 sm:$0xf0]  }
   0xf   :  { %v686_v20 = vld [vmem:[%s1512_s0 + $0x181] ss:$8 sm:$0xf]   ;;  %v305_v22 = vsel %vm228_vm0, %v690_v19, %v689_v18  ;;  %v710_v44 = vld [vmem:[%s1512_s0 + $0x183] ss:$8 sm:$0xf]   ;;  %v393_v46 = vsel %vm228_vm0, %v714_v43, %v713_v42 }
  0x10   :  { %v687_v21 = vld [vmem:[%s1512_s0 + $0x181] ss:$8 sm:$0xf0]   ;;  %306 = vrot.lane.b32.xlu1 %v305_v22, %s765_s14  ;;  %v711_v45 = vld [vmem:[%s1512_s0 + $0x183] ss:$8 sm:$0xf0]  }
  0x11   :  { %v294_v23 = vsel %vm228_vm0, %v687_v21, %v686_v20  ;;  %v382_v47 = vsel %vm228_vm0, %v711_v45, %v710_v44  ;;  %v719_v48 = vld [vmem:[%s1512_s0 + $0x45] ss:$8 sm:$0xf]   ;;  %v597_v58 = vld [vmem:[%s1512_s0 + $0x80] ss:$2 sm:$0xff]  }
  0x12   :  { %295 = vrot.lane.b32.xlu0 %v294_v23, %s765_s14  ;;  %v720_v49 = vld [vmem:[%s1512_s0 + $0x45] ss:$8 sm:$0xf0]   ;;  %v600_v59 = vld [vmem:[%s1512_s0 + $0x90] ss:$2 sm:$0xff]  }
  0x13   :  { %v716_v50 = vld [vmem:[%s1512_s0 + $0x5] ss:$8 sm:$0xf]   ;;  %v415_v54 = vsel %vm228_vm0, %v720_v49, %v719_v48  ;;  %v603_v60 = vld [vmem:[%s1512_s0 + $0xa0] ss:$2 sm:$0xff]  }
  0x14   :  { %328 = vrot.lane.b32.xlu1 %v327_v28, %s765_s14  ;;  %v717_v51 = vld [vmem:[%s1512_s0 + $0x5] ss:$8 sm:$0xf0]   ;;  %598 = vst.msk [vmem:[%s1513_s1 + $0x40] ss:$8 sm:$0xf] %vm3_vm1, %v597_v58  }
  0x15   :  { %v725_v52 = vld [vmem:[%s1512_s0 + $0xc5] ss:$8 sm:$0xf]   ;;  %v404_v57 = vsel %vm228_vm0, %v717_v51, %v716_v50  ;;  %599 = vst.msk [vmem:[%s1513_s1 + $0x21] ss:$8 sm:$0xf0] %vm3_vm1, %v597_v58  }
  0x16   :  { %317 = vrot.lane.b32.xlu0 %v316_v29, %s765_s14  ;;  %v726_v53 = vld [vmem:[%s1512_s0 + $0xc5] ss:$8 sm:$0xf0]   ;;  %601 = vst.msk [vmem:[%s1513_s1 + $0x42] ss:$8 sm:$0xf] %vm3_vm1, %v600_v59  }
  0x17   :  { %v722_v55 = vld [vmem:[%s1512_s0 + $0x85] ss:$8 sm:$0xf]   ;;  %602 = vst.msk [vmem:[%s1513_s1 + $0x23] ss:$8 sm:$0xf0] %vm3_vm1, %v600_v59   ;;  %v437_v5 = vsel %vm228_vm0, %v726_v53, %v725_v52 }
  0x18   :  { %350 = vrot.lane.b32.xlu1 %v349_v34, %s765_s14  ;;  %v723_v56 = vld [vmem:[%s1512_s0 + $0x85] ss:$8 sm:$0xf0]   ;;  %604 = vst.msk [vmem:[%s1513_s1 + $0x44] ss:$8 sm:$0xf] %vm3_vm1, %v603_v60  }
  0x19   :  { %605 = vst.msk [vmem:[%s1513_s1 + $0x25] ss:$8 sm:$0xf0] %vm3_vm1, %v603_v60   ;;  %v606_v61 = vld [vmem:[%s1512_s0 + $0xb0] ss:$2 sm:$0xff]   ;;  %v426_v11 = vsel %vm228_vm0, %v723_v56, %v722_v55 }
  0x1a   :  { %339 = vrot.lane.b32.xlu0 %v338_v35, %s765_s14  ;;  %v2_v62 = vld [vmem:[%s1512_s0] ss:$2 sm:$0xff]   ;;  %v576_v63 = vld [vmem:[%s1512_s0 + $0x10] ss:$2 sm:$0xff]  }
  0x1b   :  { %v731_v0 = vld [vmem:[%s1512_s0 + $0x145] ss:$8 sm:$0xf]   ;;  %607 = vst.msk [vmem:[%s1513_s1 + $0x46] ss:$8 sm:$0xf] %vm3_vm1, %v606_v61  }
  0x1c   :  { %372 = vrot.lane.b32.xlu1 %v371_v40, %s765_s14  ;;  %v732_v1 = vld [vmem:[%s1512_s0 + $0x145] ss:$8 sm:$0xf0]   ;;  %608 = vst.msk [vmem:[%s1513_s1 + $0x27] ss:$8 sm:$0xf0] %vm3_vm1, %v606_v61  }
  0x1d   :  { %4 = vst.msk [vmem:[%s1513_s1] ss:$8 sm:$0xf] %vm3_vm1, %v2_v62   ;;  %575 = vst.msk [vmem:[%s1513_s1 - $0x1f] ss:$8 sm:$0xf0] %vm3_vm1, %v2_v62   ;;  %v459_v23 = vsel %vm228_vm0, %v732_v1, %v731_v0 }
  0x1e   :  { %361 = vrot.lane.b32.xlu0 %v360_v41, %s765_s14  ;;  %577 = vst.msk [vmem:[%s1513_s1 + $0x2] ss:$8 sm:$0xf] %vm3_vm1, %v576_v63   ;;  %578 = vst.msk [vmem:[%s1513_s1 - $0x1d] ss:$8 sm:$0xf0] %vm3_vm1, %v576_v63  }
  0x1f   :  { %v579_v2 = vld [vmem:[%s1512_s0 + $0x20] ss:$2 sm:$0xff]   ;;  %v582_v3 = vld [vmem:[%s1512_s0 + $0x30] ss:$2 sm:$0xff]  }
  0x20   :  { %394 = vrot.lane.b32.xlu1 %v393_v46, %s765_s14  ;;  %v609_v4 = vld [vmem:[%s1512_s0 + $0xc0] ss:$2 sm:$0xff]   ;;  %v728_v6 = vld [vmem:[%s1512_s0 + $0x105] ss:$8 sm:$0xf]  }
  0x21   :  { %v729_v7 = vld [vmem:[%s1512_s0 + $0x105] ss:$8 sm:$0xf0]   ;;  %580 = vst.msk [vmem:[%s1513_s1 + $0x4] ss:$8 sm:$0xf] %vm3_vm1, %v579_v2  }
  0x22   :  { %383 = vrot.lane.b32.xlu0 %v382_v47, %s765_s14  ;;  %581 = vst.msk [vmem:[%s1513_s1 - $0x1b] ss:$8 sm:$0xf0] %vm3_vm1, %v579_v2   ;;  %583 = vst.msk [vmem:[%s1513_s1 + $0x6] ss:$8 sm:$0xf] %vm3_vm1, %v582_v3   ;;  %v448_v29 = vsel %vm228_vm0, %v729_v7, %v728_v6 }
  0x23   :  { %584 = vst.msk [vmem:[%s1513_s1 - $0x19] ss:$8 sm:$0xf0] %vm3_vm1, %v582_v3   ;;  %610 = vst.msk [vmem:[%s1513_s1 + $0x60] ss:$8 sm:$0xf] %vm3_vm1, %v609_v4  }
  0x24   :  { %416 = vrot.lane.b32.xlu1 %v415_v54, %s765_s14  ;;  %611 = vst.msk [vmem:[%s1513_s1 + $0x41] ss:$8 sm:$0xf0] %vm3_vm1, %v609_v4   ;;  %v612_v8 = vld [vmem:[%s1512_s0 + $0xd0] ss:$2 sm:$0xff]  }
  0x25   :  { %v615_v9 = vld [vmem:[%s1512_s0 + $0xe0] ss:$2 sm:$0xff]   ;;  %v618_v10 = vld [vmem:[%s1512_s0 + $0xf0] ss:$2 sm:$0xff]  }
  0x26   :  { %405 = vrot.lane.b32.xlu0 %v404_v57, %s765_s14  ;;  %613 = vst.msk [vmem:[%s1513_s1 + $0x62] ss:$8 sm:$0xf] %vm3_vm1, %v612_v8   ;;  %614 = vst.msk [vmem:[%s1513_s1 + $0x43] ss:$8 sm:$0xf0] %vm3_vm1, %v612_v8  }
  0x27   :  { %616 = vst.msk [vmem:[%s1513_s1 + $0x64] ss:$8 sm:$0xf] %vm3_vm1, %v615_v9   ;;  %617 = vst.msk [vmem:[%s1513_s1 + $0x45] ss:$8 sm:$0xf0] %vm3_vm1, %v615_v9  }
  0x28   :  { %619 = vst.msk [vmem:[%s1513_s1 + $0x66] ss:$8 sm:$0xf] %vm3_vm1, %v618_v10   ;;  %620 = vst.msk [vmem:[%s1513_s1 + $0x47] ss:$8 sm:$0xf0] %vm3_vm1, %v618_v10   ;;  %438 = vrot.lane.b32.xlu1 %v437_v5, %s765_s14 }
  0x29   :  { %v585_v12 = vld [vmem:[%s1512_s0 + $0x40] ss:$2 sm:$0xff]   ;;  %v588_v13 = vld [vmem:[%s1512_s0 + $0x50] ss:$2 sm:$0xff]  }
  0x2a   :  { %v591_v14 = vld [vmem:[%s1512_s0 + $0x60] ss:$2 sm:$0xff]   ;;  %586 = vst.msk [vmem:[%s1513_s1 + $0x20] ss:$8 sm:$0xf] %vm3_vm1, %v585_v12   ;;  %427 = vrot.lane.b32.xlu0 %v426_v11, %s765_s14 }
  0x2b   :  { %587 = vst.msk [vmem:[%s1513_s1 + $0x1] ss:$8 sm:$0xf0] %vm3_vm1, %v585_v12   ;;  %589 = vst.msk [vmem:[%s1513_s1 + $0x22] ss:$8 sm:$0xf] %vm3_vm1, %v588_v13  }
  0x2c   :  { %590 = vst.msk [vmem:[%s1513_s1 + $0x3] ss:$8 sm:$0xf0] %vm3_vm1, %v588_v13   ;;  %592 = vst.msk [vmem:[%s1513_s1 + $0x24] ss:$8 sm:$0xf] %vm3_vm1, %v591_v14   ;;  %460 = vrot.lane.b32.xlu1 %v459_v23, %s765_s14 }
  0x2d   :  { %593 = vst.msk [vmem:[%s1513_s1 + $0x5] ss:$8 sm:$0xf0] %vm3_vm1, %v591_v14   ;;  %v594_v15 = vld [vmem:[%s1512_s0 + $0x70] ss:$2 sm:$0xff]  }
  0x2e   :  { %v633_v16 = vld [vmem:[%s1512_s0 + $0x140] ss:$2 sm:$0xff]   ;;  %v636_v17 = vld [vmem:[%s1512_s0 + $0x150] ss:$2 sm:$0xff]   ;;  %449 = vrot.lane.b32.xlu0 %v448_v29, %s765_s14 }
  0x2f   :  { %v737_v18 = vld [vmem:[%s1512_s0 + $0x1c5] ss:$8 sm:$0xf]   ;;  %595 = vst.msk [vmem:[%s1513_s1 + $0x26] ss:$8 sm:$0xf] %vm3_vm1, %v594_v15  }
  0x30   :  { %v738_v19 = vld [vmem:[%s1512_s0 + $0x1c5] ss:$8 sm:$0xf0]   ;;  %596 = vst.msk [vmem:[%s1513_s1 + $0x7] ss:$8 sm:$0xf0] %vm3_vm1, %v594_v15  }
  0x31   :  { %634 = vst.msk [vmem:[%s1513_s1 + $0xa0] ss:$8 sm:$0xf] %vm3_vm1, %v633_v16   ;;  %635 = vst.msk [vmem:[%s1513_s1 + $0x81] ss:$8 sm:$0xf0] %vm3_vm1, %v633_v16   ;;  %v481_v38 = vsel %vm228_vm0, %v738_v19, %v737_v18 }
  0x32   :  { %637 = vst.msk [vmem:[%s1513_s1 + $0xa2] ss:$8 sm:$0xf] %vm3_vm1, %v636_v17   ;;  %638 = vst.msk [vmem:[%s1513_s1 + $0x83] ss:$8 sm:$0xf0] %vm3_vm1, %v636_v17   ;;  %482 = vrot.lane.b32.xlu1 %v481_v38, %s765_s14 }
  0x33   :  { %v639_v20 = vld [vmem:[%s1512_s0 + $0x160] ss:$2 sm:$0xff]   ;;  %v642_v21 = vld [vmem:[%s1512_s0 + $0x170] ss:$2 sm:$0xff]  }
  0x34   :  { %v621_v22 = vld [vmem:[%s1512_s0 + $0x100] ss:$2 sm:$0xff]   ;;  %v734_v24 = vld [vmem:[%s1512_s0 + $0x185] ss:$8 sm:$0xf]  }
  0x35   :  { %v735_v25 = vld [vmem:[%s1512_s0 + $0x185] ss:$8 sm:$0xf0]   ;;  %640 = vst.msk [vmem:[%s1513_s1 + $0xa4] ss:$8 sm:$0xf] %vm3_vm1, %v639_v20  }
  0x36   :  { %641 = vst.msk [vmem:[%s1513_s1 + $0x85] ss:$8 sm:$0xf0] %vm3_vm1, %v639_v20   ;;  %643 = vst.msk [vmem:[%s1513_s1 + $0xa6] ss:$8 sm:$0xf] %vm3_vm1, %v642_v21   ;;  %v470_v39 = vsel %vm228_vm0, %v735_v25, %v734_v24 }
  0x37   :  { %644 = vst.msk [vmem:[%s1513_s1 + $0x87] ss:$8 sm:$0xf0] %vm3_vm1, %v642_v21   ;;  %622 = vst.msk [vmem:[%s1513_s1 + $0x80] ss:$8 sm:$0xf] %vm3_vm1, %v621_v22   ;;  %471 = vrot.lane.b32.xlu0 %v470_v39, %s765_s14 }
  0x38   :  { %623 = vst.msk [vmem:[%s1513_s1 + $0x61] ss:$8 sm:$0xf0] %vm3_vm1, %v621_v22   ;;  %v624_v26 = vld [vmem:[%s1512_s0 + $0x110] ss:$2 sm:$0xff]  }
  0x39   :  { %v627_v27 = vld [vmem:[%s1512_s0 + $0x120] ss:$2 sm:$0xff]   ;;  %v630_v28 = vld [vmem:[%s1512_s0 + $0x130] ss:$2 sm:$0xff]  }
  0x3a   :  { %625 = vst.msk [vmem:[%s1513_s1 + $0x82] ss:$8 sm:$0xf] %vm3_vm1, %v624_v26   ;;  %626 = vst.msk [vmem:[%s1513_s1 + $0x63] ss:$8 sm:$0xf0] %vm3_vm1, %v624_v26  }
  0x3b   :  { %628 = vst.msk [vmem:[%s1513_s1 + $0x84] ss:$8 sm:$0xf] %vm3_vm1, %v627_v27   ;;  %629 = vst.msk [vmem:[%s1513_s1 + $0x65] ss:$8 sm:$0xf0] %vm3_vm1, %v627_v27  }
  0x3c   :  { %631 = vst.msk [vmem:[%s1513_s1 + $0x86] ss:$8 sm:$0xf] %vm3_vm1, %v630_v28   ;;  %632 = vst.msk [vmem:[%s1513_s1 + $0x67] ss:$8 sm:$0xf0] %vm3_vm1, %v630_v28  }
  0x3d   :  { %v657_v30 = vld [vmem:[%s1512_s0 + $0x1c0] ss:$2 sm:$0xff]   ;;  %v660_v31 = vld [vmem:[%s1512_s0 + $0x1d0] ss:$2 sm:$0xff]  }
  0x3e   :  { %v663_v32 = vld [vmem:[%s1512_s0 + $0x1e0] ss:$2 sm:$0xff]   ;;  %658 = vst.msk [vmem:[%s1513_s1 + $0xe0] ss:$8 sm:$0xf] %vm3_vm1, %v657_v30  }
  0x3f   :  { %659 = vst.msk [vmem:[%s1513_s1 + $0xc1] ss:$8 sm:$0xf0] %vm3_vm1, %v657_v30   ;;  %661 = vst.msk [vmem:[%s1513_s1 + $0xe2] ss:$8 sm:$0xf] %vm3_vm1, %v660_v31  }
  0x40   :  { %662 = vst.msk [vmem:[%s1513_s1 + $0xc3] ss:$8 sm:$0xf0] %vm3_vm1, %v660_v31   ;;  %664 = vst.msk [vmem:[%s1513_s1 + $0xe4] ss:$8 sm:$0xf] %vm3_vm1, %v663_v32  }
  0x41   :  { %665 = vst.msk [vmem:[%s1513_s1 + $0xc5] ss:$8 sm:$0xf0] %vm3_vm1, %v663_v32   ;;  %v666_v33 = vld [vmem:[%s1512_s0 + $0x1f0] ss:$2 sm:$0xff]  }
  0x42   :  { %v645_v34 = vld [vmem:[%s1512_s0 + $0x180] ss:$2 sm:$0xff]   ;;  %v648_v35 = vld [vmem:[%s1512_s0 + $0x190] ss:$2 sm:$0xff]  }
  0x43   :  { %667 = vst.msk [vmem:[%s1513_s1 + $0xe6] ss:$8 sm:$0xf] %vm3_vm1, %v666_v33   ;;  %668 = vst.msk [vmem:[%s1513_s1 + $0xc7] ss:$8 sm:$0xf0] %vm3_vm1, %v666_v33  }
  0x44   :  { %646 = vst.msk [vmem:[%s1513_s1 + $0xc0] ss:$8 sm:$0xf] %vm3_vm1, %v645_v34   ;;  %647 = vst.msk [vmem:[%s1513_s1 + $0xa1] ss:$8 sm:$0xf0] %vm3_vm1, %v645_v34  }
  0x45   :  { %649 = vst.msk [vmem:[%s1513_s1 + $0xc2] ss:$8 sm:$0xf] %vm3_vm1, %v648_v35   ;;  %650 = vst.msk [vmem:[%s1513_s1 + $0xa3] ss:$8 sm:$0xf0] %vm3_vm1, %v648_v35  }
  0x46   :  { %v651_v36 = vld [vmem:[%s1512_s0 + $0x1a0] ss:$2 sm:$0xff]   ;;  %v654_v37 = vld [vmem:[%s1512_s0 + $0x1b0] ss:$2 sm:$0xff]  }
  0x47   :  { %652 = vst.msk [vmem:[%s1513_s1 + $0xc4] ss:$8 sm:$0xf] %vm3_vm1, %v651_v36   ;;  %653 = vst.msk [vmem:[%s1513_s1 + $0xa5] ss:$8 sm:$0xf0] %vm3_vm1, %v651_v36  }
  0x48   :  { %655 = vst.msk [vmem:[%s1513_s1 + $0xc6] ss:$8 sm:$0xf] %vm3_vm1, %v654_v37   ;;  %656 = vst.msk [vmem:[%s1513_s1 + $0xa7] ss:$8 sm:$0xf0] %vm3_vm1, %v654_v37  }
  0x49   :  { %v743_v40 = vld [vmem:[%s1512_s0 + $0x47] ss:$8 sm:$0xf]  }
  0x4a   :  { %v744_v41 = vld [vmem:[%s1512_s0 + $0x47] ss:$8 sm:$0xf0]  }
  0x4b   :  { %v740_v42 = vld [vmem:[%s1512_s0 + $0x7] ss:$8 sm:$0xf]   ;;  %v503_v44 = vsel %vm228_vm0, %v744_v41, %v743_v40 }
  0x4c   :  { %v741_v43 = vld [vmem:[%s1512_s0 + $0x7] ss:$8 sm:$0xf0]   ;;  %504 = vrot.lane.b32.xlu1 %v503_v44, %s765_s14 }
  0x4d   :  { %v492_v45 = vsel %vm228_vm0, %v741_v43, %v740_v42  ;;  %v749_v46 = vld [vmem:[%s1512_s0 + $0xc7] ss:$8 sm:$0xf]  }
  0x4e   :  { %v750_v47 = vld [vmem:[%s1512_s0 + $0xc7] ss:$8 sm:$0xf0]   ;;  %493 = vrot.lane.b32.xlu0 %v492_v45, %s765_s14 }
  0x4f   :  { %v746_v48 = vld [vmem:[%s1512_s0 + $0x87] ss:$8 sm:$0xf]   ;;  %v525_v50 = vsel %vm228_vm0, %v750_v47, %v749_v46 }
  0x50   :  { %v747_v49 = vld [vmem:[%s1512_s0 + $0x87] ss:$8 sm:$0xf0]   ;;  %526 = vrot.lane.b32.xlu1 %v525_v50, %s765_s14 }
  0x51   :  { %v514_v51 = vsel %vm228_vm0, %v747_v49, %v746_v48  ;;  %v755_v52 = vld [vmem:[%s1512_s0 + $0x147] ss:$8 sm:$0xf]  }
  0x52   :  { %v756_v53 = vld [vmem:[%s1512_s0 + $0x147] ss:$8 sm:$0xf0]   ;;  %515 = vrot.lane.b32.xlu0 %v514_v51, %s765_s14 }
  0x53   :  { %v752_v54 = vld [vmem:[%s1512_s0 + $0x107] ss:$8 sm:$0xf]   ;;  %v547_v56 = vsel %vm228_vm0, %v756_v53, %v755_v52 }
  0x54   :  { %v753_v55 = vld [vmem:[%s1512_s0 + $0x107] ss:$8 sm:$0xf0]   ;;  %548 = vrot.lane.b32.xlu1 %v547_v56, %s765_s14 }
  0x55   :  { %v536_v57 = vsel %vm228_vm0, %v753_v55, %v752_v54  ;;  %v761_v58 = vld [vmem:[%s1512_s0 + $0x1c7] ss:$8 sm:$0xf]  }
  0x56   :  { %v762_v59 = vld [vmem:[%s1512_s0 + $0x1c7] ss:$8 sm:$0xf0]   ;;  %537 = vrot.lane.b32.xlu0 %v536_v57, %s765_s14 }
  0x57   :  { %v758_v60 = vld [vmem:[%s1512_s0 + $0x187] ss:$8 sm:$0xf]   ;;  %v569_v62 = vsel %vm228_vm0, %v762_v59, %v761_v58 }
  0x58   :  { %v759_v61 = vld [vmem:[%s1512_s0 + $0x187] ss:$8 sm:$0xf0]   ;;  %570 = vrot.lane.b32.xlu1 %v569_v62, %s765_s14 }
  0x59   :  { %v558_v63 = vsel %vm228_vm0, %v759_v61, %v758_v60 }
  0x5a   :  { %559 = vrot.lane.b32.xlu0 %v558_v63, %s765_s14 }
  0x76   :  { %v252_v0 = vpop.permute.xlu1 %251  }
  0x77   :  { %676 = vst.msk [vmem:[%s1513_s1 + $0x40] sm:$0xff] %vm232_vm2, %v252_v0  }
  0x78   :  { %v231_v1 = vpop.permute.xlu0 %230  }
  0x79   :  { %233 = vst.msk [vmem:[%s1513_s1] sm:$0xff] %vm232_vm2, %v231_v1  }
  0x7a   :  { %v263_v2 = vpop.permute.xlu1 %262  }
  0x7b   :  { %679 = vst.msk [vmem:[%s1513_s1 + $0x60] sm:$0xff] %vm232_vm2, %v263_v2  }
  0x7c   :  { %v241_v3 = vpop.permute.xlu0 %240  }
  0x7d   :  { %673 = vst.msk [vmem:[%s1513_s1 + $0x20] sm:$0xff] %vm232_vm2, %v241_v3  }
  0x7e   :  { %v285_v4 = vpop.permute.xlu1 %284  }
  0x7f   :  { %685 = vst.msk [vmem:[%s1513_s1 + $0xa0] sm:$0xff] %vm232_vm2, %v285_v4  }
  0x80   :  { %v274_v5 = vpop.permute.xlu0 %273  }
  0x81   :  { %682 = vst.msk [vmem:[%s1513_s1 + $0x80] sm:$0xff] %vm232_vm2, %v274_v5  }
  0x82   :  { %v307_v6 = vpop.permute.xlu1 %306  }
  0x83   :  { %691 = vst.msk [vmem:[%s1513_s1 + $0xe0] sm:$0xff] %vm232_vm2, %v307_v6  }
  0x84   :  { %v296_v7 = vpop.permute.xlu0 %295  }
  0x85   :  { %688 = vst.msk [vmem:[%s1513_s1 + $0xc0] sm:$0xff] %vm232_vm2, %v296_v7  }
  0x86   :  { %v329_v8 = vpop.permute.xlu1 %328  }
  0x87   :  { %697 = vst.msk [vmem:[%s1513_s1 + $0x28] sm:$0xff] %vm232_vm2, %v329_v8  }
  0x88   :  { %v318_v9 = vpop.permute.xlu0 %317  }
  0x89   :  { %694 = vst.msk [vmem:[%s1513_s1 + $0x8] sm:$0xff] %vm232_vm2, %v318_v9  }
  0x8a   :  { %v351_v10 = vpop.permute.xlu1 %350  }
  0x8b   :  { %703 = vst.msk [vmem:[%s1513_s1 + $0x68] sm:$0xff] %vm232_vm2, %v351_v10  }
  0x8c   :  { %v340_v11 = vpop.permute.xlu0 %339  }
  0x8d   :  { %700 = vst.msk [vmem:[%s1513_s1 + $0x48] sm:$0xff] %vm232_vm2, %v340_v11  }
  0x8e   :  { %v373_v12 = vpop.permute.xlu1 %372  }
  0x8f   :  { %709 = vst.msk [vmem:[%s1513_s1 + $0xa8] sm:$0xff] %vm232_vm2, %v373_v12  }
  0x90   :  { %v362_v13 = vpop.permute.xlu0 %361  }
  0x91   :  { %706 = vst.msk [vmem:[%s1513_s1 + $0x88] sm:$0xff] %vm232_vm2, %v362_v13  }
  0x92   :  { %v395_v14 = vpop.permute.xlu1 %394  }
  0x93   :  { %715 = vst.msk [vmem:[%s1513_s1 + $0xe8] sm:$0xff] %vm232_vm2, %v395_v14  }
  0x94   :  { %v384_v15 = vpop.permute.xlu0 %383  }
  0x95   :  { %712 = vst.msk [vmem:[%s1513_s1 + $0xc8] sm:$0xff] %vm232_vm2, %v384_v15  }
  0x96   :  { %v417_v16 = vpop.permute.xlu1 %416  }
  0x97   :  { %721 = vst.msk [vmem:[%s1513_s1 + $0x30] sm:$0xff] %vm232_vm2, %v417_v16  }
  0x98   :  { %v406_v17 = vpop.permute.xlu0 %405  }
  0x99   :  { %718 = vst.msk [vmem:[%s1513_s1 + $0x10] sm:$0xff] %vm232_vm2, %v406_v17  }
  0x9a   :  { %v439_v18 = vpop.permute.xlu1 %438  }
  0x9b   :  { %727 = vst.msk [vmem:[%s1513_s1 + $0x70] sm:$0xff] %vm232_vm2, %v439_v18  }
  0x9c   :  { %v428_v19 = vpop.permute.xlu0 %427  }
  0x9d   :  { %724 = vst.msk [vmem:[%s1513_s1 + $0x50] sm:$0xff] %vm232_vm2, %v428_v19  }
  0x9e   :  { %v461_v20 = vpop.permute.xlu1 %460  }
  0x9f   :  { %733 = vst.msk [vmem:[%s1513_s1 + $0xb0] sm:$0xff] %vm232_vm2, %v461_v20  }
  0xa0   :  { %v450_v21 = vpop.permute.xlu0 %449  }
  0xa1   :  { %730 = vst.msk [vmem:[%s1513_s1 + $0x90] sm:$0xff] %vm232_vm2, %v450_v21  }
  0xa4   :  { %v483_v22 = vpop.permute.xlu1 %482  }
  0xa5   :  { %739 = vst.msk [vmem:[%s1513_s1 + $0xf0] sm:$0xff] %vm232_vm2, %v483_v22  }
  0xa9   :  { %v472_v23 = vpop.permute.xlu0 %471  }
  0xaa   :  { %736 = vst.msk [vmem:[%s1513_s1 + $0xd0] sm:$0xff] %vm232_vm2, %v472_v23  }
  0xbe   :  { %v505_v24 = vpop.permute.xlu1 %504  }
  0xbf   :  { %745 = vst.msk [vmem:[%s1513_s1 + $0x38] sm:$0xff] %vm232_vm2, %v505_v24  }
  0xc0   :  { %v494_v25 = vpop.permute.xlu0 %493  }
  0xc1   :  { %742 = vst.msk [vmem:[%s1513_s1 + $0x18] sm:$0xff] %vm232_vm2, %v494_v25  }
  0xc2   :  { %v527_v26 = vpop.permute.xlu1 %526  }
  0xc3   :  { %751 = vst.msk [vmem:[%s1513_s1 + $0x78] sm:$0xff] %vm232_vm2, %v527_v26  }
  0xc4   :  { %v516_v27 = vpop.permute.xlu0 %515  }
  0xc5   :  { %748 = vst.msk [vmem:[%s1513_s1 + $0x58] sm:$0xff] %vm232_vm2, %v516_v27  }
  0xc6   :  { %v549_v28 = vpop.permute.xlu1 %548  }
  0xc7   :  { %757 = vst.msk [vmem:[%s1513_s1 + $0xb8] sm:$0xff] %vm232_vm2, %v549_v28  }
  0xc8   :  { %v538_v29 = vpop.permute.xlu0 %537  }
  0xc9   :  { %754 = vst.msk [vmem:[%s1513_s1 + $0x98] sm:$0xff] %vm232_vm2, %v538_v29  }
  0xca   :  { %v571_v30 = vpop.permute.xlu1 %570  }
  0xcb   :  { %763 = vst.msk [vmem:[%s1513_s1 + $0xf8] sm:$0xff] %vm232_vm2, %v571_v30  }
  0xcc   :  { %v560_v31 = vpop.permute.xlu0 %559  }
  0xcd   :  { %760 = vst.msk [vmem:[%s1513_s1 + $0xd8] sm:$0xff] %vm232_vm2, %v560_v31  }

// kernel: geoman2_forward.3
= control target key start
LH: loop header
LB: loop body
LE: loop exit
PB: predicated region body
PF: predicated region fallthrough
CT: control target
= control target key end

     0   :  { %s2211_s30 = smov 0   ;;  %s3146_s0 = inlined_call_operand.vmem [shape: f32[5,4,68], index: 0, kind: input, shape index: {}]   ;;  %s3147_s1 = inlined_call_operand.vmem [shape: f32[1,68], index: 1, kind: input, shape index: {}]   ;;  %s3148_s2 = inlined_call_operand.vmem [shape: f32[2,192], index: 2, kind: input, shape index: {}]   ;;  %s3149_s3 = inlined_call_operand.vmem [shape: f32[64,512], index: 3, kind: input, shape index: {}]   ;;  %s3150_s4 = inlined_call_operand.vmem [shape: f32[1,512], index: 4, kind: input, shape index: {}]   ;;  %s3151_s5 = inlined_call_operand.vmem [shape: f32[4,8,4096], index: 5, kind: input, shape index: {}]   ;;  %s3152_s6 = inlined_call_operand.vmem [shape: f32[4,8,2], index: 6, kind: input, shape index: {}]   ;;  %s3153_s7 = inlined_call_operand.vmem [shape: f32[64,2], index: 7, kind: input, shape index: {}]   ;;  %s3154_s8 = inlined_call_operand.vmem [shape: f32[1,2], index: 8, kind: input, shape index: {}]   ;;  %s3155_s9 = inlined_call_operand.vmem [shape: f32[5,4,2], index: 9, kind: output, shape index: {}]  }
   0x1 LB: > { %s1765_s10 = sadd.s32 4294967295, %s2153_s30   ;;  %p1769_p0 = scmp.ge.s32.totalorder %s2153_s30, 1  ;;  %s2153_s30 = sphi %s2211_s30, %s19_s30  }
   0x2   : > { %p286_p1 = scmp.lt.s32.totalorder %s2153_s30, 6 }
   0x4   : > { %p287_p2 = pnand %p1769_p0, %p286_p1 }
   0x5   : > { %p320_p3 = scmp.lt.s32.totalorder (!%p287_p2), %s1765_s10, 4  ;;  %v1772_v0 = vld [vmem:[%s3147_s1] ss:$0 sm:$0xff] (!%p287_p2)  ;;  %vm337_vm0 = vcmask (!%p287_p2), 551936   ;;  %v404_v4 = vld [vmem:[%s3149_s3 + $0x8] sm:$0xff] (!%p287_p2)  ;;  %v406_v9 = vld [vmem:[%s3149_s3 + $0x18] sm:$0xff] (!%p287_p2)  ;;  %v343_v52 = vlaneseq (!%p287_p2) }
   0x6   : > { %290 = sbr.rel (%p287_p2) target bundleno = 1428 (0x594), region = 56  ;;  %v408_v5 = vld [vmem:[%s3149_s3 + $0x28] sm:$0xff] (!%p287_p2)  ;;  %v403_v6 = vld [vmem:[%s3149_s3] sm:$0xff] (!%p287_p2)  ;;  %v410_v10 = vld [vmem:[%s3149_s3 + $0x38] sm:$0xff] (!%p287_p2)  ;;  %s2157_s29 = smov (!%p287_p2), 64   ;;  %vm435_vm1 = vcmask (!%p287_p2), 523264  }
   0x7   : > { %v1809_v7 = vpack.c.bf16 (!%p287_p2), %v408_v5, %v404_v4  ;;  %v407_v8 = vld [vmem:[%s3149_s3 + $0x20] sm:$0xff] (!%p287_p2)  ;;  %v1825_v12 = vpack.c.bf16 (!%p287_p2), %v410_v10, %v406_v9  ;;  %v405_v13 = vld [vmem:[%s3149_s3 + $0x10] sm:$0xff] (!%p287_p2)  ;;  %v412_v15 = vld [vmem:[%s3149_s3 + $0x48] sm:$0xff] (!%p287_p2)  ;;  %v2327_v53 = vshrl.u32 (!%p287_p2), %v343_v52, 7  ;;  %vm2158_vm2 = vmmov (!%p287_p2), 0  }
   0x8   : > { %v1811_v11 = vpack.c.bf16 (!%p287_p2), %v407_v8, %v403_v6  ;;  %v409_v14 = vld [vmem:[%s3149_s3 + $0x30] sm:$0xff] (!%p287_p2)  ;;  %v416_v17 = vld [vmem:[%s3149_s3 + $0x68] sm:$0xff] (!%p287_p2)  ;;  %v411_v18 = vld [vmem:[%s3149_s3 + $0x40] sm:$0xff] (!%p287_p2)  ;;  %vm1447_vm3 = vcmask (!%p287_p2), 1041409   ;;  %vm1449_vm4 = vcmask (!%p287_p2), 1042434   ;;  %vm1451_vm5 = vcmask (!%p287_p2), 1043459  }
   0x9   : > { %1810 = vmatprep.subr.bf16.mxu0 (!%p287_p2), %v1809_v7  ;;  %v1827_v16 = vpack.c.bf16 (!%p287_p2), %v409_v14, %v405_v13  ;;  %v415_v19 = vld [vmem:[%s3149_s3 + $0x60] sm:$0xff] (!%p287_p2)  ;;  %1826 = vmatprep.subr.bf16.mxu1 (!%p287_p2), %v1825_v12  ;;  %v1813_v20 = vpack.c.bf16 (!%p287_p2), %v416_v17, %v412_v15  ;;  %v414_v22 = vld [vmem:[%s3149_s3 + $0x58] sm:$0xff] (!%p287_p2)  ;;  %v413_v24 = vld [vmem:[%s3149_s3 + $0x50] sm:$0xff] (!%p287_p2)  ;;  %v2330_v54 = vsub.s32 (!%p287_p2), 0, %v2327_v53  ;;  %v2336_v56 = vsub.s32 (!%p287_p2), 1, %v2327_v53 }
   0xa   : > { %1812 = vmatpush1.bf16.msra.mxu0 (!%p287_p2), %v1811_v11  ;;  %v1815_v21 = vpack.c.bf16 (!%p287_p2), %v415_v19, %v411_v18  ;;  %v418_v23 = vld [vmem:[%s3149_s3 + $0x78] sm:$0xff] (!%p287_p2)  ;;  %v417_v26 = vld [vmem:[%s3149_s3 + $0x70] sm:$0xff] (!%p287_p2)  ;;  %v420_v27 = vld [vmem:[%s3149_s3 + $0x88] sm:$0xff] (!%p287_p2)  ;;  %v2347_v5 = vsub.s32 (!%p287_p2), 3, %v2327_v53  ;;  %vm1454_vm6 = vcmask (!%p287_p2), 60416   ;;  %vm1584_vm7 = vcmask (!%p287_p2), 15360  }
   0xb   : > { %1828 = vmatpush1.bf16.msra.mxu1 (!%p287_p2), %v1827_v16  ;;  %v1829_v25 = vpack.c.bf16 (!%p287_p2), %v418_v23, %v414_v22  ;;  %v424_v28 = vld [vmem:[%s3149_s3 + $0xa8] sm:$0xff] (!%p287_p2)  ;;  %1814 = vmatprep.subr.bf16.mxu0 (!%p287_p2), %v1813_v20  ;;  %v1831_v29 = vpack.c.bf16 (!%p287_p2), %v417_v26, %v413_v24  ;;  %v419_v31 = vld [vmem:[%s3149_s3 + $0x80] sm:$0xff] (!%p287_p2)  ;;  %v422_v33 = vld [vmem:[%s3149_s3 + $0x98] sm:$0xff] (!%p287_p2)  ;;  %vm1710_vm8 = vcmask (!%p287_p2), 11264  }
   0xc   : > { %v1817_v30 = vpack.c.bf16 (!%p287_p2), %v424_v28, %v420_v27  ;;  %v423_v32 = vld [vmem:[%s3149_s3 + $0xa0] sm:$0xff] (!%p287_p2)  ;;  %v426_v34 = vld [vmem:[%s3149_s3 + $0xb8] sm:$0xff] (!%p287_p2)  ;;  %v421_v35 = vld [vmem:[%s3149_s3 + $0x90] sm:$0xff] (!%p287_p2) }
   0xd   : > { %s3157_s10 = smov (!%p320_p3, %s1765_s10), 4  ;;  %1830 = vmatprep.subr.bf16.mxu1 %v1829_v25  ;;  %v425_v36 = vld [vmem:[%s3149_s3 + $0xb0] sm:$0xff]  ;;  %v1819_v37 = vpack.c.bf16 %v423_v32, %v419_v31  ;;  %v1833_v38 = vpack.c.bf16 %v426_v34, %v422_v33  ;;  %v428_v39 = vld [vmem:[%s3149_s3 + $0xc8] sm:$0xff]  ;;  %v427_v41 = vld [vmem:[%s3149_s3 + $0xc0] sm:$0xff] }
   0xe   : > { %s1770_s11 = sshll.u32 %s3157_s10, 2  ;;  %1816 = vmatpush1.bf16.msra.mxu0 %v1815_v21  ;;  %v432_v40 = vld [vmem:[%s3149_s3 + $0xe8] sm:$0xff]  ;;  %v1835_v42 = vpack.c.bf16 %v425_v36, %v421_v35  ;;  %v431_v44 = vld [vmem:[%s3149_s3 + $0xe0] sm:$0xff]  ;;  %v430_v45 = vld [vmem:[%s3149_s3 + $0xd8] sm:$0xff]  ;;  %v2159_v35 = vmov 1966171168  }
   0xf   : > { %s323_s16 = scalar_lea.vmem %s3146_s0, %s1770_s11  ;;  %1832 = vmatpush1.bf16.msra.mxu1 %v1831_v29  ;;  %1818 = vmatprep.subr.bf16.mxu0 %v1817_v30  ;;  %v1821_v43 = vpack.c.bf16 %v432_v40, %v428_v39  ;;  %v434_v46 = vld [vmem:[%s3149_s3 + $0xf8] sm:$0xff]  ;;  %v429_v48 = vld [vmem:[%s3149_s3 + $0xd0] sm:$0xff]  ;;  %v1823_v50 = vpack.c.bf16 %v431_v44, %v427_v41  ;;  %v341_v55 = vld [vmem:[%s3148_s2] sm:$0xf]  ;;  %v605_v36 = vunpack.c.l.s4 %v2159_v35  ;;  %s327_s28 = scalar_lea.vmem %s3155_s9, %s1770_s11 }
  0x10   : > { %v328_v1 = vld [vmem:[%s323_s16] sm:$0xf]  ;;  %1834 = vmatprep.subr.bf16.mxu1 %v1833_v38  ;;  %v1837_v47 = vpack.c.bf16 %v434_v46, %v430_v45  ;;  %v433_v49 = vld [vmem:[%s3149_s3 + $0xf0] sm:$0xff]  ;;  %v346_v57 = vrot.slane %v341_v55, %v2330_v54  ;;  %v366_v58 = vrot.slane %v341_v55, %v2336_v56  ;;  %v370_v7 = vrot.slane %v341_v55, %v2347_v5  ;;  %v1614_v17 = vld [vmem:[%s3153_s7 + $0x8] sm:$0xff] }
  0x11   : > { %v336_v2 = vmul.f32 %v1772_v0, %v328_v1  ;;  %v1839_v51 = vpack.c.bf16 %v433_v49, %v429_v48  ;;  %v2155_v0 = vmov 0.0   ;;  %v2156_v1 = vmov 0.0|0.0   ;;  %v1613_v16 = vld [vmem:[%s3153_s7] sm:$0xff]  ;;  %v1615_v23 = vld [vmem:[%s3153_s7 + $0x10] sm:$0xff]  ;;  %v1616_v24 = vld [vmem:[%s3153_s7 + $0x18] sm:$0xff] }
  0x12   : > { %1820 = vmatpush1.bf16.msra.mxu0 %v1819_v37  ;;  %v356_v59 = vrot.slane %v346_v57, %v2330_v54  ;;  %v376_v60 = vrot.slane %v366_v58, %v2336_v56  ;;  %503 = vmatprep.mubr.f32.mxu0 %v2155_v0  ;;  %v380_v9 = vrot.slane %v370_v7, %v2336_v56  ;;  %v1617_v26 = vld [vmem:[%s3153_s7 + $0x20] sm:$0xff]  ;;  %v1618_v27 = vld [vmem:[%s3153_s7 + $0x28] sm:$0xff]  ;;  %v1619_v29 = vld [vmem:[%s3153_s7 + $0x30] sm:$0xff]  ;;  %v606_v37 = vunpack.c.0.s8 %v605_v36 }
  0x13   : > { %v338_v3 = vsel %vm337_vm0, %v336_v2, 0.0  ;;  %1836 = vmatpush1.bf16.msra.mxu1 %v1835_v42  ;;  %1822 = vmatprep.subr.bf16.mxu0 %v1821_v43  ;;  %v1842_v21 = vpack.c.bf16 %v1614_v17, %v1613_v16  ;;  %v1845_v25 = vpack.c.bf16 %v1616_v24, %v1615_v23  ;;  %v1848_v28 = vpack.c.bf16 %v1618_v27, %v1617_v26  ;;  %v1620_v30 = vld [vmem:[%s3153_s7 + $0x38] sm:$0xff]  ;;  %v1073_v58 = vld [vmem:[%s3151_s5 + $0x80] sm:$0xff]  ;;  %v1163_v17 = vld [vmem:[%s3151_s5 + $0xb0] sm:$0xff] }
  0x14   : > { %339 = vadd.xlane.f32.xlu0 %v338_v3  ;;  %1838 = vmatprep.subr.bf16.mxu1 %v1837_v47  ;;  %v2343_v3 = vsub.s32 2, %v2327_v53  ;;  %v1851_v32 = vpack.c.bf16 %v1620_v30, %v1619_v29  ;;  %v609_v40 = vsub.s32 %v606_v37, %v2327_v53  ;;  %v586_v24 = vld [vmem:[%s3151_s5 + $0x100] sm:$0xff]  ;;  %v587_v27 = vld [vmem:[%s3151_s5 + $0x108] sm:$0xff] }
  0x15   : > { %574 = vmatprep.mubr.f32.mxu1 %v2155_v0 }
  0x16   : > { %1824 = vmatpush1.bf16.msra.mxu0 %v1823_v50  ;;  %v350_v4 = vrot.slane %v341_v55, %v2343_v3 }
  0x17   : > { %1840 = vmatpush1.bf16.msra.mxu1 %v1839_v51  ;;  %1841 = vmatprep.subr.bf16.mxu0 %v2156_v1 }
  0x18   : > { %v360_v6 = vrot.slane %v350_v4, %v2330_v54 }
  0xa1   : > { %v340_v61 = vpop.xlane.xlu0 %339 }
  0xa2   : > { %v361_v62 = vmul.f32 %v356_v59, %v340_v61  ;;  %v362_v10 = vmul.f32 %v360_v6, %v340_v61  ;;  %v1074_v59 = vld [vmem:[%s3151_s5 + $0x88] sm:$0xff]  ;;  %v1076_v61 = vld [vmem:[%s3151_s5 + $0x98] sm:$0xff]  ;;  %v584_v6 = vld [vmem:[%s3151_s5 + $0x10] sm:$0xff] }
  0xa4   : > { %v381_v63 = vadd.f32 %v376_v60, %v361_v62  ;;  %v382_v11 = vadd.f32 %v380_v9, %v362_v10  ;;  %v1075_v60 = vld [vmem:[%s3151_s5 + $0x90] sm:$0xff]  ;;  %v582_v62 = vld [vmem:[%s3151_s5] sm:$0xff]  ;;  %v585_v9 = vld [vmem:[%s3151_s5 + $0x18] sm:$0xff] }
  0xa6   : > { %1869 = vtanh.f32 %v381_v63  ;;  %v1773_v8 = vmul.f32 -1.442695, %v381_v63  ;;  %v1774_v12 = vmul.f32 -1.442695, %v382_v11 }
  0xa8   : > { %1871 = vpow2.f32 %v1773_v8 }
  0xa9   : > { %1873 = vpow2.f32 %v1774_v12 }
  0xb0   : > { %v1870_v2 = vpop.eup %1869 }
  0xb1   : > { %391 = vrot.lane.b32.xlu0 %v1870_v2, %s2157_s29 }
  0xb2   : > { %v1872_v13 = vpop.eup %1871 }
  0xb3   : > { %v386_v14 = vadd.f32 1.0, %v1872_v13  ;;  %v1874_v15 = vpop.eup %1873  ;;  %v1161_v13 = vld [vmem:[%s3151_s5 + $0xa0] sm:$0xff] }
  0xb4   : > { %v398_v18 = vadd.f32 1.0, %v1874_v15  ;;  %v1162_v15 = vld [vmem:[%s3151_s5 + $0xa8] sm:$0xff] }
  0xb5   : > { %1875 = vrcp.f32 %v386_v14 }
  0xb6   : > { %1877 = vrcp.f32 %v398_v18  ;;  %v581_v18 = vld [vmem:[%s3150_s4] sm:$0xf] }
  0xbf   : > { %v1876_v19 = vpop.eup %1875 }
  0xc0   : > { %v1878_v31 = vpop.eup %1877 }
 0x123   : > { %v392_v20 = vpop.permute.xlu0 %391 }
 0x124   : > { %v394_v22 = vmul.f32 %v1876_v19, %v392_v20  ;;  %v1164_v20 = vld [vmem:[%s3151_s5 + $0xb8] sm:$0xff] }
 0x126   : > { %1879 = vtanh.f32 %v394_v22  ;;  %1775 = vmatmul.mubr.msk.f32.vlgmr.msra.gmra.mrb[0].mxu0 %vm435_vm1, %v394_v22  ;;  %1776 = vmatmul.mubr.msk.f32.vlgmr.msra.gmra.mrb[0].mxu1 %vm435_vm1, %v394_v22 }
 0x127   : > { %1843 = vmatpush3.bf16.msra.mxu0 %v1842_v21  ;;  %1806 = vmatprep.mubr.msk.f32.mxu0 %vm2158_vm2, %v2155_v0 }
 0x128   : > { %1844 = vmatprep.subr.bf16.mxu0 %v2156_v1 }
 0x12b   : > { %1846 = vmatpush3.bf16.msra.mxu0 %v1845_v25 }
 0x12c   : > { %1847 = vmatprep.subr.bf16.mxu0 %v2156_v1 }
 0x12f   : > { %1849 = vmatpush3.bf16.msra.mxu0 %v1848_v28  ;;  %v2460_v28 = vrot.slane %v581_v18, %v2330_v54 }
 0x130   : > { %v1880_v33 = vpop.eup %1879  ;;  %1850 = vmatprep.subr.bf16.mxu0 %v2156_v1  ;;  %v583_v1 = vld [vmem:[%s3151_s5 + $0x8] sm:$0xff] }
 0x131   : > { %v402_v34 = vmul.f32 %v1880_v33, %v1878_v31  ;;  %v588_v31 = vld [vmem:[%s3151_s5 + $0x110] sm:$0xff]  ;;  %v589_v33 = vld [vmem:[%s3151_s5 + $0x118] sm:$0xff] }
 0x133   : > { %1852 = vmatpush3.bf16.msra.mxu0 %v1851_v32  ;;  %v2470_v32 = vrot.slane %v581_v18, %v2336_v56 }
 0x136   : > { %1807 = vmatmul.mubr.msk.f32.vlgmr.msra.gmra.mrb[2].mxu0 %vm435_vm1, %v402_v34 }
 0x1f9   : > { %v505_v38 = vpop.f32.mrb[0].mxu0  ;;  %v576_v39 = vpop.f32.mrb[0].mxu1 }
 0x1fa   : > { %v507_v41 = vpop.f32.mrb[1].mxu0  ;;  %v578_v42 = vpop.f32.mrb[1].mxu1 }
 0x1fb   : > { %v602_v43 = vcombine.low %v505_v38, %v507_v41  ;;  %v603_v44 = vcombine.low %v576_v39, %v578_v42  ;;  %v1249_v38 = vld [vmem:[%s3151_s5 + $0xc0] sm:$0xff]  ;;  %v1250_v42 = vld [vmem:[%s3151_s5 + $0xc8] sm:$0xff] }
 0x1fd   : > { %v610_v45 = vrot.slane %v602_v43, %v609_v40  ;;  %v617_v46 = vrot.slane %v603_v44, %v609_v40 }
 0x1ff   : > { %v618_v47 = vcombine.low %v610_v45, %v617_v46  ;;  %v619_v48 = vcombine.high %v610_v45, %v617_v46  ;;  %v1251_v46 = vld [vmem:[%s3151_s5 + $0xd0] sm:$0xff] }
 0x201   : > { %v626_v49 = vrot.slane %v618_v47, %v609_v40  ;;  %v633_v7 = vrot.slane %v619_v48, %v609_v40  ;;  %v2485_v40 = vrot.slane %v581_v18, %v2343_v3  ;;  %v2497_v48 = vrot.slane %v581_v18, %v2347_v5  ;;  %v812_v18 = vld [vmem:[%s3151_s5 + $0x38] sm:$0xff] }
 0x203   : > { %v2381_v50 = vrot.slane %v626_v49, %v2330_v54  ;;  %v2384_v51 = vrot.slane %v626_v49, %v2336_v56  ;;  %v2387_v55 = vrot.slane %v626_v49, %v2343_v3  ;;  %v2390_v57 = vrot.slane %v626_v49, %v2347_v5 }
 0x204   : > { %v2439_v19 = vrot.slane %v633_v7, %v2330_v54  ;;  %v2446_v22 = vrot.slane %v633_v7, %v2336_v56  ;;  %v2453_v25 = vrot.slane %v633_v7, %v2343_v3  ;;  %v2463_v29 = vrot.slane %v633_v7, %v2347_v5 }
 0x205   : > { %v1089_v63 = vadd.f32 %v1073_v58, %v2381_v50  ;;  %v1090_v0 = vadd.f32 %v1074_v59, %v2384_v51  ;;  %v1091_v2 = vadd.f32 %v1075_v60, %v2387_v55  ;;  %v1092_v4 = vadd.f32 %v1076_v61, %v2390_v57  ;;  %v1252_v58 = vld [vmem:[%s3151_s5 + $0xd8] sm:$0xff]  ;;  %v809_v60 = vld [vmem:[%s3151_s5 + $0x20] sm:$0xff] }
 0x206   : > { %v716_v10 = vadd.f32 %v2381_v50, %v582_v62  ;;  %v717_v12 = vadd.f32 %v2384_v51, %v583_v1  ;;  %v718_v14 = vadd.f32 %v2387_v55, %v584_v6  ;;  %v719_v16 = vadd.f32 %v2390_v57, %v585_v9  ;;  %v811_v9 = vld [vmem:[%s3151_s5 + $0x30] sm:$0xff] }
 0x207   : > { %1881 = vtanh.f32 %v1089_v63  ;;  %v1177_v21 = vadd.f32 %v1161_v13, %v2381_v50  ;;  %v1178_v23 = vadd.f32 %v1162_v15, %v2384_v51  ;;  %v1179_v26 = vadd.f32 %v1163_v17, %v2387_v55 }
 0x208   : > { %1883 = vtanh.f32 %v1090_v0  ;;  %v1180_v30 = vadd.f32 %v1164_v20, %v2390_v57  ;;  %v720_v34 = vadd.f32 %v2439_v19, %v586_v24  ;;  %v2476_v35 = vcombine.high %v626_v49, %v626_v49  ;;  %v1337_v20 = vld [vmem:[%s3151_s5 + $0xe0] sm:$0xff] }
 0x209   : > { %v2417_v8 = vpop.f32.mrb[2].mxu0  ;;  %1885 = vtanh.f32 %v1091_v2  ;;  %v2478_v36 = vcombine.high %v633_v7, %v633_v7  ;;  %v721_v37 = vadd.f32 %v2446_v22, %v587_v27  ;;  %v722_v41 = vadd.f32 %v2453_v25, %v588_v31  ;;  %v810_v7 = vld [vmem:[%s3151_s5 + $0x28] sm:$0xff] }
 0x20a   : > { %v1808_v11 = vpop.f32.mrb[3].mxu0  ;;  %1887 = vtanh.f32 %v1092_v4  ;;  %v723_v45 = vadd.f32 %v2463_v29, %v589_v33  ;;  %v1265_v59 = vadd.f32 %v1249_v38, %v2381_v50  ;;  %v2509_v62 = vrot.slane %v2476_v35, %v2330_v54 }
 0x20b   : > { %1889 = vtanh.f32 %v716_v10  ;;  %v2513_v63 = vrot.slane %v2478_v36, %v2330_v54  ;;  %v1266_v0 = vadd.f32 %v1250_v42, %v2384_v51  ;;  %v1267_v6 = vadd.f32 %v1251_v46, %v2387_v55 }
 0x20c   : > { %1891 = vtanh.f32 %v717_v12  ;;  %v1268_v12 = vadd.f32 %v1252_v58, %v2390_v57  ;;  %v825_v13 = vadd.f32 %v809_v60, %v2381_v50  ;;  %v826_v24 = vadd.f32 %v810_v7, %v2384_v51  ;;  %v815_v7 = vld [vmem:[%s3151_s5 + $0x130] sm:$0xff] }
 0x20d   : > { %1893 = vtanh.f32 %v718_v14  ;;  %v1353_v42 = vadd.f32 %v1337_v20, %v2381_v50 }
 0x20e   : > { %1895 = vtanh.f32 %v719_v16 }
 0x20f   : > { %1897 = vtanh.f32 %v1177_v21 }
 0x210   : > { %1899 = vtanh.f32 %v1178_v23  ;;  %v2537_v23 = vrot.slane %v2478_v36, %v2336_v56 }
 0x211   : > { %v1882_v39 = vpop.eup %1881  ;;  %1901 = vtanh.f32 %v1179_v26  ;;  %v827_v26 = vadd.f32 %v811_v9, %v2387_v55 }
 0x212   : > { %v1884_v43 = vpop.eup %1883  ;;  %v1121_v44 = vmul.f32 %v1882_v39, %v2460_v28  ;;  %1903 = vtanh.f32 %v1180_v30 }
 0x213   : > { %v1886_v47 = vpop.eup %1885  ;;  %v1122_v49 = vmul.f32 %v1884_v43, %v2470_v32  ;;  %1905 = vtanh.f32 %v720_v34  ;;  %v1338_v34 = vld [vmem:[%s3151_s5 + $0xe8] sm:$0xff] }
 0x214   : > { %v1888_v61 = vpop.eup %1887  ;;  %1907 = vtanh.f32 %v721_v37  ;;  %v1123_v2 = vmul.f32 %v1886_v47, %v2485_v40  ;;  %v1339_v37 = vld [vmem:[%s3151_s5 + $0xf0] sm:$0xff]  ;;  %v1340_v47 = vld [vmem:[%s3151_s5 + $0xf8] sm:$0xff]  ;;  %v1354_v60 = vadd.f32 %v1338_v34, %v2384_v51  ;;  %v822_v34 = vld [vmem:[%s3151_s5 + $0x328] sm:$0xff] }
 0x215   : > { %v1890_v1 = vpop.eup %1889  ;;  %v1137_v4 = vadd.f32 %v1122_v49, %v1121_v44  ;;  %1909 = vtanh.f32 %v722_v41  ;;  %v1124_v15 = vmul.f32 %v1888_v61, %v2497_v48  ;;  %v828_v41 = vadd.f32 %v812_v18, %v2390_v57  ;;  %v813_v49 = vld [vmem:[%s3151_s5 + $0x120] sm:$0xff] }
 0x216   : > { %v1892_v10 = vpop.eup %1891  ;;  %v769_v11 = vmul.f32 %v1890_v1, %v2460_v28  ;;  %1911 = vtanh.f32 %v723_v45  ;;  %v1355_v61 = vadd.f32 %v1339_v37, %v2387_v55  ;;  %v821_v18 = vld [vmem:[%s3151_s5 + $0x320] sm:$0xff] }
 0x217   : > { %v1894_v14 = vpop.eup %1893  ;;  %v1138_v16 = vadd.f32 %v1137_v4, %v1123_v2  ;;  %v770_v17 = vmul.f32 %v1892_v10, %v2470_v32  ;;  %1913 = vtanh.f32 %v1265_v59  ;;  %v2561_v59 = vrot.slane %v2478_v36, %v2343_v3 }
 0x218   : > { %v1896_v21 = vpop.eup %1895  ;;  %1915 = vtanh.f32 %v1266_v0  ;;  %v771_v31 = vmul.f32 %v1894_v14, %v2485_v40 }
 0x219   : > { %v1898_v27 = vpop.eup %1897  ;;  %v1139_v30 = vadd.f32 %v1138_v16, %v1124_v15  ;;  %v785_v33 = vadd.f32 %v770_v17, %v769_v11  ;;  %1917 = vtanh.f32 %v1267_v6  ;;  %v772_v44 = vmul.f32 %v1896_v21, %v2497_v48  ;;  %v814_v6 = vld [vmem:[%s3151_s5 + $0x128] sm:$0xff]  ;;  %v816_v17 = vld [vmem:[%s3151_s5 + $0x138] sm:$0xff] }
 0x21a   : > { %v1900_v38 = vpop.eup %1899  ;;  %v1209_v39 = vmul.f32 %v1898_v27, %v2460_v28  ;;  %1919 = vtanh.f32 %v1268_v12  ;;  %v1356_v11 = vadd.f32 %v1340_v47, %v2390_v57  ;;  %v829_v12 = vadd.f32 %v813_v49, %v2439_v19  ;;  %v897_v47 = vld [vmem:[%s3151_s5 + $0x40] sm:$0xff] }
 0x21b   : > { %v1902_v43 = vpop.eup %1901  ;;  %1140 = vadd.xlane.f32.xlu0 %v1139_v30  ;;  %v786_v45 = vadd.f32 %v785_v33, %v771_v31  ;;  %v1210_v46 = vmul.f32 %v1900_v38, %v2470_v32  ;;  %1921 = vtanh.f32 %v825_v13  ;;  %v2585_v21 = vrot.slane %v2478_v36, %v2347_v5  ;;  %v823_v36 = vld [vmem:[%s3151_s5 + $0x330] sm:$0xff] }
 0x21c   : > { %v1904_v58 = vpop.eup %1903  ;;  %1923 = vtanh.f32 %v826_v24  ;;  %v1211_v2 = vmul.f32 %v1902_v43, %v2485_v40  ;;  %v830_v24 = vadd.f32 %v814_v6, %v2446_v22  ;;  %v898_v6 = vld [vmem:[%s3151_s5 + $0x48] sm:$0xff] }
 0x21d   : > { %v1906_v0 = vpop.eup %1905  ;;  %v787_v1 = vadd.f32 %v786_v45, %v772_v44  ;;  %v1225_v4 = vadd.f32 %v1210_v46, %v1209_v39  ;;  %1925 = vtanh.f32 %v827_v26  ;;  %v1212_v14 = vmul.f32 %v1904_v58, %v2497_v48  ;;  %v824_v46 = vld [vmem:[%s3151_s5 + $0x338] sm:$0xff] }
 0x21e   : > { %v1908_v9 = vpop.eup %1907  ;;  %v773_v10 = vmul.f32 %v1906_v0, %v2460_v28  ;;  %1927 = vtanh.f32 %v828_v41  ;;  %v831_v26 = vadd.f32 %v815_v7, %v2453_v25  ;;  %v832_v39 = vadd.f32 %v816_v17, %v2463_v29  ;;  %v899_v7 = vld [vmem:[%s3151_s5 + $0x50] sm:$0xff]  ;;  %v900_v17 = vld [vmem:[%s3151_s5 + $0x58] sm:$0xff] }
 0x21f   : > { %v1910_v13 = vpop.eup %1909  ;;  %788 = vadd.xlane.f32.xlu1 %v787_v1  ;;  %v1226_v15 = vadd.f32 %v1225_v4, %v1211_v2  ;;  %v774_v16 = vmul.f32 %v1908_v9, %v2470_v32  ;;  %1929 = vtanh.f32 %v1353_v42  ;;  %v837_v41 = vadd.f32 %v821_v18, %v2513_v63  ;;  %v901_v18 = vld [vmem:[%s3151_s5 + $0x140] sm:$0xff] }
 0x220   : > { %v1912_v20 = vpop.eup %1911  ;;  %1931 = vtanh.f32 %v1354_v60  ;;  %v775_v31 = vmul.f32 %v1910_v13, %v2485_v40  ;;  %v2609_v58 = vrot.slane %v2476_v35, %v2336_v56  ;;  %v838_v60 = vadd.f32 %v822_v34, %v2537_v23 }
 0x221   : > { %v1914_v27 = vpop.eup %1913  ;;  %v1227_v30 = vadd.f32 %v1226_v15, %v1212_v14  ;;  %v790_v33 = vadd.f32 %v774_v16, %v773_v10  ;;  %1933 = vtanh.f32 %v1355_v61  ;;  %v776_v43 = vmul.f32 %v1912_v20, %v2497_v48 }
 0x222   : > { %v1916_v37 = vpop.eup %1915  ;;  %v1297_v38 = vmul.f32 %v1914_v27, %v2460_v28  ;;  %1935 = vtanh.f32 %v1356_v11  ;;  %v839_v61 = vadd.f32 %v823_v36, %v2561_v59  ;;  %v840_v11 = vadd.f32 %v824_v46, %v2585_v21  ;;  %v902_v36 = vld [vmem:[%s3151_s5 + $0x148] sm:$0xff] }
 0x223   : > { %v1918_v42 = vpop.eup %1917  ;;  %1228 = vadd.xlane.f32.xlu0 %v1227_v30  ;;  %v791_v44 = vadd.f32 %v790_v33, %v775_v31  ;;  %v1298_v45 = vmul.f32 %v1916_v37, %v2470_v32  ;;  %1937 = vtanh.f32 %v829_v12  ;;  %v913_v12 = vadd.f32 %v897_v47, %v2381_v50  ;;  %v903_v37 = vld [vmem:[%s3151_s5 + $0x150] sm:$0xff]  ;;  %v904_v47 = vld [vmem:[%s3151_s5 + $0x158] sm:$0xff] }
 0x224   : > { %v1920_v49 = vpop.eup %1919  ;;  %1939 = vtanh.f32 %v830_v24  ;;  %v1299_v2 = vmul.f32 %v1918_v42, %v2485_v40  ;;  %v2633_v24 = vrot.slane %v2476_v35, %v2343_v3  ;;  %v915_v27 = vadd.f32 %v899_v7, %v2387_v55 }
 0x225   : > { %v1922_v0 = vpop.eup %1921  ;;  %v792_v1 = vadd.f32 %v791_v44, %v776_v43  ;;  %v1313_v4 = vadd.f32 %v1298_v45, %v1297_v38  ;;  %1941 = vtanh.f32 %v831_v26  ;;  %v1300_v14 = vmul.f32 %v1920_v49, %v2497_v48  ;;  %v1081_v49 = vld [vmem:[%s3151_s5 + $0x280] sm:$0xff] }
 0x226   : > { %v1924_v9 = vpop.eup %1923  ;;  %v857_v10 = vmul.f32 %v1922_v0, %v2460_v28  ;;  %1943 = vtanh.f32 %v832_v39  ;;  %v914_v26 = vadd.f32 %v898_v6, %v2384_v51  ;;  %v917_v42 = vadd.f32 %v901_v18, %v2439_v19  ;;  %v1084_v18 = vld [vmem:[%s3151_s5 + $0x298] sm:$0xff] }
 0x227   : > { %v1926_v13 = vpop.eup %1925  ;;  %793 = vadd.xlane.f32.xlu1 %v792_v1  ;;  %v1314_v15 = vadd.f32 %v1313_v4, %v1299_v2  ;;  %v858_v16 = vmul.f32 %v1924_v9, %v2470_v32  ;;  %1945 = vtanh.f32 %v837_v41  ;;  %v916_v41 = vadd.f32 %v900_v17, %v2390_v57  ;;  %v1082_v9 = vld [vmem:[%s3151_s5 + $0x288] sm:$0xff] }
 0x228   : > { %v1928_v20 = vpop.eup %1927  ;;  %1947 = vtanh.f32 %v838_v60  ;;  %v859_v33 = vmul.f32 %v1926_v13, %v2485_v40  ;;  %v918_v0 = vadd.f32 %v902_v36, %v2446_v22  ;;  %v919_v1 = vadd.f32 %v903_v37, %v2453_v25  ;;  %v986_v37 = vld [vmem:[%s3151_s5 + $0x68] sm:$0xff] }
 0x229   : > { %v1930_v30 = vpop.eup %1929  ;;  %v1315_v31 = vadd.f32 %v1314_v15, %v1300_v14  ;;  %v873_v34 = vadd.f32 %v858_v16, %v857_v10  ;;  %1949 = vtanh.f32 %v839_v61  ;;  %v860_v44 = vmul.f32 %v1928_v20, %v2497_v48  ;;  %v985_v20 = vld [vmem:[%s3151_s5 + $0x60] sm:$0xff] }
 0x22a   : > { %v1932_v38 = vpop.eup %1931  ;;  %v1385_v39 = vmul.f32 %v1930_v30, %v2460_v28  ;;  %1951 = vtanh.f32 %v840_v11  ;;  %v2657_v61 = vrot.slane %v2476_v35, %v2347_v5  ;;  %v1083_v35 = vld [vmem:[%s3151_s5 + $0x290] sm:$0xff]  ;;  %v1097_v13 = vadd.f32 %v1081_v49, %v2509_v62  ;;  %v988_v49 = vld [vmem:[%s3151_s5 + $0x78] sm:$0xff] }
 0x22b   : > { %v1934_v43 = vpop.eup %1933  ;;  %1316 = vadd.xlane.f32.xlu0 %v1315_v31  ;;  %v874_v45 = vadd.f32 %v873_v34, %v859_v33  ;;  %v1386_v46 = vmul.f32 %v1932_v38, %v2470_v32  ;;  %1953 = vtanh.f32 %v913_v12  ;;  %v920_v12 = vadd.f32 %v904_v47, %v2463_v29  ;;  %v987_v38 = vld [vmem:[%s3151_s5 + $0x70] sm:$0xff] }
 0x22c   : > { %v1936_v60 = vpop.eup %1935  ;;  %1955 = vtanh.f32 %v914_v26  ;;  %v1387_v6 = vmul.f32 %v1934_v43, %v2485_v40  ;;  %v1099_v30 = vadd.f32 %v1083_v35, %v2633_v24  ;;  %v1001_v43 = vadd.f32 %v985_v20, %v2381_v50  ;;  %v1171_v35 = vld [vmem:[%s3151_s5 + $0x2b0] sm:$0xff] }
 0x22d   : > { %v1938_v2 = vpop.eup %1937  ;;  %v875_v4 = vadd.f32 %v874_v45, %v860_v44  ;;  %v1401_v7 = vadd.f32 %v1386_v46, %v1385_v39  ;;  %1957 = vtanh.f32 %v915_v27  ;;  %v1388_v15 = vmul.f32 %v1936_v60, %v2497_v48  ;;  %v1169_v60 = vld [vmem:[%s3151_s5 + $0x2a0] sm:$0xff] }
 0x22e   : > { %v1940_v10 = vpop.eup %1939  ;;  %v861_v11 = vmul.f32 %v1938_v2, %v2460_v28  ;;  %1959 = vtanh.f32 %v916_v41  ;;  %v1098_v27 = vadd.f32 %v1082_v9, %v2609_v58  ;;  %v1002_v50 = vadd.f32 %v986_v37, %v2384_v51  ;;  %v1170_v9 = vld [vmem:[%s3151_s5 + $0x2a8] sm:$0xff] }
 0x22f   : > { %v1942_v14 = vpop.eup %1941  ;;  %876 = vadd.xlane.f32.xlu1 %v875_v4  ;;  %v1402_v16 = vadd.f32 %v1401_v7, %v1387_v6  ;;  %v862_v17 = vmul.f32 %v1940_v10, %v2470_v32  ;;  %1961 = vtanh.f32 %v917_v42  ;;  %v1100_v42 = vadd.f32 %v1084_v18, %v2657_v61 }
 0x230   : > { %v1944_v26 = vpop.eup %1943  ;;  %1963 = vtanh.f32 %v918_v0  ;;  %v863_v34 = vmul.f32 %v1942_v14, %v2485_v40  ;;  %v1004_v51 = vadd.f32 %v988_v49, %v2390_v57  ;;  %v1186_v57 = vadd.f32 %v1170_v9, %v2609_v58 }
 0x231   : > { %v1946_v31 = vpop.eup %1945  ;;  %v1403_v33 = vadd.f32 %v1402_v16, %v1388_v15  ;;  %v878_v36 = vadd.f32 %v862_v17, %v861_v11  ;;  %1965 = vtanh.f32 %v919_v1  ;;  %v864_v45 = vmul.f32 %v1944_v26, %v2497_v48  ;;  %v1172_v16 = vld [vmem:[%s3151_s5 + $0x2b8] sm:$0xff]  ;;  %v989_v17 = vld [vmem:[%s3151_s5 + $0x160] sm:$0xff] }
 0x232   : > { %v1948_v39 = vpop.eup %1947  ;;  %v869_v41 = vmul.f32 %v1946_v31, %v2460_v28  ;;  %1967 = vtanh.f32 %v920_v12  ;;  %v1003_v1 = vadd.f32 %v987_v38, %v2387_v55  ;;  %v1185_v55 = vadd.f32 %v1169_v60, %v2509_v62 }
 0x233   : > { %v1950_v44 = vpop.eup %1949  ;;  %1404 = vadd.xlane.f32.xlu0 %v1403_v33  ;;  %v879_v46 = vadd.f32 %v878_v36, %v863_v34  ;;  %v870_v47 = vmul.f32 %v1948_v39, %v2470_v32  ;;  %1969 = vtanh.f32 %v1097_v13  ;;  %v1187_v20 = vadd.f32 %v1171_v35, %v2633_v24  ;;  %v990_v33 = vld [vmem:[%s3151_s5 + $0x168] sm:$0xff]  ;;  %v991_v34 = vld [vmem:[%s3151_s5 + $0x170] sm:$0xff] }
 0x234   : > { %v1952_v0 = vpop.eup %1951  ;;  %1971 = vtanh.f32 %v1098_v27  ;;  %v871_v6 = vmul.f32 %v1950_v44, %v2485_v40  ;;  %v1188_v38 = vadd.f32 %v1172_v16, %v2657_v61  ;;  %v1005_v39 = vadd.f32 %v989_v17, %v2439_v19 }
 0x235   : > { %v1954_v2 = vpop.eup %1953  ;;  %v880_v4 = vadd.f32 %v879_v46, %v864_v45  ;;  %v888_v7 = vadd.f32 %v870_v47, %v869_v41  ;;  %1973 = vtanh.f32 %v1099_v30  ;;  %v872_v13 = vmul.f32 %v1952_v0, %v2497_v48  ;;  %v992_v45 = vld [vmem:[%s3151_s5 + $0x178] sm:$0xff]  ;;  %v1257_v46 = vld [vmem:[%s3151_s5 + $0x2c0] sm:$0xff] }
 0x236   : > { %v1956_v10 = vpop.eup %1955  ;;  %v945_v11 = vmul.f32 %v1954_v2, %v2460_v28  ;;  %1975 = vtanh.f32 %v1100_v42  ;;  %v1006_v49 = vadd.f32 %v990_v33, %v2446_v22  ;;  %v1007_v60 = vadd.f32 %v991_v34, %v2453_v25 }
 0x237   : > { %v1958_v12 = vpop.eup %1957  ;;  %881 = vadd.xlane.f32.xlu1 %v880_v4  ;;  %v889_v14 = vadd.f32 %v888_v7, %v871_v6  ;;  %v946_v15 = vmul.f32 %v1956_v10, %v2470_v32  ;;  %1977 = vtanh.f32 %v1001_v43  ;;  %v1258_v4 = vld [vmem:[%s3151_s5 + $0x2c8] sm:$0xff]  ;;  %v1259_v6 = vld [vmem:[%s3151_s5 + $0x2d0] sm:$0xff]  ;;  %v1008_v35 = vadd.f32 %v992_v45, %v2463_v29 }
 0x238   : > { %v1960_v18 = vpop.eup %1959  ;;  %1979 = vtanh.f32 %v1002_v50  ;;  %v947_v30 = vmul.f32 %v1958_v12, %v2485_v40  ;;  %v1273_v10 = vadd.f32 %v1257_v46, %v2509_v62  ;;  %v1274_v16 = vadd.f32 %v1258_v4, %v2609_v58 }
 0x239   : > { %v1962_v26 = vpop.eup %1961  ;;  %v890_v27 = vadd.f32 %v889_v14, %v872_v13  ;;  %v961_v31 = vadd.f32 %v946_v15, %v945_v11  ;;  %1981 = vtanh.f32 %v1003_v1  ;;  %v948_v42 = vmul.f32 %v1960_v18, %v2497_v48  ;;  %v1260_v13 = vld [vmem:[%s3151_s5 + $0x2d8] sm:$0xff]  ;;  %v1077_v14 = vld [vmem:[%s3151_s5 + $0x180] sm:$0xff] }
 0x23a   : > { %v1964_v36 = vpop.eup %1963  ;;  %v949_v37 = vmul.f32 %v1962_v26, %v2460_v28  ;;  %1983 = vtanh.f32 %v1004_v51  ;;  %v1275_v17 = vadd.f32 %v1259_v6, %v2633_v24  ;;  %v1276_v34 = vadd.f32 %v1260_v13, %v2657_v61 }
 0x23b   : > { %v1966_v41 = vpop.eup %1965  ;;  %891 = vadd.xlane.f32.xlu0 %v890_v27  ;;  %v962_v43 = vadd.f32 %v961_v31, %v947_v30  ;;  %v950_v44 = vmul.f32 %v1964_v36, %v2470_v32  ;;  %1985 = vtanh.f32 %v1185_v55  ;;  %v1078_v27 = vld [vmem:[%s3151_s5 + $0x188] sm:$0xff]  ;;  %v1079_v30 = vld [vmem:[%s3151_s5 + $0x190] sm:$0xff]  ;;  %v1093_v36 = vadd.f32 %v1077_v14, %v2439_v19 }
 0x23c   : > { %v1968_v47 = vpop.eup %1967  ;;  %1987 = vtanh.f32 %v1186_v57  ;;  %v951_v1 = vmul.f32 %v1966_v41, %v2485_v40  ;;  %v1094_v45 = vadd.f32 %v1078_v27, %v2446_v22  ;;  %v1095_v46 = vadd.f32 %v1079_v30, %v2453_v25 }
 0x23d   : > { %v1970_v0 = vpop.eup %1969  ;;  %v963_v50 = vadd.f32 %v962_v43, %v948_v42  ;;  %v966_v2 = vadd.f32 %v950_v44, %v949_v37  ;;  %1989 = vtanh.f32 %v1187_v20  ;;  %v952_v51 = vmul.f32 %v1968_v47, %v2497_v48  ;;  %v1080_v42 = vld [vmem:[%s3151_s5 + $0x198] sm:$0xff]  ;;  %v1345_v43 = vld [vmem:[%s3151_s5 + $0x2e0] sm:$0xff] }
 0x23e   : > { %v1972_v7 = vpop.eup %1971  ;;  %v1129_v9 = vmul.f32 %v1970_v0, %v2460_v28  ;;  %1991 = vtanh.f32 %v1188_v38  ;;  %v1096_v6 = vadd.f32 %v1080_v42, %v2463_v29 }
 0x23f   : > { %v1974_v11 = vpop.eup %1973  ;;  %964 = vadd.xlane.f32.xlu1 %v963_v50  ;;  %v967_v55 = vadd.f32 %v966_v2, %v951_v1  ;;  %v1130_v12 = vmul.f32 %v1972_v7, %v2470_v32  ;;  %1993 = vtanh.f32 %v1005_v39  ;;  %v1346_v50 = vld [vmem:[%s3151_s5 + $0x2e8] sm:$0xff]  ;;  %v1347_v1 = vld [vmem:[%s3151_s5 + $0x2f0] sm:$0xff]  ;;  %v1361_v7 = vadd.f32 %v1345_v43, %v2509_v62 }
 0x240   : > { %v1976_v15 = vpop.eup %1975  ;;  %1995 = vtanh.f32 %v1006_v49  ;;  %v1131_v20 = vmul.f32 %v1974_v11, %v2485_v40  ;;  %v1362_v13 = vadd.f32 %v1346_v50, %v2609_v58  ;;  %v1363_v14 = vadd.f32 %v1347_v1, %v2633_v24 }
 0x241   : > { %v1978_v18 = vpop.eup %1977  ;;  %v968_v57 = vadd.f32 %v967_v55, %v952_v51  ;;  %v1147_v26 = vadd.f32 %v1130_v12, %v1129_v9  ;;  %1997 = vtanh.f32 %v1007_v60  ;;  %v1132_v38 = vmul.f32 %v1976_v15, %v2497_v48  ;;  %v1348_v51 = vld [vmem:[%s3151_s5 + $0x2f8] sm:$0xff]  ;;  %v1165_v55 = vld [vmem:[%s3151_s5 + $0x1a0] sm:$0xff] }
 0x242   : > { %v1980_v31 = vpop.eup %1979  ;;  %v1033_v33 = vmul.f32 %v1978_v18, %v2460_v28  ;;  %1999 = vtanh.f32 %v1008_v35  ;;  %v1364_v30 = vadd.f32 %v1348_v51, %v2657_v61 }
 0x243   : > { %v1982_v37 = vpop.eup %1981  ;;  %969 = vadd.xlane.f32.xlu1 %v968_v57  ;;  %v1148_v39 = vadd.f32 %v1147_v26, %v1131_v20  ;;  %v1034_v41 = vmul.f32 %v1980_v31, %v2470_v32  ;;  %2001 = vtanh.f32 %v1273_v10  ;;  %v1166_v57 = vld [vmem:[%s3151_s5 + $0x1a8] sm:$0xff]  ;;  %v1167_v20 = vld [vmem:[%s3151_s5 + $0x1b0] sm:$0xff]  ;;  %v1181_v31 = vadd.f32 %v1165_v55, %v2439_v19 }
 0x244   : > { %v1984_v44 = vpop.eup %1983  ;;  %2003 = vtanh.f32 %v1274_v16  ;;  %v1035_v60 = vmul.f32 %v1982_v37, %v2485_v40  ;;  %v1182_v42 = vadd.f32 %v1166_v57, %v2446_v22  ;;  %v1183_v43 = vadd.f32 %v1167_v20, %v2453_v25 }
 0x245   : > { %v1986_v47 = vpop.eup %1985  ;;  %v1149_v49 = vadd.f32 %v1148_v39, %v1132_v38  ;;  %v1049_v0 = vadd.f32 %v1034_v41, %v1033_v33  ;;  %2005 = vtanh.f32 %v1275_v17  ;;  %v1036_v35 = vmul.f32 %v1984_v44, %v2497_v48  ;;  %v1168_v38 = vld [vmem:[%s3151_s5 + $0x1b8] sm:$0xff]  ;;  %v1253_v39 = vld [vmem:[%s3151_s5 + $0x1c0] sm:$0xff] }
 0x246   : > { %v1988_v2 = vpop.eup %1987  ;;  %v1217_v4 = vmul.f32 %v1986_v47, %v2460_v28  ;;  %2007 = vtanh.f32 %v1276_v34  ;;  %v1184_v1 = vadd.f32 %v1168_v38, %v2463_v29 }
 0x247   : > { %v1990_v9 = vpop.eup %1989  ;;  %1150 = vadd.xlane.f32.xlu0 %v1149_v49  ;;  %v1050_v10 = vadd.f32 %v1049_v0, %v1035_v60  ;;  %v1218_v11 = vmul.f32 %v1988_v2, %v2470_v32  ;;  %2009 = vtanh.f32 %v1093_v36  ;;  %v1254_v49 = vld [vmem:[%s3151_s5 + $0x1c8] sm:$0xff]  ;;  %v1255_v60 = vld [vmem:[%s3151_s5 + $0x1d0] sm:$0xff]  ;;  %v1269_v2 = vadd.f32 %v1253_v39, %v2439_v19 }
 0x248   : > { %v1992_v12 = vpop.eup %1991  ;;  %2011 = vtanh.f32 %v1094_v45  ;;  %v1219_v17 = vmul.f32 %v1990_v9, %v2485_v40  ;;  %v1270_v51 = vadd.f32 %v1254_v49, %v2446_v22  ;;  %v1271_v55 = vadd.f32 %v1255_v60, %v2453_v25 }
 0x249   : > { %v1994_v15 = vpop.eup %1993  ;;  %v1051_v16 = vadd.f32 %v1050_v10, %v1036_v35  ;;  %v1235_v18 = vadd.f32 %v1218_v11, %v1217_v4  ;;  %2013 = vtanh.f32 %v1095_v46  ;;  %v1220_v34 = vmul.f32 %v1992_v12, %v2497_v48  ;;  %v1256_v35 = vld [vmem:[%s3151_s5 + $0x1d8] sm:$0xff]  ;;  %v1341_v10 = vld [vmem:[%s3151_s5 + $0x1e0] sm:$0xff] }
 0x24a   : > { %v1996_v26 = vpop.eup %1995  ;;  %v1037_v27 = vmul.f32 %v1994_v15, %v2460_v28  ;;  %2015 = vtanh.f32 %v1096_v6  ;;  %v1272_v20 = vadd.f32 %v1256_v35, %v2463_v29 }
 0x24b   : > { %v1998_v33 = vpop.eup %1997  ;;  %1052 = vadd.xlane.f32.xlu1 %v1051_v16  ;;  %v1236_v36 = vadd.f32 %v1235_v18, %v1219_v17  ;;  %v1038_v37 = vmul.f32 %v1996_v26, %v2470_v32  ;;  %2017 = vtanh.f32 %v1361_v7  ;;  %v1342_v16 = vld [vmem:[%s3151_s5 + $0x1e8] sm:$0xff]  ;;  %v1343_v17 = vld [vmem:[%s3151_s5 + $0x1f0] sm:$0xff]  ;;  %v1357_v26 = vadd.f32 %v1341_v10, %v2439_v19 }
 0x24c   : > { %v2000_v41 = vpop.eup %1999  ;;  %2019 = vtanh.f32 %v1362_v13  ;;  %v1039_v46 = vmul.f32 %v1998_v33, %v2485_v40  ;;  %v1358_v19 = vadd.f32 %v1342_v16, %v2446_v22  ;;  %v1359_v38 = vadd.f32 %v1343_v17, %v2453_v25 }
 0x24d   : > { %v2002_v44 = vpop.eup %2001  ;;  %v1237_v45 = vadd.f32 %v1236_v36, %v1220_v34  ;;  %v1054_v47 = vadd.f32 %v1038_v37, %v1037_v27  ;;  %2021 = vtanh.f32 %v1363_v14  ;;  %v1040_v6 = vmul.f32 %v2000_v41, %v2497_v48  ;;  %v1344_v34 = vld [vmem:[%s3151_s5 + $0x1f8] sm:$0xff]  ;;  %v590_v36 = vld [vmem:[%s3151_s5 + $0x200] sm:$0xff] }
 0x24e   : > { %v2004_v0 = vpop.eup %2003  ;;  %v1305_v50 = vmul.f32 %v2002_v44, %v2460_v28  ;;  %2023 = vtanh.f32 %v1364_v30  ;;  %v591_v44 = vld [vmem:[%s3151_s5 + $0x208] sm:$0xff]  ;;  %v1360_v22 = vadd.f32 %v1344_v34, %v2463_v29  ;;  %v724_v25 = vadd.f32 %v2509_v62, %v590_v36 }
 0x24f   : > { %v2006_v4 = vpop.eup %2005  ;;  %1238 = vadd.xlane.f32.xlu0 %v1237_v45  ;;  %v1055_v7 = vadd.f32 %v1054_v47, %v1039_v46  ;;  %v1306_v9 = vmul.f32 %v2004_v0, %v2470_v32  ;;  %2025 = vtanh.f32 %v1181_v31  ;;  %v592_v45 = vld [vmem:[%s3151_s5 + $0x210] sm:$0xff]  ;;  %v725_v29 = vadd.f32 %v2609_v58, %v591_v44 }
 0x250   : > { %v2008_v11 = vpop.eup %2007  ;;  %2027 = vtanh.f32 %v1182_v42  ;;  %v1307_v14 = vmul.f32 %v2006_v4, %v2485_v40 }
 0x251   : > { %v2010_v12 = vpop.eup %2009  ;;  %v1056_v13 = vadd.f32 %v1055_v7, %v1040_v6  ;;  %v1323_v15 = vadd.f32 %v1306_v9, %v1305_v50  ;;  %2029 = vtanh.f32 %v1183_v43  ;;  %v1308_v30 = vmul.f32 %v2008_v11, %v2497_v48  ;;  %v818_v11 = vld [vmem:[%s3151_s5 + $0x228] sm:$0xff] }
 0x252   : > { %v2012_v18 = vpop.eup %2011  ;;  %v1125_v57 = vmul.f32 %v2010_v12, %v2460_v28  ;;  %2031 = vtanh.f32 %v1184_v1  ;;  %v593_v1 = vld [vmem:[%s3151_s5 + $0x218] sm:$0xff]  ;;  %v726_v6 = vadd.f32 %v2633_v24, %v592_v45 }
 0x253   : > { %v2014_v27 = vpop.eup %2013  ;;  %1057 = vadd.xlane.f32.xlu1 %v1056_v13  ;;  %v1324_v31 = vadd.f32 %v1323_v15, %v1307_v14  ;;  %v1126_v33 = vmul.f32 %v2012_v18, %v2470_v32  ;;  %2033 = vtanh.f32 %v1269_v2  ;;  %v817_v2 = vld [vmem:[%s3151_s5 + $0x220] sm:$0xff]  ;;  %v727_v13 = vadd.f32 %v2657_v61, %v593_v1 }
 0x254   : > { %v2016_v37 = vpop.eup %2015  ;;  %2035 = vtanh.f32 %v1270_v51  ;;  %v1127_v42 = vmul.f32 %v2014_v27, %v2485_v40  ;;  %v819_v51 = vld [vmem:[%s3151_s5 + $0x230] sm:$0xff]  ;;  %v833_v14 = vadd.f32 %v817_v2, %v2509_v62  ;;  %v834_v27 = vadd.f32 %v818_v11, %v2609_v58 }
 0x255   : > { %v2018_v39 = vpop.eup %2017  ;;  %v1325_v41 = vadd.f32 %v1324_v31, %v1308_v30  ;;  %v1142_v43 = vadd.f32 %v1126_v33, %v1125_v57  ;;  %2037 = vtanh.f32 %v1271_v55  ;;  %v1128_v60 = vmul.f32 %v2016_v37, %v2497_v48  ;;  %v820_v57 = vld [vmem:[%s3151_s5 + $0x238] sm:$0xff]  ;;  %v595_v37 = vld [vmem:[%s3151_s5 + $0x308] sm:$0xff] }
 0x256   : > { %v2020_v46 = vpop.eup %2019  ;;  %v1393_v47 = vmul.f32 %v2018_v39, %v2460_v28  ;;  %2039 = vtanh.f32 %v1272_v20  ;;  %v594_v20 = vld [vmem:[%s3151_s5 + $0x300] sm:$0xff]  ;;  %v835_v30 = vadd.f32 %v819_v51, %v2633_v24 }
 0x257   : > { %v2022_v49 = vpop.eup %2021  ;;  %1326 = vadd.xlane.f32.xlu0 %v1325_v41  ;;  %v1143_v0 = vadd.f32 %v1142_v43, %v1127_v42  ;;  %v1394_v50 = vmul.f32 %v2020_v46, %v2470_v32  ;;  %2041 = vtanh.f32 %v1357_v26  ;;  %v836_v41 = vadd.f32 %v820_v57, %v2657_v61 }
 0x258   : > { %v2024_v4 = vpop.eup %2023  ;;  %2043 = vtanh.f32 %v1358_v19  ;;  %v1395_v35 = vmul.f32 %v2022_v49, %v2485_v40  ;;  %v596_v19 = vld [vmem:[%s3151_s5 + $0x310] sm:$0xff]  ;;  %v728_v42 = vadd.f32 %v2513_v63, %v594_v20  ;;  %v729_v49 = vadd.f32 %v2537_v23, %v595_v37 }
 0x259   : > { %v2026_v7 = vpop.eup %2025  ;;  %v1144_v9 = vadd.f32 %v1143_v0, %v1128_v60  ;;  %v1411_v10 = vadd.f32 %v1394_v50, %v1393_v47  ;;  %2045 = vtanh.f32 %v1359_v38  ;;  %v1396_v16 = vmul.f32 %v2024_v4, %v2497_v48  ;;  %v597_v47 = vld [vmem:[%s3151_s5 + $0x318] sm:$0xff]  ;;  %v906_v4 = vld [vmem:[%s3151_s5 + $0x248] sm:$0xff] }
 0x25a   : > { %v2028_v55 = vpop.eup %2027  ;;  %v1213_v12 = vmul.f32 %v2026_v7, %v2460_v28  ;;  %2047 = vtanh.f32 %v1360_v22  ;;  %v905_v22 = vld [vmem:[%s3151_s5 + $0x240] sm:$0xff]  ;;  %v730_v60 = vadd.f32 %v2561_v59, %v596_v19 }
 0x25b   : > { %v2030_v15 = vpop.eup %2029  ;;  %1145 = vadd.xlane.f32.xlu1 %v1144_v9  ;;  %v1412_v17 = vadd.f32 %v1411_v10, %v1395_v35  ;;  %v1214_v18 = vmul.f32 %v2028_v55, %v2470_v32  ;;  %2049 = vtanh.f32 %v724_v25  ;;  %v731_v9 = vadd.f32 %v2585_v21, %v597_v47 }
 0x25c   : > { %v2032_v26 = vpop.eup %2031  ;;  %2051 = vtanh.f32 %v725_v29  ;;  %v1215_v34 = vmul.f32 %v2030_v15, %v2485_v40  ;;  %v907_v29 = vld [vmem:[%s3151_s5 + $0x250] sm:$0xff]  ;;  %v921_v35 = vadd.f32 %v905_v22, %v2509_v62  ;;  %v922_v15 = vadd.f32 %v906_v4, %v2609_v58 }
 0x25d   : > { %v2034_v31 = vpop.eup %2033  ;;  %v1413_v33 = vadd.f32 %v1412_v17, %v1396_v16  ;;  %v1230_v36 = vadd.f32 %v1214_v18, %v1213_v12  ;;  %2053 = vtanh.f32 %v726_v6  ;;  %v1216_v44 = vmul.f32 %v2032_v26, %v2497_v48  ;;  %v908_v12 = vld [vmem:[%s3151_s5 + $0x258] sm:$0xff]  ;;  %v910_v26 = vld [vmem:[%s3151_s5 + $0x348] sm:$0xff] }
 0x25e   : > { %v2036_v38 = vpop.eup %2035  ;;  %v1301_v39 = vmul.f32 %v2034_v31, %v2460_v28  ;;  %2055 = vtanh.f32 %v727_v13  ;;  %v909_v13 = vld [vmem:[%s3151_s5 + $0x340] sm:$0xff]  ;;  %v923_v16 = vadd.f32 %v907_v29, %v2633_v24 }
 0x25f   : > { %v2038_v43 = vpop.eup %2037  ;;  %1414 = vadd.xlane.f32.xlu0 %v1413_v33  ;;  %v1231_v45 = vadd.f32 %v1230_v36, %v1215_v34  ;;  %v1302_v46 = vmul.f32 %v2036_v38, %v2470_v32  ;;  %2057 = vtanh.f32 %v833_v14  ;;  %v924_v33 = vadd.f32 %v908_v12, %v2657_v61 }
 0x260   : > { %v2040_v25 = vpop.eup %2039  ;;  %2059 = vtanh.f32 %v834_v27  ;;  %v1303_v1 = vmul.f32 %v2038_v43, %v2485_v40  ;;  %v911_v27 = vld [vmem:[%s3151_s5 + $0x350] sm:$0xff]  ;;  %v925_v34 = vadd.f32 %v909_v13, %v2513_v63  ;;  %v926_v43 = vadd.f32 %v910_v26, %v2537_v23  ;;  %v998_v13 = vld [vmem:[%s3151_s5 + $0x368] sm:$0xff]  ;;  %v1000_v26 = vld [vmem:[%s3151_s5 + $0x378] sm:$0xff] }
 0x261   : > { %v2042_v0 = vpop.eup %2041  ;;  %v1232_v50 = vadd.f32 %v1231_v45, %v1216_v44  ;;  %v1318_v2 = vadd.f32 %v1302_v46, %v1301_v39  ;;  %2061 = vtanh.f32 %v835_v30  ;;  %v1304_v11 = vmul.f32 %v2040_v25, %v2497_v48  ;;  %v912_v39 = vld [vmem:[%s3151_s5 + $0x358] sm:$0xff]  ;;  %v994_v25 = vld [vmem:[%s3151_s5 + $0x268] sm:$0xff] }
 0x262   : > { %v2044_v6 = vpop.eup %2043  ;;  %v1389_v7 = vmul.f32 %v2042_v0, %v2460_v28  ;;  %2063 = vtanh.f32 %v836_v41  ;;  %v993_v41 = vld [vmem:[%s3151_s5 + $0x260] sm:$0xff]  ;;  %v927_v44 = vadd.f32 %v911_v27, %v2561_v59 }
 0x263   : > { %v2046_v10 = vpop.eup %2045  ;;  %1233 = vadd.xlane.f32.xlu1 %v1232_v50  ;;  %v1319_v51 = vadd.f32 %v1318_v2, %v1303_v1  ;;  %v1390_v55 = vmul.f32 %v2044_v6, %v2470_v32  ;;  %2065 = vtanh.f32 %v728_v42  ;;  %v928_v50 = vadd.f32 %v912_v39, %v2585_v21  ;;  %v1085_v27 = vld [vmem:[%s3151_s5 + $0x380] sm:$0xff] }
 0x264   : > { %v2048_v14 = vpop.eup %2047  ;;  %2067 = vtanh.f32 %v729_v49  ;;  %v1391_v57 = vmul.f32 %v2046_v10, %v2485_v40  ;;  %v995_v49 = vld [vmem:[%s3151_s5 + $0x270] sm:$0xff]  ;;  %v1009_v1 = vadd.f32 %v993_v41, %v2509_v62  ;;  %v1010_v62 = vadd.f32 %v994_v25, %v2609_v58  ;;  %v1173_v25 = vld [vmem:[%s3151_s5 + $0x3a0] sm:$0xff] }
 0x265   : > { %v2050_v17 = vpop.eup %2049  ;;  %v1320_v18 = vadd.f32 %v1319_v51, %v1304_v11  ;;  %v1406_v20 = vadd.f32 %v1390_v55, %v1389_v7  ;;  %2069 = vtanh.f32 %v730_v60  ;;  %v1392_v37 = vmul.f32 %v2048_v14, %v2497_v48  ;;  %v996_v7 = vld [vmem:[%s3151_s5 + $0x278] sm:$0xff]  ;;  %v999_v14 = vld [vmem:[%s3151_s5 + $0x370] sm:$0xff] }
 0x266   : > { %v2052_v30 = vpop.eup %2051  ;;  %v777_v31 = vmul.f32 %v2050_v17, %v2460_v28  ;;  %2071 = vtanh.f32 %v731_v9  ;;  %v997_v9 = vld [vmem:[%s3151_s5 + $0x360] sm:$0xff]  ;;  %v1011_v10 = vadd.f32 %v995_v49, %v2633_v24  ;;  %v1012_v58 = vadd.f32 %v996_v7, %v2657_v61 }
 0x267   : > { %v2054_v36 = vpop.eup %2053  ;;  %1321 = vadd.xlane.f32.xlu1 %v1320_v18  ;;  %v1407_v19 = vadd.f32 %v1406_v20, %v1391_v57  ;;  %v778_v38 = vmul.f32 %v2052_v30, %v2470_v32  ;;  %2073 = vtanh.f32 %v921_v35  ;;  %v1013_v24 = vadd.f32 %v997_v9, %v2513_v63 }
 0x268   : > { %v2056_v42 = vpop.eup %2055  ;;  %2075 = vtanh.f32 %v922_v15  ;;  %v779_v47 = vmul.f32 %v2054_v36, %v2485_v40  ;;  %v1014_v61 = vadd.f32 %v998_v13, %v2537_v23  ;;  %v1261_v13 = vld [vmem:[%s3151_s5 + $0x3c0] sm:$0xff] }
 0x269   : > { %v2058_v45 = vpop.eup %2057  ;;  %v1408_v46 = vadd.f32 %v1407_v19, %v1392_v37  ;;  %v795_v22 = vadd.f32 %v778_v38, %v777_v31  ;;  %2077 = vtanh.f32 %v923_v16  ;;  %v780_v4 = vmul.f32 %v2056_v42, %v2497_v48  ;;  %v1086_v19 = vld [vmem:[%s3151_s5 + $0x388] sm:$0xff]  ;;  %v1087_v38 = vld [vmem:[%s3151_s5 + $0x390] sm:$0xff] }
 0x26a   : > { %v2060_v60 = vpop.eup %2059  ;;  %v865_v0 = vmul.f32 %v2058_v45, %v2460_v28  ;;  %2079 = vtanh.f32 %v924_v33  ;;  %v1015_v31 = vadd.f32 %v999_v14, %v2561_v59  ;;  %v1016_v42 = vadd.f32 %v1000_v26, %v2585_v21 }
 0x26b   : > { %v2062_v2 = vpop.eup %2061  ;;  %1409 = vadd.xlane.f32.xlu1 %v1408_v46  ;;  %v796_v29 = vadd.f32 %v795_v22, %v779_v47  ;;  %v866_v6 = vmul.f32 %v2060_v60, %v2470_v32  ;;  %2081 = vtanh.f32 %v925_v34  ;;  %v1088_v22 = vld [vmem:[%s3151_s5 + $0x398] sm:$0xff]  ;;  %v1102_v60 = vadd.f32 %v1086_v19, %v2537_v23  ;;  %v1349_v19 = vld [vmem:[%s3151_s5 + $0x3e0] sm:$0xff] }
 0x26c   : > { %v2064_v35 = vpop.eup %2063  ;;  %2083 = vtanh.f32 %v926_v43  ;;  %v867_v55 = vmul.f32 %v2062_v2, %v2485_v40  ;;  %v1101_v43 = vadd.f32 %v1085_v27, %v2513_v63 }
 0x26d   : > { %v2066_v11 = vpop.eup %2065  ;;  %v797_v51 = vadd.f32 %v796_v29, %v780_v4  ;;  %v883_v12 = vadd.f32 %v866_v6, %v865_v0  ;;  %2085 = vtanh.f32 %v927_v44  ;;  %v868_v18 = vmul.f32 %v2064_v35, %v2497_v48  ;;  %v1174_v29 = vld [vmem:[%s3151_s5 + $0x3a8] sm:$0xff]  ;;  %v1175_v6 = vld [vmem:[%s3151_s5 + $0x3b0] sm:$0xff] }
 0x26e   : > { %v2068_v15 = vpop.eup %2067  ;;  %v781_v16 = vmul.f32 %v2066_v11, %v2460_v28  ;;  %2087 = vtanh.f32 %v928_v50  ;;  %v1103_v0 = vadd.f32 %v1087_v38, %v2561_v59  ;;  %v1104_v35 = vadd.f32 %v1088_v22, %v2585_v21 }
 0x26f   : > { %v2070_v17 = vpop.eup %2069  ;;  %798 = vadd.xlane.f32.xlu1 %v797_v51  ;;  %v884_v57 = vadd.f32 %v883_v12, %v867_v55  ;;  %v782_v20 = vmul.f32 %v2068_v15, %v2470_v32  ;;  %2089 = vtanh.f32 %v1009_v1  ;;  %v1176_v12 = vld [vmem:[%s3151_s5 + $0x3b8] sm:$0xff]  ;;  %v1190_v15 = vadd.f32 %v1174_v29, %v2537_v23 }
 0x270   : > { %v2072_v30 = vpop.eup %2071  ;;  %2091 = vtanh.f32 %v1010_v62  ;;  %v783_v36 = vmul.f32 %v2070_v17, %v2485_v40  ;;  %v1189_v62 = vadd.f32 %v1173_v25, %v2513_v63 }
 0x271   : > { %v2074_v33 = vpop.eup %2073  ;;  %v885_v34 = vadd.f32 %v884_v57, %v868_v18  ;;  %v800_v37 = vadd.f32 %v782_v20, %v781_v16  ;;  %2093 = vtanh.f32 %v1011_v10  ;;  %v784_v45 = vmul.f32 %v2072_v30, %v2497_v48  ;;  %v1262_v57 = vld [vmem:[%s3151_s5 + $0x3c8] sm:$0xff]  ;;  %v1263_v20 = vld [vmem:[%s3151_s5 + $0x3d0] sm:$0xff] }
 0x272   : > { %v2076_v39 = vpop.eup %2075  ;;  %v953_v41 = vmul.f32 %v2074_v33, %v2460_v28  ;;  %2095 = vtanh.f32 %v1012_v58  ;;  %v1191_v16 = vadd.f32 %v1175_v6, %v2561_v59  ;;  %v1192_v30 = vadd.f32 %v1176_v12, %v2585_v21 }
 0x273   : > { %v2078_v44 = vpop.eup %2077  ;;  %886 = vadd.xlane.f32.xlu1 %v885_v34  ;;  %v801_v46 = vadd.f32 %v800_v37, %v783_v36  ;;  %v954_v47 = vmul.f32 %v2076_v39, %v2470_v32  ;;  %2097 = vtanh.f32 %v1013_v24  ;;  %v1264_v37 = vld [vmem:[%s3151_s5 + $0x3d8] sm:$0xff]  ;;  %v1278_v39 = vadd.f32 %v1262_v57, %v2537_v23 }
 0x274   : > { %v2080_v49 = vpop.eup %2079  ;;  %2099 = vtanh.f32 %v1014_v61  ;;  %v955_v2 = vmul.f32 %v2078_v44, %v2485_v40  ;;  %v1277_v61 = vadd.f32 %v1261_v13, %v2513_v63 }
 0x275   : > { %v2082_v50 = vpop.eup %2081  ;;  %v802_v1 = vadd.f32 %v801_v46, %v784_v45  ;;  %v971_v4 = vadd.f32 %v954_v47, %v953_v41  ;;  %2101 = vtanh.f32 %v1015_v31  ;;  %v956_v11 = vmul.f32 %v2080_v49, %v2497_v48  ;;  %v1350_v46 = vld [vmem:[%s3151_s5 + $0x3e8] sm:$0xff]  ;;  %v1351_v47 = vld [vmem:[%s3151_s5 + $0x3f0] sm:$0xff] }
 0x276   : > { %v2084_v7 = vpop.eup %2083  ;;  %v957_v9 = vmul.f32 %v2082_v50, %v2460_v28  ;;  %2103 = vtanh.f32 %v1016_v42  ;;  %v1279_v41 = vadd.f32 %v1263_v20, %v2561_v59  ;;  %v1280_v49 = vadd.f32 %v1264_v37, %v2585_v21 }
 0x277   : > { %v2086_v10 = vpop.eup %2085  ;;  %803 = vadd.xlane.f32.xlu1 %v802_v1  ;;  %v972_v51 = vadd.f32 %v971_v4, %v955_v2  ;;  %v958_v55 = vmul.f32 %v2084_v7, %v2470_v32  ;;  %2105 = vtanh.f32 %v1101_v43  ;;  %v1352_v4 = vld [vmem:[%s3151_s5 + $0x3f8] sm:$0xff]  ;;  %v1366_v6 = vadd.f32 %v1350_v46, %v2537_v23 }
 0x278   : > { %v2088_v14 = vpop.eup %2087  ;;  %2107 = vtanh.f32 %v1102_v60  ;;  %v959_v17 = vmul.f32 %v2086_v10, %v2485_v40  ;;  %v1365_v60 = vadd.f32 %v1349_v19, %v2513_v63  ;;  %v1367_v7 = vadd.f32 %v1351_v47, %v2561_v59 }
 0x279   : > { %v2090_v58 = vpop.eup %2089  ;;  %v973_v24 = vadd.f32 %v972_v51, %v956_v11  ;;  %v976_v18 = vadd.f32 %v958_v55, %v957_v9  ;;  %2109 = vtanh.f32 %v1103_v0  ;;  %v960_v33 = vmul.f32 %v2088_v14, %v2497_v48 }
 0x27a   : > { %v2092_v26 = vpop.eup %2091  ;;  %v1041_v27 = vmul.f32 %v2090_v58, %v2460_v28  ;;  %2111 = vtanh.f32 %v1104_v35  ;;  %v1368_v51 = vadd.f32 %v1352_v4, %v2585_v21 }
 0x27b   : > { %v2094_v31 = vpop.eup %2093  ;;  %974 = vadd.xlane.f32.xlu1 %v973_v24  ;;  %v977_v34 = vadd.f32 %v976_v18, %v959_v17  ;;  %v1042_v36 = vmul.f32 %v2092_v26, %v2470_v32  ;;  %2113 = vtanh.f32 %v1189_v62 }
 0x27c   : > { %v2096_v38 = vpop.eup %2095  ;;  %2115 = vtanh.f32 %v1190_v15  ;;  %v1043_v44 = vmul.f32 %v2094_v31, %v2485_v40 }
 0x27d   : > { %v2098_v42 = vpop.eup %2097  ;;  %v978_v43 = vadd.f32 %v977_v34, %v960_v33  ;;  %v1059_v45 = vadd.f32 %v1042_v36, %v1041_v27  ;;  %2117 = vtanh.f32 %v1191_v16  ;;  %v1044_v50 = vmul.f32 %v2096_v38, %v2497_v48 }
 0x27e   : > { %v2100_v22 = vpop.eup %2099  ;;  %v1045_v25 = vmul.f32 %v2098_v42, %v2460_v28  ;;  %2119 = vtanh.f32 %v1192_v30 }
 0x27f   : > { %v2102_v0 = vpop.eup %2101  ;;  %979 = vadd.xlane.f32.xlu1 %v978_v43  ;;  %v1060_v1 = vadd.f32 %v1059_v45, %v1043_v44  ;;  %v1046_v2 = vmul.f32 %v2100_v22, %v2470_v32  ;;  %2121 = vtanh.f32 %v1277_v61 }
 0x280   : > { %v2104_v29 = vpop.eup %2103  ;;  %2123 = vtanh.f32 %v1278_v39  ;;  %v1047_v35 = vmul.f32 %v2102_v0, %v2485_v40 }
 0x281   : > { %v2106_v9 = vpop.eup %2105  ;;  %v1061_v63 = vadd.f32 %v1060_v1, %v1044_v50  ;;  %v1064_v62 = vadd.f32 %v1046_v2, %v1045_v25  ;;  %2125 = vtanh.f32 %v1279_v41  ;;  %v1048_v12 = vmul.f32 %v2104_v29, %v2497_v48 }
 0x282   : > { %v2108_v10 = vpop.eup %2107  ;;  %v1133_v11 = vmul.f32 %v2106_v9, %v2460_v28  ;;  %2127 = vtanh.f32 %v1280_v49 }
 0x283   : > { %v2110_v55 = vpop.eup %2109  ;;  %1062 = vadd.xlane.f32.xlu1 %v1061_v63  ;;  %v1065_v13 = vadd.f32 %v1064_v62, %v1047_v35  ;;  %v1134_v23 = vmul.f32 %v2108_v10, %v2470_v32  ;;  %2129 = vtanh.f32 %v1365_v60 }
 0x284   : > { %v2112_v59 = vpop.eup %2111  ;;  %2131 = vtanh.f32 %v1366_v6  ;;  %v1135_v16 = vmul.f32 %v2110_v55, %v2485_v40 }
 0x285   : > { %v2114_v14 = vpop.eup %2113  ;;  %v1066_v15 = vadd.f32 %v1065_v13, %v1048_v12  ;;  %v1152_v58 = vadd.f32 %v1134_v23, %v1133_v11  ;;  %2133 = vtanh.f32 %v1367_v7  ;;  %v1136_v18 = vmul.f32 %v2112_v59, %v2497_v48 }
 0x286   : > { %v2116_v24 = vpop.eup %2115  ;;  %v1221_v17 = vmul.f32 %v2114_v14, %v2460_v28  ;;  %2135 = vtanh.f32 %v1368_v51 }
 0x287   : > { %v2118_v21 = vpop.eup %2117  ;;  %1067 = vadd.xlane.f32.xlu1 %v1066_v15  ;;  %v1153_v57 = vadd.f32 %v1152_v58, %v1135_v16  ;;  %v1222_v20 = vmul.f32 %v2116_v24, %v2470_v32 }
 0x288   : > { %v2120_v26 = vpop.eup %2119  ;;  %v1223_v61 = vmul.f32 %v2118_v21, %v2485_v40 }
 0x289   : > { %v2122_v27 = vpop.eup %2121  ;;  %v1154_v30 = vadd.f32 %v1153_v57, %v1136_v18  ;;  %v1240_v31 = vadd.f32 %v1222_v20, %v1221_v17  ;;  %v1224_v37 = vmul.f32 %v2120_v26, %v2497_v48 }
 0x28a   : > { %v2124_v33 = vpop.eup %2123  ;;  %v1309_v34 = vmul.f32 %v2122_v27, %v2460_v28 }
 0x28b   : > { %v2126_v36 = vpop.eup %2125  ;;  %1155 = vadd.xlane.f32.xlu1 %v1154_v30  ;;  %v1241_v19 = vadd.f32 %v1240_v31, %v1223_v61  ;;  %v1310_v38 = vmul.f32 %v2124_v33, %v2470_v32 }
 0x28c   : > { %v2128_v39 = vpop.eup %2127  ;;  %v1311_v43 = vmul.f32 %v2126_v36, %v2485_v40 }
 0x28d   : > { %v2130_v41 = vpop.eup %2129  ;;  %v1242_v42 = vadd.f32 %v1241_v19, %v1224_v37  ;;  %v1328_v44 = vadd.f32 %v1310_v38, %v1309_v34  ;;  %v1312_v22 = vmul.f32 %v2128_v39, %v2497_v48 }
 0x28e   : > { %v2132_v45 = vpop.eup %2131  ;;  %v1397_v46 = vmul.f32 %v2130_v41, %v2460_v28 }
 0x28f   : > { %v2134_v47 = vpop.eup %2133  ;;  %1243 = vadd.xlane.f32.xlu1 %v1242_v42  ;;  %v1329_v25 = vadd.f32 %v1328_v44, %v1311_v43  ;;  %v1398_v49 = vmul.f32 %v2132_v45, %v2470_v32 }
 0x290   : > { %v2136_v60 = vpop.eup %2135  ;;  %v1399_v50 = vmul.f32 %v2134_v47, %v2485_v40 }
 0x291   : > { %v1330_v0 = vadd.f32 %v1329_v25, %v1312_v22  ;;  %v1416_v1 = vadd.f32 %v1398_v49, %v1397_v46  ;;  %v1400_v2 = vmul.f32 %v2136_v60, %v2497_v48  ;;  %v1430_v49 = vand.u32 127, %v343_v52 }
 0x293   : > { %1331 = vadd.xlane.f32.xlu1 %v1330_v0  ;;  %v1417_v4 = vadd.f32 %v1416_v1, %v1399_v50 }
 0x295   : > { %v1418_v29 = vadd.f32 %v1417_v4, %v1400_v2 }
 0x297   : > { %1419 = vadd.xlane.f32.xlu1 %v1418_v29 }
 0x2a8   : > { %v1141_v51 = vpop.xlane.xlu0 %1140 }
 0x2ac   : > { %v789_v6 = vpop.xlane.xlu1 %788 }
 0x2b0   : > { %v1229_v12 = vpop.xlane.xlu0 %1228 }
 0x2b4   : > { %v794_v28 = vpop.xlane.xlu1 %793 }
 0x2b8   : > { %v1317_v23 = vpop.xlane.xlu0 %1316 }
 0x2bc   : > { %v877_v7 = vpop.xlane.xlu1 %876 }
 0x2bd   : > { %v893_v9 = vadd.f32 %v877_v7, %v789_v6  ;;  %v1433_v6 = vsub.s32 %v1430_v49, %v2327_v53 }
 0x2c0   : > { %v1405_v14 = vpop.xlane.xlu0 %1404 }
 0x2c4   : > { %v882_v63 = vpop.xlane.xlu1 %881 }
 0x2c5   : > { %v894_v30 = vadd.f32 %v882_v63, %v794_v28 }
 0x2c8   : > { %v892_v16 = vpop.xlane.xlu0 %891 }
 0x2cc   : > { %v965_v35 = vpop.xlane.xlu1 %964 }
 0x2cd   : > { %v981_v18 = vadd.f32 %v965_v35, %v893_v9 }
 0x2d0   : > { %v970_v62 = vpop.xlane.xlu1 %969 }
 0x2d1   : > { %v982_v34 = vadd.f32 %v970_v62, %v894_v30 }
 0x2d4   : > { %v1151_v17 = vpop.xlane.xlu0 %1150 }
 0x2d8   : > { %v1053_v10 = vpop.xlane.xlu1 %1052 }
 0x2d9   : > { %v1069_v26 = vadd.f32 %v1053_v10, %v981_v18 }
 0x2db   : > { %v1157_v36 = vadd.f32 %v1141_v51, %v1069_v26 }
 0x2dc   : > { %v1239_v61 = vpop.xlane.xlu0 %1238 }
 0x2dd   : > { %v1245_v39 = vadd.f32 %v1229_v12, %v1157_v36 }
 0x2df   : > { %v1333_v22 = vadd.f32 %v1317_v23, %v1245_v39 }
 0x2e0   : > { %v1058_v32 = vpop.xlane.xlu1 %1057 }
 0x2e1   : > { %v1070_v37 = vadd.f32 %v1058_v32, %v982_v34  ;;  %v1421_v29 = vadd.f32 %v1405_v14, %v1333_v22 }
 0x2e3   : > { %v1434_v10 = vrot.slane %v1421_v29, %v1433_v6 }
 0x2e4   : > { %v1327_v41 = vpop.xlane.xlu0 %1326 }
 0x2e8   : > { %v1146_v11 = vpop.xlane.xlu1 %1145 }
 0x2e9   : > { %v1158_v42 = vadd.f32 %v1146_v11, %v1070_v37 }
 0x2ec   : > { %v1415_v0 = vpop.xlane.xlu0 %1414 }
 0x2f0   : > { %v1234_v55 = vpop.xlane.xlu1 %1233 }
 0x2f1   : > { %v1246_v44 = vadd.f32 %v1234_v55, %v1158_v42  ;;  %v2160_v55 = vmov 0  }
 0x2f2   : > { %1868 = vset.pattern.permute.xlu0 %v2160_v55  ;;  %1867 = vset.pattern.permute.xlu1 %v2160_v55 }
 0x2f4   : > { %v1322_v40 = vpop.xlane.xlu1 %1321 }
 0x2f5   : > { %v1334_v25 = vadd.f32 %v1322_v40, %v1246_v44 }
 0x2f8   : > { %v1410_v13 = vpop.xlane.xlu1 %1409 }
 0x2f9   : > { %v1422_v50 = vadd.f32 %v1410_v13, %v1334_v25 }
 0x2fb   : > { %v1438_v7 = vrot.slane %v1422_v50, %v1433_v6 }
 0x2fc   : > { %v799_v48 = vpop.xlane.xlu1 %798 }
 0x2fd   : > { %v1448_v32 = vsel %vm1447_vm3, %v1438_v7, %v1434_v10 }
 0x300   : > { %v887_v59 = vpop.xlane.xlu1 %886 }
 0x301   : > { %v895_v21 = vadd.f32 %v887_v59, %v799_v48 }
 0x304   : > { %v804_v15 = vpop.xlane.xlu1 %803 }
 0x305   : > { %v896_v43 = vadd.f32 %v892_v16, %v804_v15 }
 0x308   : > { %v975_v58 = vpop.xlane.xlu1 %974 }
 0x309   : > { %v983_v57 = vadd.f32 %v975_v58, %v895_v21 }
 0x30c   : > { %v980_v24 = vpop.xlane.xlu1 %979 }
 0x30d   : > { %v984_v45 = vadd.f32 %v980_v24, %v896_v43 }
 0x310   : > { %v1063_v20 = vpop.xlane.xlu1 %1062 }
 0x311   : > { %v1071_v27 = vadd.f32 %v1063_v20, %v983_v57 }
 0x313   : > { %v1159_v31 = vadd.f32 %v1151_v17, %v1071_v27 }
 0x314   : > { %v1068_v33 = vpop.xlane.xlu1 %1067 }
 0x315   : > { %v1247_v19 = vadd.f32 %v1239_v61, %v1159_v31  ;;  %v1072_v60 = vadd.f32 %v1068_v33, %v984_v45 }
 0x317   : > { %v1335_v46 = vadd.f32 %v1327_v41, %v1247_v19 }
 0x318   : > { %v1156_v38 = vpop.xlane.xlu1 %1155 }
 0x319   : > { %v1160_v1 = vadd.f32 %v1156_v38, %v1072_v60  ;;  %v1423_v2 = vadd.f32 %v1415_v0, %v1335_v46  ;;  %v1556_v0 = vld [vmem:[%s3152_s6] sm:$0xff] }
 0x31b   : > { %v1442_v35 = vrot.slane %v1423_v2, %v1433_v6 }
 0x31c   : > { %v1244_v47 = vpop.xlane.xlu1 %1243 }
 0x31d   : > { %v1248_v28 = vadd.f32 %v1244_v47, %v1160_v1  ;;  %v1450_v11 = vsel %vm1449_vm4, %v1442_v35, %v1448_v32  ;;  %v1559_v35 = vld [vmem:[%s3152_s6 + $0x18] sm:$0xff] }
 0x320   : > { %v1332_v4 = vpop.xlane.xlu1 %1331 }
 0x321   : > { %v1336_v9 = vadd.f32 %v1332_v4, %v1248_v28 }
 0x324   : > { %v1420_v63 = vpop.xlane.xlu1 %1419 }
 0x325   : > { %v1424_v62 = vadd.f32 %v1420_v63, %v1336_v9 }
 0x327   : > { %v1446_v52 = vrot.slane %v1424_v62, %v1433_v6 }
 0x329   : > { %v1452_v51 = vsel %vm1451_vm5, %v1446_v52, %v1450_v11 }
 0x32a   : > { %v1455_v53 = vsel %vm1454_vm6, %v1452_v51, -inf }
 0x32b   : > { %1456 = vmax.xlane.f32.xlu0 %v1455_v53 }
 0x3b8   : > { %v1457_v40 = vpop.xlane.xlu0 %1456 }
 0x3b9   : > { %v1462_v12 = vrot.slane %v1457_v40, %v2330_v54  ;;  %v1466_v13 = vrot.slane %v1457_v40, %v2336_v56  ;;  %v1470_v23 = vrot.slane %v1457_v40, %v2343_v3  ;;  %v1474_v48 = vrot.slane %v1457_v40, %v2347_v5 }
 0x3bb   : > { %v1479_v59 = vsub.f32 %v1421_v29, %v1462_v12  ;;  %v1480_v14 = vsub.f32 %v1422_v50, %v1466_v13  ;;  %v1481_v15 = vsub.f32 %v1423_v2, %v1470_v23  ;;  %v1482_v24 = vsub.f32 %v1424_v62, %v1474_v48 }
 0x3bd   : > { %v1483_v16 = vmul.f32 1.442695, %v1479_v59  ;;  %v1485_v58 = vmul.f32 1.442695, %v1480_v14  ;;  %v1487_v17 = vmul.f32 1.442695, %v1481_v15 }
 0x3be   : > { %v1489_v21 = vmul.f32 1.442695, %v1482_v24 }
 0x3bf   : > { %2137 = vpow2.f32 %v1483_v16 }
 0x3c0   : > { %2139 = vpow2.f32 %v1485_v58 }
 0x3c1   : > { %2141 = vpow2.f32 %v1487_v17 }
 0x3c2   : > { %2143 = vpow2.f32 %v1489_v21 }
 0x3c9   : > { %v2138_v18 = vpop.eup %2137 }
 0x3ca   : > { %v2140_v57 = vpop.eup %2139  ;;  %1496 = vperm.xlu1 %1867, %v2138_v18  }
 0x3cb   : > { %1499 = vperm.xlu0 %1868, %v2140_v57   ;;  %v2142_v20 = vpop.eup %2141 }
 0x3cc   : > { %v2144_v26 = vpop.eup %2143 }
 0x3ce   : > { %1502 = vperm.xlu1 %1867, %v2142_v20  }
 0x3d2   : > { %1505 = vperm.xlu1 %1867, %v2144_v26  }
 0x449   : > { %v1497_v27 = vpop.permute.xlu1 %1496 }
 0x44a   : > { %v1500_v30 = vpop.permute.xlu0 %1499  ;;  %v1510_v33 = vrot.slane %v1497_v27, %v1433_v6 }
 0x44b   : > { %v1514_v31 = vrot.slane %v1500_v30, %v1433_v6  ;;  %v1778_v30 = vld [vmem:[%s3154_s8] ss:$0 sm:$0xff] }
 0x44d   : > { %v1503_v61 = vpop.permute.xlu1 %1502  ;;  %v1523_v37 = vsel %vm1447_vm3, %v1514_v31, %v1510_v33 }
 0x44e   : > { %v1518_v34 = vrot.slane %v1503_v61, %v1433_v6 }
 0x450   : > { %v1524_v38 = vsel %vm1449_vm4, %v1518_v34, %v1523_v37 }
 0x451   : > { %v1506_v36 = vpop.permute.xlu1 %1505 }
 0x452   : > { %v1522_v19 = vrot.slane %v1506_v36, %v1433_v6 }
 0x454   : > { %v1525_v39 = vsel %vm1451_vm5, %v1522_v19, %v1524_v38 }
 0x455   : > { %v1527_v41 = vsel %vm1454_vm6, %v1525_v39, 0.0 }
 0x456   : > { %1528 = vadd.xlane.f32.xlu1 %v1527_v41 }
 0x4e3   : > { %v1529_v42 = vpop.xlane.xlu1 %1528 }
 0x4e4   : > { %2145 = vrcp.f32 %v1529_v42 }
 0x4ee   : > { %v2146_v43 = vpop.eup %2145 }
 0x4ef   : > { %v1535_v44 = vrot.slane %v2146_v43, %v2330_v54  ;;  %v1539_v46 = vrot.slane %v2146_v43, %v2336_v56  ;;  %v1543_v22 = vrot.slane %v2146_v43, %v2343_v3  ;;  %v1547_v49 = vrot.slane %v2146_v43, %v2347_v5  ;;  %v1557_v56 = vld [vmem:[%s3152_s6 + $0x8] sm:$0xff]  ;;  %v1558_v5 = vld [vmem:[%s3152_s6 + $0x10] sm:$0xff] }
 0x4f1   : > { %v1552_v45 = vmul.f32 %v2138_v18, %v1535_v44  ;;  %v1553_v47 = vmul.f32 %v2140_v57, %v1539_v46  ;;  %v1554_v25 = vmul.f32 %v2142_v20, %v1543_v22  ;;  %v1555_v60 = vmul.f32 %v2144_v26, %v1547_v49 }
 0x4f3   : > { %1562 = vperm.xlu0 %1868, %v1552_v45  }
 0x4f7   : > { %1567 = vperm.xlu0 %1868, %v1553_v47  }
 0x4fb   : > { %1572 = vperm.xlu0 %1868, %v1554_v25  }
 0x4ff   : > { %1577 = vperm.xlu0 %1868, %v1555_v60  }
 0x572   : > { %v1563_v54 = vpop.permute.xlu0 %1562 }
 0x573   : > { %v1580_v50 = vmul.f32 %v1563_v54, %v1556_v0 }
 0x575   : > { %v1585_v3 = vsel %vm1584_vm7, %v1580_v50, 0.0 }
 0x576   : > { %v1586_v1 = vrot.slane %v1585_v3, 4  ;;  %v1568_v2 = vpop.permute.xlu0 %1567 }
 0x577   : > { %v1581_v4 = vmul.f32 %v1568_v2, %v1557_v56 }
 0x578   : > { %v1587_v6 = vadd.f32 %v1586_v1, %v1585_v3 }
 0x579   : > { %v1592_v29 = vsel %vm1584_vm7, %v1581_v4, 0.0 }
 0x57a   : > { %v1593_v28 = vrot.slane %v1592_v29, 4  ;;  %v1573_v7 = vpop.permute.xlu0 %1572  ;;  %v1588_v10 = vrot.slane %v1587_v6, 2 }
 0x57b   : > { %v1582_v9 = vmul.f32 %v1573_v7, %v1558_v5 }
 0x57c   : > { %v1594_v63 = vadd.f32 %v1593_v28, %v1592_v29  ;;  %v1589_v12 = vadd.f32 %v1588_v10, %v1587_v6 }
 0x57d   : > { %v1599_v62 = vsel %vm1584_vm7, %v1582_v9, 0.0 }
 0x57e   : > { %v1595_v52 = vrot.slane %v1594_v63, 2  ;;  %v1600_v32 = vrot.slane %v1599_v62, 4  ;;  %v1578_v11 = vpop.permute.xlu0 %1577  ;;  %v1590_v15 = vrot.slane %v1589_v12, 1 }
 0x57f   : > { %v1583_v51 = vmul.f32 %v1578_v11, %v1559_v35 }
 0x580   : > { %v1596_v53 = vadd.f32 %v1595_v52, %v1594_v63  ;;  %v1601_v55 = vadd.f32 %v1600_v32, %v1599_v62  ;;  %v1591_v18 = vadd.f32 %v1590_v15, %v1589_v12 }
 0x581   : > { %v1606_v40 = vsel %vm1584_vm7, %v1583_v51, 0.0 }
 0x582   : > { %v1602_v13 = vrot.slane %v1601_v55, 2  ;;  %v1607_v23 = vrot.slane %v1606_v40, 4  ;;  %v1597_v48 = vrot.slane %v1596_v53, 1 }
 0x584   : > { %v1603_v59 = vadd.f32 %v1602_v13, %v1601_v55  ;;  %v1608_v14 = vadd.f32 %v1607_v23, %v1606_v40  ;;  %v1598_v24 = vadd.f32 %v1597_v48, %v1596_v53 }
 0x586   : > { %v1604_v16 = vrot.slane %v1603_v59, 1  ;;  %v1609_v58 = vrot.slane %v1608_v14, 2  ;;  %v1625_v20 = vsel %vm1447_vm3, %v1598_v24, %v1591_v18 }
 0x588   : > { %v1610_v17 = vadd.f32 %v1609_v58, %v1608_v14  ;;  %v1605_v21 = vadd.f32 %v1604_v16, %v1603_v59 }
 0x58a   : > { %v1611_v57 = vrot.slane %v1610_v17, 1  ;;  %v1626_v27 = vsel %vm1449_vm4, %v1605_v21, %v1625_v20 }
 0x58c   : > { %v1612_v26 = vadd.f32 %v1611_v57, %v1610_v17 }
 0x58e   : > { %v1627_v61 = vsel %vm1451_vm5, %v1612_v26, %v1626_v27 }
 0x58f   : > { %v1699_v31 = vadd.f32 %v2417_v8, %v1627_v61 }
 0x591   : > { %v1709_v33 = vadd.f32 %v1778_v30, %v1699_v31 }
 0x593   : > { %1711 = vst.msk [vmem:[%s327_s28] sm:$0xf] %vm1710_vm8, %v1709_v33 }
 0x594 PF: > { %s19_s30 = sadd.s32 1, %s2153_s30  }
 0x595   : > { %p16_p4 = scmp.ge.s32.totalorder %s19_s30, 7  }
 0x597   :  { %18 = sbr.rel (!%p16_p4) target bundleno = 1 (0x1), region = 86 }

// kernel: geoman2_forward.2
= control target key start
LH: loop header
LB: loop body
LE: loop exit
PB: predicated region body
PF: predicated region fallthrough
CT: control target
= control target key end

     0   :  { %vm73_vm0 = vcmask 1045504   ;;  %v6461_v2 = vmov 0.0   ;;  %vm69_vm1 = vcmask 48128   ;;  %vm157_vm2 = vcmask 1043456   ;;  %s6464_s13 = smov 64   ;;  %s8115_s8 = inlined_call_operand.vmem [shape: f32[6,192], index: 8, kind: input, shape index: {}]   ;;  %s8116_s1 = inlined_call_operand.vmem [shape: f32[8,4,6], index: 1, kind: input, shape index: {}]   ;;  %s8117_s6 = inlined_call_operand.vmem [shape: f32[4,6], index: 6, kind: input, shape index: {}]   ;;  %s8118_s7 = inlined_call_operand.vmem [shape: f32[4,192], index: 7, kind: input, shape index: {}]   ;;  %s8119_s0 = inlined_call_operand.vmem [shape: f32[8,4,4], index: 0, kind: input, shape index: {}]   ;;  %s8120_s5 = inlined_call_operand.vmem [shape: f32[4,4], index: 5, kind: input, shape index: {}]   ;;  %s8121_s10 = inlined_call_operand.vmem [shape: f32[64,128], index: 10, kind: input, shape index: {}]   ;;  %s8122_s9 = inlined_call_operand.vmem [shape: f32[1,192], index: 9, kind: input, shape index: {}]   ;;  %s8123_s12 = inlined_call_operand.vmem [shape: f32[8,4,64], index: 12, kind: output, shape index: {}]   ;;  %s8124_s4 = inlined_call_operand.vmem [shape: f32[4,6], index: 4, kind: input, shape index: {}]   ;;  %s8125_s3 = inlined_call_operand.vmem [shape: f32[4,6,64], index: 3, kind: input, shape index: {}]   ;;  %s8126_s11 = inlined_call_operand.vmem [shape: f32[2,64], index: 11, kind: input, shape index: {}]   ;;  %s8127_s2 = inlined_call_operand.vmem [shape: f32[4,4,64], index: 2, kind: input, shape index: {}]  }
   0x1   :  { %v6535_v0 = vld [vmem:[%s8115_s8 + $0x8] sm:$0x3f]  ;;  %v6540_v1 = vld [vmem:[%s8115_s8] sm:$0x3f]  ;;  %144 = vmatprep.mubr.f32.mxu0 %v6461_v2  ;;  %vm153_vm3 = vcmask 31744   ;;  %v6462_v11 = vmov 0.0|0.0   ;;  %v234_v24 = vlaneseq }
   0x2   :  { %v64_v3 = vld [vmem:[%s8117_s6] sm:$0xf]  ;;  %5685 = vmatprep.subr.msk.mxu0 %vm73_vm0, %v6535_v0  ;;  %5973 = vmatprep.subr.bf16.mxu1 %v6462_v11  ;;  %v55_v13 = vld [vmem:[%s8121_s10 + $0x8] sm:$0xff]  ;;  %v56_v14 = vld [vmem:[%s8121_s10 + $0x10] sm:$0xff]  ;;  %vm6463_vm4 = vmmov 0   ;;  %vm268_vm5 = vcmask 523264  }
   0x3   :  { %v67_v4 = vld [vmem:[%s8116_s1] sm:$0xf]  ;;  %5686 = vmatpush1.msk.msra.mxu0 %vm73_vm0, %v6540_v1  ;;  %v57_v16 = vld [vmem:[%s8121_s10 + $0x18] sm:$0xff]  ;;  %v59_v19 = vld [vmem:[%s8121_s10 + $0x28] sm:$0xff]  ;;  %v6625_v25 = vshrl.u32 %v234_v24, 7  ;;  %5856 = vmatprep.mubr.msk.f32.mxu1 %vm6463_vm4, %v6461_v2  ;;  %vm266_vm6 = vcmask 519168  }
   0x4   :  { %v6554_v5 = vld [vmem:[%s8118_s7] sm:$0xff]  ;;  %v68_v6 = vmul.f32 %v67_v4, %v64_v3  ;;  %v6598_v17 = vpack.c.bf16 %v57_v16, %v56_v14  ;;  %v60_v21 = vld [vmem:[%s8121_s10 + $0x30] sm:$0xff]  ;;  %v61_v22 = vld [vmem:[%s8121_s10 + $0x38] sm:$0xff]  ;;  %v6465_v48 = vmov 1966171168   ;;  %vm574_vm7 = vcmask 521216  }
   0x5   :  { %v6560_v7 = vcombine.high %v6554_v5, %v6554_v5  ;;  %v63_v8 = vld [vmem:[%s8120_s5] sm:$0xf]  ;;  %v6618_v23 = vpack.c.bf16 %v61_v22, %v60_v21  ;;  %v6628_v26 = vsub.s32 0, %v6625_v25  ;;  %v6641_v34 = vsub.s32 1, %v6625_v25  ;;  %v6696_v16 = vld [vmem:[%s8125_s3 + $0x18] sm:$0x3f] }
   0x6   :  { %5687 = vmatmul.mubr.msk.f32.vlgmr.msra.gmra.mrb[0].mxu0 %vm69_vm1, %v68_v6  ;;  %v65_v9 = vld [vmem:[%s8119_s0] sm:$0xf]  ;;  %v344_v49 = vunpack.c.l.s4 %v6465_v48  ;;  %v6702_v21 = vld [vmem:[%s8125_s3 + $0x10] sm:$0x3f]  ;;  %v6466_v48 = vmov 0   ;;  %vm437_vm8 = vcmask 1041409  }
   0x7   :  { %5688 = vmatprep.subr.msk.mxu0 %vm157_vm2, %v6560_v7  ;;  %226 = vmatprep.mubr.f32.mxu0 %v6461_v2  ;;  %v66_v10 = vmul.f32 %v65_v9, %v63_v8  ;;  %v54_v12 = vld [vmem:[%s8121_s10] sm:$0xff]  ;;  %vm439_vm9 = vcmask 1042434   ;;  %vm441_vm10 = vcmask 1043459   ;;  %vm665_vm11 = vcmask 44032  }
   0x8   :  { %5689 = vmatpush1.msk.msra.mxu0 %vm157_vm2, %v6554_v5  ;;  %v6592_v15 = vpack.c.bf16 %v55_v13, %v54_v12  ;;  %v58_v18 = vld [vmem:[%s8121_s10 + $0x20] sm:$0xff]  ;;  %v345_v50 = vunpack.c.0.s8 %v344_v49  ;;  %v6690_v12 = vld [vmem:[%s8125_s3 + $0x8] sm:$0x3f]  ;;  %6079 = vset.pattern.permute.xlu1 %v6466_v48  ;;  %v6725_v49 = vsub.s32 3, %v6625_v25  ;;  %vm444_vm12 = vcmask 27648  }
   0x9   :  { %5696 = vmatprep.subr.msk.mxu0 %vm73_vm0, %v6535_v0  ;;  %v6608_v20 = vpack.c.bf16 %v59_v19, %v58_v18  ;;  %v53_v27 = vld [vmem:[%s8122_s9] sm:$0x3]  ;;  %6080 = vset.pattern.permute.xlu0 %v6466_v48 }
   0xa   :  { %5975 = vmatpush3.bf16.msra.mxu1 %v6592_v15  ;;  %v6634_v28 = vrot.slane %v53_v27, %v6628_v26  ;;  %v6644_v35 = vrot.slane %v53_v27, %v6641_v34  ;;  %v6658_v51 = vsub.s32 %v345_v50, %v6625_v25  ;;  %v49_v59 = vld [vmem:[%s8124_s4] sm:$0xf] }
   0xb   :  { %5976 = vmatprep.subr.bf16.mxu1 %v6462_v11  ;;  %v591_v3 = vmul.f32 0.3, %v49_v59  ;;  %v6685_v9 = vld [vmem:[%s8125_s3] sm:$0x3f] }
   0xd   :  { %v596_v6 = vrot.slane %v591_v3, %v6628_v26  ;;  %v603_v8 = vrot.slane %v591_v3, %v6641_v34  ;;  %v617_v50 = vrot.slane %v591_v3, %v6725_v49 }
   0xe   :  { %5690 = vmatmul.mubr.msk.f32.vlgmr.msra.gmra.mrb[0].mxu0 %vm153_vm3, %v66_v10  ;;  %5978 = vmatpush3.bf16.msra.mxu1 %v6598_v17 }
   0xf   :  { %5697 = vmatpush1.msk.msra.mxu0 %vm73_vm0, %v6540_v1  ;;  %946 = vmatprep.mubr.f32.mxu0 %v6461_v2 }
  0x10   :  { %5699 = vmatprep.subr.msk.mxu0 %vm157_vm2, %v6560_v7  ;;  %5979 = vmatprep.subr.bf16.mxu1 %v6462_v11 }
  0x12   :  { %5981 = vmatpush3.bf16.msra.mxu1 %v6608_v20 }
  0x13   :  { %5982 = vmatprep.subr.bf16.mxu1 %v6462_v11 }
  0x16   :  { %5984 = vmatpush3.bf16.msra.mxu1 %v6618_v23 }
  0x17   :  { %5708 = vmatprep.subr.msk.mxu1 %vm73_vm0, %v6535_v0 }
  0xe1   :  { %v228_v29 = vpop.f32.mrb[0].mxu0 }
  0xe2   :  { %v244_v30 = vadd.f32 %v6634_v28, %v228_v29  ;;  %v230_v31 = vpop.f32.mrb[1].mxu0 }
  0xe3   :  { %v245_v36 = vadd.f32 %v6644_v35, %v230_v31 }
  0xe4   :  { %6082 = vtanh.f32 %v244_v30  ;;  %v5691_v33 = vmul.f32 -1.442695, %v244_v30  ;;  %v62_v30 = vld [vmem:[%s8126_s11] sm:$0x3] }
  0xe5   :  { %v5692_v37 = vmul.f32 -1.442695, %v245_v36  ;;  %v6710_v31 = vrot.slane %v62_v30, %v6641_v34  ;;  %v6748_v59 = vrot.slane %v62_v30, %v6628_v26 }
  0xe6   :  { %6084 = vpow2.f32 %v5691_v33 }
  0xe7   :  { %6086 = vpow2.f32 %v5692_v37 }
  0xee   :  { %v6083_v32 = vpop.eup %6082 }
  0xef   :  { %254 = vrot.lane.b32.xlu0 %v6083_v32, %s6464_s13 }
  0xf0   :  { %v6085_v38 = vpop.eup %6084 }
  0xf1   :  { %v249_v39 = vadd.f32 1.0, %v6085_v38  ;;  %v6087_v40 = vpop.eup %6086 }
  0xf2   :  { %v261_v41 = vadd.f32 1.0, %v6087_v40 }
  0xf3   :  { %6088 = vrcp.f32 %v249_v39 }
  0xf4   :  { %6090 = vrcp.f32 %v261_v41 }
  0xfd   :  { %v6089_v42 = vpop.eup %6088 }
  0xfe   :  { %v6091_v45 = vpop.eup %6090 }
 0x161   :  { %v255_v43 = vpop.permute.xlu0 %254 }
 0x162   :  { %v257_v44 = vmul.f32 %v6089_v42, %v255_v43 }
 0x164   :  { %6092 = vtanh.f32 %v257_v44  ;;  %5857 = vmatmul.mubr.msk.f32.vlgmr.msra.gmra.mrb[0].mxu1 %vm268_vm5, %v257_v44 }
 0x165   :  { %5709 = vmatpush1.msk.msra.mxu1 %vm73_vm0, %v6540_v1  ;;  %1712 = vmatprep.mubr.f32.mxu1 %v6461_v2 }
 0x166   :  { %5711 = vmatprep.subr.msk.mxu1 %vm157_vm2, %v6560_v7 }
 0x16e   :  { %v6093_v46 = vpop.eup %6092 }
 0x16f   :  { %v265_v47 = vmul.f32 %v6093_v46, %v6091_v45  ;;  %v6721_v46 = vsub.s32 2, %v6625_v25 }
 0x171   :  { %267 = vst.msk [vmem:[%s8123_s12] sm:$0xf] %vm266_vm6, %v265_v47  ;;  %v610_v47 = vrot.slane %v591_v3, %v6721_v46 }
 0x237   :  { %v338_v52 = vpop.f32.mrb[0].mxu1 }
 0x238   :  { %v349_v53 = vrot.slane %v338_v52, %v6658_v51  ;;  %v5858_v54 = vpop.f32.mrb[1].mxu1  ;;  %v6731_v52 = vld [vmem:[%s8127_s2] sm:$0xf] }
 0x23a   :  { %v350_v55 = vcombine.high %v349_v53, %v349_v53  ;;  %v357_v56 = vrot.slane %v349_v53, %v6658_v51  ;;  %v6736_v53 = vld [vmem:[%s8127_s2 + $0x4] sm:$0xf] }
 0x23c   :  { %v6663_v57 = vrot.slane %v357_v56, %v6628_v26  ;;  %v364_v58 = vrot.slane %v350_v55, %v6658_v51  ;;  %v365_v60 = vcombine.high %v357_v56, %v357_v56  ;;  %v6744_v56 = vld [vmem:[%s8127_s2 + $0x8] sm:$0xf] }
 0x23e   :  { %546 = vrot.lane.b32.xlu0 %v6663_v57, %s6464_s13  ;;  %v374_v61 = vrot.slane %v364_v58, %v6628_v26  ;;  %v366_v62 = vcombine.high %v364_v58, %v364_v58  ;;  %v378_v4 = vrot.slane %v365_v60, %v6628_v26  ;;  %v387_v54 = vadd.f32 %v6663_v57, %v6731_v52 }
 0x240   :  { %548 = vrot.lane.b32.xlu1 %v374_v61, %s6464_s13  ;;  %v6674_v63 = vrot.slane %v366_v62, %v6628_v26  ;;  %v388_v55 = vadd.f32 %v374_v61, %v6736_v53  ;;  %v389_v58 = vadd.f32 %v378_v4, %v6744_v56 }
 0x242   :  { %552 = vrot.lane.b32.xlu0 %v6674_v63, %s6464_s13 }
 0x244   :  { %550 = vrot.lane.b32.xlu1 %v378_v4, %s6464_s13 }
 0x246   :  { %598 = vbcast.lane.b32.xlu0 %v596_v6, 256 }
 0x248   :  { %605 = vbcast.lane.b32.xlu1 %v603_v8, 256 }
 0x2b0   :  { %v547_v10 = vpop.permute.xlu0 %546 }
 0x2b1   :  { %v558_v13 = vadd.f32 %v547_v10, %v6685_v9 }
 0x2b2   :  { %v549_v14 = vpop.permute.xlu1 %548 }
 0x2b3   :  { %6094 = vtanh.f32 %v558_v13  ;;  %v559_v18 = vadd.f32 %v549_v14, %v6690_v12 }
 0x2b4   :  { %v553_v19 = vpop.permute.xlu0 %552 }
 0x2b5   :  { %6096 = vtanh.f32 %v559_v18  ;;  %v561_v22 = vadd.f32 %v553_v19, %v6696_v16 }
 0x2b6   :  { %v551_v27 = vpop.permute.xlu1 %550 }
 0x2b7   :  { %6098 = vtanh.f32 %v561_v22  ;;  %v560_v29 = vadd.f32 %v551_v27, %v6702_v21 }
 0x2b8   :  { %v6758_v14 = vpop.permute.xlu0 %598 }
 0x2b9   :  { %6100 = vtanh.f32 %v560_v29 }
 0x2ba   :  { %6102 = vtanh.f32 %v387_v54  ;;  %v6756_v13 = vpop.permute.xlu1 %605 }
 0x2bb   :  { %6104 = vtanh.f32 %v388_v55 }
 0x2bc   :  { %6106 = vtanh.f32 %v389_v58 }
 0x2bd   :  { %v6095_v32 = vpop.eup %6094 }
 0x2be   :  { %v570_v33 = vmul.f32 %v6095_v32, %v6710_v31 }
 0x2bf   :  { %v6097_v36 = vpop.eup %6096 }
 0x2c0   :  { %v575_v37 = vsel %vm574_vm7, %v570_v33, 0.0  ;;  %v571_v38 = vmul.f32 %v6097_v36, %v6710_v31 }
 0x2c1   :  { %v6099_v39 = vpop.eup %6098  ;;  %576 = vadd.xlane.f32.xlu1 %v575_v37 }
 0x2c2   :  { %v578_v40 = vsel %vm574_vm7, %v571_v38, 0.0  ;;  %v573_v41 = vmul.f32 %v6099_v39, %v6710_v31 }
 0x2c3   :  { %v6101_v42 = vpop.eup %6100  ;;  %579 = vadd.xlane.f32.xlu0 %v578_v40 }
 0x2c4   :  { %v584_v43 = vsel %vm574_vm7, %v573_v41, 0.0  ;;  %v572_v44 = vmul.f32 %v6101_v42, %v6710_v31  ;;  %v6103_v60 = vpop.eup %6102  ;;  %v6771_v42 = vld [vmem:[%s8127_s2 + $0xc] sm:$0xf] }
 0x2c5   :  { %585 = vadd.xlane.f32.xlu1 %v584_v43  ;;  %v6105_v62 = vpop.eup %6104  ;;  %v399_v3 = vmul.f32 %v6103_v60, %v6748_v59  ;;  %v390_v43 = vadd.f32 %v6674_v63, %v6771_v42 }
 0x2c6   :  { %v581_v45 = vsel %vm574_vm7, %v572_v44, 0.0  ;;  %v400_v57 = vmul.f32 %v6105_v62, %v6748_v59  ;;  %v6107_v61 = vpop.eup %6106 }
 0x2c7   :  { %582 = vadd.xlane.f32.xlu0 %v581_v45  ;;  %v403_v6 = vsel %vm266_vm6, %v399_v3, 0.0  ;;  %v401_v10 = vmul.f32 %v6107_v61, %v6748_v59  ;;  %6108 = vtanh.f32 %v390_v43 }
 0x2c8   :  { %v406_v8 = vsel %vm266_vm6, %v400_v57, 0.0 }
 0x2c9   :  { %v409_v4 = vsel %vm266_vm6, %v401_v10, 0.0 }
 0x2d1   :  { %v6109_v44 = vpop.eup %6108 }
 0x2d2   :  { %v402_v45 = vmul.f32 %v6109_v44, %v6748_v59 }
 0x2d6   :  { %612 = vbcast.lane.b32.xlu1 %v610_v47, 256  ;;  %v412_v47 = vsel %vm266_vm6, %v402_v45, 0.0 }
 0x2dd   :  { %619 = vbcast.lane.b32.xlu0 %v617_v50, 256  ;;  %v420_v50 = vand.u32 127, %v234_v24 }
 0x2df   :  { %v6781_v58 = vsub.s32 %v420_v50, %v6625_v25 }
 0x2fa   :  { %404 = vadd.xlane.f32.xlu1 %v403_v6 }
 0x2fc   :  { %407 = vadd.xlane.f32.xlu0 %v406_v8 }
 0x300   :  { %410 = vadd.xlane.f32.xlu0 %v409_v4 }
 0x34e   :  { %v577_v18 = vpop.xlane.xlu1 %576 }
 0x34f   :  { %v587_v19 = vmul.f32 0.7, %v577_v18 }
 0x350   :  { %v580_v22 = vpop.xlane.xlu0 %579 }
 0x351   :  { %v625_v27 = vadd.f32 %v6758_v14, %v587_v19  ;;  %v588_v29 = vmul.f32 0.7, %v580_v22 }
 0x352   :  { %v586_v30 = vpop.xlane.xlu1 %585 }
 0x353   :  { %v626_v32 = vadd.f32 %v6756_v13, %v588_v29  ;;  %634 = vperm.xlu1 %6079, %v625_v27   ;;  %v590_v38 = vmul.f32 0.7, %v586_v30 }
 0x354   :  { %v583_v33 = vpop.xlane.xlu0 %582 }
 0x355   :  { %v589_v36 = vmul.f32 0.7, %v583_v33  ;;  %637 = vperm.xlu0 %6080, %v626_v32  }
 0x356   :  { %v6762_v37 = vpop.permute.xlu1 %612 }
 0x357   :  { %v627_v39 = vadd.f32 %v6762_v37, %v589_v36 }
 0x358   :  { %v6765_v40 = vpop.permute.xlu0 %619 }
 0x359   :  { %640 = vperm.xlu1 %6079, %v627_v39   ;;  %v628_v41 = vadd.f32 %v6765_v40, %v590_v38 }
 0x35b   :  { %643 = vperm.xlu0 %6080, %v628_v41  }
 0x37d   :  { %413 = vadd.xlane.f32.xlu1 %v412_v47 }
 0x387   :  { %v405_v54 = vpop.xlane.xlu1 %404 }
 0x388   :  { %v424_v22 = vrot.slane %v405_v54, %v6781_v58 }
 0x389   :  { %v6777_v48 = vpop.xlane.xlu0 %407 }
 0x38a   :  { %v428_v18 = vrot.slane %v6777_v48, %v6781_v58 }
 0x38c   :  { %v438_v33 = vsel %vm437_vm8, %v428_v18, %v424_v22 }
 0x38d   :  { %v411_v55 = vpop.xlane.xlu0 %410 }
 0x38e   :  { %v432_v19 = vrot.slane %v411_v55, %v6781_v58 }
 0x390   :  { %v440_v36 = vsel %vm439_vm9, %v432_v19, %v438_v33 }
 0x3d2   :  { %v635_v60 = vpop.permute.xlu1 %634 }
 0x3d3   :  { %v648_v3 = vrot.slane %v635_v60, %v6781_v58 }
 0x3d4   :  { %v638_v62 = vpop.permute.xlu0 %637 }
 0x3d5   :  { %v652_v63 = vrot.slane %v638_v62, %v6781_v58 }
 0x3d7   :  { %v661_v24 = vsel %vm437_vm8, %v652_v63, %v648_v3 }
 0x3d8   :  { %v641_v57 = vpop.permute.xlu1 %640 }
 0x3d9   :  { %v656_v61 = vrot.slane %v641_v57, %v6781_v58 }
 0x3da   :  { %v644_v6 = vpop.permute.xlu0 %643 }
 0x3db   :  { %v660_v8 = vrot.slane %v644_v6, %v6781_v58  ;;  %v662_v25 = vsel %vm439_vm9, %v656_v61, %v661_v24 }
 0x3dd   :  { %v663_v10 = vsel %vm441_vm10, %v660_v8, %v662_v25 }
 0x3de   :  { %v666_v4 = vsel %vm665_vm11, %v663_v10, -inf }
 0x3df   :  { %667 = vmax.xlane.f32.xlu0 %v666_v4 }
 0x40a   :  { %v414_v29 = vpop.xlane.xlu1 %413 }
 0x40b   :  { %v436_v30 = vrot.slane %v414_v29, %v6781_v58 }
 0x40d   :  { %v442_v38 = vsel %vm441_vm10, %v436_v30, %v440_v36 }
 0x40e   :  { %v445_v43 = vsel %vm444_vm12, %v442_v38, -inf }
 0x40f   :  { %446 = vmax.xlane.f32.xlu1 %v445_v43 }
 0x46c   :  { %v668_v44 = vpop.xlane.xlu0 %667 }
 0x46d   :  { %v673_v45 = vrot.slane %v668_v44, %v6628_v26  ;;  %v677_v47 = vrot.slane %v668_v44, %v6641_v34  ;;  %v681_v50 = vrot.slane %v668_v44, %v6721_v46  ;;  %v685_v60 = vrot.slane %v668_v44, %v6725_v49 }
 0x46f   :  { %v690_v62 = vsub.f32 %v625_v27, %v673_v45  ;;  %v691_v63 = vsub.f32 %v626_v32, %v677_v47  ;;  %v692_v3 = vsub.f32 %v627_v39, %v681_v50  ;;  %v693_v6 = vsub.f32 %v628_v41, %v685_v60 }
 0x471   :  { %v694_v57 = vmul.f32 1.442695, %v690_v62  ;;  %v696_v61 = vmul.f32 1.442695, %v691_v63  ;;  %v698_v24 = vmul.f32 1.442695, %v692_v3 }
 0x472   :  { %v700_v8 = vmul.f32 1.442695, %v693_v6 }
 0x473   :  { %6110 = vpow2.f32 %v694_v57 }
 0x474   :  { %6112 = vpow2.f32 %v696_v61 }
 0x475   :  { %6114 = vpow2.f32 %v698_v24 }
 0x476   :  { %6116 = vpow2.f32 %v700_v8 }
 0x47d   :  { %v6804_v25 = vpop.eup %6110 }
 0x47e   :  { %v6806_v10 = vpop.eup %6112  ;;  %707 = vperm.xlu1 %6079, %v6804_v25  }
 0x47f   :  { %710 = vperm.xlu0 %6080, %v6806_v10   ;;  %v6810_v27 = vpop.eup %6114 }
 0x480   :  { %v6813_v32 = vpop.eup %6116 }
 0x482   :  { %713 = vperm.xlu1 %6079, %v6810_v27  }
 0x486   :  { %716 = vperm.xlu1 %6079, %v6813_v32  }
 0x49c   :  { %v447_v39 = vpop.xlane.xlu1 %446 }
 0x49d   :  { %v452_v41 = vrot.slane %v447_v39, %v6628_v26  ;;  %v456_v4 = vrot.slane %v447_v39, %v6641_v34  ;;  %v460_v18 = vrot.slane %v447_v39, %v6721_v46  ;;  %v464_v19 = vrot.slane %v447_v39, %v6725_v49 }
 0x49f   :  { %v469_v22 = vsub.f32 %v405_v54, %v452_v41  ;;  %v470_v30 = vsub.f32 %v6777_v48, %v456_v4  ;;  %v471_v33 = vsub.f32 %v411_v55, %v460_v18  ;;  %v472_v36 = vsub.f32 %v414_v29, %v464_v19  ;;  %v5695_v48 = vld [vmem:[%s8116_s1 + $0x4] sm:$0xf] }
 0x4a0   :  { %v812_v29 = vrot.slane %v5695_v48, %v6628_v26  ;;  %v826_v18 = vrot.slane %v5695_v48, %v6721_v46  ;;  %v5694_v19 = vld [vmem:[%s8119_s0 + $0x4] sm:$0xf] }
 0x4a1   :  { %v473_v38 = vmul.f32 1.442695, %v469_v22  ;;  %v475_v43 = vmul.f32 1.442695, %v470_v30  ;;  %v477_v44 = vmul.f32 1.442695, %v471_v33  ;;  %v773_v22 = vrot.slane %v5694_v19, %v6628_v26 }
 0x4a2   :  { %v479_v45 = vmul.f32 1.442695, %v472_v36  ;;  %v787_v30 = vrot.slane %v5694_v19, %v6721_v46 }
 0x4a3   :  { %6118 = vpow2.f32 %v473_v38 }
 0x4a4   :  { %6120 = vpow2.f32 %v475_v43 }
 0x4a5   :  { %6122 = vpow2.f32 %v477_v44 }
 0x4a6   :  { %6124 = vpow2.f32 %v479_v45 }
 0x4ad   :  { %v6821_v47 = vpop.eup %6118 }
 0x4ae   :  { %v6823_v50 = vpop.eup %6120  ;;  %486 = vperm.xlu0 %6080, %v6821_v47  }
 0x4af   :  { %489 = vperm.xlu1 %6079, %v6823_v50   ;;  %v6830_v54 = vpop.eup %6122 }
 0x4b0   :  { %v6832_v55 = vpop.eup %6124 }
 0x4b2   :  { %492 = vperm.xlu0 %6080, %v6830_v54  }
 0x4b3   :  { %495 = vperm.xlu1 %6079, %v6832_v55  }
 0x4b6   :  { %814 = vbcast.lane.b32.xlu0 %v812_v29, 256 }
 0x4fd   :  { %v708_v60 = vpop.permute.xlu1 %707 }
 0x4fe   :  { %v711_v62 = vpop.permute.xlu0 %710  ;;  %v721_v57 = vrot.slane %v708_v60, %v6781_v58 }
 0x4ff   :  { %v725_v3 = vrot.slane %v711_v62, %v6781_v58 }
 0x501   :  { %v714_v63 = vpop.permute.xlu1 %713  ;;  %v734_v8 = vsel %vm437_vm8, %v725_v3, %v721_v57 }
 0x502   :  { %v729_v61 = vrot.slane %v714_v63, %v6781_v58 }
 0x504   :  { %v735_v39 = vsel %vm439_vm9, %v729_v61, %v734_v8  ;;  %v819_v61 = vrot.slane %v5695_v48, %v6641_v34  ;;  %v794_v8 = vrot.slane %v5694_v19, %v6725_v49 }
 0x505   :  { %v717_v6 = vpop.permute.xlu1 %716 }
 0x506   :  { %v733_v24 = vrot.slane %v717_v6, %v6781_v58  ;;  %v833_v6 = vrot.slane %v5695_v48, %v6725_v49 }
 0x508   :  { %v736_v41 = vsel %vm441_vm10, %v733_v24, %v735_v39  ;;  %v780_v24 = vrot.slane %v5694_v19, %v6641_v34 }
 0x509   :  { %v738_v4 = vsel %vm665_vm11, %v736_v41, 0.0 }
 0x50a   :  { %739 = vadd.xlane.f32.xlu0 %v738_v4 }
 0x520   :  { %828 = vbcast.lane.b32.xlu0 %v826_v18, 256 }
 0x524   :  { %775 = vbcast.lane.b32.xlu0 %v773_v22, 256 }
 0x528   :  { %789 = vbcast.lane.b32.xlu0 %v787_v30, 256 }
 0x52d   :  { %v487_v33 = vpop.permute.xlu0 %486 }
 0x52e   :  { %v490_v36 = vpop.permute.xlu1 %489  ;;  %v500_v38 = vrot.slane %v487_v33, %v6781_v58 }
 0x52f   :  { %v504_v43 = vrot.slane %v490_v36, %v6781_v58 }
 0x531   :  { %v493_v44 = vpop.permute.xlu0 %492  ;;  %v513_v62 = vsel %vm437_vm8, %v504_v43, %v500_v38 }
 0x532   :  { %v508_v45 = vrot.slane %v493_v44, %v6781_v58  ;;  %v496_v29 = vpop.permute.xlu1 %495 }
 0x533   :  { %v512_v60 = vrot.slane %v496_v29, %v6781_v58 }
 0x534   :  { %v514_v63 = vsel %vm439_vm9, %v508_v45, %v513_v62 }
 0x535   :  { %v515_v3 = vsel %vm441_vm10, %v512_v60, %v514_v63  ;;  %v815_v39 = vpop.permute.xlu0 %814 }
 0x536   :  { %v517_v57 = vsel %vm444_vm12, %v515_v3, 0.0 }
 0x537   :  { %518 = vadd.xlane.f32.xlu1 %v517_v57 }
 0x548   :  { %821 = vbcast.lane.b32.xlu1 %v819_v61, 256 }
 0x54c   :  { %835 = vbcast.lane.b32.xlu1 %v833_v6, 256 }
 0x550   :  { %782 = vbcast.lane.b32.xlu1 %v780_v24, 256 }
 0x554   :  { %796 = vbcast.lane.b32.xlu1 %v794_v8, 256 }
 0x597   :  { %v740_v41 = vpop.xlane.xlu0 %739 }
 0x598   :  { %6126 = vrcp.f32 %v740_v41 }
 0x59b   :  { %v829_v36 = vpop.permute.xlu0 %828 }
 0x59f   :  { %v776_v3 = vpop.permute.xlu0 %775 }
 0x5a2   :  { %v6127_v4 = vpop.eup %6126 }
 0x5a3   :  { %v754_v18 = vrot.slane %v6127_v4, %v6721_v46  ;;  %v746_v22 = vrot.slane %v6127_v4, %v6628_v26  ;;  %v750_v19 = vrot.slane %v6127_v4, %v6641_v34  ;;  %v758_v45 = vrot.slane %v6127_v4, %v6725_v49 }
 0x5a5   :  { %v763_v30 = vmul.f32 %v6804_v25, %v746_v22  ;;  %v765_v33 = vmul.f32 %v6810_v27, %v754_v18  ;;  %v764_v44 = vmul.f32 %v6806_v10, %v750_v19  ;;  %v766_v25 = vmul.f32 %v6813_v32, %v758_v45  ;;  %v790_v22 = vpop.permute.xlu0 %789 }
 0x5a7   :  { %v841_v48 = vmul.f32 %v815_v39, %v763_v30  ;;  %v843_v38 = vmul.f32 %v829_v36, %v765_v33 }
 0x5a9   :  { %850 = vperm.xlu0 %6080, %v841_v48  }
 0x5ad   :  { %856 = vperm.xlu0 %6080, %v843_v38  }
 0x5c4   :  { %v519_v43 = vpop.xlane.xlu1 %518 }
 0x5c5   :  { %6128 = vrcp.f32 %v519_v43 }
 0x5c8   :  { %v822_v29 = vpop.permute.xlu1 %821 }
 0x5c9   :  { %v842_v60 = vmul.f32 %v822_v29, %v764_v44 }
 0x5cb   :  { %853 = vperm.xlu1 %6079, %v842_v60  }
 0x5cc   :  { %v836_v62 = vpop.permute.xlu1 %835 }
 0x5cd   :  { %v844_v27 = vmul.f32 %v836_v62, %v766_v25 }
 0x5cf   :  { %v6129_v63 = vpop.eup %6128  ;;  %859 = vperm.xlu1 %6079, %v844_v27  }
 0x5d0   :  { %v525_v57 = vrot.slane %v6129_v63, %v6628_v26  ;;  %v529_v61 = vrot.slane %v6129_v63, %v6641_v34  ;;  %v783_v6 = vpop.permute.xlu1 %782  ;;  %v533_v24 = vrot.slane %v6129_v63, %v6721_v46  ;;  %v537_v10 = vrot.slane %v6129_v63, %v6725_v49 }
 0x5d2   :  { %v542_v8 = vmul.f32 %v6821_v47, %v525_v57  ;;  %v543_v39 = vmul.f32 %v6823_v50, %v529_v61  ;;  %v544_v4 = vmul.f32 %v6830_v54, %v533_v24  ;;  %v545_v18 = vmul.f32 %v6832_v55, %v537_v10 }
 0x5d4   :  { %v802_v41 = vmul.f32 %v776_v3, %v542_v8  ;;  %v803_v32 = vmul.f32 %v783_v6, %v543_v39  ;;  %v797_v30 = vpop.permute.xlu1 %796  ;;  %v804_v33 = vmul.f32 %v790_v22, %v544_v4 }
 0x5d5   :  { %v805_v48 = vmul.f32 %v797_v30, %v545_v18 }
 0x5d6   :  { %958 = vperm.xlu0 %6080, %v802_v41   ;;  %961 = vperm.xlu1 %6079, %v803_v32  }
 0x5da   :  { %964 = vperm.xlu0 %6080, %v804_v33   ;;  %967 = vperm.xlu1 %6079, %v805_v48  }
 0x628   :  { %v851_v36 = vpop.permute.xlu0 %850 }
 0x629   :  { %v864_v47 = vrot.slane %v851_v36, %v6781_v58 }
 0x62c   :  { %v857_v19 = vpop.permute.xlu0 %856 }
 0x62d   :  { %v872_v54 = vrot.slane %v857_v19, %v6781_v58 }
 0x64a   :  { %v854_v38 = vpop.permute.xlu1 %853 }
 0x64b   :  { %v868_v50 = vrot.slane %v854_v38, %v6781_v58 }
 0x64d   :  { %v877_v43 = vsel %vm437_vm8, %v868_v50, %v864_v47 }
 0x64e   :  { %v860_v55 = vpop.permute.xlu1 %859  ;;  %v878_v45 = vsel %vm439_vm9, %v872_v54, %v877_v43 }
 0x64f   :  { %v876_v44 = vrot.slane %v860_v55, %v6781_v58 }
 0x651   :  { %v879_v29 = vsel %vm441_vm10, %v876_v44, %v878_v45 }
 0x652   :  { %5698 = vmatmul.mubr.msk.f32.vlgmr.msra.gmra.mrb[2].mxu0 %vm69_vm1, %v879_v29 }
 0x653   :  { %5700 = vmatpush1.msk.msra.mxu0 %vm157_vm2, %v6554_v5  ;;  %1054 = vmatprep.mubr.f32.mxu0 %v6461_v2 }
 0x654   :  { %5985 = vmatprep.subr.bf16.mxu0 %v6462_v11 }
 0x655   :  { %v959_v60 = vpop.permute.xlu0 %958  ;;  %v962_v25 = vpop.permute.xlu1 %961 }
 0x656   :  { %v972_v62 = vrot.slane %v959_v60, %v6781_v58  ;;  %v976_v27 = vrot.slane %v962_v25, %v6781_v58 }
 0x658   :  { %v985_v6 = vsel %vm437_vm8, %v976_v27, %v972_v62 }
 0x659   :  { %v965_v63 = vpop.permute.xlu0 %964  ;;  %v968_v3 = vpop.permute.xlu1 %967 }
 0x65a   :  { %v980_v57 = vrot.slane %v965_v63, %v6781_v58  ;;  %v984_v61 = vrot.slane %v968_v3, %v6781_v58 }
 0x65c   :  { %v986_v5 = vsel %vm439_vm9, %v980_v57, %v985_v6 }
 0x65d   :  { %v987_v24 = vsel %vm441_vm10, %v984_v61, %v986_v5 }
 0x65e   :  { %5701 = vmatmul.mubr.msk.f32.vlgmr.msra.gmra.mrb[2].mxu0 %vm153_vm3, %v987_v24 }
 0x65f   :  { %5987 = vmatpush3.bf16.msra.mxu0 %v6592_v15  ;;  %5875 = vmatprep.mubr.msk.f32.mxu0 %vm6463_vm4, %v6461_v2 }
 0x660   :  { %5988 = vmatprep.subr.bf16.mxu0 %v6462_v11 }
 0x663   :  { %5990 = vmatpush3.bf16.msra.mxu0 %v6598_v17 }
 0x664   :  { %5991 = vmatprep.subr.bf16.mxu0 %v6462_v11 }
 0x667   :  { %5993 = vmatpush3.bf16.msra.mxu0 %v6608_v20 }
 0x668   :  { %5994 = vmatprep.subr.bf16.mxu0 %v6462_v11 }
 0x66b   :  { %5996 = vmatpush3.bf16.msra.mxu0 %v6618_v23 }
 0x66c   :  { %5720 = vmatprep.subr.msk.mxu0 %vm73_vm0, %v6535_v0 }
 0x731   :  { %v1056_v10 = vpop.f32.mrb[2].mxu0 }
 0x732   :  { %v1061_v8 = vadd.f32 %v1056_v10, %v6634_v28  ;;  %v1058_v39 = vpop.f32.mrb[3].mxu0 }
 0x733   :  { %v1062_v4 = vadd.f32 %v1058_v39, %v6644_v35 }
 0x734   :  { %6130 = vtanh.f32 %v1061_v8  ;;  %v5702_v32 = vmul.f32 -1.442695, %v1061_v8 }
 0x735   :  { %v5703_v18 = vmul.f32 -1.442695, %v1062_v4 }
 0x736   :  { %6132 = vpow2.f32 %v5702_v32 }
 0x737   :  { %6134 = vpow2.f32 %v5703_v18 }
 0x73e   :  { %v6131_v41 = vpop.eup %6130 }
 0x73f   :  { %1071 = vrot.lane.b32.xlu0 %v6131_v41, %s6464_s13 }
 0x740   :  { %v6133_v22 = vpop.eup %6132 }
 0x741   :  { %v1066_v30 = vadd.f32 1.0, %v6133_v22  ;;  %v6135_v33 = vpop.eup %6134 }
 0x742   :  { %v1078_v48 = vadd.f32 1.0, %v6135_v33 }
 0x743   :  { %6136 = vrcp.f32 %v1066_v30 }
 0x744   :  { %6138 = vrcp.f32 %v1078_v48 }
 0x74d   :  { %v6137_v0 = vpop.eup %6136 }
 0x74e   :  { %v6139_v47 = vpop.eup %6138 }
 0x7b1   :  { %v1072_v36 = vpop.permute.xlu0 %1071 }
 0x7b2   :  { %v1074_v38 = vmul.f32 %v6137_v0, %v1072_v36 }
 0x7b4   :  { %6140 = vtanh.f32 %v1074_v38  ;;  %5876 = vmatmul.mubr.msk.f32.vlgmr.msra.gmra.mrb[4].mxu0 %vm268_vm5, %v1074_v38 }
 0x7b5   :  { %5721 = vmatpush1.msk.msra.mxu0 %vm73_vm0, %v6540_v1  ;;  %2478 = vmatprep.mubr.f32.mxu0 %v6461_v2 }
 0x7b6   :  { %5723 = vmatprep.subr.msk.mxu0 %vm157_vm2, %v6560_v7 }
 0x7be   :  { %v6141_v19 = vpop.eup %6140 }
 0x7bf   :  { %v1082_v50 = vmul.f32 %v6141_v19, %v6139_v47 }
 0x7c1   :  { %5704 = vst.msk [vmem:[%s8123_s12 + $0x4] sm:$0xf] %vm266_vm6, %v1082_v50 }
 0x887   :  { %v1154_v43 = vpop.f32.mrb[4].mxu0 }
 0x888   :  { %v1165_v54 = vrot.slane %v1154_v43, %v6658_v51  ;;  %v5877_v55 = vpop.f32.mrb[5].mxu0 }
 0x88a   :  { %v1166_v44 = vcombine.high %v1165_v54, %v1165_v54  ;;  %v1173_v1 = vrot.slane %v1165_v54, %v6658_v51 }
 0x88c   :  { %v1180_v45 = vrot.slane %v1166_v44, %v6658_v51  ;;  %v1181_v29 = vcombine.high %v1173_v1, %v1173_v1  ;;  %v1186_v60 = vrot.slane %v1173_v1, %v6628_v26 }
 0x88e   :  { %1352 = vrot.lane.b32.xlu1 %v1186_v60, %s6464_s13  ;;  %v1190_v25 = vrot.slane %v1180_v45, %v6628_v26  ;;  %v1182_v62 = vcombine.high %v1180_v45, %v1180_v45  ;;  %v1194_v27 = vrot.slane %v1181_v29, %v6628_v26  ;;  %v1203_v61 = vadd.f32 %v1186_v60, %v6731_v52 }
 0x890   :  { %1354 = vrot.lane.b32.xlu0 %v1190_v25, %s6464_s13  ;;  %v6933_v63 = vrot.slane %v1182_v62, %v6628_v26  ;;  %v1204_v24 = vadd.f32 %v1190_v25, %v6736_v53 }
 0x892   :  { %1356 = vrot.lane.b32.xlu1 %v1194_v27, %s6464_s13 }
 0x894   :  { %1358 = vrot.lane.b32.xlu0 %v6933_v63, %s6464_s13 }
 0x900   :  { %v1353_v3 = vpop.permute.xlu1 %1352 }
 0x901   :  { %v1364_v57 = vadd.f32 %v1353_v3, %v6685_v9  ;;  %v1205_v9 = vadd.f32 %v1194_v27, %v6744_v56 }
 0x902   :  { %v1355_v6 = vpop.permute.xlu0 %1354 }
 0x903   :  { %6142 = vtanh.f32 %v1364_v57  ;;  %v1365_v5 = vadd.f32 %v1355_v6, %v6690_v12  ;;  %v1206_v6 = vadd.f32 %v6933_v63, %v6771_v42 }
 0x904   :  { %v1357_v10 = vpop.permute.xlu1 %1356 }
 0x905   :  { %6144 = vtanh.f32 %v1365_v5  ;;  %v1366_v8 = vadd.f32 %v1357_v10, %v6702_v21 }
 0x906   :  { %6146 = vtanh.f32 %v1203_v61  ;;  %v1359_v39 = vpop.permute.xlu0 %1358 }
 0x907   :  { %6148 = vtanh.f32 %v1366_v8  ;;  %v1367_v41 = vadd.f32 %v1359_v39, %v6696_v16 }
 0x908   :  { %6150 = vtanh.f32 %v1204_v24 }
 0x909   :  { %6152 = vtanh.f32 %v1367_v41 }
 0x90a   :  { %6154 = vtanh.f32 %v1205_v9 }
 0x90b   :  { %6156 = vtanh.f32 %v1206_v6 }
 0x90d   :  { %v6143_v52 = vpop.eup %6142 }
 0x90e   :  { %v1372_v32 = vmul.f32 %v6143_v52, %v6710_v31 }
 0x90f   :  { %v6145_v12 = vpop.eup %6144 }
 0x910   :  { %v6147_v4 = vpop.eup %6146  ;;  %v1376_v53 = vsel %vm574_vm7, %v1372_v32, 0.0  ;;  %v1373_v18 = vmul.f32 %v6145_v12, %v6710_v31 }
 0x911   :  { %v6149_v21 = vpop.eup %6148  ;;  %1377 = vadd.xlane.f32.xlu1 %v1376_v53  ;;  %v1211_v38 = vmul.f32 %v6147_v4, %v6748_v59 }
 0x912   :  { %v6151_v22 = vpop.eup %6150  ;;  %v1379_v30 = vsel %vm574_vm7, %v1373_v18, 0.0  ;;  %v1374_v16 = vmul.f32 %v6149_v21, %v6710_v31 }
 0x913   :  { %v6153_v33 = vpop.eup %6152  ;;  %1380 = vadd.xlane.f32.xlu0 %v1379_v30  ;;  %v1212_v36 = vmul.f32 %v6151_v22, %v6748_v59  ;;  %v1215_v50 = vsel %vm266_vm6, %v1211_v38, 0.0 }
 0x914   :  { %v1375_v56 = vmul.f32 %v6153_v33, %v6710_v31  ;;  %v1382_v48 = vsel %vm574_vm7, %v1374_v16, 0.0  ;;  %v6155_v47 = vpop.eup %6154 }
 0x915   :  { %v1218_v19 = vsel %vm266_vm6, %v1212_v36, 0.0  ;;  %v1213_v43 = vmul.f32 %v6155_v47, %v6748_v59  ;;  %v6157_v5 = vpop.eup %6156 }
 0x916   :  { %v1385_v0 = vsel %vm574_vm7, %v1375_v56, 0.0  ;;  %v1214_v24 = vmul.f32 %v6157_v5, %v6748_v59 }
 0x917   :  { %1383 = vadd.xlane.f32.xlu0 %v1382_v48  ;;  %1386 = vadd.xlane.f32.xlu1 %v1385_v0  ;;  %v1221_v54 = vsel %vm266_vm6, %v1213_v43, 0.0 }
 0x918   :  { %v1224_v10 = vsel %vm266_vm6, %v1214_v24, 0.0 }
 0x91b   :  { %1219 = vadd.xlane.f32.xlu0 %v1218_v19  ;;  %1216 = vadd.xlane.f32.xlu1 %v1215_v50 }
 0x91f   :  { %1222 = vadd.xlane.f32.xlu1 %v1221_v54 }
 0x99e   :  { %v1378_v55 = vpop.xlane.xlu1 %1377 }
 0x99f   :  { %v1388_v44 = vmul.f32 0.7, %v1378_v55 }
 0x9a0   :  { %v1381_v1 = vpop.xlane.xlu0 %1380 }
 0x9a1   :  { %v1392_v45 = vadd.f32 %v1388_v44, %v6758_v14  ;;  %v1389_v29 = vmul.f32 0.7, %v1381_v1 }
 0x9a3   :  { %v1393_v60 = vadd.f32 %v1389_v29, %v6756_v13  ;;  %1401 = vperm.xlu0 %6080, %v1392_v45  }
 0x9a4   :  { %v1387_v25 = vpop.xlane.xlu1 %1386  ;;  %v1384_v62 = vpop.xlane.xlu0 %1383 }
 0x9a5   :  { %v1391_v27 = vmul.f32 0.7, %v1387_v25  ;;  %v1390_v3 = vmul.f32 0.7, %v1384_v62  ;;  %1404 = vperm.xlu1 %6079, %v1393_v60  }
 0x9a7   :  { %v1395_v57 = vadd.f32 %v1391_v27, %v6765_v40  ;;  %v1394_v61 = vadd.f32 %v1390_v3, %v6762_v37 }
 0x9a8   :  { %v1217_v8 = vpop.xlane.xlu1 %1216  ;;  %v1220_v39 = vpop.xlane.xlu0 %1219 }
 0x9a9   :  { %1410 = vperm.xlu1 %6079, %v1395_v57   ;;  %1407 = vperm.xlu0 %6080, %v1394_v61   ;;  %v1234_v16 = vrot.slane %v1217_v8, %v6781_v58  ;;  %v1238_v33 = vrot.slane %v1220_v39, %v6781_v58 }
 0x9ab   :  { %v1247_v36 = vsel %vm437_vm8, %v1238_v33, %v1234_v16 }
 0x9ac   :  { %v1223_v41 = vpop.xlane.xlu1 %1222 }
 0x9ad   :  { %v1242_v56 = vrot.slane %v1223_v41, %v6781_v58 }
 0x9af   :  { %v1248_v38 = vsel %vm439_vm9, %v1242_v56, %v1247_v36 }
 0x9c8   :  { %1225 = vadd.xlane.f32.xlu0 %v1224_v10 }
 0xa22   :  { %v1402_v9 = vpop.permute.xlu0 %1401 }
 0xa23   :  { %v1415_v12 = vrot.slane %v1402_v9, %v6781_v58 }
 0xa24   :  { %v1405_v52 = vpop.permute.xlu1 %1404 }
 0xa25   :  { %v1419_v32 = vrot.slane %v1405_v52, %v6781_v58 }
 0xa27   :  { %v1428_v18 = vsel %vm437_vm8, %v1419_v32, %v1415_v12 }
 0xa28   :  { %v1411_v4 = vpop.permute.xlu1 %1410  ;;  %v1408_v53 = vpop.permute.xlu0 %1407 }
 0xa29   :  { %v1427_v42 = vrot.slane %v1411_v4, %v6781_v58  ;;  %v1423_v63 = vrot.slane %v1408_v53, %v6781_v58 }
 0xa2b   :  { %v1429_v21 = vsel %vm439_vm9, %v1423_v63, %v1428_v18 }
 0xa2c   :  { %v1430_v22 = vsel %vm441_vm10, %v1427_v42, %v1429_v21 }
 0xa2d   :  { %v1432_v30 = vsel %vm665_vm11, %v1430_v22, -inf }
 0xa2e   :  { %1433 = vmax.xlane.f32.xlu1 %v1432_v30 }
 0xa55   :  { %v1226_v48 = vpop.xlane.xlu0 %1225 }
 0xa56   :  { %v1246_v0 = vrot.slane %v1226_v48, %v6781_v58 }
 0xa58   :  { %v1249_v47 = vsel %vm441_vm10, %v1246_v0, %v1248_v38 }
 0xa59   :  { %v1251_v19 = vsel %vm444_vm12, %v1249_v47, -inf }
 0xa5a   :  { %1252 = vmax.xlane.f32.xlu0 %v1251_v19 }
 0xabb   :  { %v1434_v50 = vpop.xlane.xlu1 %1433 }
 0xabc   :  { %v1439_v43 = vrot.slane %v1434_v50, %v6628_v26  ;;  %v1443_v54 = vrot.slane %v1434_v50, %v6641_v34  ;;  %v1447_v55 = vrot.slane %v1434_v50, %v6721_v46  ;;  %v1451_v44 = vrot.slane %v1434_v50, %v6725_v49 }
 0xabe   :  { %v1456_v1 = vsub.f32 %v1392_v45, %v1439_v43  ;;  %v1457_v29 = vsub.f32 %v1393_v60, %v1443_v54  ;;  %v1459_v25 = vsub.f32 %v1395_v57, %v1451_v44  ;;  %v1458_v62 = vsub.f32 %v1394_v61, %v1447_v55 }
 0xac0   :  { %v1460_v27 = vmul.f32 1.442695, %v1456_v1  ;;  %v1462_v3 = vmul.f32 1.442695, %v1457_v29  ;;  %v1466_v6 = vmul.f32 1.442695, %v1459_v25 }
 0xac1   :  { %v1464_v5 = vmul.f32 1.442695, %v1458_v62  ;;  %v5706_v29 = vld [vmem:[%s8119_s0 + $0x8] sm:$0xf] }
 0xac2   :  { %6158 = vpow2.f32 %v1460_v27  ;;  %v1539_v25 = vrot.slane %v5706_v29, %v6628_v26  ;;  %v1553_v62 = vrot.slane %v5706_v29, %v6721_v46 }
 0xac3   :  { %6160 = vpow2.f32 %v1462_v3 }
 0xac4   :  { %6162 = vpow2.f32 %v1466_v6 }
 0xac5   :  { %6164 = vpow2.f32 %v1464_v5 }
 0xacc   :  { %v6986_v24 = vpop.eup %6158 }
 0xacd   :  { %v6988_v10 = vpop.eup %6160  ;;  %1473 = vperm.xlu0 %6080, %v6986_v24  }
 0xace   :  { %1476 = vperm.xlu1 %6079, %v6988_v10   ;;  %v6992_v45 = vpop.eup %6162 }
 0xacf   :  { %v6994_v60 = vpop.eup %6164 }
 0xad1   :  { %1482 = vperm.xlu0 %6080, %v6992_v45  }
 0xad2   :  { %1479 = vperm.xlu1 %6079, %v6994_v60  }
 0xae7   :  { %v1253_v57 = vpop.xlane.xlu0 %1252 }
 0xae8   :  { %v1258_v61 = vrot.slane %v1253_v57, %v6628_v26  ;;  %v1262_v9 = vrot.slane %v1253_v57, %v6641_v34  ;;  %v1266_v52 = vrot.slane %v1253_v57, %v6721_v46  ;;  %v1270_v32 = vrot.slane %v1253_v57, %v6725_v49 }
 0xaea   :  { %v1275_v12 = vsub.f32 %v1217_v8, %v1258_v61  ;;  %v1276_v4 = vsub.f32 %v1220_v39, %v1262_v9  ;;  %v1277_v53 = vsub.f32 %v1223_v41, %v1266_v52  ;;  %v1278_v42 = vsub.f32 %v1226_v48, %v1270_v32  ;;  %v5707_v8 = vld [vmem:[%s8116_s1 + $0x8] sm:$0xf] }
 0xaeb   :  { %v1585_v33 = vrot.slane %v5707_v8, %v6641_v34  ;;  %v1592_v56 = vrot.slane %v5707_v8, %v6721_v46 }
 0xaec   :  { %v1279_v63 = vmul.f32 1.442695, %v1275_v12  ;;  %v1281_v18 = vmul.f32 1.442695, %v1276_v4  ;;  %v1283_v21 = vmul.f32 1.442695, %v1277_v53 }
 0xaed   :  { %v1285_v22 = vmul.f32 1.442695, %v1278_v42  ;;  %v1578_v42 = vrot.slane %v5707_v8, %v6628_v26 }
 0xaee   :  { %6166 = vpow2.f32 %v1279_v63  ;;  %v1599_v63 = vrot.slane %v5707_v8, %v6725_v49 }
 0xaef   :  { %6168 = vpow2.f32 %v1281_v18  ;;  %v1546_v18 = vrot.slane %v5706_v29, %v6641_v34 }
 0xaf0   :  { %6170 = vpow2.f32 %v1283_v21  ;;  %v1560_v21 = vrot.slane %v5706_v29, %v6725_v49 }
 0xaf1   :  { %6172 = vpow2.f32 %v1285_v22 }
 0xaf8   :  { %v7002_v30 = vpop.eup %6166 }
 0xaf9   :  { %v7004_v16 = vpop.eup %6168  ;;  %1292 = vperm.xlu1 %6079, %v7002_v30  }
 0xafa   :  { %1295 = vperm.xlu0 %6080, %v7004_v16   ;;  %v7011_v39 = vpop.eup %6170 }
 0xafb   :  { %v7013_v41 = vpop.eup %6172 }
 0xafd   :  { %1298 = vperm.xlu1 %6079, %v7011_v39  }
 0xafe   :  { %1301 = vperm.xlu0 %6080, %v7013_v41  }
 0xb01   :  { %1587 = vbcast.lane.b32.xlu1 %v1585_v33, 256 }
 0xb05   :  { %1594 = vbcast.lane.b32.xlu1 %v1592_v56, 256 }
 0xb4c   :  { %v1474_v48 = vpop.permute.xlu0 %1473 }
 0xb4d   :  { %v1477_v0 = vpop.permute.xlu1 %1476  ;;  %v1487_v38 = vrot.slane %v1474_v48, %v6781_v58 }
 0xb4e   :  { %v1491_v36 = vrot.slane %v1477_v0, %v6781_v58 }
 0xb50   :  { %v1483_v47 = vpop.permute.xlu0 %1482  ;;  %v1500_v54 = vsel %vm437_vm8, %v1491_v36, %v1487_v38 }
 0xb51   :  { %v1480_v19 = vpop.permute.xlu1 %1479  ;;  %v1499_v50 = vrot.slane %v1483_v47, %v6781_v58 }
 0xb52   :  { %v1495_v43 = vrot.slane %v1480_v19, %v6781_v58 }
 0xb54   :  { %v1501_v55 = vsel %vm439_vm9, %v1495_v43, %v1500_v54 }
 0xb55   :  { %v1502_v44 = vsel %vm441_vm10, %v1499_v50, %v1501_v55 }
 0xb56   :  { %v1504_v1 = vsel %vm665_vm11, %v1502_v44, 0.0 }
 0xb57   :  { %1505 = vadd.xlane.f32.xlu1 %v1504_v1 }
 0xb68   :  { %1541 = vbcast.lane.b32.xlu1 %v1539_v25, 256 }
 0xb6c   :  { %1555 = vbcast.lane.b32.xlu1 %v1553_v62, 256 }
 0xb78   :  { %v1293_v27 = vpop.permute.xlu1 %1292 }
 0xb79   :  { %v1296_v3 = vpop.permute.xlu0 %1295  ;;  %v1306_v6 = vrot.slane %v1293_v27, %v6781_v58 }
 0xb7a   :  { %v1310_v5 = vrot.slane %v1296_v3, %v6781_v58 }
 0xb7c   :  { %v1299_v57 = vpop.permute.xlu1 %1298  ;;  %v1319_v32 = vsel %vm437_vm8, %v1310_v5, %v1306_v6 }
 0xb7d   :  { %v1314_v61 = vrot.slane %v1299_v57, %v6781_v58  ;;  %v1302_v9 = vpop.permute.xlu0 %1301 }
 0xb7e   :  { %v1318_v52 = vrot.slane %v1302_v9, %v6781_v58 }
 0xb7f   :  { %v1320_v12 = vsel %vm439_vm9, %v1314_v61, %v1319_v32 }
 0xb80   :  { %v1321_v4 = vsel %vm441_vm10, %v1318_v52, %v1320_v12  ;;  %v1588_v22 = vpop.permute.xlu1 %1587 }
 0xb81   :  { %v1323_v53 = vsel %vm444_vm12, %v1321_v4, 0.0 }
 0xb82   :  { %1324 = vadd.xlane.f32.xlu0 %v1323_v53 }
 0xb84   :  { %v1595_v33 = vpop.permute.xlu1 %1594 }
 0xb98   :  { %1580 = vbcast.lane.b32.xlu0 %v1578_v42, 256 }
 0xb9c   :  { %1601 = vbcast.lane.b32.xlu0 %v1599_v63, 256 }
 0xba0   :  { %1548 = vbcast.lane.b32.xlu0 %v1546_v18, 256 }
 0xba4   :  { %1562 = vbcast.lane.b32.xlu0 %v1560_v21, 256 }
 0xbe4   :  { %v1506_v56 = vpop.xlane.xlu1 %1505 }
 0xbe5   :  { %6174 = vrcp.f32 %v1506_v56 }
 0xbe8   :  { %v1542_v27 = vpop.permute.xlu1 %1541 }
 0xbec   :  { %v1556_v12 = vpop.permute.xlu1 %1555 }
 0xbef   :  { %v6175_v48 = vpop.eup %6174 }
 0xbf0   :  { %v1516_v0 = vrot.slane %v6175_v48, %v6641_v34  ;;  %v1512_v8 = vrot.slane %v6175_v48, %v6628_v26  ;;  %v1520_v19 = vrot.slane %v6175_v48, %v6721_v46  ;;  %v1524_v43 = vrot.slane %v6175_v48, %v6725_v49 }
 0xbf2   :  { %v1530_v36 = vmul.f32 %v6988_v10, %v1516_v0  ;;  %v1529_v50 = vmul.f32 %v6986_v24, %v1512_v8  ;;  %v1531_v44 = vmul.f32 %v6994_v60, %v1520_v19  ;;  %v1532_v1 = vmul.f32 %v6992_v45, %v1524_v43  ;;  %v7071_v0 = vld [vmem:[%s8118_s7] sm:$0xff] }
 0xbf4   :  { %v1608_v38 = vmul.f32 %v1588_v22, %v1530_v36  ;;  %v1609_v25 = vmul.f32 %v1595_v33, %v1531_v44 }
 0xbf6   :  { %1619 = vperm.xlu0 %6080, %v1608_v38  }
 0xc0f   :  { %v1325_v47 = vpop.xlane.xlu0 %1324 }
 0xc10   :  { %6176 = vrcp.f32 %v1325_v47 }
 0xc13   :  { %v1581_v54 = vpop.permute.xlu0 %1580 }
 0xc14   :  { %v1607_v55 = vmul.f32 %v1581_v54, %v1529_v50 }
 0xc16   :  { %1616 = vperm.xlu1 %6079, %v1607_v55  }
 0xc17   :  { %v1602_v10 = vpop.permute.xlu0 %1601 }
 0xc18   :  { %v1610_v29 = vmul.f32 %v1602_v10, %v1532_v1  ;;  %v7097_v10 = vld [vmem:[%s8115_s8 + $0x8] sm:$0x3f] }
 0xc1a   :  { %v6177_v62 = vpop.eup %6176  ;;  %1622 = vperm.xlu1 %6079, %v1609_v25   ;;  %1625 = vperm.xlu0 %6080, %v1610_v29  }
 0xc1b   :  { %v1331_v3 = vrot.slane %v6177_v62, %v6628_v26  ;;  %v1335_v24 = vrot.slane %v6177_v62, %v6641_v34  ;;  %v1549_v6 = vpop.permute.xlu0 %1548  ;;  %v1339_v5 = vrot.slane %v6177_v62, %v6721_v46  ;;  %v1343_v57 = vrot.slane %v6177_v62, %v6725_v49 }
 0xc1d   :  { %v1348_v60 = vmul.f32 %v7002_v30, %v1331_v3  ;;  %v1349_v45 = vmul.f32 %v7004_v16, %v1335_v24  ;;  %v1350_v52 = vmul.f32 %v7011_v39, %v1339_v5  ;;  %v1351_v32 = vmul.f32 %v7013_v41, %v1343_v57 }
 0xc1f   :  { %v1568_v61 = vmul.f32 %v1542_v27, %v1348_v60  ;;  %v1569_v9 = vmul.f32 %v1549_v6, %v1349_v45  ;;  %v1563_v4 = vpop.permute.xlu0 %1562  ;;  %v1570_v53 = vmul.f32 %v1556_v12, %v1350_v52 }
 0xc20   :  { %v1571_v42 = vmul.f32 %v1563_v4, %v1351_v32  ;;  %v7108_v32 = vld [vmem:[%s8115_s8] sm:$0x3f] }
 0xc21   :  { %1724 = vperm.xlu1 %6079, %v1568_v61   ;;  %1727 = vperm.xlu0 %6080, %v1569_v9  }
 0xc25   :  { %1730 = vperm.xlu1 %6079, %v1570_v53   ;;  %1733 = vperm.xlu0 %6080, %v1571_v42  }
 0xc75   :  { %v1620_v63 = vpop.permute.xlu0 %1619 }
 0xc76   :  { %v1634_v16 = vrot.slane %v1620_v63, %v6781_v58 }
 0xc95   :  { %v1617_v18 = vpop.permute.xlu1 %1616 }
 0xc96   :  { %v1630_v30 = vrot.slane %v1617_v18, %v6781_v58 }
 0xc98   :  { %v1643_v33 = vsel %vm437_vm8, %v1634_v16, %v1630_v30 }
 0xc99   :  { %v1623_v21 = vpop.permute.xlu1 %1622  ;;  %v1626_v22 = vpop.permute.xlu0 %1625 }
 0xc9a   :  { %v1638_v39 = vrot.slane %v1623_v21, %v6781_v58  ;;  %v1642_v41 = vrot.slane %v1626_v22, %v6781_v58 }
 0xc9c   :  { %v1644_v56 = vsel %vm439_vm9, %v1638_v39, %v1643_v33 }
 0xc9d   :  { %v1645_v48 = vsel %vm441_vm10, %v1642_v41, %v1644_v56 }
 0xc9e   :  { %5710 = vmatmul.mubr.msk.f32.vlgmr.msra.gmra.mrb[2].mxu1 %vm69_vm1, %v1645_v48 }
 0xc9f   :  { %5712 = vmatpush1.msk.msra.mxu1 %vm157_vm2, %v7071_v0  ;;  %1820 = vmatprep.mubr.f32.mxu1 %v6461_v2 }
 0xca0   :  { %v1725_v36 = vpop.permute.xlu1 %1724  ;;  %v1728_v38 = vpop.permute.xlu0 %1727  ;;  %5997 = vmatprep.subr.bf16.mxu1 %v6462_v11 }
 0xca1   :  { %v1738_v8 = vrot.slane %v1725_v36, %v6781_v58  ;;  %v1742_v47 = vrot.slane %v1728_v38, %v6781_v58  ;;  %v7136_v36 = vld [vmem:[%s8127_s2] sm:$0xf] }
 0xca3   :  { %v1751_v55 = vsel %vm437_vm8, %v1742_v47, %v1738_v8  ;;  %v7142_v47 = vld [vmem:[%s8125_s3] sm:$0x3f] }
 0xca4   :  { %v1731_v19 = vpop.permute.xlu1 %1730  ;;  %v1734_v50 = vpop.permute.xlu0 %1733 }
 0xca5   :  { %v1746_v43 = vrot.slane %v1731_v19, %v6781_v58  ;;  %v1750_v54 = vrot.slane %v1734_v50, %v6781_v58 }
 0xca7   :  { %v1752_v44 = vsel %vm439_vm9, %v1746_v43, %v1751_v55  ;;  %v7148_v43 = vld [vmem:[%s8125_s3 + $0x8] sm:$0x3f] }
 0xca8   :  { %v1753_v1 = vsel %vm441_vm10, %v1750_v54, %v1752_v44  ;;  %v7154_v44 = vld [vmem:[%s8125_s3 + $0x10] sm:$0x3f] }
 0xca9   :  { %5713 = vmatmul.mubr.msk.f32.vlgmr.msra.gmra.mrb[2].mxu1 %vm153_vm3, %v1753_v1 }
 0xcaa   :  { %5999 = vmatpush3.bf16.msra.mxu1 %v6592_v15  ;;  %5894 = vmatprep.mubr.msk.f32.mxu1 %vm6463_vm4, %v6461_v2 }
 0xcab   :  { %6000 = vmatprep.subr.bf16.mxu1 %v6462_v11 }
 0xcae   :  { %6002 = vmatpush3.bf16.msra.mxu1 %v6598_v17 }
 0xcaf   :  { %6003 = vmatprep.subr.bf16.mxu1 %v6462_v11 }
 0xcb2   :  { %6005 = vmatpush3.bf16.msra.mxu1 %v6608_v20 }
 0xcb3   :  { %6006 = vmatprep.subr.bf16.mxu1 %v6462_v11 }
 0xcb6   :  { %6008 = vmatpush3.bf16.msra.mxu1 %v6618_v23 }
 0xcb7   :  { %5732 = vmatprep.subr.msk.mxu1 %vm73_vm0, %v7097_v10 }
 0xd7c   :  { %v1822_v29 = vpop.f32.mrb[2].mxu1 }
 0xd7d   :  { %v1827_v25 = vadd.f32 %v1822_v29, %v6634_v28  ;;  %v1824_v62 = vpop.f32.mrb[3].mxu1 }
 0xd7e   :  { %v1828_v24 = vadd.f32 %v1824_v62, %v6644_v35 }
 0xd7f   :  { %6178 = vtanh.f32 %v1827_v25  ;;  %v5714_v3 = vmul.f32 -1.442695, %v1827_v25  ;;  %v7160_v25 = vld [vmem:[%s8127_s2 + $0x4] sm:$0xf] }
 0xd80   :  { %v5715_v6 = vmul.f32 -1.442695, %v1828_v24  ;;  %v7172_v24 = vld [vmem:[%s8127_s2 + $0x8] sm:$0xf] }
 0xd81   :  { %6180 = vpow2.f32 %v5714_v3 }
 0xd82   :  { %6182 = vpow2.f32 %v5715_v6 }
 0xd89   :  { %v6179_v27 = vpop.eup %6178 }
 0xd8a   :  { %1837 = vrot.lane.b32.xlu1 %v6179_v27, %s6464_s13  ;;  %v7166_v27 = vld [vmem:[%s8125_s3 + $0x18] sm:$0x3f] }
 0xd8b   :  { %v6181_v5 = vpop.eup %6180 }
 0xd8c   :  { %v1832_v57 = vadd.f32 1.0, %v6181_v5  ;;  %v6183_v60 = vpop.eup %6182 }
 0xd8d   :  { %v1844_v45 = vadd.f32 1.0, %v6183_v60 }
 0xd8e   :  { %6184 = vrcp.f32 %v1832_v57 }
 0xd8f   :  { %6186 = vrcp.f32 %v1844_v45 }
 0xd98   :  { %v6185_v61 = vpop.eup %6184 }
 0xd99   :  { %v6187_v12 = vpop.eup %6186 }
 0xdfc   :  { %v1838_v9 = vpop.permute.xlu1 %1837 }
 0xdfd   :  { %v1840_v52 = vmul.f32 %v6185_v61, %v1838_v9 }
 0xdff   :  { %6188 = vtanh.f32 %v1840_v52  ;;  %5895 = vmatmul.mubr.msk.f32.vlgmr.msra.gmra.mrb[4].mxu1 %vm268_vm5, %v1840_v52 }
 0xe00   :  { %5733 = vmatpush1.msk.msra.mxu1 %vm73_vm0, %v7108_v32  ;;  %3244 = vmatprep.mubr.f32.mxu1 %v6461_v2 }
 0xe01   :  { %5735 = vmatprep.subr.msk.mxu1 %vm157_vm2, %v6560_v7 }
 0xe09   :  { %v6189_v4 = vpop.eup %6188 }
 0xe0a   :  { %v1848_v53 = vmul.f32 %v6189_v4, %v6187_v12 }
 0xe0c   :  { %5716 = vst.msk [vmem:[%s8123_s12 + $0x8] sm:$0xf] %vm266_vm6, %v1848_v53 }
 0xed2   :  { %v1920_v42 = vpop.f32.mrb[4].mxu1 }
 0xed3   :  { %v1931_v63 = vrot.slane %v1920_v42, %v6658_v51  ;;  %v5896_v18 = vpop.f32.mrb[5].mxu1 }
 0xed5   :  { %v1932_v30 = vcombine.high %v1931_v63, %v1931_v63  ;;  %v1939_v16 = vrot.slane %v1931_v63, %v6658_v51 }
 0xed7   :  { %v1946_v21 = vrot.slane %v1932_v30, %v6658_v51  ;;  %v1947_v22 = vcombine.high %v1939_v16, %v1939_v16  ;;  %v1952_v39 = vrot.slane %v1939_v16, %v6628_v26 }
 0xed9   :  { %v1948_v41 = vcombine.high %v1946_v21, %v1946_v21  ;;  %2118 = vrot.lane.b32.xlu0 %v1952_v39, %s6464_s13  ;;  %v1956_v33 = vrot.slane %v1946_v21, %v6628_v26  ;;  %v1960_v56 = vrot.slane %v1947_v22, %v6628_v26  ;;  %v1969_v38 = vadd.f32 %v7136_v36, %v1952_v39 }
 0xedb   :  { %2120 = vrot.lane.b32.xlu1 %v1956_v33, %s6464_s13  ;;  %v7129_v48 = vrot.slane %v1948_v41, %v6628_v26  ;;  %v1970_v62 = vadd.f32 %v7160_v25, %v1956_v33  ;;  %v1971_v6 = vadd.f32 %v7172_v24, %v1960_v56 }
 0xedd   :  { %2122 = vrot.lane.b32.xlu0 %v1960_v56, %s6464_s13 }
 0xedf   :  { %2124 = vrot.lane.b32.xlu1 %v7129_v48, %s6464_s13 }
 0xf4b   :  { %v2119_v8 = vpop.permute.xlu0 %2118 }
 0xf4c   :  { %v2130_v19 = vadd.f32 %v7142_v47, %v2119_v8 }
 0xf4d   :  { %v2121_v50 = vpop.permute.xlu1 %2120 }
 0xf4e   :  { %6190 = vtanh.f32 %v2130_v19  ;;  %v2131_v54 = vadd.f32 %v7148_v43, %v2121_v50 }
 0xf4f   :  { %6192 = vtanh.f32 %v1969_v38  ;;  %v2123_v55 = vpop.permute.xlu0 %2122 }
 0xf50   :  { %6194 = vtanh.f32 %v2131_v54  ;;  %v2132_v1 = vadd.f32 %v7154_v44, %v2123_v55 }
 0xf51   :  { %v2125_v29 = vpop.permute.xlu1 %2124 }
 0xf52   :  { %6196 = vtanh.f32 %v2132_v1  ;;  %v2133_v3 = vadd.f32 %v7166_v27, %v2125_v29 }
 0xf54   :  { %6198 = vtanh.f32 %v2133_v3 }
 0xf55   :  { %6200 = vtanh.f32 %v1970_v62 }
 0xf56   :  { %6202 = vtanh.f32 %v1971_v6 }
 0xf58   :  { %v6191_v5 = vpop.eup %6190 }
 0xf59   :  { %v6193_v57 = vpop.eup %6192  ;;  %v2138_v60 = vmul.f32 %v6191_v5, %v6710_v31 }
 0xf5a   :  { %v6195_v45 = vpop.eup %6194  ;;  %v1977_v53 = vmul.f32 %v6193_v57, %v6748_v59  ;;  %v7196_v57 = vld [vmem:[%s8127_s2 + $0xc] sm:$0xf] }
 0xf5b   :  { %v2142_v61 = vsel %vm574_vm7, %v2138_v60, 0.0  ;;  %v2139_v9 = vmul.f32 %v6195_v45, %v6710_v31  ;;  %v1972_v60 = vadd.f32 %v7196_v57, %v7129_v48 }
 0xf5c   :  { %v6197_v52 = vpop.eup %6196  ;;  %2143 = vadd.xlane.f32.xlu0 %v2142_v61  ;;  %v1981_v16 = vsel %vm266_vm6, %v1977_v53, 0.0 }
 0xf5d   :  { %v2145_v12 = vsel %vm574_vm7, %v2139_v9, 0.0  ;;  %v2140_v4 = vmul.f32 %v6197_v52, %v6710_v31  ;;  %6204 = vtanh.f32 %v1972_v60 }
 0xf5e   :  { %v6199_v42 = vpop.eup %6198  ;;  %2146 = vadd.xlane.f32.xlu1 %v2145_v12 }
 0xf5f   :  { %v2148_v63 = vsel %vm574_vm7, %v2140_v4, 0.0  ;;  %v2141_v18 = vmul.f32 %v6199_v42, %v6710_v31  ;;  %v6201_v30 = vpop.eup %6200 }
 0xf60   :  { %2149 = vadd.xlane.f32.xlu0 %v2148_v63  ;;  %v1978_v22 = vmul.f32 %v6201_v30, %v6748_v59  ;;  %v6203_v39 = vpop.eup %6202 }
 0xf61   :  { %v2151_v21 = vsel %vm574_vm7, %v2141_v18, 0.0  ;;  %v1979_v33 = vmul.f32 %v6203_v39, %v6748_v59 }
 0xf62   :  { %1982 = vadd.xlane.f32.xlu1 %v1981_v16  ;;  %v1984_v41 = vsel %vm266_vm6, %v1978_v22, 0.0 }
 0xf63   :  { %v1987_v56 = vsel %vm266_vm6, %v1979_v33, 0.0 }
 0xf64   :  { %2152 = vadd.xlane.f32.xlu0 %v2151_v21 }
 0xf67   :  { %v6205_v45 = vpop.eup %6204 }
 0xf68   :  { %1985 = vadd.xlane.f32.xlu0 %v1984_v41  ;;  %v1980_v61 = vmul.f32 %v6205_v45, %v6748_v59 }
 0xf6a   :  { %v1990_v9 = vsel %vm266_vm6, %v1980_v61, 0.0 }
 0xf6c   :  { %1988 = vadd.xlane.f32.xlu0 %v1987_v56 }
 0xfe9   :  { %v2144_v38 = vpop.xlane.xlu0 %2143 }
 0xfea   :  { %v2154_v8 = vmul.f32 0.7, %v2144_v38 }
 0xfeb   :  { %v2147_v19 = vpop.xlane.xlu1 %2146 }
 0xfec   :  { %v2158_v50 = vadd.f32 %v2154_v8, %v6758_v14  ;;  %v2155_v54 = vmul.f32 0.7, %v2147_v19 }
 0xfed   :  { %v2150_v55 = vpop.xlane.xlu0 %2149 }
 0xfee   :  { %v2159_v1 = vadd.f32 %v2155_v54, %v6756_v13  ;;  %v2156_v29 = vmul.f32 0.7, %v2150_v55  ;;  %2167 = vperm.xlu1 %6079, %v2158_v50  }
 0xfef   :  { %v1983_v12 = vpop.xlane.xlu1 %1982 }
 0xff0   :  { %v2160_v62 = vadd.f32 %v2156_v29, %v6762_v37  ;;  %2170 = vperm.xlu0 %6080, %v2159_v1   ;;  %v2000_v8 = vrot.slane %v1983_v12, %v6781_v58 }
 0xff1   :  { %v2153_v3 = vpop.xlane.xlu0 %2152 }
 0xff2   :  { %v2157_v6 = vmul.f32 0.7, %v2153_v3  ;;  %2173 = vperm.xlu1 %6079, %v2160_v62  }
 0xff4   :  { %v2161_v5 = vadd.f32 %v2157_v6, %v6765_v40 }
 0xff5   :  { %v1986_v52 = vpop.xlane.xlu0 %1985 }
 0xff6   :  { %2176 = vperm.xlu0 %6080, %v2161_v5   ;;  %v2004_v56 = vrot.slane %v1986_v52, %v6781_v58 }
 0xff8   :  { %v2013_v55 = vsel %vm437_vm8, %v2004_v56, %v2000_v8 }
 0xff9   :  { %v1989_v4 = vpop.xlane.xlu0 %1988 }
 0xffa   :  { %v2008_v38 = vrot.slane %v1989_v4, %v6781_v58 }
 0xffc   :  { %v2014_v29 = vsel %vm439_vm9, %v2008_v38, %v2013_v55 }
0x1016   :  { %1991 = vadd.xlane.f32.xlu1 %v1990_v9 }
0x106d   :  { %v2168_v53 = vpop.permute.xlu1 %2167 }
0x106e   :  { %v2181_v30 = vrot.slane %v2168_v53, %v6781_v58 }
0x106f   :  { %v2171_v42 = vpop.permute.xlu0 %2170 }
0x1070   :  { %v2185_v63 = vrot.slane %v2171_v42, %v6781_v58 }
0x1071   :  { %v2174_v18 = vpop.permute.xlu1 %2173 }
0x1072   :  { %v2189_v16 = vrot.slane %v2174_v18, %v6781_v58  ;;  %v2194_v48 = vsel %vm437_vm8, %v2185_v63, %v2181_v30 }
0x1074   :  { %v2195_v39 = vsel %vm439_vm9, %v2189_v16, %v2194_v48 }
0x1075   :  { %v2177_v21 = vpop.permute.xlu0 %2176 }
0x1076   :  { %v2193_v22 = vrot.slane %v2177_v21, %v6781_v58 }
0x1078   :  { %v2196_v41 = vsel %vm441_vm10, %v2193_v22, %v2195_v39 }
0x1079   :  { %v2198_v33 = vsel %vm665_vm11, %v2196_v41, -inf }
0x107a   :  { %2199 = vmax.xlane.f32.xlu0 %v2198_v33 }
0x10a3   :  { %v1992_v19 = vpop.xlane.xlu1 %1991 }
0x10a4   :  { %v2012_v54 = vrot.slane %v1992_v19, %v6781_v58 }
0x10a6   :  { %v2015_v3 = vsel %vm441_vm10, %v2012_v54, %v2014_v29 }
0x10a7   :  { %v2017_v6 = vsel %vm444_vm12, %v2015_v3, -inf }
0x10a8   :  { %2018 = vmax.xlane.f32.xlu1 %v2017_v6 }
0x1107   :  { %v2200_v60 = vpop.xlane.xlu0 %2199 }
0x1108   :  { %v2205_v45 = vrot.slane %v2200_v60, %v6628_v26  ;;  %v2209_v61 = vrot.slane %v2200_v60, %v6641_v34  ;;  %v2213_v9 = vrot.slane %v2200_v60, %v6721_v46  ;;  %v2217_v53 = vrot.slane %v2200_v60, %v6725_v49 }
0x110a   :  { %v2222_v42 = vsub.f32 %v2158_v50, %v2205_v45  ;;  %v2223_v63 = vsub.f32 %v2159_v1, %v2209_v61  ;;  %v2224_v18 = vsub.f32 %v2160_v62, %v2213_v9  ;;  %v2225_v48 = vsub.f32 %v2161_v5, %v2217_v53 }
0x110c   :  { %v2226_v30 = vmul.f32 1.442695, %v2222_v42  ;;  %v2228_v16 = vmul.f32 1.442695, %v2223_v63  ;;  %v2230_v21 = vmul.f32 1.442695, %v2224_v18 }
0x110d   :  { %v2232_v22 = vmul.f32 1.442695, %v2225_v48 }
0x110e   :  { %6206 = vpow2.f32 %v2226_v30 }
0x110f   :  { %6208 = vpow2.f32 %v2228_v16 }
0x1110   :  { %6210 = vpow2.f32 %v2230_v21 }
0x1111   :  { %6212 = vpow2.f32 %v2232_v22 }
0x1118   :  { %v7222_v39 = vpop.eup %6206 }
0x1119   :  { %v7224_v41 = vpop.eup %6208  ;;  %2239 = vperm.xlu1 %6079, %v7222_v39  }
0x111a   :  { %2242 = vperm.xlu0 %6080, %v7224_v41   ;;  %v7228_v50 = vpop.eup %6210 }
0x111b   :  { %v7231_v1 = vpop.eup %6212 }
0x111d   :  { %2245 = vperm.xlu1 %6079, %v7228_v50  }
0x1121   :  { %2248 = vperm.xlu1 %6079, %v7231_v1  }
0x1135   :  { %v2019_v62 = vpop.xlane.xlu1 %2018 }
0x1136   :  { %v2024_v5 = vrot.slane %v2019_v62, %v6628_v26  ;;  %v2028_v33 = vrot.slane %v2019_v62, %v6641_v34  ;;  %v2032_v56 = vrot.slane %v2019_v62, %v6721_v46  ;;  %v2036_v38 = vrot.slane %v2019_v62, %v6725_v49 }
0x1138   :  { %v2041_v8 = vsub.f32 %v1983_v12, %v2024_v5  ;;  %v2042_v54 = vsub.f32 %v1986_v52, %v2028_v33  ;;  %v2043_v55 = vsub.f32 %v1989_v4, %v2032_v56  ;;  %v2044_v29 = vsub.f32 %v1992_v19, %v2036_v38  ;;  %v5719_v52 = vld [vmem:[%s8116_s1 + $0xc] sm:$0xf] }
0x1139   :  { %v2344_v19 = vrot.slane %v5719_v52, %v6628_v26  ;;  %v2358_v56 = vrot.slane %v5719_v52, %v6721_v46  ;;  %v5718_v38 = vld [vmem:[%s8119_s0 + $0xc] sm:$0xf] }
0x113a   :  { %v2045_v3 = vmul.f32 1.442695, %v2041_v8  ;;  %v2047_v6 = vmul.f32 1.442695, %v2042_v54  ;;  %v2049_v60 = vmul.f32 1.442695, %v2043_v55  ;;  %v2305_v8 = vrot.slane %v5718_v38, %v6628_v26 }
0x113b   :  { %v2051_v45 = vmul.f32 1.442695, %v2044_v29  ;;  %v2319_v54 = vrot.slane %v5718_v38, %v6721_v46 }
0x113c   :  { %6214 = vpow2.f32 %v2045_v3 }
0x113d   :  { %6216 = vpow2.f32 %v2047_v6 }
0x113e   :  { %6218 = vpow2.f32 %v2049_v60 }
0x113f   :  { %6220 = vpow2.f32 %v2051_v45 }
0x1146   :  { %v7238_v61 = vpop.eup %6214 }
0x1147   :  { %v7240_v9 = vpop.eup %6216  ;;  %2058 = vperm.xlu0 %6080, %v7238_v61  }
0x1148   :  { %2061 = vperm.xlu1 %6079, %v7240_v9   ;;  %v7247_v12 = vpop.eup %6218 }
0x1149   :  { %v7249_v4 = vpop.eup %6220 }
0x114b   :  { %2064 = vperm.xlu0 %6080, %v7247_v12  }
0x114c   :  { %2067 = vperm.xlu1 %6079, %v7249_v4  }
0x114f   :  { %2346 = vbcast.lane.b32.xlu0 %v2344_v19, 256 }
0x1198   :  { %v2240_v53 = vpop.permute.xlu1 %2239 }
0x1199   :  { %v2243_v42 = vpop.permute.xlu0 %2242  ;;  %v2253_v30 = vrot.slane %v2240_v53, %v6781_v58 }
0x119a   :  { %v2257_v18 = vrot.slane %v2243_v42, %v6781_v58 }
0x119c   :  { %v2246_v63 = vpop.permute.xlu1 %2245  ;;  %v2266_v21 = vsel %vm437_vm8, %v2257_v18, %v2253_v30 }
0x119d   :  { %v2261_v16 = vrot.slane %v2246_v63, %v6781_v58 }
0x119f   :  { %v2267_v62 = vsel %vm439_vm9, %v2261_v16, %v2266_v21  ;;  %v2351_v16 = vrot.slane %v5719_v52, %v6641_v34  ;;  %v2312_v21 = vrot.slane %v5718_v38, %v6641_v34 }
0x11a0   :  { %v2249_v48 = vpop.permute.xlu1 %2248 }
0x11a1   :  { %v2265_v22 = vrot.slane %v2249_v48, %v6781_v58  ;;  %v2365_v48 = vrot.slane %v5719_v52, %v6725_v49 }
0x11a3   :  { %v2268_v5 = vsel %vm441_vm10, %v2265_v22, %v2267_v62  ;;  %v2326_v22 = vrot.slane %v5718_v38, %v6725_v49 }
0x11a4   :  { %v2270_v33 = vsel %vm665_vm11, %v2268_v5, 0.0 }
0x11a5   :  { %2271 = vadd.xlane.f32.xlu0 %v2270_v33 }
0x11bb   :  { %2360 = vbcast.lane.b32.xlu0 %v2358_v56, 256 }
0x11bf   :  { %2307 = vbcast.lane.b32.xlu0 %v2305_v8, 256 }
0x11c3   :  { %2321 = vbcast.lane.b32.xlu0 %v2319_v54, 256 }
0x11c6   :  { %v2059_v55 = vpop.permute.xlu0 %2058 }
0x11c7   :  { %v2062_v29 = vpop.permute.xlu1 %2061  ;;  %v2072_v3 = vrot.slane %v2059_v55, %v6781_v58 }
0x11c8   :  { %v2076_v6 = vrot.slane %v2062_v29, %v6781_v58 }
0x11ca   :  { %v2065_v60 = vpop.permute.xlu0 %2064  ;;  %v2085_v53 = vsel %vm437_vm8, %v2076_v6, %v2072_v3 }
0x11cb   :  { %v2080_v45 = vrot.slane %v2065_v60, %v6781_v58  ;;  %v2068_v19 = vpop.permute.xlu1 %2067 }
0x11cc   :  { %v2084_v42 = vrot.slane %v2068_v19, %v6781_v58 }
0x11cd   :  { %v2086_v63 = vsel %vm439_vm9, %v2080_v45, %v2085_v53 }
0x11ce   :  { %v2087_v18 = vsel %vm441_vm10, %v2084_v42, %v2086_v63  ;;  %v2347_v62 = vpop.permute.xlu0 %2346 }
0x11cf   :  { %v2089_v30 = vsel %vm444_vm12, %v2087_v18, 0.0 }
0x11d0   :  { %2090 = vadd.xlane.f32.xlu1 %v2089_v30 }
0x11e1   :  { %2353 = vbcast.lane.b32.xlu1 %v2351_v16, 256 }
0x11e5   :  { %2367 = vbcast.lane.b32.xlu1 %v2365_v48, 256 }
0x11e9   :  { %2314 = vbcast.lane.b32.xlu1 %v2312_v21, 256 }
0x11ed   :  { %2328 = vbcast.lane.b32.xlu1 %v2326_v22, 256 }
0x1232   :  { %v2272_v5 = vpop.xlane.xlu0 %2271 }
0x1233   :  { %6222 = vrcp.f32 %v2272_v5 }
0x1236   :  { %v2361_v29 = vpop.permute.xlu0 %2360 }
0x123a   :  { %v2308_v18 = vpop.permute.xlu0 %2307 }
0x123d   :  { %v6223_v33 = vpop.eup %6222 }
0x123e   :  { %v2286_v56 = vrot.slane %v6223_v33, %v6721_v46  ;;  %v2278_v8 = vrot.slane %v6223_v33, %v6628_v26  ;;  %v2282_v38 = vrot.slane %v6223_v33, %v6641_v34  ;;  %v2290_v45 = vrot.slane %v6223_v33, %v6725_v49 }
0x1240   :  { %v2295_v54 = vmul.f32 %v7222_v39, %v2278_v8  ;;  %v2297_v55 = vmul.f32 %v7228_v50, %v2286_v56  ;;  %v2296_v60 = vmul.f32 %v7224_v41, %v2282_v38  ;;  %v2298_v39 = vmul.f32 %v7231_v1, %v2290_v45  ;;  %v2322_v8 = vpop.permute.xlu0 %2321 }
0x1242   :  { %v2373_v52 = vmul.f32 %v2347_v62, %v2295_v54  ;;  %v2375_v3 = vmul.f32 %v2361_v29, %v2297_v55 }
0x1244   :  { %2382 = vperm.xlu0 %6080, %v2373_v52  }
0x1248   :  { %2388 = vperm.xlu0 %6080, %v2375_v3  }
0x125d   :  { %v2091_v6 = vpop.xlane.xlu1 %2090 }
0x125e   :  { %6224 = vrcp.f32 %v2091_v6 }
0x1261   :  { %v2354_v19 = vpop.permute.xlu1 %2353 }
0x1262   :  { %v2374_v53 = vmul.f32 %v2354_v19, %v2296_v60 }
0x1264   :  { %2385 = vperm.xlu1 %6079, %v2374_v53  }
0x1265   :  { %v2368_v42 = vpop.permute.xlu1 %2367 }
0x1266   :  { %v2376_v50 = vmul.f32 %v2368_v42, %v2298_v39 }
0x1268   :  { %v6225_v63 = vpop.eup %6224  ;;  %2391 = vperm.xlu1 %6079, %v2376_v50  }
0x1269   :  { %v2097_v30 = vrot.slane %v6225_v63, %v6628_v26  ;;  %v2101_v16 = vrot.slane %v6225_v63, %v6641_v34  ;;  %v2315_v48 = vpop.permute.xlu1 %2314  ;;  %v2105_v21 = vrot.slane %v6225_v63, %v6721_v46  ;;  %v2109_v41 = vrot.slane %v6225_v63, %v6725_v49 }
0x126b   :  { %v2114_v22 = vmul.f32 %v7238_v61, %v2097_v30  ;;  %v2115_v62 = vmul.f32 %v7240_v9, %v2101_v16  ;;  %v2116_v33 = vmul.f32 %v7247_v12, %v2105_v21  ;;  %v2117_v56 = vmul.f32 %v7249_v4, %v2109_v41 }
0x126d   :  { %v2334_v5 = vmul.f32 %v2308_v18, %v2114_v22  ;;  %v2335_v1 = vmul.f32 %v2315_v48, %v2115_v62  ;;  %v2329_v54 = vpop.permute.xlu1 %2328  ;;  %v2336_v55 = vmul.f32 %v2322_v8, %v2116_v33 }
0x126e   :  { %v2337_v52 = vmul.f32 %v2329_v54, %v2117_v56 }
0x126f   :  { %2490 = vperm.xlu0 %6080, %v2334_v5   ;;  %2493 = vperm.xlu1 %6079, %v2335_v1  }
0x1273   :  { %2496 = vperm.xlu0 %6080, %v2336_v55   ;;  %2499 = vperm.xlu1 %6079, %v2337_v52  }
0x12c3   :  { %v2383_v29 = vpop.permute.xlu0 %2382 }
0x12c4   :  { %v2396_v61 = vrot.slane %v2383_v29, %v6781_v58 }
0x12c7   :  { %v2389_v38 = vpop.permute.xlu0 %2388 }
0x12c8   :  { %v2404_v12 = vrot.slane %v2389_v38, %v6781_v58 }
0x12e3   :  { %v2386_v3 = vpop.permute.xlu1 %2385 }
0x12e4   :  { %v2400_v9 = vrot.slane %v2386_v3, %v6781_v58 }
0x12e6   :  { %v2409_v6 = vsel %vm437_vm8, %v2400_v9, %v2396_v61 }
0x12e7   :  { %v2392_v4 = vpop.permute.xlu1 %2391  ;;  %v2410_v45 = vsel %vm439_vm9, %v2404_v12, %v2409_v6 }
0x12e8   :  { %v2408_v60 = vrot.slane %v2392_v4, %v6781_v58 }
0x12ea   :  { %v2411_v19 = vsel %vm441_vm10, %v2408_v60, %v2410_v45 }
0x12eb   :  { %5722 = vmatmul.mubr.msk.f32.vlgmr.msra.gmra.mrb[6].mxu0 %vm69_vm1, %v2411_v19 }
0x12ec   :  { %5724 = vmatpush1.msk.msra.mxu0 %vm157_vm2, %v7071_v0  ;;  %2586 = vmatprep.mubr.f32.mxu0 %v6461_v2 }
0x12ed   :  { %6009 = vmatprep.subr.bf16.mxu0 %v6462_v11 }
0x12ee   :  { %v2491_v53 = vpop.permute.xlu0 %2490  ;;  %v2494_v39 = vpop.permute.xlu1 %2493 }
0x12ef   :  { %v2504_v42 = vrot.slane %v2491_v53, %v6781_v58  ;;  %v2508_v50 = vrot.slane %v2494_v39, %v6781_v58 }
0x12f1   :  { %v2517_v48 = vsel %vm437_vm8, %v2508_v50, %v2504_v42 }
0x12f2   :  { %v2497_v63 = vpop.permute.xlu0 %2496  ;;  %v2500_v18 = vpop.permute.xlu1 %2499 }
0x12f3   :  { %v2512_v30 = vrot.slane %v2497_v63, %v6781_v58  ;;  %v2516_v16 = vrot.slane %v2500_v18, %v6781_v58 }
0x12f5   :  { %v2518_v0 = vsel %vm439_vm9, %v2512_v30, %v2517_v48 }
0x12f6   :  { %v2519_v21 = vsel %vm441_vm10, %v2516_v16, %v2518_v0 }
0x12f7   :  { %5725 = vmatmul.mubr.msk.f32.vlgmr.msra.gmra.mrb[6].mxu0 %vm153_vm3, %v2519_v21 }
0x12f8   :  { %6011 = vmatpush3.bf16.msra.mxu0 %v6592_v15  ;;  %5913 = vmatprep.mubr.msk.f32.mxu0 %vm6463_vm4, %v6461_v2 }
0x12f9   :  { %6012 = vmatprep.subr.bf16.mxu0 %v6462_v11 }
0x12fc   :  { %6014 = vmatpush3.bf16.msra.mxu0 %v6598_v17 }
0x12fd   :  { %6015 = vmatprep.subr.bf16.mxu0 %v6462_v11 }
0x1300   :  { %6017 = vmatpush3.bf16.msra.mxu0 %v6608_v20 }
0x1301   :  { %6018 = vmatprep.subr.bf16.mxu0 %v6462_v11 }
0x1304   :  { %6020 = vmatpush3.bf16.msra.mxu0 %v6618_v23 }
0x1305   :  { %5744 = vmatprep.subr.msk.mxu0 %vm73_vm0, %v7097_v10 }
0x13ca   :  { %v2588_v41 = vpop.f32.mrb[6].mxu0 }
0x13cb   :  { %v2593_v22 = vadd.f32 %v2588_v41, %v6634_v28  ;;  %v2590_v62 = vpop.f32.mrb[7].mxu0 }
0x13cc   :  { %v2594_v33 = vadd.f32 %v2590_v62, %v6644_v35 }
0x13cd   :  { %6226 = vtanh.f32 %v2593_v22  ;;  %v5726_v1 = vmul.f32 -1.442695, %v2593_v22 }
0x13ce   :  { %v5727_v56 = vmul.f32 -1.442695, %v2594_v33 }
0x13cf   :  { %6228 = vpow2.f32 %v5726_v1 }
0x13d0   :  { %6230 = vpow2.f32 %v5727_v56 }
0x13d7   :  { %v6227_v5 = vpop.eup %6226 }
0x13d8   :  { %2603 = vrot.lane.b32.xlu0 %v6227_v5, %s6464_s13 }
0x13d9   :  { %v6229_v8 = vpop.eup %6228 }
0x13da   :  { %v2598_v54 = vadd.f32 1.0, %v6229_v8  ;;  %v6231_v55 = vpop.eup %6230 }
0x13db   :  { %v2610_v52 = vadd.f32 1.0, %v6231_v55 }
0x13dc   :  { %6232 = vrcp.f32 %v2598_v54 }
0x13dd   :  { %6234 = vrcp.f32 %v2610_v52 }
0x13e6   :  { %v6233_v10 = vpop.eup %6232 }
0x13e7   :  { %v6235_v61 = vpop.eup %6234 }
0x144a   :  { %v2604_v29 = vpop.permute.xlu0 %2603 }
0x144b   :  { %v2606_v3 = vmul.f32 %v6233_v10, %v2604_v29 }
0x144d   :  { %6236 = vtanh.f32 %v2606_v3  ;;  %5914 = vmatmul.mubr.msk.f32.vlgmr.msra.gmra.mrb[8].mxu0 %vm268_vm5, %v2606_v3 }
0x144e   :  { %5745 = vmatpush1.msk.msra.mxu0 %vm73_vm0, %v7108_v32  ;;  %4010 = vmatprep.mubr.f32.mxu0 %v6461_v2 }
0x144f   :  { %5747 = vmatprep.subr.msk.mxu0 %vm157_vm2, %v6560_v7 }
0x1457   :  { %v6237_v38 = vpop.eup %6236 }
0x1458   :  { %v2614_v9 = vmul.f32 %v6237_v38, %v6235_v61 }
0x145a   :  { %5728 = vst.msk [vmem:[%s8123_s12 + $0xc] sm:$0xf] %vm266_vm6, %v2614_v9 }
0x1520   :  { %v2686_v6 = vpop.f32.mrb[8].mxu0 }
0x1521   :  { %v2697_v12 = vrot.slane %v2686_v6, %v6658_v51  ;;  %v5915_v4 = vpop.f32.mrb[9].mxu0 }
0x1523   :  { %v2698_v60 = vcombine.high %v2697_v12, %v2697_v12  ;;  %v2705_v32 = vrot.slane %v2697_v12, %v6658_v51 }
0x1525   :  { %v2712_v45 = vrot.slane %v2698_v60, %v6658_v51  ;;  %v2713_v19 = vcombine.high %v2705_v32, %v2705_v32  ;;  %v2718_v53 = vrot.slane %v2705_v32, %v6628_v26 }
0x1527   :  { %v2714_v39 = vcombine.high %v2712_v45, %v2712_v45  ;;  %v2722_v42 = vrot.slane %v2712_v45, %v6628_v26  ;;  %2884 = vrot.lane.b32.xlu1 %v2718_v53, %s6464_s13  ;;  %v2726_v50 = vrot.slane %v2713_v19, %v6628_v26  ;;  %v2735_v16 = vadd.f32 %v7136_v36, %v2718_v53 }
0x1529   :  { %2886 = vrot.lane.b32.xlu0 %v2722_v42, %s6464_s13  ;;  %v7350_v63 = vrot.slane %v2714_v39, %v6628_v26  ;;  %v2736_v21 = vadd.f32 %v7160_v25, %v2722_v42 }
0x152b   :  { %2888 = vrot.lane.b32.xlu1 %v2726_v50, %s6464_s13 }
0x152d   :  { %2890 = vrot.lane.b32.xlu0 %v7350_v63, %s6464_s13 }
0x1599   :  { %v2885_v18 = vpop.permute.xlu1 %2884 }
0x159a   :  { %v2896_v30 = vadd.f32 %v7142_v47, %v2885_v18  ;;  %v2737_v47 = vadd.f32 %v7172_v24, %v2726_v50 }
0x159b   :  { %v2887_v48 = vpop.permute.xlu0 %2886 }
0x159c   :  { %6238 = vtanh.f32 %v2896_v30  ;;  %v2897_v0 = vadd.f32 %v7148_v43, %v2887_v48  ;;  %v2738_v48 = vadd.f32 %v7196_v57, %v7350_v63 }
0x159d   :  { %v2889_v41 = vpop.permute.xlu1 %2888 }
0x159e   :  { %6240 = vtanh.f32 %v2897_v0  ;;  %v2898_v22 = vadd.f32 %v7154_v44, %v2889_v41 }
0x159f   :  { %6242 = vtanh.f32 %v2735_v16  ;;  %v2891_v62 = vpop.permute.xlu0 %2890 }
0x15a0   :  { %6244 = vtanh.f32 %v2898_v22  ;;  %v2899_v5 = vadd.f32 %v7166_v27, %v2891_v62 }
0x15a1   :  { %6246 = vtanh.f32 %v2736_v21 }
0x15a2   :  { %6248 = vtanh.f32 %v2899_v5 }
0x15a3   :  { %6250 = vtanh.f32 %v2737_v47 }
0x15a4   :  { %6252 = vtanh.f32 %v2738_v48 }
0x15a6   :  { %v6239_v36 = vpop.eup %6238 }
0x15a7   :  { %v2904_v1 = vmul.f32 %v6239_v36, %v6710_v31 }
0x15a8   :  { %v6241_v43 = vpop.eup %6240 }
0x15a9   :  { %v6243_v33 = vpop.eup %6242  ;;  %v2908_v25 = vsel %vm574_vm7, %v2904_v1, 0.0  ;;  %v2905_v56 = vmul.f32 %v6241_v43, %v6710_v31 }
0x15aa   :  { %v6245_v44 = vpop.eup %6244  ;;  %2909 = vadd.xlane.f32.xlu1 %v2908_v25  ;;  %v2743_v3 = vmul.f32 %v6243_v33, %v6748_v59 }
0x15ab   :  { %v6247_v8 = vpop.eup %6246  ;;  %v2911_v54 = vsel %vm574_vm7, %v2905_v56, 0.0  ;;  %v2906_v27 = vmul.f32 %v6245_v44, %v6710_v31 }
0x15ac   :  { %v6249_v55 = vpop.eup %6248  ;;  %2912 = vadd.xlane.f32.xlu0 %v2911_v54  ;;  %v2744_v29 = vmul.f32 %v6247_v8, %v6748_v59  ;;  %v2747_v9 = vsel %vm266_vm6, %v2743_v3, 0.0 }
0x15ad   :  { %v2907_v24 = vmul.f32 %v6249_v55, %v6710_v31  ;;  %v2914_v52 = vsel %vm574_vm7, %v2906_v27, 0.0  ;;  %v6251_v61 = vpop.eup %6250 }
0x15ae   :  { %v2750_v38 = vsel %vm266_vm6, %v2744_v29, 0.0  ;;  %v2745_v6 = vmul.f32 %v6251_v61, %v6748_v59  ;;  %v6253_v0 = vpop.eup %6252 }
0x15af   :  { %v2917_v10 = vsel %vm574_vm7, %v2907_v24, 0.0  ;;  %v2746_v21 = vmul.f32 %v6253_v0, %v6748_v59 }
0x15b0   :  { %2915 = vadd.xlane.f32.xlu0 %v2914_v52  ;;  %2918 = vadd.xlane.f32.xlu1 %v2917_v10  ;;  %v2753_v12 = vsel %vm266_vm6, %v2745_v6, 0.0 }
0x15b1   :  { %v2756_v41 = vsel %vm266_vm6, %v2746_v21, 0.0 }
0x15b4   :  { %2751 = vadd.xlane.f32.xlu0 %v2750_v38  ;;  %2748 = vadd.xlane.f32.xlu1 %v2747_v9 }
0x15b8   :  { %2754 = vadd.xlane.f32.xlu1 %v2753_v12 }
0x1637   :  { %v2910_v4 = vpop.xlane.xlu1 %2909 }
0x1638   :  { %v2920_v60 = vmul.f32 0.7, %v2910_v4 }
0x1639   :  { %v2913_v32 = vpop.xlane.xlu0 %2912 }
0x163a   :  { %v2924_v45 = vadd.f32 %v2920_v60, %v6758_v14  ;;  %v2921_v19 = vmul.f32 0.7, %v2913_v32 }
0x163c   :  { %v2925_v53 = vadd.f32 %v2921_v19, %v6756_v13  ;;  %2933 = vperm.xlu0 %6080, %v2924_v45  }
0x163d   :  { %v2919_v39 = vpop.xlane.xlu1 %2918  ;;  %v2916_v42 = vpop.xlane.xlu0 %2915 }
0x163e   :  { %v2923_v50 = vmul.f32 0.7, %v2919_v39  ;;  %v2922_v18 = vmul.f32 0.7, %v2916_v42  ;;  %2936 = vperm.xlu1 %6079, %v2925_v53  }
0x1640   :  { %v2927_v30 = vadd.f32 %v2923_v50, %v6765_v40  ;;  %v2926_v16 = vadd.f32 %v2922_v18, %v6762_v37 }
0x1641   :  { %v2749_v22 = vpop.xlane.xlu1 %2748  ;;  %v2752_v62 = vpop.xlane.xlu0 %2751 }
0x1642   :  { %2942 = vperm.xlu1 %6079, %v2927_v30   ;;  %2939 = vperm.xlu0 %6080, %v2926_v16   ;;  %v2766_v27 = vrot.slane %v2749_v22, %v6781_v58  ;;  %v2770_v55 = vrot.slane %v2752_v62, %v6781_v58 }
0x1644   :  { %v2779_v29 = vsel %vm437_vm8, %v2770_v55, %v2766_v27 }
0x1645   :  { %v2755_v5 = vpop.xlane.xlu1 %2754 }
0x1646   :  { %v2774_v24 = vrot.slane %v2755_v5, %v6781_v58 }
0x1648   :  { %v2780_v3 = vsel %vm439_vm9, %v2774_v24, %v2779_v29 }
0x1661   :  { %2757 = vadd.xlane.f32.xlu0 %v2756_v41 }
0x16bb   :  { %v2934_v47 = vpop.permute.xlu0 %2933 }
0x16bc   :  { %v2947_v43 = vrot.slane %v2934_v47, %v6781_v58 }
0x16bd   :  { %v2937_v36 = vpop.permute.xlu1 %2936 }
0x16be   :  { %v2951_v1 = vrot.slane %v2937_v36, %v6781_v58 }
0x16c0   :  { %v2960_v56 = vsel %vm437_vm8, %v2951_v1, %v2947_v43 }
0x16c1   :  { %v2943_v33 = vpop.permute.xlu1 %2942  ;;  %v2940_v25 = vpop.permute.xlu0 %2939 }
0x16c2   :  { %v2959_v57 = vrot.slane %v2943_v33, %v6781_v58  ;;  %v2955_v63 = vrot.slane %v2940_v25, %v6781_v58 }
0x16c4   :  { %v2961_v44 = vsel %vm439_vm9, %v2955_v63, %v2960_v56 }
0x16c5   :  { %v2962_v8 = vsel %vm441_vm10, %v2959_v57, %v2961_v44 }
0x16c6   :  { %v2964_v54 = vsel %vm665_vm11, %v2962_v8, -inf }
0x16c7   :  { %2965 = vmax.xlane.f32.xlu1 %v2964_v54 }
0x16ee   :  { %v2758_v52 = vpop.xlane.xlu0 %2757 }
0x16ef   :  { %v2778_v10 = vrot.slane %v2758_v52, %v6781_v58 }
0x16f1   :  { %v2781_v61 = vsel %vm441_vm10, %v2778_v10, %v2780_v3 }
0x16f2   :  { %v2783_v38 = vsel %vm444_vm12, %v2781_v61, -inf }
0x16f3   :  { %2784 = vmax.xlane.f32.xlu0 %v2783_v38 }
0x1754   :  { %v2966_v9 = vpop.xlane.xlu1 %2965 }
0x1755   :  { %v2971_v6 = vrot.slane %v2966_v9, %v6628_v26  ;;  %v2975_v12 = vrot.slane %v2966_v9, %v6641_v34  ;;  %v2979_v4 = vrot.slane %v2966_v9, %v6721_v46  ;;  %v2983_v60 = vrot.slane %v2966_v9, %v6725_v49 }
0x1757   :  { %v2988_v32 = vsub.f32 %v2924_v45, %v2971_v6  ;;  %v2989_v19 = vsub.f32 %v2925_v53, %v2975_v12  ;;  %v2991_v39 = vsub.f32 %v2927_v30, %v2983_v60  ;;  %v2990_v42 = vsub.f32 %v2926_v16, %v2979_v4 }
0x1759   :  { %v2992_v50 = vmul.f32 1.442695, %v2988_v32  ;;  %v2994_v18 = vmul.f32 1.442695, %v2989_v19  ;;  %v2998_v48 = vmul.f32 1.442695, %v2991_v39 }
0x175a   :  { %v2996_v0 = vmul.f32 1.442695, %v2990_v42  ;;  %v5730_v19 = vld [vmem:[%s8119_s0 + $0x10] sm:$0xf] }
0x175b   :  { %6254 = vpow2.f32 %v2992_v50  ;;  %v3071_v39 = vrot.slane %v5730_v19, %v6628_v26  ;;  %v3085_v42 = vrot.slane %v5730_v19, %v6721_v46 }
0x175c   :  { %6256 = vpow2.f32 %v2994_v18 }
0x175d   :  { %6258 = vpow2.f32 %v2998_v48 }
0x175e   :  { %6260 = vpow2.f32 %v2996_v0 }
0x1765   :  { %v7403_v21 = vpop.eup %6254 }
0x1766   :  { %v7405_v41 = vpop.eup %6256  ;;  %3005 = vperm.xlu0 %6080, %v7403_v21  }
0x1767   :  { %3008 = vperm.xlu1 %6079, %v7405_v41   ;;  %v7409_v45 = vpop.eup %6258 }
0x1768   :  { %v7411_v53 = vpop.eup %6260 }
0x176a   :  { %3014 = vperm.xlu0 %6080, %v7409_v45  }
0x176b   :  { %3011 = vperm.xlu1 %6079, %v7411_v53  }
0x1780   :  { %v2785_v30 = vpop.xlane.xlu0 %2784 }
0x1781   :  { %v2790_v16 = vrot.slane %v2785_v30, %v6628_v26  ;;  %v2794_v47 = vrot.slane %v2785_v30, %v6641_v34  ;;  %v2798_v36 = vrot.slane %v2785_v30, %v6721_v46  ;;  %v2802_v1 = vrot.slane %v2785_v30, %v6725_v49 }
0x1783   :  { %v2807_v43 = vsub.f32 %v2749_v22, %v2790_v16  ;;  %v2808_v33 = vsub.f32 %v2752_v62, %v2794_v47  ;;  %v2809_v25 = vsub.f32 %v2755_v5, %v2798_v36  ;;  %v2810_v57 = vsub.f32 %v2758_v52, %v2802_v1  ;;  %v5731_v22 = vld [vmem:[%s8116_s1 + $0x10] sm:$0xf] }
0x1784   :  { %v3117_v55 = vrot.slane %v5731_v22, %v6641_v34  ;;  %v3124_v24 = vrot.slane %v5731_v22, %v6721_v46 }
0x1785   :  { %v2811_v63 = vmul.f32 1.442695, %v2807_v43  ;;  %v2813_v56 = vmul.f32 1.442695, %v2808_v33  ;;  %v2815_v44 = vmul.f32 1.442695, %v2809_v25 }
0x1786   :  { %v2817_v8 = vmul.f32 1.442695, %v2810_v57  ;;  %v3110_v57 = vrot.slane %v5731_v22, %v6628_v26 }
0x1787   :  { %6262 = vpow2.f32 %v2811_v63  ;;  %v3131_v63 = vrot.slane %v5731_v22, %v6725_v49 }
0x1788   :  { %6264 = vpow2.f32 %v2813_v56  ;;  %v3078_v56 = vrot.slane %v5730_v19, %v6641_v34 }
0x1789   :  { %6266 = vpow2.f32 %v2815_v44  ;;  %v3092_v44 = vrot.slane %v5730_v19, %v6725_v49 }
0x178a   :  { %6268 = vpow2.f32 %v2817_v8 }
0x1791   :  { %v7419_v54 = vpop.eup %6262 }
0x1792   :  { %v7421_v27 = vpop.eup %6264  ;;  %2824 = vperm.xlu1 %6079, %v7419_v54  }
0x1793   :  { %2827 = vperm.xlu0 %6080, %v7421_v27   ;;  %v7428_v62 = vpop.eup %6266 }
0x1794   :  { %v7430_v5 = vpop.eup %6268 }
0x1796   :  { %2830 = vperm.xlu1 %6079, %v7428_v62  }
0x1797   :  { %2833 = vperm.xlu0 %6080, %v7430_v5  }
0x179a   :  { %3119 = vbcast.lane.b32.xlu1 %v3117_v55, 256 }
0x179e   :  { %3126 = vbcast.lane.b32.xlu1 %v3124_v24, 256 }
0x17e5   :  { %v3006_v52 = vpop.permute.xlu0 %3005 }
0x17e6   :  { %v3009_v10 = vpop.permute.xlu1 %3008  ;;  %v3019_v3 = vrot.slane %v3006_v52, %v6781_v58 }
0x17e7   :  { %v3023_v29 = vrot.slane %v3009_v10, %v6781_v58 }
0x17e9   :  { %v3015_v61 = vpop.permute.xlu0 %3014  ;;  %v3032_v12 = vsel %vm437_vm8, %v3023_v29, %v3019_v3 }
0x17ea   :  { %v3012_v38 = vpop.permute.xlu1 %3011  ;;  %v3031_v9 = vrot.slane %v3015_v61, %v6781_v58 }
0x17eb   :  { %v3027_v6 = vrot.slane %v3012_v38, %v6781_v58 }
0x17ed   :  { %v3033_v4 = vsel %vm439_vm9, %v3027_v6, %v3032_v12 }
0x17ee   :  { %v3034_v60 = vsel %vm441_vm10, %v3031_v9, %v3033_v4 }
0x17ef   :  { %v3036_v32 = vsel %vm665_vm11, %v3034_v60, 0.0 }
0x17f0   :  { %3037 = vadd.xlane.f32.xlu1 %v3036_v32 }
0x1801   :  { %3073 = vbcast.lane.b32.xlu1 %v3071_v39, 256 }
0x1805   :  { %3087 = vbcast.lane.b32.xlu1 %v3085_v42, 256 }
0x1811   :  { %v2825_v50 = vpop.permute.xlu1 %2824 }
0x1812   :  { %v2828_v18 = vpop.permute.xlu0 %2827  ;;  %v2838_v48 = vrot.slane %v2825_v50, %v6781_v58 }
0x1813   :  { %v2842_v0 = vrot.slane %v2828_v18, %v6781_v58 }
0x1815   :  { %v2831_v30 = vpop.permute.xlu1 %2830  ;;  %v2851_v36 = vsel %vm437_vm8, %v2842_v0, %v2838_v48 }
0x1816   :  { %v2846_v16 = vrot.slane %v2831_v30, %v6781_v58  ;;  %v2834_v47 = vpop.permute.xlu0 %2833 }
0x1817   :  { %v2850_v1 = vrot.slane %v2834_v47, %v6781_v58 }
0x1818   :  { %v2852_v43 = vsel %vm439_vm9, %v2846_v16, %v2851_v36 }
0x1819   :  { %v2853_v33 = vsel %vm441_vm10, %v2850_v1, %v2852_v43  ;;  %v3120_v8 = vpop.permute.xlu1 %3119 }
0x181a   :  { %v2855_v25 = vsel %vm444_vm12, %v2853_v33, 0.0 }
0x181b   :  { %2856 = vadd.xlane.f32.xlu0 %v2855_v25 }
0x181d   :  { %v3127_v55 = vpop.permute.xlu1 %3126 }
0x1831   :  { %3112 = vbcast.lane.b32.xlu0 %v3110_v57, 256 }
0x1835   :  { %3133 = vbcast.lane.b32.xlu0 %v3131_v63, 256 }
0x1839   :  { %3080 = vbcast.lane.b32.xlu0 %v3078_v56, 256 }
0x183d   :  { %3094 = vbcast.lane.b32.xlu0 %v3092_v44, 256 }
0x187d   :  { %v3038_v24 = vpop.xlane.xlu1 %3037 }
0x187e   :  { %6270 = vrcp.f32 %v3038_v24 }
0x1881   :  { %v3074_v50 = vpop.permute.xlu1 %3073 }
0x1885   :  { %v3088_v43 = vpop.permute.xlu1 %3087 }
0x1888   :  { %v6271_v52 = vpop.eup %6270 }
0x1889   :  { %v3048_v10 = vrot.slane %v6271_v52, %v6641_v34  ;;  %v3044_v22 = vrot.slane %v6271_v52, %v6628_v26  ;;  %v3052_v38 = vrot.slane %v6271_v52, %v6721_v46  ;;  %v3056_v6 = vrot.slane %v6271_v52, %v6725_v49 }
0x188b   :  { %v3062_v29 = vmul.f32 %v7405_v41, %v3048_v10  ;;  %v3061_v9 = vmul.f32 %v7403_v21, %v3044_v22  ;;  %v3063_v60 = vmul.f32 %v7411_v53, %v3052_v38  ;;  %v3064_v32 = vmul.f32 %v7409_v45, %v3056_v6  ;;  %v7488_v10 = vld [vmem:[%s8118_s7] sm:$0xff] }
0x188d   :  { %v3140_v3 = vmul.f32 %v3120_v8, %v3062_v29  ;;  %v3141_v39 = vmul.f32 %v3127_v55, %v3063_v60 }
0x188f   :  { %3151 = vperm.xlu0 %6080, %v3140_v3  }
0x18a8   :  { %v2857_v61 = vpop.xlane.xlu0 %2856 }
0x18a9   :  { %6272 = vrcp.f32 %v2857_v61 }
0x18ac   :  { %v3113_v12 = vpop.permute.xlu0 %3112 }
0x18ad   :  { %v3139_v4 = vmul.f32 %v3113_v12, %v3061_v9 }
0x18af   :  { %3148 = vperm.xlu1 %6079, %v3139_v4  }
0x18b0   :  { %v3134_v41 = vpop.permute.xlu0 %3133 }
0x18b1   :  { %v3142_v19 = vmul.f32 %v3134_v41, %v3064_v32  ;;  %v7514_v41 = vld [vmem:[%s8115_s8 + $0x8] sm:$0x3f] }
0x18b3   :  { %v6273_v42 = vpop.eup %6272  ;;  %3154 = vperm.xlu1 %6079, %v3141_v39   ;;  %3157 = vperm.xlu0 %6080, %v3142_v19  }
0x18b4   :  { %v2863_v18 = vrot.slane %v6273_v42, %v6628_v26  ;;  %v2867_v21 = vrot.slane %v6273_v42, %v6641_v34  ;;  %v3081_v48 = vpop.permute.xlu0 %3080  ;;  %v2871_v0 = vrot.slane %v6273_v42, %v6721_v46  ;;  %v2875_v30 = vrot.slane %v6273_v42, %v6725_v49 }
0x18b6   :  { %v2880_v53 = vmul.f32 %v7419_v54, %v2863_v18  ;;  %v2881_v45 = vmul.f32 %v7421_v27, %v2867_v21  ;;  %v2882_v36 = vmul.f32 %v7428_v62, %v2871_v0  ;;  %v2883_v1 = vmul.f32 %v7430_v5, %v2875_v30 }
0x18b8   :  { %v3100_v16 = vmul.f32 %v3074_v50, %v2880_v53  ;;  %v3101_v47 = vmul.f32 %v3081_v48, %v2881_v45  ;;  %v3095_v33 = vpop.permute.xlu0 %3094  ;;  %v3102_v25 = vmul.f32 %v3088_v43, %v2882_v36 }
0x18b9   :  { %v3103_v57 = vmul.f32 %v3095_v33, %v2883_v1  ;;  %v7525_v1 = vld [vmem:[%s8115_s8] sm:$0x3f] }
0x18ba   :  { %3256 = vperm.xlu1 %6079, %v3100_v16   ;;  %3259 = vperm.xlu0 %6080, %v3101_v47  }
0x18be   :  { %3262 = vperm.xlu1 %6079, %v3102_v25   ;;  %3265 = vperm.xlu0 %6080, %v3103_v57  }
0x190e   :  { %v3152_v63 = vpop.permute.xlu0 %3151 }
0x190f   :  { %v3166_v27 = vrot.slane %v3152_v63, %v6781_v58 }
0x192e   :  { %v3149_v56 = vpop.permute.xlu1 %3148 }
0x192f   :  { %v3162_v54 = vrot.slane %v3149_v56, %v6781_v58 }
0x1931   :  { %v3175_v55 = vsel %vm437_vm8, %v3166_v27, %v3162_v54 }
0x1932   :  { %v3155_v44 = vpop.permute.xlu1 %3154  ;;  %v3158_v8 = vpop.permute.xlu0 %3157 }
0x1933   :  { %v3170_v62 = vrot.slane %v3155_v44, %v6781_v58  ;;  %v3174_v5 = vrot.slane %v3158_v8, %v6781_v58 }
0x1935   :  { %v3176_v24 = vsel %vm439_vm9, %v3170_v62, %v3175_v55 }
0x1936   :  { %v3177_v52 = vsel %vm441_vm10, %v3174_v5, %v3176_v24 }
0x1937   :  { %5734 = vmatmul.mubr.msk.f32.vlgmr.msra.gmra.mrb[6].mxu1 %vm69_vm1, %v3177_v52 }
0x1938   :  { %5736 = vmatpush1.msk.msra.mxu1 %vm157_vm2, %v7488_v10  ;;  %3352 = vmatprep.mubr.f32.mxu1 %v6461_v2 }
0x1939   :  { %v3257_v29 = vpop.permute.xlu1 %3256  ;;  %v3260_v3 = vpop.permute.xlu0 %3259  ;;  %6021 = vmatprep.subr.bf16.mxu1 %v6462_v11 }
0x193a   :  { %v3270_v22 = vrot.slane %v3257_v29, %v6781_v58  ;;  %v3274_v61 = vrot.slane %v3260_v3, %v6781_v58  ;;  %v7553_v29 = vld [vmem:[%s8127_s2] sm:$0xf] }
0x193c   :  { %v3283_v4 = vsel %vm437_vm8, %v3274_v61, %v3270_v22  ;;  %v7559_v61 = vld [vmem:[%s8125_s3] sm:$0x3f] }
0x193d   :  { %v3263_v38 = vpop.permute.xlu1 %3262  ;;  %v3266_v9 = vpop.permute.xlu0 %3265 }
0x193e   :  { %v3278_v6 = vrot.slane %v3263_v38, %v6781_v58  ;;  %v3282_v12 = vrot.slane %v3266_v9, %v6781_v58 }
0x1940   :  { %v3284_v60 = vsel %vm439_vm9, %v3278_v6, %v3283_v4  ;;  %v7565_v6 = vld [vmem:[%s8125_s3 + $0x8] sm:$0x3f] }
0x1941   :  { %v3285_v32 = vsel %vm441_vm10, %v3282_v12, %v3284_v60  ;;  %v7571_v60 = vld [vmem:[%s8125_s3 + $0x10] sm:$0x3f] }
0x1942   :  { %5737 = vmatmul.mubr.msk.f32.vlgmr.msra.gmra.mrb[6].mxu1 %vm153_vm3, %v3285_v32 }
0x1943   :  { %6023 = vmatpush3.bf16.msra.mxu1 %v6592_v15  ;;  %5932 = vmatprep.mubr.msk.f32.mxu1 %vm6463_vm4, %v6461_v2 }
0x1944   :  { %6024 = vmatprep.subr.bf16.mxu1 %v6462_v11 }
0x1947   :  { %6026 = vmatpush3.bf16.msra.mxu1 %v6598_v17 }
0x1948   :  { %6027 = vmatprep.subr.bf16.mxu1 %v6462_v11 }
0x194b   :  { %6029 = vmatpush3.bf16.msra.mxu1 %v6608_v20 }
0x194c   :  { %6030 = vmatprep.subr.bf16.mxu1 %v6462_v11 }
0x194f   :  { %6032 = vmatpush3.bf16.msra.mxu1 %v6618_v23 }
0x1950   :  { %5756 = vmatprep.subr.msk.mxu1 %vm73_vm0, %v7514_v41 }
0x1a15   :  { %v3354_v19 = vpop.f32.mrb[6].mxu1 }
0x1a16   :  { %v3359_v39 = vadd.f32 %v3354_v19, %v6634_v28  ;;  %v3356_v42 = vpop.f32.mrb[7].mxu1 }
0x1a17   :  { %v3360_v21 = vadd.f32 %v3356_v42, %v6644_v35 }
0x1a18   :  { %6274 = vtanh.f32 %v3359_v39  ;;  %v5738_v18 = vmul.f32 -1.442695, %v3359_v39  ;;  %v7577_v39 = vld [vmem:[%s8127_s2 + $0x4] sm:$0xf] }
0x1a19   :  { %v5739_v48 = vmul.f32 -1.442695, %v3360_v21  ;;  %v7589_v21 = vld [vmem:[%s8127_s2 + $0x8] sm:$0xf] }
0x1a1a   :  { %6276 = vpow2.f32 %v5738_v18 }
0x1a1b   :  { %6278 = vpow2.f32 %v5739_v48 }
0x1a22   :  { %v6275_v50 = vpop.eup %6274 }
0x1a23   :  { %3369 = vrot.lane.b32.xlu1 %v6275_v50, %s6464_s13  ;;  %v7583_v50 = vld [vmem:[%s8125_s3 + $0x18] sm:$0x3f] }
0x1a24   :  { %v6277_v0 = vpop.eup %6276 }
0x1a25   :  { %v3364_v30 = vadd.f32 1.0, %v6277_v0  ;;  %v6279_v53 = vpop.eup %6278 }
0x1a26   :  { %v3376_v45 = vadd.f32 1.0, %v6279_v53 }
0x1a27   :  { %6280 = vrcp.f32 %v3364_v30 }
0x1a28   :  { %6282 = vrcp.f32 %v3376_v45 }
0x1a31   :  { %v6281_v16 = vpop.eup %6280 }
0x1a32   :  { %v6283_v43 = vpop.eup %6282 }
0x1a95   :  { %v3370_v47 = vpop.permute.xlu1 %3369 }
0x1a96   :  { %v3372_v36 = vmul.f32 %v6281_v16, %v3370_v47 }
0x1a98   :  { %6284 = vtanh.f32 %v3372_v36  ;;  %5933 = vmatmul.mubr.msk.f32.vlgmr.msra.gmra.mrb[8].mxu1 %vm268_vm5, %v3372_v36 }
0x1a99   :  { %5757 = vmatpush1.msk.msra.mxu1 %vm73_vm0, %v7525_v1  ;;  %4776 = vmatprep.mubr.f32.mxu1 %v6461_v2 }
0x1a9a   :  { %5759 = vmatprep.subr.msk.mxu1 %vm157_vm2, %v6560_v7 }
0x1aa2   :  { %v6285_v33 = vpop.eup %6284 }
0x1aa3   :  { %v3380_v25 = vmul.f32 %v6285_v33, %v6283_v43 }
0x1aa5   :  { %5740 = vst.msk [vmem:[%s8123_s12 + $0x10] sm:$0xf] %vm266_vm6, %v3380_v25 }
0x1b6b   :  { %v3452_v57 = vpop.f32.mrb[8].mxu1 }
0x1b6c   :  { %v3463_v63 = vrot.slane %v3452_v57, %v6658_v51  ;;  %v5934_v56 = vpop.f32.mrb[9].mxu1 }
0x1b6e   :  { %v3464_v54 = vcombine.high %v3463_v63, %v3463_v63  ;;  %v3471_v27 = vrot.slane %v3463_v63, %v6658_v51 }
0x1b70   :  { %v3478_v44 = vrot.slane %v3464_v54, %v6658_v51  ;;  %v3479_v8 = vcombine.high %v3471_v27, %v3471_v27  ;;  %v3484_v62 = vrot.slane %v3471_v27, %v6628_v26 }
0x1b72   :  { %v3480_v5 = vcombine.high %v3478_v44, %v3478_v44  ;;  %v3488_v55 = vrot.slane %v3478_v44, %v6628_v26  ;;  %3650 = vrot.lane.b32.xlu0 %v3484_v62, %s6464_s13  ;;  %v3492_v24 = vrot.slane %v3479_v8, %v6628_v26  ;;  %v3501_v3 = vadd.f32 %v7553_v29, %v3484_v62 }
0x1b74   :  { %3652 = vrot.lane.b32.xlu1 %v3488_v55, %s6464_s13  ;;  %v7546_v52 = vrot.slane %v3480_v5, %v6628_v26  ;;  %v3502_v42 = vadd.f32 %v7577_v39, %v3488_v55  ;;  %v3503_v48 = vadd.f32 %v7589_v21, %v3492_v24 }
0x1b76   :  { %3654 = vrot.lane.b32.xlu0 %v3492_v24, %s6464_s13 }
0x1b78   :  { %3656 = vrot.lane.b32.xlu1 %v7546_v52, %s6464_s13 }
0x1be4   :  { %v3651_v22 = vpop.permute.xlu0 %3650 }
0x1be5   :  { %v3662_v38 = vadd.f32 %v7559_v61, %v3651_v22 }
0x1be6   :  { %v3653_v9 = vpop.permute.xlu1 %3652 }
0x1be7   :  { %6286 = vtanh.f32 %v3662_v38  ;;  %v3663_v12 = vadd.f32 %v7565_v6, %v3653_v9 }
0x1be8   :  { %6288 = vtanh.f32 %v3501_v3  ;;  %v3655_v4 = vpop.permute.xlu0 %3654 }
0x1be9   :  { %6290 = vtanh.f32 %v3663_v12  ;;  %v3664_v32 = vadd.f32 %v7571_v60, %v3655_v4 }
0x1bea   :  { %v3657_v19 = vpop.permute.xlu1 %3656 }
0x1beb   :  { %6292 = vtanh.f32 %v3664_v32  ;;  %v3665_v18 = vadd.f32 %v7583_v50, %v3657_v19 }
0x1bed   :  { %6294 = vtanh.f32 %v3665_v18 }
0x1bee   :  { %6296 = vtanh.f32 %v3502_v42 }
0x1bef   :  { %6298 = vtanh.f32 %v3503_v48 }
0x1bf1   :  { %v6287_v0 = vpop.eup %6286 }
0x1bf2   :  { %v6289_v30 = vpop.eup %6288  ;;  %v3670_v53 = vmul.f32 %v6287_v0, %v6710_v31 }
0x1bf3   :  { %v6291_v45 = vpop.eup %6290  ;;  %v3509_v25 = vmul.f32 %v6289_v30, %v6748_v59  ;;  %v7613_v30 = vld [vmem:[%s8127_s2 + $0xc] sm:$0xf] }
0x1bf4   :  { %v3674_v16 = vsel %vm574_vm7, %v3670_v53, 0.0  ;;  %v3671_v47 = vmul.f32 %v6291_v45, %v6710_v31  ;;  %v3504_v53 = vadd.f32 %v7613_v30, %v7546_v52 }
0x1bf5   :  { %v6293_v36 = vpop.eup %6292  ;;  %3675 = vadd.xlane.f32.xlu0 %v3674_v16  ;;  %v3513_v27 = vsel %vm266_vm6, %v3509_v25, 0.0 }
0x1bf6   :  { %v3677_v43 = vsel %vm574_vm7, %v3671_v47, 0.0  ;;  %v3672_v33 = vmul.f32 %v6293_v36, %v6710_v31  ;;  %6300 = vtanh.f32 %v3504_v53 }
0x1bf7   :  { %v6295_v57 = vpop.eup %6294  ;;  %3678 = vadd.xlane.f32.xlu1 %v3677_v43 }
0x1bf8   :  { %v3680_v63 = vsel %vm574_vm7, %v3672_v33, 0.0  ;;  %v3673_v56 = vmul.f32 %v6295_v57, %v6710_v31  ;;  %v6297_v54 = vpop.eup %6296 }
0x1bf9   :  { %3681 = vadd.xlane.f32.xlu0 %v3680_v63  ;;  %v3510_v8 = vmul.f32 %v6297_v54, %v6748_v59  ;;  %v6299_v62 = vpop.eup %6298 }
0x1bfa   :  { %v3683_v44 = vsel %vm574_vm7, %v3673_v56, 0.0  ;;  %v3511_v55 = vmul.f32 %v6299_v62, %v6748_v59 }
0x1bfb   :  { %3514 = vadd.xlane.f32.xlu1 %v3513_v27  ;;  %v3516_v5 = vsel %vm266_vm6, %v3510_v8, 0.0 }
0x1bfc   :  { %v3519_v24 = vsel %vm266_vm6, %v3511_v55, 0.0 }
0x1bfd   :  { %3684 = vadd.xlane.f32.xlu0 %v3683_v44 }
0x1c00   :  { %v6301_v45 = vpop.eup %6300 }
0x1c01   :  { %3517 = vadd.xlane.f32.xlu0 %v3516_v5  ;;  %v3512_v16 = vmul.f32 %v6301_v45, %v6748_v59 }
0x1c03   :  { %v3522_v47 = vsel %vm266_vm6, %v3512_v16, 0.0 }
0x1c05   :  { %3520 = vadd.xlane.f32.xlu0 %v3519_v24 }
0x1c82   :  { %v3676_v3 = vpop.xlane.xlu0 %3675 }
0x1c83   :  { %v3686_v22 = vmul.f32 0.7, %v3676_v3 }
0x1c84   :  { %v3679_v38 = vpop.xlane.xlu1 %3678 }
0x1c85   :  { %v3690_v9 = vadd.f32 %v3686_v22, %v6758_v14  ;;  %v3687_v12 = vmul.f32 0.7, %v3679_v38 }
0x1c86   :  { %v3682_v4 = vpop.xlane.xlu0 %3681 }
0x1c87   :  { %v3691_v32 = vadd.f32 %v3687_v12, %v6756_v13  ;;  %v3688_v19 = vmul.f32 0.7, %v3682_v4  ;;  %3699 = vperm.xlu1 %6079, %v3690_v9  }
0x1c88   :  { %v3515_v43 = vpop.xlane.xlu1 %3514 }
0x1c89   :  { %v3692_v42 = vadd.f32 %v3688_v19, %v6762_v37  ;;  %3702 = vperm.xlu0 %6080, %v3691_v32   ;;  %v3532_v22 = vrot.slane %v3515_v43, %v6781_v58 }
0x1c8a   :  { %v3685_v18 = vpop.xlane.xlu0 %3684 }
0x1c8b   :  { %v3689_v48 = vmul.f32 0.7, %v3685_v18  ;;  %3705 = vperm.xlu1 %6079, %v3692_v42  }
0x1c8d   :  { %v3693_v0 = vadd.f32 %v3689_v48, %v6765_v40 }
0x1c8e   :  { %v3518_v36 = vpop.xlane.xlu0 %3517 }
0x1c8f   :  { %3708 = vperm.xlu0 %6080, %v3693_v0   ;;  %v3536_v24 = vrot.slane %v3518_v36, %v6781_v58 }
0x1c91   :  { %v3545_v4 = vsel %vm437_vm8, %v3536_v24, %v3532_v22 }
0x1c92   :  { %v3521_v33 = vpop.xlane.xlu0 %3520 }
0x1c93   :  { %v3540_v3 = vrot.slane %v3521_v33, %v6781_v58 }
0x1c95   :  { %v3546_v19 = vsel %vm439_vm9, %v3540_v3, %v3545_v4 }
0x1caf   :  { %3523 = vadd.xlane.f32.xlu1 %v3522_v47 }
0x1d06   :  { %v3700_v25 = vpop.permute.xlu1 %3699 }
0x1d07   :  { %v3713_v54 = vrot.slane %v3700_v25, %v6781_v58 }
0x1d08   :  { %v3703_v57 = vpop.permute.xlu0 %3702 }
0x1d09   :  { %v3717_v63 = vrot.slane %v3703_v57, %v6781_v58 }
0x1d0a   :  { %v3706_v56 = vpop.permute.xlu1 %3705 }
0x1d0b   :  { %v3721_v27 = vrot.slane %v3706_v56, %v6781_v58  ;;  %v3726_v52 = vsel %vm437_vm8, %v3717_v63, %v3713_v54 }
0x1d0d   :  { %v3727_v62 = vsel %vm439_vm9, %v3721_v27, %v3726_v52 }
0x1d0e   :  { %v3709_v44 = vpop.permute.xlu0 %3708 }
0x1d0f   :  { %v3725_v8 = vrot.slane %v3709_v44, %v6781_v58 }
0x1d11   :  { %v3728_v5 = vsel %vm441_vm10, %v3725_v8, %v3727_v62 }
0x1d12   :  { %v3730_v55 = vsel %vm665_vm11, %v3728_v5, -inf }
0x1d13   :  { %3731 = vmax.xlane.f32.xlu0 %v3730_v55 }
0x1d3c   :  { %v3524_v38 = vpop.xlane.xlu1 %3523 }
0x1d3d   :  { %v3544_v12 = vrot.slane %v3524_v38, %v6781_v58 }
0x1d3f   :  { %v3547_v18 = vsel %vm441_vm10, %v3544_v12, %v3546_v19 }
0x1d40   :  { %v3549_v48 = vsel %vm444_vm12, %v3547_v18, -inf }
0x1d41   :  { %3550 = vmax.xlane.f32.xlu1 %v3549_v48 }
0x1da0   :  { %v3732_v53 = vpop.xlane.xlu0 %3731 }
0x1da1   :  { %v3737_v45 = vrot.slane %v3732_v53, %v6628_v26  ;;  %v3741_v16 = vrot.slane %v3732_v53, %v6641_v34  ;;  %v3745_v47 = vrot.slane %v3732_v53, %v6721_v46  ;;  %v3749_v25 = vrot.slane %v3732_v53, %v6725_v49 }
0x1da3   :  { %v3754_v57 = vsub.f32 %v3690_v9, %v3737_v45  ;;  %v3755_v63 = vsub.f32 %v3691_v32, %v3741_v16  ;;  %v3756_v56 = vsub.f32 %v3692_v42, %v3745_v47  ;;  %v3757_v52 = vsub.f32 %v3693_v0, %v3749_v25 }
0x1da5   :  { %v3758_v54 = vmul.f32 1.442695, %v3754_v57  ;;  %v3760_v27 = vmul.f32 1.442695, %v3755_v63  ;;  %v3762_v44 = vmul.f32 1.442695, %v3756_v56 }
0x1da6   :  { %v3764_v8 = vmul.f32 1.442695, %v3757_v52 }
0x1da7   :  { %6302 = vpow2.f32 %v3758_v54 }
0x1da8   :  { %6304 = vpow2.f32 %v3760_v27 }
0x1da9   :  { %6306 = vpow2.f32 %v3762_v44 }
0x1daa   :  { %6308 = vpow2.f32 %v3764_v8 }
0x1db1   :  { %v7639_v62 = vpop.eup %6302 }
0x1db2   :  { %v7641_v5 = vpop.eup %6304  ;;  %3771 = vperm.xlu1 %6079, %v7639_v62  }
0x1db3   :  { %3774 = vperm.xlu0 %6080, %v7641_v5   ;;  %v7645_v9 = vpop.eup %6306 }
0x1db4   :  { %v7648_v32 = vpop.eup %6308 }
0x1db6   :  { %3777 = vperm.xlu1 %6079, %v7645_v9  }
0x1dba   :  { %3780 = vperm.xlu1 %6079, %v7648_v32  }
0x1dce   :  { %v3551_v42 = vpop.xlane.xlu1 %3550 }
0x1dcf   :  { %v3556_v0 = vrot.slane %v3551_v42, %v6628_v26  ;;  %v3560_v55 = vrot.slane %v3551_v42, %v6641_v34  ;;  %v3564_v24 = vrot.slane %v3551_v42, %v6721_v46  ;;  %v3568_v3 = vrot.slane %v3551_v42, %v6725_v49 }
0x1dd1   :  { %v3573_v22 = vsub.f32 %v3515_v43, %v3556_v0  ;;  %v3574_v12 = vsub.f32 %v3518_v36, %v3560_v55  ;;  %v3575_v4 = vsub.f32 %v3521_v33, %v3564_v24  ;;  %v3576_v19 = vsub.f32 %v3524_v38, %v3568_v3  ;;  %v5743_v36 = vld [vmem:[%s8116_s1 + $0x14] sm:$0xf] }
0x1dd2   :  { %v3876_v38 = vrot.slane %v5743_v36, %v6628_v26  ;;  %v3890_v24 = vrot.slane %v5743_v36, %v6721_v46  ;;  %v5742_v3 = vld [vmem:[%s8119_s0 + $0x14] sm:$0xf] }
0x1dd3   :  { %v3577_v18 = vmul.f32 1.442695, %v3573_v22  ;;  %v3579_v48 = vmul.f32 1.442695, %v3574_v12  ;;  %v3581_v53 = vmul.f32 1.442695, %v3575_v4  ;;  %v3837_v22 = vrot.slane %v5742_v3, %v6628_v26 }
0x1dd4   :  { %v3583_v45 = vmul.f32 1.442695, %v3576_v19  ;;  %v3851_v12 = vrot.slane %v5742_v3, %v6721_v46 }
0x1dd5   :  { %6310 = vpow2.f32 %v3577_v18 }
0x1dd6   :  { %6312 = vpow2.f32 %v3579_v48 }
0x1dd7   :  { %6314 = vpow2.f32 %v3581_v53 }
0x1dd8   :  { %6316 = vpow2.f32 %v3583_v45 }
0x1ddf   :  { %v7655_v16 = vpop.eup %6310 }
0x1de0   :  { %v7657_v47 = vpop.eup %6312  ;;  %3590 = vperm.xlu0 %6080, %v7655_v16  }
0x1de1   :  { %3593 = vperm.xlu1 %6079, %v7657_v47   ;;  %v7664_v43 = vpop.eup %6314 }
0x1de2   :  { %v7666_v33 = vpop.eup %6316 }
0x1de4   :  { %3596 = vperm.xlu0 %6080, %v7664_v43  }
0x1de5   :  { %3599 = vperm.xlu1 %6079, %v7666_v33  }
0x1de8   :  { %3878 = vbcast.lane.b32.xlu0 %v3876_v38, 256 }
0x1e31   :  { %v3772_v25 = vpop.permute.xlu1 %3771 }
0x1e32   :  { %v3775_v57 = vpop.permute.xlu0 %3774  ;;  %v3785_v54 = vrot.slane %v3772_v25, %v6781_v58 }
0x1e33   :  { %v3789_v56 = vrot.slane %v3775_v57, %v6781_v58 }
0x1e35   :  { %v3778_v63 = vpop.permute.xlu1 %3777  ;;  %v3798_v44 = vsel %vm437_vm8, %v3789_v56, %v3785_v54 }
0x1e36   :  { %v3793_v27 = vrot.slane %v3778_v63, %v6781_v58 }
0x1e38   :  { %v3799_v42 = vsel %vm439_vm9, %v3793_v27, %v3798_v44  ;;  %v3883_v27 = vrot.slane %v5743_v36, %v6641_v34  ;;  %v3844_v44 = vrot.slane %v5742_v3, %v6641_v34 }
0x1e39   :  { %v3781_v52 = vpop.permute.xlu1 %3780 }
0x1e3a   :  { %v3797_v8 = vrot.slane %v3781_v52, %v6781_v58  ;;  %v3897_v52 = vrot.slane %v5743_v36, %v6725_v49 }
0x1e3c   :  { %v3800_v0 = vsel %vm441_vm10, %v3797_v8, %v3799_v42  ;;  %v3858_v8 = vrot.slane %v5742_v3, %v6725_v49 }
0x1e3d   :  { %v3802_v55 = vsel %vm665_vm11, %v3800_v0, 0.0 }
0x1e3e   :  { %3803 = vadd.xlane.f32.xlu0 %v3802_v55 }
0x1e54   :  { %3892 = vbcast.lane.b32.xlu0 %v3890_v24, 256 }
0x1e58   :  { %3839 = vbcast.lane.b32.xlu0 %v3837_v22, 256 }
0x1e5c   :  { %3853 = vbcast.lane.b32.xlu0 %v3851_v12, 256 }
0x1e5f   :  { %v3591_v4 = vpop.permute.xlu0 %3590 }
0x1e60   :  { %v3594_v19 = vpop.permute.xlu1 %3593  ;;  %v3604_v18 = vrot.slane %v3591_v4, %v6781_v58 }
0x1e61   :  { %v3608_v48 = vrot.slane %v3594_v19, %v6781_v58 }
0x1e63   :  { %v3597_v53 = vpop.permute.xlu0 %3596  ;;  %v3617_v25 = vsel %vm437_vm8, %v3608_v48, %v3604_v18 }
0x1e64   :  { %v3612_v45 = vrot.slane %v3597_v53, %v6781_v58  ;;  %v3600_v38 = vpop.permute.xlu1 %3599 }
0x1e65   :  { %v3616_v57 = vrot.slane %v3600_v38, %v6781_v58 }
0x1e66   :  { %v3618_v63 = vsel %vm439_vm9, %v3612_v45, %v3617_v25 }
0x1e67   :  { %v3619_v56 = vsel %vm441_vm10, %v3616_v57, %v3618_v63  ;;  %v3879_v42 = vpop.permute.xlu0 %3878 }
0x1e68   :  { %v3621_v54 = vsel %vm444_vm12, %v3619_v56, 0.0 }
0x1e69   :  { %3622 = vadd.xlane.f32.xlu1 %v3621_v54 }
0x1e7a   :  { %3885 = vbcast.lane.b32.xlu1 %v3883_v27, 256 }
0x1e7e   :  { %3899 = vbcast.lane.b32.xlu1 %v3897_v52, 256 }
0x1e82   :  { %3846 = vbcast.lane.b32.xlu1 %v3844_v44, 256 }
0x1e86   :  { %3860 = vbcast.lane.b32.xlu1 %v3858_v8, 256 }
0x1ecb   :  { %v3804_v0 = vpop.xlane.xlu0 %3803 }
0x1ecc   :  { %6318 = vrcp.f32 %v3804_v0 }
0x1ecf   :  { %v3893_v19 = vpop.permute.xlu0 %3892 }
0x1ed3   :  { %v3840_v56 = vpop.permute.xlu0 %3839 }
0x1ed6   :  { %v6319_v55 = vpop.eup %6318 }
0x1ed7   :  { %v3818_v24 = vrot.slane %v6319_v55, %v6721_v46  ;;  %v3810_v22 = vrot.slane %v6319_v55, %v6628_v26  ;;  %v3814_v3 = vrot.slane %v6319_v55, %v6641_v34  ;;  %v3822_v45 = vrot.slane %v6319_v55, %v6725_v49 }
0x1ed9   :  { %v3827_v12 = vmul.f32 %v7639_v62, %v3810_v22  ;;  %v3829_v4 = vmul.f32 %v7645_v9, %v3818_v24  ;;  %v3828_v53 = vmul.f32 %v7641_v5, %v3814_v3  ;;  %v3830_v62 = vmul.f32 %v7648_v32, %v3822_v45  ;;  %v3854_v22 = vpop.permute.xlu0 %3853 }
0x1edb   :  { %v3905_v36 = vmul.f32 %v3879_v42, %v3827_v12  ;;  %v3907_v18 = vmul.f32 %v3893_v19, %v3829_v4 }
0x1edd   :  { %3914 = vperm.xlu0 %6080, %v3905_v36  }
0x1ee1   :  { %3920 = vperm.xlu0 %6080, %v3907_v18  }
0x1ef6   :  { %v3623_v48 = vpop.xlane.xlu1 %3622 }
0x1ef7   :  { %6320 = vrcp.f32 %v3623_v48 }
0x1efa   :  { %v3886_v38 = vpop.permute.xlu1 %3885 }
0x1efb   :  { %v3906_v25 = vmul.f32 %v3886_v38, %v3828_v53 }
0x1efd   :  { %3917 = vperm.xlu1 %6079, %v3906_v25  }
0x1efe   :  { %v3900_v57 = vpop.permute.xlu1 %3899 }
0x1eff   :  { %v3908_v9 = vmul.f32 %v3900_v57, %v3830_v62 }
0x1f01   :  { %v6321_v63 = vpop.eup %6320  ;;  %3923 = vperm.xlu1 %6079, %v3908_v9  }
0x1f02   :  { %v3629_v54 = vrot.slane %v6321_v63, %v6628_v26  ;;  %v3633_v27 = vrot.slane %v6321_v63, %v6641_v34  ;;  %v3847_v52 = vpop.permute.xlu1 %3846  ;;  %v3637_v44 = vrot.slane %v6321_v63, %v6721_v46  ;;  %v3641_v5 = vrot.slane %v6321_v63, %v6725_v49 }
0x1f04   :  { %v3646_v8 = vmul.f32 %v7655_v16, %v3629_v54  ;;  %v3647_v42 = vmul.f32 %v7657_v47, %v3633_v27  ;;  %v3648_v55 = vmul.f32 %v7664_v43, %v3637_v44  ;;  %v3649_v24 = vmul.f32 %v7666_v33, %v3641_v5 }
0x1f06   :  { %v3866_v0 = vmul.f32 %v3840_v56, %v3646_v8  ;;  %v3867_v32 = vmul.f32 %v3847_v52, %v3647_v42  ;;  %v3861_v12 = vpop.permute.xlu1 %3860  ;;  %v3868_v4 = vmul.f32 %v3854_v22, %v3648_v55 }
0x1f07   :  { %v3869_v36 = vmul.f32 %v3861_v12, %v3649_v24 }
0x1f08   :  { %4022 = vperm.xlu0 %6080, %v3866_v0   ;;  %4025 = vperm.xlu1 %6079, %v3867_v32  }
0x1f0c   :  { %4028 = vperm.xlu0 %6080, %v3868_v4   ;;  %4031 = vperm.xlu1 %6079, %v3869_v36  }
0x1f5c   :  { %v3915_v19 = vpop.permute.xlu0 %3914 }
0x1f5d   :  { %v3928_v16 = vrot.slane %v3915_v19, %v6781_v58 }
0x1f60   :  { %v3921_v3 = vpop.permute.xlu0 %3920 }
0x1f61   :  { %v3936_v43 = vrot.slane %v3921_v3, %v6781_v58 }
0x1f7c   :  { %v3918_v18 = vpop.permute.xlu1 %3917 }
0x1f7d   :  { %v3932_v47 = vrot.slane %v3918_v18, %v6781_v58 }
0x1f7f   :  { %v3941_v48 = vsel %vm437_vm8, %v3932_v47, %v3928_v16 }
0x1f80   :  { %v3924_v33 = vpop.permute.xlu1 %3923  ;;  %v3942_v45 = vsel %vm439_vm9, %v3936_v43, %v3941_v48 }
0x1f81   :  { %v3940_v53 = vrot.slane %v3924_v33, %v6781_v58 }
0x1f83   :  { %v3943_v38 = vsel %vm441_vm10, %v3940_v53, %v3942_v45 }
0x1f84   :  { %5746 = vmatmul.mubr.msk.f32.vlgmr.msra.gmra.mrb[10].mxu0 %vm69_vm1, %v3943_v38 }
0x1f85   :  { %5748 = vmatpush1.msk.msra.mxu0 %vm157_vm2, %v7488_v10  ;;  %4118 = vmatprep.mubr.f32.mxu0 %v6461_v2 }
0x1f86   :  { %6033 = vmatprep.subr.bf16.mxu0 %v6462_v11 }
0x1f87   :  { %v4023_v25 = vpop.permute.xlu0 %4022  ;;  %v4026_v62 = vpop.permute.xlu1 %4025 }
0x1f88   :  { %v4036_v57 = vrot.slane %v4023_v25, %v6781_v58  ;;  %v4040_v9 = vrot.slane %v4026_v62, %v6781_v58 }
0x1f8a   :  { %v4049_v52 = vsel %vm437_vm8, %v4040_v9, %v4036_v57 }
0x1f8b   :  { %v4029_v63 = vpop.permute.xlu0 %4028  ;;  %v4032_v56 = vpop.permute.xlu1 %4031 }
0x1f8c   :  { %v4044_v54 = vrot.slane %v4029_v63, %v6781_v58  ;;  %v4048_v27 = vrot.slane %v4032_v56, %v6781_v58 }
0x1f8e   :  { %v4050_v10 = vsel %vm439_vm9, %v4044_v54, %v4049_v52 }
0x1f8f   :  { %v4051_v44 = vsel %vm441_vm10, %v4048_v27, %v4050_v10 }
0x1f90   :  { %5749 = vmatmul.mubr.msk.f32.vlgmr.msra.gmra.mrb[10].mxu0 %vm153_vm3, %v4051_v44 }
0x1f91   :  { %6035 = vmatpush3.bf16.msra.mxu0 %v6592_v15  ;;  %5951 = vmatprep.mubr.msk.f32.mxu0 %vm6463_vm4, %v6461_v2 }
0x1f92   :  { %6036 = vmatprep.subr.bf16.mxu0 %v6462_v11 }
0x1f95   :  { %6038 = vmatpush3.bf16.msra.mxu0 %v6598_v17 }
0x1f96   :  { %6039 = vmatprep.subr.bf16.mxu0 %v6462_v11 }
0x1f99   :  { %6041 = vmatpush3.bf16.msra.mxu0 %v6608_v20 }
0x1f9a   :  { %6042 = vmatprep.subr.bf16.mxu0 %v6462_v11 }
0x1f9d   :  { %6044 = vmatpush3.bf16.msra.mxu0 %v6618_v23 }
0x1f9e   :  { %5768 = vmatprep.subr.msk.mxu0 %vm73_vm0, %v7514_v41 }
0x2063   :  { %v4120_v5 = vpop.f32.mrb[10].mxu0 }
0x2064   :  { %v4125_v8 = vadd.f32 %v4120_v5, %v6634_v28  ;;  %v4122_v42 = vpop.f32.mrb[11].mxu0 }
0x2065   :  { %v4126_v55 = vadd.f32 %v4122_v42, %v6644_v35 }
0x2066   :  { %6322 = vtanh.f32 %v4125_v8  ;;  %v5750_v32 = vmul.f32 -1.442695, %v4125_v8 }
0x2067   :  { %v5751_v24 = vmul.f32 -1.442695, %v4126_v55 }
0x2068   :  { %6324 = vpow2.f32 %v5750_v32 }
0x2069   :  { %6326 = vpow2.f32 %v5751_v24 }
0x2070   :  { %v6323_v0 = vpop.eup %6322 }
0x2071   :  { %4135 = vrot.lane.b32.xlu0 %v6323_v0, %s6464_s13 }
0x2072   :  { %v6325_v22 = vpop.eup %6324 }
0x2073   :  { %v4130_v12 = vadd.f32 1.0, %v6325_v22  ;;  %v6327_v4 = vpop.eup %6326 }
0x2074   :  { %v4142_v36 = vadd.f32 1.0, %v6327_v4 }
0x2075   :  { %6328 = vrcp.f32 %v4130_v12 }
0x2076   :  { %6330 = vrcp.f32 %v4142_v36 }
0x207f   :  { %v6329_v41 = vpop.eup %6328 }
0x2080   :  { %v6331_v16 = vpop.eup %6330 }
0x20e3   :  { %v4136_v19 = vpop.permute.xlu0 %4135 }
0x20e4   :  { %v4138_v18 = vmul.f32 %v6329_v41, %v4136_v19 }
0x20e6   :  { %6332 = vtanh.f32 %v4138_v18  ;;  %5952 = vmatmul.mubr.msk.f32.vlgmr.msra.gmra.mrb[12].mxu0 %vm268_vm5, %v4138_v18 }
0x20e7   :  { %5769 = vmatpush1.msk.msra.mxu0 %vm73_vm0, %v7525_v1  ;;  %5542 = vmatprep.mubr.f32.mxu0 %v6461_v2 }
0x20e8   :  { %5771 = vmatprep.subr.msk.mxu0 %vm157_vm2, %v6560_v7 }
0x20f0   :  { %v6333_v3 = vpop.eup %6332 }
0x20f1   :  { %v4146_v47 = vmul.f32 %v6333_v3, %v6331_v16 }
0x20f3   :  { %5752 = vst.msk [vmem:[%s8123_s12 + $0x14] sm:$0xf] %vm266_vm6, %v4146_v47 }
0x21b9   :  { %v4218_v48 = vpop.f32.mrb[12].mxu0 }
0x21ba   :  { %v4229_v43 = vrot.slane %v4218_v48, %v6658_v51  ;;  %v5953_v33 = vpop.f32.mrb[13].mxu0 }
0x21bc   :  { %v4230_v53 = vcombine.high %v4229_v43, %v4229_v43  ;;  %v4237_v1 = vrot.slane %v4229_v43, %v6658_v51 }
0x21be   :  { %v4244_v45 = vrot.slane %v4230_v53, %v6658_v51  ;;  %v4245_v38 = vcombine.high %v4237_v1, %v4237_v1  ;;  %v4250_v7 = vrot.slane %v4237_v1, %v6628_v26 }
0x21c0   :  { %v4246_v25 = vcombine.high %v4244_v45, %v4244_v45  ;;  %v4254_v62 = vrot.slane %v4244_v45, %v6628_v26  ;;  %4416 = vrot.lane.b32.xlu1 %v4250_v7, %s6464_s13  ;;  %v4258_v57 = vrot.slane %v4245_v38, %v6628_v26  ;;  %v4267_v54 = vadd.f32 %v7553_v29, %v4250_v7 }
0x21c2   :  { %4418 = vrot.lane.b32.xlu0 %v4254_v62, %s6464_s13  ;;  %v7767_v9 = vrot.slane %v4246_v25, %v6628_v26  ;;  %v4268_v10 = vadd.f32 %v7577_v39, %v4254_v62 }
0x21c4   :  { %4420 = vrot.lane.b32.xlu1 %v4258_v57, %s6464_s13 }
0x21c6   :  { %4422 = vrot.lane.b32.xlu0 %v7767_v9, %s6464_s13 }
0x2232   :  { %v4417_v63 = vpop.permute.xlu1 %4416 }
0x2233   :  { %v4428_v56 = vadd.f32 %v7559_v61, %v4417_v63  ;;  %v4269_v61 = vadd.f32 %v7589_v21, %v4258_v57 }
0x2234   :  { %v4419_v27 = vpop.permute.xlu0 %4418 }
0x2235   :  { %6334 = vtanh.f32 %v4428_v56  ;;  %v4429_v52 = vadd.f32 %v7565_v6, %v4419_v27 }
0x2236   :  { %v4421_v44 = vpop.permute.xlu1 %4420 }
0x2237   :  { %6336 = vtanh.f32 %v4429_v52  ;;  %v4430_v5 = vadd.f32 %v7571_v60, %v4421_v44 }
0x2238   :  { %6338 = vtanh.f32 %v4267_v54  ;;  %v4423_v8 = vpop.permute.xlu0 %4422  ;;  %v4270_v54 = vadd.f32 %v7613_v30, %v7767_v9 }
0x2239   :  { %6340 = vtanh.f32 %v4430_v5  ;;  %v4431_v42 = vadd.f32 %v7583_v50, %v4423_v8 }
0x223a   :  { %6342 = vtanh.f32 %v4268_v10 }
0x223b   :  { %6344 = vtanh.f32 %v4431_v42 }
0x223c   :  { %6346 = vtanh.f32 %v4269_v61 }
0x223d   :  { %6348 = vtanh.f32 %v4270_v54 }
0x223f   :  { %v6335_v29 = vpop.eup %6334 }
0x2240   :  { %v4436_v0 = vmul.f32 %v6335_v29, %v6710_v31 }
0x2241   :  { %v6337_v6 = vpop.eup %6336 }
0x2242   :  { %v6339_v32 = vpop.eup %6338  ;;  %v4440_v39 = vsel %vm574_vm7, %v4436_v0, 0.0  ;;  %v4437_v55 = vmul.f32 %v6337_v6, %v6710_v31 }
0x2243   :  { %v6341_v60 = vpop.eup %6340  ;;  %4441 = vadd.xlane.f32.xlu1 %v4440_v39  ;;  %v4275_v19 = vmul.f32 %v6339_v32, %v6748_v59 }
0x2244   :  { %v6343_v24 = vpop.eup %6342  ;;  %v4443_v22 = vsel %vm574_vm7, %v4437_v55, 0.0  ;;  %v4438_v50 = vmul.f32 %v6341_v60, %v6710_v31 }
0x2245   :  { %v6345_v12 = vpop.eup %6344  ;;  %4444 = vadd.xlane.f32.xlu0 %v4443_v22  ;;  %v4276_v41 = vmul.f32 %v6343_v24, %v6748_v59  ;;  %v4279_v3 = vsel %vm266_vm6, %v4275_v19, 0.0 }
0x2246   :  { %v4439_v21 = vmul.f32 %v6345_v12, %v6710_v31  ;;  %v4446_v4 = vsel %vm574_vm7, %v4438_v50, 0.0  ;;  %v6347_v18 = vpop.eup %6346 }
0x2247   :  { %v4282_v16 = vsel %vm266_vm6, %v4276_v41, 0.0  ;;  %v4277_v47 = vmul.f32 %v6347_v18, %v6748_v59  ;;  %v6349_v27 = vpop.eup %6348 }
0x2248   :  { %v4449_v36 = vsel %vm574_vm7, %v4439_v21, 0.0  ;;  %v4278_v52 = vmul.f32 %v6349_v27, %v6748_v59 }
0x2249   :  { %4447 = vadd.xlane.f32.xlu0 %v4446_v4  ;;  %4450 = vadd.xlane.f32.xlu1 %v4449_v36  ;;  %v4285_v48 = vsel %vm266_vm6, %v4277_v47, 0.0 }
0x224a   :  { %v4288_v10 = vsel %vm266_vm6, %v4278_v52, 0.0 }
0x224d   :  { %4283 = vadd.xlane.f32.xlu0 %v4282_v16  ;;  %4280 = vadd.xlane.f32.xlu1 %v4279_v3 }
0x2251   :  { %4286 = vadd.xlane.f32.xlu1 %v4285_v48 }
0x22d0   :  { %v4442_v43 = vpop.xlane.xlu1 %4441 }
0x22d1   :  { %v4452_v33 = vmul.f32 0.7, %v4442_v43 }
0x22d2   :  { %v4445_v53 = vpop.xlane.xlu0 %4444 }
0x22d3   :  { %v4456_v1 = vadd.f32 %v4452_v33, %v6758_v14  ;;  %v4453_v45 = vmul.f32 0.7, %v4445_v53 }
0x22d5   :  { %v4457_v38 = vadd.f32 %v4453_v45, %v6756_v13  ;;  %4465 = vperm.xlu0 %6080, %v4456_v1  }
0x22d6   :  { %v4451_v7 = vpop.xlane.xlu1 %4450  ;;  %v4448_v25 = vpop.xlane.xlu0 %4447 }
0x22d7   :  { %v4455_v62 = vmul.f32 0.7, %v4451_v7  ;;  %v4454_v57 = vmul.f32 0.7, %v4448_v25  ;;  %4468 = vperm.xlu1 %6079, %v4457_v38  }
0x22d9   :  { %v4459_v63 = vadd.f32 %v4455_v62, %v6765_v40  ;;  %v4458_v56 = vadd.f32 %v4454_v57, %v6762_v37 }
0x22da   :  { %v4281_v44 = vpop.xlane.xlu1 %4280  ;;  %v4284_v5 = vpop.xlane.xlu0 %4283 }
0x22db   :  { %4474 = vperm.xlu1 %6079, %v4459_v63   ;;  %4471 = vperm.xlu0 %6080, %v4458_v56   ;;  %v4298_v22 = vrot.slane %v4281_v44, %v6781_v58  ;;  %v4302_v50 = vrot.slane %v4284_v5, %v6781_v58 }
0x22dd   :  { %v4311_v4 = vsel %vm437_vm8, %v4302_v50, %v4298_v22 }
0x22de   :  { %v4287_v8 = vpop.xlane.xlu1 %4286 }
0x22df   :  { %v4306_v12 = vrot.slane %v4287_v8, %v6781_v58 }
0x22e1   :  { %v4312_v41 = vsel %vm439_vm9, %v4306_v12, %v4311_v4 }
0x22fa   :  { %4289 = vadd.xlane.f32.xlu0 %v4288_v10 }
0x2354   :  { %v4466_v42 = vpop.permute.xlu0 %4465 }
0x2355   :  { %v4479_v0 = vrot.slane %v4466_v42, %v6781_v58 }
0x2356   :  { %v4469_v61 = vpop.permute.xlu1 %4468 }
0x2357   :  { %v4483_v29 = vrot.slane %v4469_v61, %v6781_v58 }
0x2359   :  { %v4492_v39 = vsel %vm437_vm8, %v4483_v29, %v4479_v0 }
0x235a   :  { %v4475_v6 = vpop.permute.xlu1 %4474  ;;  %v4472_v32 = vpop.permute.xlu0 %4471 }
0x235b   :  { %v4491_v30 = vrot.slane %v4475_v6, %v6781_v58  ;;  %v4487_v9 = vrot.slane %v4472_v32, %v6781_v58 }
0x235d   :  { %v4493_v55 = vsel %vm439_vm9, %v4487_v9, %v4492_v39 }
0x235e   :  { %v4494_v60 = vsel %vm441_vm10, %v4491_v30, %v4493_v55 }
0x235f   :  { %v4496_v24 = vsel %vm665_vm11, %v4494_v60, -inf }
0x2360   :  { %4497 = vmax.xlane.f32.xlu1 %v4496_v24 }
0x2387   :  { %v4290_v21 = vpop.xlane.xlu0 %4289 }
0x2388   :  { %v4310_v36 = vrot.slane %v4290_v21, %v6781_v58 }
0x238a   :  { %v4313_v19 = vsel %vm441_vm10, %v4310_v36, %v4312_v41 }
0x238b   :  { %v4315_v18 = vsel %vm444_vm12, %v4313_v19, -inf }
0x238c   :  { %4316 = vmax.xlane.f32.xlu0 %v4315_v18 }
0x23ed   :  { %v4498_v16 = vpop.xlane.xlu1 %4497 }
0x23ee   :  { %v4503_v3 = vrot.slane %v4498_v16, %v6628_v26  ;;  %v4507_v47 = vrot.slane %v4498_v16, %v6641_v34  ;;  %v4511_v48 = vrot.slane %v4498_v16, %v6721_v46  ;;  %v4515_v43 = vrot.slane %v4498_v16, %v6725_v49 }
0x23f0   :  { %v4520_v33 = vsub.f32 %v4456_v1, %v4503_v3  ;;  %v4521_v53 = vsub.f32 %v4457_v38, %v4507_v47  ;;  %v4523_v45 = vsub.f32 %v4459_v63, %v4515_v43  ;;  %v4522_v7 = vsub.f32 %v4458_v56, %v4511_v48 }
0x23f2   :  { %v4524_v25 = vmul.f32 1.442695, %v4520_v33  ;;  %v4526_v62 = vmul.f32 1.442695, %v4521_v53  ;;  %v4530_v57 = vmul.f32 1.442695, %v4523_v45 }
0x23f3   :  { %v4528_v54 = vmul.f32 1.442695, %v4522_v7  ;;  %v5754_v33 = vld [vmem:[%s8119_s0 + $0x18] sm:$0xf] }
0x23f4   :  { %6350 = vpow2.f32 %v4524_v25  ;;  %v4603_v53 = vrot.slane %v5754_v33, %v6628_v26  ;;  %v4617_v45 = vrot.slane %v5754_v33, %v6721_v46 }
0x23f5   :  { %6352 = vpow2.f32 %v4526_v62 }
0x23f6   :  { %6354 = vpow2.f32 %v4530_v57 }
0x23f7   :  { %6356 = vpow2.f32 %v4528_v54 }
0x23fe   :  { %v7820_v27 = vpop.eup %6350 }
0x23ff   :  { %v7822_v52 = vpop.eup %6352  ;;  %4537 = vperm.xlu0 %6080, %v7820_v27  }
0x2400   :  { %4540 = vperm.xlu1 %6079, %v7822_v52   ;;  %v7826_v1 = vpop.eup %6354 }
0x2401   :  { %v7828_v38 = vpop.eup %6356 }
0x2403   :  { %4546 = vperm.xlu0 %6080, %v7826_v1  }
0x2404   :  { %4543 = vperm.xlu1 %6079, %v7828_v38  }
0x2419   :  { %v4317_v63 = vpop.xlane.xlu0 %4316 }
0x241a   :  { %v4322_v56 = vrot.slane %v4317_v63, %v6628_v26  ;;  %v4326_v10 = vrot.slane %v4317_v63, %v6641_v34  ;;  %v4330_v42 = vrot.slane %v4317_v63, %v6721_v46  ;;  %v4334_v61 = vrot.slane %v4317_v63, %v6725_v49 }
0x241c   :  { %v4339_v29 = vsub.f32 %v4281_v44, %v4322_v56  ;;  %v4340_v0 = vsub.f32 %v4284_v5, %v4326_v10  ;;  %v4341_v6 = vsub.f32 %v4287_v8, %v4330_v42  ;;  %v4342_v32 = vsub.f32 %v4290_v21, %v4334_v61  ;;  %v5755_v44 = vld [vmem:[%s8116_s1 + $0x18] sm:$0xf] }
0x241d   :  { %v4649_v22 = vrot.slane %v5755_v44, %v6641_v34  ;;  %v4656_v50 = vrot.slane %v5755_v44, %v6721_v46 }
0x241e   :  { %v4343_v30 = vmul.f32 1.442695, %v4339_v29  ;;  %v4345_v9 = vmul.f32 1.442695, %v4340_v0  ;;  %v4347_v39 = vmul.f32 1.442695, %v4341_v6  ;;  %v4642_v6 = vrot.slane %v5755_v44, %v6628_v26 }
0x241f   :  { %v4349_v55 = vmul.f32 1.442695, %v4342_v32  ;;  %v4663_v32 = vrot.slane %v5755_v44, %v6725_v49 }
0x2420   :  { %6358 = vpow2.f32 %v4343_v30  ;;  %v4610_v30 = vrot.slane %v5754_v33, %v6641_v34 }
0x2421   :  { %6360 = vpow2.f32 %v4345_v9  ;;  %v4624_v9 = vrot.slane %v5754_v33, %v6725_v49 }
0x2422   :  { %6362 = vpow2.f32 %v4347_v39 }
0x2423   :  { %6364 = vpow2.f32 %v4349_v55 }
0x242a   :  { %v7836_v60 = vpop.eup %6358 }
0x242b   :  { %v7838_v24 = vpop.eup %6360  ;;  %4356 = vperm.xlu1 %6079, %v7836_v60  }
0x242c   :  { %4359 = vperm.xlu0 %6080, %v7838_v24   ;;  %v7845_v5 = vpop.eup %6362 }
0x242d   :  { %v7847_v8 = vpop.eup %6364 }
0x242f   :  { %4362 = vperm.xlu1 %6079, %v7845_v5  }
0x2430   :  { %4365 = vperm.xlu0 %6080, %v7847_v8  }
0x2433   :  { %4651 = vbcast.lane.b32.xlu1 %v4649_v22, 256 }
0x2437   :  { %4658 = vbcast.lane.b32.xlu1 %v4656_v50, 256 }
0x247e   :  { %v4538_v12 = vpop.permute.xlu0 %4537 }
0x247f   :  { %v4541_v21 = vpop.permute.xlu1 %4540  ;;  %v4551_v36 = vrot.slane %v4538_v12, %v6781_v58 }
0x2480   :  { %v4555_v4 = vrot.slane %v4541_v21, %v6781_v58 }
0x2482   :  { %v4547_v41 = vpop.permute.xlu0 %4546  ;;  %v4564_v3 = vsel %vm437_vm8, %v4555_v4, %v4551_v36 }
0x2483   :  { %v4544_v19 = vpop.permute.xlu1 %4543  ;;  %v4563_v18 = vrot.slane %v4547_v41, %v6781_v58 }
0x2484   :  { %v4559_v16 = vrot.slane %v4544_v19, %v6781_v58 }
0x2486   :  { %v4565_v47 = vsel %vm439_vm9, %v4559_v16, %v4564_v3 }
0x2487   :  { %v4566_v48 = vsel %vm441_vm10, %v4563_v18, %v4565_v47 }
0x2488   :  { %v4568_v43 = vsel %vm665_vm11, %v4566_v48, 0.0 }
0x2489   :  { %4569 = vadd.xlane.f32.xlu1 %v4568_v43 }
0x249a   :  { %4605 = vbcast.lane.b32.xlu1 %v4603_v53, 256 }
0x249e   :  { %4619 = vbcast.lane.b32.xlu1 %v4617_v45, 256 }
0x24aa   :  { %v4357_v7 = vpop.permute.xlu1 %4356 }
0x24ab   :  { %v4360_v25 = vpop.permute.xlu0 %4359  ;;  %v4370_v62 = vrot.slane %v4357_v7, %v6781_v58 }
0x24ac   :  { %v4374_v57 = vrot.slane %v4360_v25, %v6781_v58 }
0x24ae   :  { %v4363_v54 = vpop.permute.xlu1 %4362  ;;  %v4383_v10 = vsel %vm437_vm8, %v4374_v57, %v4370_v62 }
0x24af   :  { %v4378_v63 = vrot.slane %v4363_v54, %v6781_v58  ;;  %v4366_v56 = vpop.permute.xlu0 %4365 }
0x24b0   :  { %v4382_v42 = vrot.slane %v4366_v56, %v6781_v58 }
0x24b1   :  { %v4384_v61 = vsel %vm439_vm9, %v4378_v63, %v4383_v10 }
0x24b2   :  { %v4385_v29 = vsel %vm441_vm10, %v4382_v42, %v4384_v61  ;;  %v4652_v39 = vpop.permute.xlu1 %4651 }
0x24b3   :  { %v4387_v0 = vsel %vm444_vm12, %v4385_v29, 0.0 }
0x24b4   :  { %4388 = vadd.xlane.f32.xlu0 %v4387_v0 }
0x24b6   :  { %v4659_v55 = vpop.permute.xlu1 %4658 }
0x24ca   :  { %4644 = vbcast.lane.b32.xlu0 %v4642_v6, 256 }
0x24ce   :  { %4665 = vbcast.lane.b32.xlu0 %v4663_v32, 256 }
0x24d2   :  { %4612 = vbcast.lane.b32.xlu0 %v4610_v30, 256 }
0x24d6   :  { %4626 = vbcast.lane.b32.xlu0 %v4624_v9, 256 }
0x2516   :  { %v4570_v22 = vpop.xlane.xlu1 %4569 }
0x2517   :  { %6366 = vrcp.f32 %v4570_v22 }
0x251a   :  { %v4606_v45 = vpop.permute.xlu1 %4605 }
0x251e   :  { %v4620_v42 = vpop.permute.xlu1 %4619 }
0x2521   :  { %v6367_v50 = vpop.eup %6366 }
0x2522   :  { %v4580_v12 = vrot.slane %v6367_v50, %v6641_v34  ;;  %v4576_v44 = vrot.slane %v6367_v50, %v6628_v26  ;;  %v4584_v41 = vrot.slane %v6367_v50, %v6721_v46  ;;  %v4588_v18 = vrot.slane %v6367_v50, %v6725_v49  ;;  %v7905_v50 = vld [vmem:[%s8118_s7] sm:$0xff] }
0x2524   :  { %v4594_v21 = vmul.f32 %v7822_v52, %v4580_v12  ;;  %v4593_v19 = vmul.f32 %v7820_v27, %v4576_v44  ;;  %v4595_v47 = vmul.f32 %v7828_v38, %v4584_v41  ;;  %v4596_v48 = vmul.f32 %v7826_v1, %v4588_v18 }
0x2526   :  { %v4672_v4 = vmul.f32 %v4652_v39, %v4594_v21  ;;  %v4673_v33 = vmul.f32 %v4659_v55, %v4595_v47 }
0x2528   :  { %4683 = vperm.xlu0 %6080, %v4672_v4  }
0x2541   :  { %v4389_v36 = vpop.xlane.xlu0 %4388 }
0x2542   :  { %6368 = vrcp.f32 %v4389_v36 }
0x2545   :  { %v4645_v16 = vpop.permute.xlu0 %4644 }
0x2546   :  { %v4671_v3 = vmul.f32 %v4645_v16, %v4593_v19 }
0x2548   :  { %4680 = vperm.xlu1 %6079, %v4671_v3  }
0x2549   :  { %v4666_v52 = vpop.permute.xlu0 %4665 }
0x254a   :  { %v4674_v43 = vmul.f32 %v4666_v52, %v4596_v48 }
0x254c   :  { %v6369_v53 = vpop.eup %6368  ;;  %4686 = vperm.xlu1 %6079, %v4673_v33   ;;  %4689 = vperm.xlu0 %6080, %v4674_v43  }
0x254d   :  { %v4395_v7 = vrot.slane %v6369_v53, %v6628_v26  ;;  %v4399_v27 = vrot.slane %v6369_v53, %v6641_v34  ;;  %v4613_v25 = vpop.permute.xlu0 %4612  ;;  %v4403_v62 = vrot.slane %v6369_v53, %v6721_v46  ;;  %v4407_v57 = vrot.slane %v6369_v53, %v6725_v49 }
0x254f   :  { %v4412_v38 = vmul.f32 %v7836_v60, %v4395_v7  ;;  %v4413_v1 = vmul.f32 %v7838_v24, %v4399_v27  ;;  %v4414_v56 = vmul.f32 %v7845_v5, %v4403_v62  ;;  %v4415_v10 = vmul.f32 %v7847_v8, %v4407_v57 }
0x2551   :  { %v4632_v54 = vmul.f32 %v4606_v45, %v4412_v38  ;;  %v4633_v63 = vmul.f32 %v4613_v25, %v4413_v1  ;;  %v4627_v61 = vpop.permute.xlu0 %4626  ;;  %v4634_v29 = vmul.f32 %v4620_v42, %v4414_v56 }
0x2552   :  { %v4635_v0 = vmul.f32 %v4627_v61, %v4415_v10 }
0x2553   :  { %4788 = vperm.xlu1 %6079, %v4632_v54   ;;  %4791 = vperm.xlu0 %6080, %v4633_v63  }
0x2557   :  { %4794 = vperm.xlu1 %6079, %v4634_v29   ;;  %4797 = vperm.xlu0 %6080, %v4635_v0  }
0x25a7   :  { %v4684_v6 = vpop.permute.xlu0 %4683 }
0x25a8   :  { %v4698_v24 = vrot.slane %v4684_v6, %v6781_v58 }
0x25c7   :  { %v4681_v32 = vpop.permute.xlu1 %4680 }
0x25c8   :  { %v4694_v60 = vrot.slane %v4681_v32, %v6781_v58 }
0x25ca   :  { %v4707_v39 = vsel %vm437_vm8, %v4698_v24, %v4694_v60 }
0x25cb   :  { %v4687_v30 = vpop.permute.xlu1 %4686  ;;  %v4690_v9 = vpop.permute.xlu0 %4689 }
0x25cc   :  { %v4702_v5 = vrot.slane %v4687_v30, %v6781_v58  ;;  %v4706_v8 = vrot.slane %v4690_v9, %v6781_v58  ;;  %v6454_v9 = vld [vmem:[%s8125_s3] sm:$0x3f] }
0x25ce   :  { %v4708_v55 = vsel %vm439_vm9, %v4702_v5, %v4707_v39  ;;  %v6455_v39 = vld [vmem:[%s8125_s3 + $0x8] sm:$0x3f] }
0x25cf   :  { %v4709_v22 = vsel %vm441_vm10, %v4706_v8, %v4708_v55 }
0x25d0   :  { %5758 = vmatmul.mubr.msk.f32.vlgmr.msra.gmra.mrb[10].mxu1 %vm69_vm1, %v4709_v22 }
0x25d1   :  { %5760 = vmatpush1.msk.msra.mxu1 %vm157_vm2, %v7905_v50  ;;  %4884 = vmatprep.mubr.f32.mxu1 %v6461_v2 }
0x25d2   :  { %v4789_v12 = vpop.permute.xlu1 %4788  ;;  %v4792_v21 = vpop.permute.xlu0 %4791  ;;  %6045 = vmatprep.subr.bf16.mxu1 %v6462_v11 }
0x25d3   :  { %v4802_v4 = vrot.slane %v4789_v12, %v6781_v58  ;;  %v4806_v44 = vrot.slane %v4792_v21, %v6781_v58  ;;  %v6456_v12 = vld [vmem:[%s8125_s3 + $0x10] sm:$0x3f] }
0x25d5   :  { %v4815_v16 = vsel %vm437_vm8, %v4806_v44, %v4802_v4  ;;  %v6457_v44 = vld [vmem:[%s8127_s2 + $0x4] sm:$0xf] }
0x25d6   :  { %v4795_v36 = vpop.permute.xlu1 %4794  ;;  %v4798_v41 = vpop.permute.xlu0 %4797 }
0x25d7   :  { %v4810_v19 = vrot.slane %v4795_v36, %v6781_v58  ;;  %v4814_v18 = vrot.slane %v4798_v41, %v6781_v58  ;;  %v6458_v41 = vld [vmem:[%s8125_s3 + $0x18] sm:$0x3f] }
0x25d9   :  { %v4816_v3 = vsel %vm439_vm9, %v4810_v19, %v4815_v16 }
0x25da   :  { %v4817_v47 = vsel %vm441_vm10, %v4814_v18, %v4816_v3  ;;  %v6459_v18 = vld [vmem:[%s8127_s2 + $0x8] sm:$0xf] }
0x25db   :  { %5761 = vmatmul.mubr.msk.f32.vlgmr.msra.gmra.mrb[10].mxu1 %vm153_vm3, %v4817_v47 }
0x25dc   :  { %6047 = vmatpush3.bf16.msra.mxu1 %v6592_v15  ;;  %5970 = vmatprep.mubr.msk.f32.mxu1 %vm6463_vm4, %v6461_v2 }
0x25dd   :  { %6048 = vmatprep.subr.bf16.mxu1 %v6462_v11 }
0x25e0   :  { %6050 = vmatpush3.bf16.msra.mxu1 %v6598_v17 }
0x25e1   :  { %6051 = vmatprep.subr.bf16.mxu1 %v6462_v11 }
0x25e4   :  { %6053 = vmatpush3.bf16.msra.mxu1 %v6608_v20 }
0x25e5   :  { %6054 = vmatprep.subr.bf16.mxu1 %v6462_v11 }
0x25e8   :  { %6056 = vmatpush3.bf16.msra.mxu1 %v6618_v23 }
0x26ae   :  { %v4886_v48 = vpop.f32.mrb[10].mxu1 }
0x26af   :  { %v4891_v52 = vadd.f32 %v4886_v48, %v6634_v28  ;;  %v4888_v43 = vpop.f32.mrb[11].mxu1 }
0x26b0   :  { %v4892_v17 = vadd.f32 %v4888_v43, %v6644_v35 }
0x26b1   :  { %6370 = vtanh.f32 %v4891_v52  ;;  %v5762_v33 = vmul.f32 -1.442695, %v4891_v52 }
0x26b2   :  { %v5763_v53 = vmul.f32 -1.442695, %v4892_v17 }
0x26b3   :  { %6372 = vpow2.f32 %v5762_v33 }
0x26b4   :  { %6374 = vpow2.f32 %v5763_v53 }
0x26bb   :  { %v6371_v15 = vpop.eup %6370 }
0x26bc   :  { %4901 = vrot.lane.b32.xlu1 %v6371_v15, %s6464_s13 }
0x26bd   :  { %v6373_v45 = vpop.eup %6372 }
0x26be   :  { %v4896_v20 = vadd.f32 1.0, %v6373_v45  ;;  %v6375_v11 = vpop.eup %6374 }
0x26bf   :  { %v4908_v7 = vadd.f32 1.0, %v6375_v11 }
0x26c0   :  { %6376 = vrcp.f32 %v4896_v20 }
0x26c1   :  { %6378 = vrcp.f32 %v4908_v7 }
0x26ca   :  { %v6377_v23 = vpop.eup %6376 }
0x26cb   :  { %v6379_v62 = vpop.eup %6378 }
0x272e   :  { %v4902_v27 = vpop.permute.xlu1 %4901 }
0x272f   :  { %v4904_v25 = vmul.f32 %v6377_v23, %v4902_v27 }
0x2731   :  { %6380 = vtanh.f32 %v4904_v25  ;;  %5971 = vmatmul.mubr.msk.f32.vlgmr.msra.gmra.mrb[12].mxu1 %vm268_vm5, %v4904_v25 }
0x273b   :  { %v6381_v57 = vpop.eup %6380 }
0x273c   :  { %v4912_v38 = vmul.f32 %v6381_v57, %v6379_v62 }
0x273e   :  { %5764 = vst.msk [vmem:[%s8123_s12 + $0x18] sm:$0xf] %vm266_vm6, %v4912_v38 }
0x2804   :  { %v4984_v1 = vpop.f32.mrb[12].mxu1 }
0x2805   :  { %v4995_v54 = vrot.slane %v4984_v1, %v6658_v51  ;;  %v5972_v63 = vpop.f32.mrb[13].mxu1 }
0x2807   :  { %v4996_v56 = vcombine.high %v4995_v54, %v4995_v54  ;;  %v5003_v10 = vrot.slane %v4995_v54, %v6658_v51 }
0x2809   :  { %v5010_v42 = vrot.slane %v4996_v56, %v6658_v51  ;;  %v5011_v61 = vcombine.high %v5003_v10, %v5003_v10  ;;  %v5016_v29 = vrot.slane %v5003_v10, %v6628_v26  ;;  %v6453_v51 = vld [vmem:[%s8127_s2] sm:$0xf] }
0x280b   :  { %v5012_v0 = vcombine.high %v5010_v42, %v5010_v42  ;;  %v5020_v6 = vrot.slane %v5010_v42, %v6628_v26  ;;  %5182 = vrot.lane.b32.xlu0 %v5016_v29, %s6464_s13  ;;  %v5024_v32 = vrot.slane %v5011_v61, %v6628_v26  ;;  %v5033_v24 = vadd.f32 %v6453_v51, %v5016_v29 }
0x280d   :  { %5184 = vrot.lane.b32.xlu1 %v5020_v6, %s6464_s13  ;;  %v7946_v60 = vrot.slane %v5012_v0, %v6628_v26  ;;  %v5034_v36 = vadd.f32 %v6457_v44, %v5020_v6  ;;  %v5035_v16 = vadd.f32 %v6459_v18, %v5024_v32 }
0x280f   :  { %5186 = vrot.lane.b32.xlu0 %v5024_v32, %s6464_s13 }
0x2811   :  { %5188 = vrot.lane.b32.xlu1 %v7946_v60, %s6464_s13 }
0x287d   :  { %v5183_v30 = vpop.permute.xlu0 %5182 }
0x287e   :  { %v5194_v5 = vadd.f32 %v6454_v9, %v5183_v30  ;;  %v6460_v30 = vld [vmem:[%s8127_s2 + $0xc] sm:$0xf] }
0x287f   :  { %v5185_v8 = vpop.permute.xlu1 %5184 }
0x2880   :  { %6382 = vtanh.f32 %v5194_v5  ;;  %v5195_v55 = vadd.f32 %v6455_v39, %v5185_v8 }
0x2881   :  { %6384 = vtanh.f32 %v5033_v24  ;;  %v5187_v22 = vpop.permute.xlu0 %5186 }
0x2882   :  { %6386 = vtanh.f32 %v5195_v55  ;;  %v5196_v21 = vadd.f32 %v6456_v12, %v5187_v22 }
0x2883   :  { %v5189_v4 = vpop.permute.xlu1 %5188 }
0x2884   :  { %6388 = vtanh.f32 %v5196_v21  ;;  %v5197_v19 = vadd.f32 %v6458_v41, %v5189_v4 }
0x2886   :  { %6390 = vtanh.f32 %v5197_v19 }
0x2887   :  { %6392 = vtanh.f32 %v5034_v36 }
0x2888   :  { %6394 = vtanh.f32 %v5035_v16 }
0x288a   :  { %v6383_v3 = vpop.eup %6382 }
0x288b   :  { %v6385_v47 = vpop.eup %6384  ;;  %v5202_v48 = vmul.f32 %v6383_v3, %v6710_v31 }
0x288c   :  { %v6387_v52 = vpop.eup %6386  ;;  %v5041_v45 = vmul.f32 %v6385_v47, %v6748_v59 }
0x288d   :  { %v5206_v43 = vsel %vm574_vm7, %v5202_v48, 0.0  ;;  %v5203_v15 = vmul.f32 %v6387_v52, %v6710_v31 }
0x288e   :  { %v6389_v33 = vpop.eup %6388  ;;  %5207 = vadd.xlane.f32.xlu0 %v5206_v43  ;;  %v5045_v27 = vsel %vm266_vm6, %v5041_v45, 0.0 }
0x288f   :  { %v5209_v17 = vsel %vm574_vm7, %v5203_v15, 0.0  ;;  %v5204_v53 = vmul.f32 %v6389_v33, %v6710_v31 }
0x2890   :  { %v6391_v20 = vpop.eup %6390  ;;  %5210 = vadd.xlane.f32.xlu1 %v5209_v17 }
0x2891   :  { %v5212_v11 = vsel %vm574_vm7, %v5204_v53, 0.0  ;;  %v5205_v7 = vmul.f32 %v6391_v20, %v6710_v31  ;;  %v6393_v23 = vpop.eup %6392 }
0x2892   :  { %5213 = vadd.xlane.f32.xlu0 %v5212_v11  ;;  %v5042_v62 = vmul.f32 %v6393_v23, %v6748_v59  ;;  %v6395_v57 = vpop.eup %6394 }
0x2893   :  { %v5215_v25 = vsel %vm574_vm7, %v5205_v7, 0.0  ;;  %v5043_v1 = vmul.f32 %v6395_v57, %v6748_v59 }
0x2894   :  { %5046 = vadd.xlane.f32.xlu1 %v5045_v27  ;;  %v5048_v38 = vsel %vm266_vm6, %v5042_v62, 0.0 }
0x2895   :  { %v5051_v54 = vsel %vm266_vm6, %v5043_v1, 0.0 }
0x2896   :  { %5216 = vadd.xlane.f32.xlu0 %v5215_v25 }
0x289a   :  { %5049 = vadd.xlane.f32.xlu0 %v5048_v38 }
0x289e   :  { %5052 = vadd.xlane.f32.xlu0 %v5051_v54 }
0x291b   :  { %v5208_v31 = vpop.xlane.xlu0 %5207 }
0x291c   :  { %v5218_v63 = vmul.f32 0.7, %v5208_v31 }
0x291d   :  { %v5211_v56 = vpop.xlane.xlu1 %5210 }
0x291e   :  { %v5222_v10 = vadd.f32 %v5218_v63, %v6758_v14  ;;  %v5219_v42 = vmul.f32 0.7, %v5211_v56  ;;  %v5036_v14 = vadd.f32 %v6460_v30, %v7946_v60 }
0x291f   :  { %v5214_v61 = vpop.xlane.xlu0 %5213 }
0x2920   :  { %v5223_v29 = vadd.f32 %v5219_v42, %v6756_v13  ;;  %v5220_v0 = vmul.f32 0.7, %v5214_v61  ;;  %5231 = vperm.xlu1 %6079, %v5222_v10   ;;  %6396 = vtanh.f32 %v5036_v14 }
0x2921   :  { %v5047_v8 = vpop.xlane.xlu1 %5046 }
0x2922   :  { %v5224_v6 = vadd.f32 %v5220_v0, %v6762_v37  ;;  %5234 = vperm.xlu0 %6080, %v5223_v29   ;;  %v5064_v3 = vrot.slane %v5047_v8, %v6781_v58 }
0x2923   :  { %v5217_v32 = vpop.xlane.xlu0 %5216 }
0x2924   :  { %v5221_v51 = vmul.f32 0.7, %v5217_v32  ;;  %5237 = vperm.xlu1 %6079, %v5224_v6  }
0x2926   :  { %v5225_v24 = vadd.f32 %v5221_v51, %v6765_v40 }
0x2927   :  { %v5050_v37 = vpop.xlane.xlu0 %5049 }
0x2928   :  { %5240 = vperm.xlu0 %6080, %v5225_v24   ;;  %v5068_v18 = vrot.slane %v5050_v37, %v6781_v58 }
0x292a   :  { %v6397_v9 = vpop.eup %6396  ;;  %v5077_v48 = vsel %vm437_vm8, %v5068_v18, %v5064_v3 }
0x292b   :  { %v5044_v13 = vmul.f32 %v6397_v9, %v6748_v59  ;;  %v5053_v39 = vpop.xlane.xlu0 %5052 }
0x292c   :  { %v5072_v16 = vrot.slane %v5053_v39, %v6781_v58 }
0x292d   :  { %v5054_v5 = vsel %vm266_vm6, %v5044_v13, 0.0 }
0x292e   :  { %v5078_v43 = vsel %vm439_vm9, %v5072_v16, %v5077_v48 }
0x2948   :  { %5055 = vadd.xlane.f32.xlu1 %v5054_v5 }
0x299f   :  { %v5232_v55 = vpop.permute.xlu1 %5231 }
0x29a0   :  { %v5245_v21 = vrot.slane %v5232_v55, %v6781_v58 }
0x29a1   :  { %v5235_v22 = vpop.permute.xlu0 %5234 }
0x29a2   :  { %v5249_v40 = vrot.slane %v5235_v22, %v6781_v58 }
0x29a3   :  { %v5238_v12 = vpop.permute.xlu1 %5237 }
0x29a4   :  { %v5253_v4 = vrot.slane %v5238_v12, %v6781_v58  ;;  %v5258_v60 = vsel %vm437_vm8, %v5249_v40, %v5245_v21 }
0x29a6   :  { %v5259_v36 = vsel %vm439_vm9, %v5253_v4, %v5258_v60 }
0x29a7   :  { %v5241_v44 = vpop.permute.xlu0 %5240 }
0x29a8   :  { %v5257_v59 = vrot.slane %v5241_v44, %v6781_v58 }
0x29aa   :  { %v5260_v41 = vsel %vm441_vm10, %v5257_v59, %v5259_v36 }
0x29ab   :  { %v5262_v19 = vsel %vm665_vm11, %v5260_v41, -inf }
0x29ac   :  { %5263 = vmax.xlane.f32.xlu0 %v5262_v19 }
0x29d5   :  { %v5056_v47 = vpop.xlane.xlu1 %5055 }
0x29d6   :  { %v5076_v52 = vrot.slane %v5056_v47, %v6781_v58 }
0x29d8   :  { %v5079_v15 = vsel %vm441_vm10, %v5076_v52, %v5078_v43 }
0x29d9   :  { %v5081_v33 = vsel %vm444_vm12, %v5079_v15, -inf }
0x29da   :  { %5082 = vmax.xlane.f32.xlu1 %v5081_v33 }
0x2a39   :  { %v5264_v17 = vpop.xlane.xlu0 %5263 }
0x2a3a   :  { %v5269_v53 = vrot.slane %v5264_v17, %v6628_v26  ;;  %v5273_v45 = vrot.slane %v5264_v17, %v6641_v34  ;;  %v5277_v20 = vrot.slane %v5264_v17, %v6721_v46  ;;  %v5281_v11 = vrot.slane %v5264_v17, %v6725_v49 }
0x2a3c   :  { %v5286_v7 = vsub.f32 %v5222_v10, %v5269_v53  ;;  %v5287_v23 = vsub.f32 %v5223_v29, %v5273_v45  ;;  %v5288_v27 = vsub.f32 %v5224_v6, %v5277_v20  ;;  %v5289_v57 = vsub.f32 %v5225_v24, %v5281_v11 }
0x2a3e   :  { %v5290_v25 = vmul.f32 1.442695, %v5286_v7  ;;  %v5292_v62 = vmul.f32 1.442695, %v5287_v23  ;;  %v5294_v38 = vmul.f32 1.442695, %v5288_v27 }
0x2a3f   :  { %v5296_v1 = vmul.f32 1.442695, %v5289_v57 }
0x2a40   :  { %6398 = vpow2.f32 %v5290_v25 }
0x2a41   :  { %6400 = vpow2.f32 %v5292_v62 }
0x2a42   :  { %6402 = vpow2.f32 %v5294_v38 }
0x2a43   :  { %6404 = vpow2.f32 %v5296_v1 }
0x2a4a   :  { %v8015_v54 = vpop.eup %6398 }
0x2a4b   :  { %v8017_v31 = vpop.eup %6400  ;;  %5303 = vperm.xlu1 %6079, %v8015_v54  }
0x2a4c   :  { %5306 = vperm.xlu0 %6080, %v8017_v31   ;;  %v8021_v63 = vpop.eup %6402 }
0x2a4d   :  { %v8024_v56 = vpop.eup %6404 }
0x2a4f   :  { %5309 = vperm.xlu1 %6079, %v8021_v63  }
0x2a53   :  { %5312 = vperm.xlu1 %6079, %v8024_v56  }
0x2a67   :  { %v5083_v10 = vpop.xlane.xlu1 %5082 }
0x2a68   :  { %v5088_v42 = vrot.slane %v5083_v10, %v6628_v26  ;;  %v5092_v61 = vrot.slane %v5083_v10, %v6641_v34  ;;  %v5096_v29 = vrot.slane %v5083_v10, %v6721_v46  ;;  %v5100_v0 = vrot.slane %v5083_v10, %v6725_v49 }
0x2a6a   :  { %v5105_v6 = vsub.f32 %v5047_v8, %v5088_v42  ;;  %v5106_v32 = vsub.f32 %v5050_v37, %v5092_v61  ;;  %v5107_v51 = vsub.f32 %v5053_v39, %v5096_v29  ;;  %v5108_v24 = vsub.f32 %v5056_v47, %v5100_v0  ;;  %v5767_v37 = vld [vmem:[%s8116_s1 + $0x1c] sm:$0xf] }
0x2a6b   :  { %v5408_v22 = vrot.slane %v5767_v37, %v6628_v26  ;;  %v5422_v3 = vrot.slane %v5767_v37, %v6721_v46  ;;  %v5766_v47 = vld [vmem:[%s8119_s0 + $0x1c] sm:$0xf]  ;;  %v5415_v62 = vrot.slane %v5767_v37, %v6641_v34  ;;  %v5429_v57 = vrot.slane %v5767_v37, %v6725_v49 }
0x2a6c   :  { %v5109_v30 = vmul.f32 1.442695, %v5105_v6  ;;  %v5111_v14 = vmul.f32 1.442695, %v5106_v32  ;;  %v5113_v9 = vmul.f32 1.442695, %v5107_v51  ;;  %v5369_v48 = vrot.slane %v5766_v47, %v6628_v26 }
0x2a6d   :  { %v5115_v13 = vmul.f32 1.442695, %v5108_v24  ;;  %v5383_v52 = vrot.slane %v5766_v47, %v6721_v46  ;;  %v5376_v38 = vrot.slane %v5766_v47, %v6641_v34  ;;  %v5390_v1 = vrot.slane %v5766_v47, %v6725_v49 }
0x2a6e   :  { %6406 = vpow2.f32 %v5109_v30 }
0x2a6f   :  { %6408 = vpow2.f32 %v5111_v14 }
0x2a70   :  { %6410 = vpow2.f32 %v5113_v9 }
0x2a71   :  { %6412 = vpow2.f32 %v5115_v13 }
0x2a78   :  { %v8031_v5 = vpop.eup %6406 }
0x2a79   :  { %v8033_v55 = vpop.eup %6408  ;;  %5122 = vperm.xlu0 %6080, %v8031_v5  }
0x2a7a   :  { %5125 = vperm.xlu1 %6079, %v8033_v55   ;;  %v8040_v8 = vpop.eup %6410 }
0x2a7b   :  { %v8042_v39 = vpop.eup %6412 }
0x2a7d   :  { %5128 = vperm.xlu0 %6080, %v8040_v8  }
0x2a7e   :  { %5131 = vperm.xlu1 %6079, %v8042_v39  }
0x2a81   :  { %5410 = vbcast.lane.b32.xlu0 %v5408_v22, 256 }
0x2aca   :  { %v5304_v40 = vpop.permute.xlu1 %5303 }
0x2acb   :  { %v5307_v12 = vpop.permute.xlu0 %5306  ;;  %v5317_v60 = vrot.slane %v5304_v40, %v6781_v58 }
0x2acc   :  { %v5321_v4 = vrot.slane %v5307_v12, %v6781_v58 }
0x2ace   :  { %v5310_v21 = vpop.permute.xlu1 %5309  ;;  %v5330_v36 = vsel %vm437_vm8, %v5321_v4, %v5317_v60 }
0x2acf   :  { %v5325_v44 = vrot.slane %v5310_v21, %v6781_v58 }
0x2ad1   :  { %v5331_v19 = vsel %vm439_vm9, %v5325_v44, %v5330_v36 }
0x2ad2   :  { %v5313_v59 = vpop.permute.xlu1 %5312 }
0x2ad3   :  { %v5329_v41 = vrot.slane %v5313_v59, %v6781_v58 }
0x2ad5   :  { %v5332_v18 = vsel %vm441_vm10, %v5329_v41, %v5331_v19 }
0x2ad6   :  { %v5334_v16 = vsel %vm665_vm11, %v5332_v18, 0.0 }
0x2ad7   :  { %5335 = vadd.xlane.f32.xlu0 %v5334_v16 }
0x2aed   :  { %5424 = vbcast.lane.b32.xlu0 %v5422_v3, 256 }
0x2af1   :  { %5371 = vbcast.lane.b32.xlu0 %v5369_v48, 256 }
0x2af5   :  { %5385 = vbcast.lane.b32.xlu0 %v5383_v52, 256 }
0x2af8   :  { %v5123_v43 = vpop.permute.xlu0 %5122 }
0x2af9   :  { %v5126_v15 = vpop.permute.xlu1 %5125  ;;  %v5136_v33 = vrot.slane %v5123_v43, %v6781_v58 }
0x2afa   :  { %v5140_v17 = vrot.slane %v5126_v15, %v6781_v58 }
0x2afc   :  { %v5129_v53 = vpop.permute.xlu0 %5128  ;;  %v5149_v11 = vsel %vm437_vm8, %v5140_v17, %v5136_v33 }
0x2afd   :  { %v5144_v45 = vrot.slane %v5129_v53, %v6781_v58  ;;  %v5132_v20 = vpop.permute.xlu1 %5131 }
0x2afe   :  { %v5148_v7 = vrot.slane %v5132_v20, %v6781_v58 }
0x2aff   :  { %v5150_v23 = vsel %vm439_vm9, %v5144_v45, %v5149_v11 }
0x2b00   :  { %v5151_v27 = vsel %vm441_vm10, %v5148_v7, %v5150_v23  ;;  %v5411_v10 = vpop.permute.xlu0 %5410 }
0x2b01   :  { %v5153_v25 = vsel %vm444_vm12, %v5151_v27, 0.0 }
0x2b02   :  { %5154 = vadd.xlane.f32.xlu1 %v5153_v25 }
0x2b13   :  { %5417 = vbcast.lane.b32.xlu1 %v5415_v62, 256 }
0x2b17   :  { %5431 = vbcast.lane.b32.xlu1 %v5429_v57, 256 }
0x2b1b   :  { %5378 = vbcast.lane.b32.xlu1 %v5376_v38, 256 }
0x2b1f   :  { %5392 = vbcast.lane.b32.xlu1 %v5390_v1, 256 }
0x2b64   :  { %v5336_v42 = vpop.xlane.xlu0 %5335 }
0x2b65   :  { %6414 = vrcp.f32 %v5336_v42 }
0x2b68   :  { %v5425_v24 = vpop.permute.xlu0 %5424 }
0x2b6c   :  { %v5372_v4 = vpop.permute.xlu0 %5371 }
0x2b6f   :  { %v6415_v61 = vpop.eup %6414 }
0x2b70   :  { %v5350_v29 = vrot.slane %v6415_v61, %v6721_v46  ;;  %v5342_v0 = vrot.slane %v6415_v61, %v6628_v26  ;;  %v5346_v14 = vrot.slane %v6415_v61, %v6641_v34  ;;  %v5354_v37 = vrot.slane %v6415_v61, %v6725_v49  ;;  %v5386_v47 = vpop.permute.xlu0 %5385 }
0x2b72   :  { %v5359_v6 = vmul.f32 %v8015_v54, %v5342_v0  ;;  %v5361_v32 = vmul.f32 %v8021_v63, %v5350_v29  ;;  %v5360_v13 = vmul.f32 %v8017_v31, %v5346_v14  ;;  %v5362_v54 = vmul.f32 %v8024_v56, %v5354_v37 }
0x2b74   :  { %v5437_v51 = vmul.f32 %v5411_v10, %v5359_v6  ;;  %v5439_v30 = vmul.f32 %v5425_v24, %v5361_v32 }
0x2b76   :  { %5446 = vperm.xlu0 %6080, %v5437_v51  }
0x2b7a   :  { %5452 = vperm.xlu0 %6080, %v5439_v30  }
0x2b8f   :  { %v5155_v9 = vpop.xlane.xlu1 %5154 }
0x2b90   :  { %6416 = vrcp.f32 %v5155_v9 }
0x2b93   :  { %v5418_v22 = vpop.permute.xlu1 %5417 }
0x2b94   :  { %v5438_v40 = vmul.f32 %v5418_v22, %v5360_v13 }
0x2b96   :  { %5449 = vperm.xlu1 %6079, %v5438_v40  }
0x2b97   :  { %v5432_v12 = vpop.permute.xlu1 %5431 }
0x2b98   :  { %v5440_v63 = vmul.f32 %v5432_v12, %v5362_v54 }
0x2b9a   :  { %v6417_v21 = vpop.eup %6416  ;;  %5455 = vperm.xlu1 %6079, %v5440_v63  }
0x2b9b   :  { %v5161_v60 = vrot.slane %v6417_v21, %v6628_v26  ;;  %v5165_v44 = vrot.slane %v6417_v21, %v6641_v34  ;;  %v5379_v59 = vpop.permute.xlu1 %5378  ;;  %v5169_v36 = vrot.slane %v6417_v21, %v6721_v46  ;;  %v5173_v31 = vrot.slane %v6417_v21, %v6725_v49 }
0x2b9d   :  { %v5178_v41 = vmul.f32 %v8031_v5, %v5161_v60  ;;  %v5179_v19 = vmul.f32 %v8033_v55, %v5165_v44  ;;  %v5180_v16 = vmul.f32 %v8040_v8, %v5169_v36  ;;  %v5181_v3 = vmul.f32 %v8042_v39, %v5173_v31 }
0x2b9f   :  { %v5398_v18 = vmul.f32 %v5372_v4, %v5178_v41  ;;  %v5399_v56 = vmul.f32 %v5379_v59, %v5179_v19  ;;  %v5393_v48 = vpop.permute.xlu1 %5392  ;;  %v5400_v26 = vmul.f32 %v5386_v47, %v5180_v16 }
0x2ba0   :  { %v5401_v34 = vmul.f32 %v5393_v48, %v5181_v3 }
0x2ba1   :  { %5554 = vperm.xlu0 %6080, %v5398_v18   ;;  %5557 = vperm.xlu1 %6079, %v5399_v56  }
0x2ba5   :  { %5560 = vperm.xlu0 %6080, %v5400_v26   ;;  %5563 = vperm.xlu1 %6079, %v5401_v34  }
0x2bf5   :  { %v5447_v46 = vpop.permute.xlu0 %5446 }
0x2bf6   :  { %v5460_v5 = vrot.slane %v5447_v46, %v6781_v58 }
0x2bf9   :  { %v5453_v52 = vpop.permute.xlu0 %5452 }
0x2bfa   :  { %v5468_v8 = vrot.slane %v5453_v52, %v6781_v58 }
0x2c15   :  { %v5450_v49 = vpop.permute.xlu1 %5449 }
0x2c16   :  { %v5464_v55 = vrot.slane %v5450_v49, %v6781_v58 }
0x2c18   :  { %v5473_v43 = vsel %vm437_vm8, %v5464_v55, %v5460_v5 }
0x2c19   :  { %v5456_v39 = vpop.permute.xlu1 %5455  ;;  %v5474_v33 = vsel %vm439_vm9, %v5468_v8, %v5473_v43 }
0x2c1a   :  { %v5472_v15 = vrot.slane %v5456_v39, %v6781_v58 }
0x2c1c   :  { %v5475_v17 = vsel %vm441_vm10, %v5472_v15, %v5474_v33 }
0x2c1d   :  { %5770 = vmatmul.mubr.msk.f32.vlgmr.msra.gmra.mrb[14].mxu0 %vm69_vm1, %v5475_v17 }
0x2c1e   :  { %5772 = vmatpush1.msk.msra.mxu0 %vm157_vm2, %v7905_v50  ;;  %5650 = vmatprep.mubr.f32.mxu0 %v6461_v2 }
0x2c20   :  { %v5555_v53 = vpop.permute.xlu0 %5554  ;;  %v5558_v45 = vpop.permute.xlu1 %5557 }
0x2c21   :  { %v5568_v20 = vrot.slane %v5555_v53, %v6781_v58  ;;  %v5572_v11 = vrot.slane %v5558_v45, %v6781_v58 }
0x2c23   :  { %v5581_v62 = vsel %vm437_vm8, %v5572_v11, %v5568_v20 }
0x2c24   :  { %v5561_v7 = vpop.permute.xlu0 %5560  ;;  %v5564_v23 = vpop.permute.xlu1 %5563 }
0x2c25   :  { %v5576_v27 = vrot.slane %v5561_v7, %v6781_v58  ;;  %v5580_v25 = vrot.slane %v5564_v23, %v6781_v58 }
0x2c27   :  { %v5582_v57 = vsel %vm439_vm9, %v5576_v27, %v5581_v62 }
0x2c28   :  { %v5583_v50 = vsel %vm441_vm10, %v5580_v25, %v5582_v57 }
0x2c29   :  { %5773 = vmatmul.mubr.msk.f32.vlgmr.msra.gmra.mrb[14].mxu0 %vm153_vm3, %v5583_v50 }
0x2cfc   :  { %v5652_v2 = vpop.f32.mrb[14].mxu0 }
0x2cfd   :  { %v5657_v38 = vadd.f32 %v5652_v2, %v6634_v28  ;;  %v5654_v1 = vpop.f32.mrb[15].mxu0 }
0x2cfe   :  { %v5658_v58 = vadd.f32 %v5654_v1, %v6644_v35 }
0x2cff   :  { %6418 = vtanh.f32 %v5657_v38  ;;  %v5774_v42 = vmul.f32 -1.442695, %v5657_v38 }
0x2d00   :  { %v5775_v61 = vmul.f32 -1.442695, %v5658_v58 }
0x2d01   :  { %6420 = vpow2.f32 %v5774_v42 }
0x2d02   :  { %6422 = vpow2.f32 %v5775_v61 }
0x2d09   :  { %v6419_v10 = vpop.eup %6418 }
0x2d0a   :  { %5667 = vrot.lane.b32.xlu0 %v6419_v10, %s6464_s13 }
0x2d0b   :  { %v6421_v29 = vpop.eup %6420 }
0x2d0c   :  { %v5662_v0 = vadd.f32 1.0, %v6421_v29  ;;  %v6423_v6 = vpop.eup %6422 }
0x2d0d   :  { %v5674_v32 = vadd.f32 1.0, %v6423_v6 }
0x2d0e   :  { %6424 = vrcp.f32 %v5662_v0 }
0x2d0f   :  { %6426 = vrcp.f32 %v5674_v32 }
0x2d18   :  { %v6425_v51 = vpop.eup %6424 }
0x2d19   :  { %v6427_v28 = vpop.eup %6426 }
0x2d7c   :  { %v5668_v24 = vpop.permute.xlu0 %5667 }
0x2d7d   :  { %v5670_v30 = vmul.f32 %v6425_v51, %v5668_v24 }
0x2d7f   :  { %6428 = vtanh.f32 %v5670_v30 }
0x2d89   :  { %v6429_v14 = vpop.eup %6428 }
0x2d8a   :  { %v5678_v9 = vmul.f32 %v6429_v14, %v6427_v28 }
0x2d8c   :  { %5776 = vst.msk [vmem:[%s8123_s12 + $0x1c] sm:$0xf] %vm266_vm6, %v5678_v9 }

</bundles_post_ra>
